<compile_context>
chip_gen: v7x
topology: tpu7x:2x2x1
jax: 0.10.0
libtpu: 0.0.40
codegen_flags: <defaults>
</compile_context>

<pallas_src>
import numpy as np
import jax
import jax.numpy as jnp
from jax.experimental import pallas as pl
from jax.experimental.pallas import tpu as pltpu

GN_EPS = 1e-5          # PyTorch GroupNorm default eps
LEAKY_SLOPE = 0.2      # GroupConv2d uses nn.LeakyReLU(0.2)


# --------------------------------------------------------------------------- #
# Kernel
# --------------------------------------------------------------------------- #
def _make_inception_kernel(H, W, Cin, Chid, Cout, nb, Kmax, wpad, epilogue_dtype):
    HW = H * W
    pmax = Kmax // 2
    Hrows = H + 2 * pmax          # rows of the halo-padded h buffer
    Wp = W + 2 * wpad             # columns of the halo-padded h buffer
    nbC = nb * Cout               # branch-packed lane width (128 for 4 x 32)

    # Group dx windows so that im2col stores start on 128-lane boundaries.
    if Chid % 128 == 0:
        dx_chunk = 1              # every dx block is already 128-aligned
    elif 128 % Chid == 0:
        dx_chunk = 128 // Chid    # e.g. Chid=32 -> chunks of 4 dx = 128 lanes
    else:
        dx_chunk = 1              # fallback: masked (unaligned) lane stores

    def kernel(x_ref, w1_ref, b1_ref, wpack_ref, bias_ref, gamma_ref, beta_ref,
               gred_ref, gscat_ref, bsum_ref, o_ref, hpad_ref, s2d_ref):
        cdt = hpad_ref.dtype

        # ---- conv1: 1x1 conv + bias (bf16 MXU operands, f32 accumulation) ----
        x2d = x_ref[0].reshape(HW, Cin).astype(w1_ref.dtype)
        h = jnp.dot(x2d, w1_ref[...], preferred_element_type=jnp.float32)
        h = h + b1_ref[...]                                   # (HW, Chid)

        # ---- stage h into halo-padded VMEM; zero ONLY the halo strips --------
        hpad_ref[0:pmax, :, :] = jnp.zeros((pmax, Wp, Chid), cdt)
        hpad_ref[pmax + H:Hrows, :, :] = jnp.zeros((pmax, Wp, Chid), cdt)
        hpad_ref[pmax:pmax + H, 0:wpad, :] = jnp.zeros((H, wpad, Chid), cdt)
        hpad_ref[pmax:pmax + H, wpad + W:Wp, :] = jnp.zeros((H, wpad, Chid), cdt)
        hpad_ref[pmax:pmax + H, wpad:wpad + W, :] = (
            h.reshape(H, W, Chid).astype(cdt))

        # ---- build the dx-im2col slab: S[(r*W+x), dx*Chid+c] = hpad[r, x+dx, c]
        # (only Kmax unaligned sublane window reads per sample live here)
        base = wpad - pmax
        for dx0 in range(0, Kmax, dx_chunk):
            dxs = range(dx0, min(dx0 + dx_chunk, Kmax))
            cols = [hpad_ref[:, base + dx:base + dx + W, :].reshape(Hrows * W, Chid)
                    for dx in dxs]
            blk = cols[0] if len(cols) == 1 else jnp.concatenate(cols, axis=-1)
            s2d_ref[:, dx0 * Chid:dx0 * Chid + blk.shape[-1]] = blk

        # ---- grouped KxK convs, all branches at once: Kmax big matmuls -------
        # LHS (HW, Kmax*Chid) is an 8-aligned sublane slice of the slab.
        acc = jnp.zeros((HW, nbC), jnp.float32)
        for dy in range(Kmax):
            lhs = s2d_ref[dy * W:dy * W + HW, :]
            acc = acc + jnp.dot(lhs, wpack_ref[dy],
                                preferred_element_type=jnp.float32)

        # ---- packed epilogue: bias + GroupNorm + affine + LeakyReLU ----------
        y = acc + bias_ref[...]                               # (HW, nbC) f32
        # per-(branch,group) mean (1/count folded into gred)
        s = jnp.sum(y, axis=0, keepdims=True)                 # (1, nbC)
        mean_lane = jnp.dot(
            jnp.dot(s, gred_ref[...], preferred_element_type=jnp.float32),
            gscat_ref[...], preferred_element_type=jnp.float32)
        d = y - mean_lane
        ss = jnp.sum(d * d, axis=0, keepdims=True)
        var_g = jnp.dot(ss, gred_ref[...], preferred_element_type=jnp.float32)
        rstd_lane = jnp.dot(jax.lax.rsqrt(var_g + GN_EPS), gscat_ref[...],
                            preferred_element_type=jnp.float32)

        scale = (rstd_lane * gamma_ref[...]).astype(epilogue_dtype)
        shift = beta_ref[...].astype(epilogue_dtype)
        z = d.astype(epilogue_dtype) * scale + shift
        z = jnp.where(z >= 0, z, jnp.asarray(LEAKY_SLOPE, epilogue_dtype) * z)

        # ---- branch sum via one (nbC -> Cout) one-hot MXU matmul -------------
        out = jnp.dot(z, bsum_ref[...].astype(epilogue_dtype),
                      preferred_element_type=jnp.float32)
        o_ref[0] = out.astype(o_ref.dtype)

    return kernel


# --------------------------------------------------------------------------- #
# Host-side parameter packing
# --------------------------------------------------------------------------- #
def pack_inception_params(params, H, W, incep_ker=(3, 5, 7, 11),
                          compute_dtype=jnp.bfloat16):
    """Packs PyTorch-shaped parameters into the fused-kernel layout."""
    incep_ker = tuple(incep_ker)
    nb = len(incep_ker)
    Kmax = max(incep_ker)
    pmax = Kmax // 2
    g = int(params["groups_eff"])

    w1 = np.asarray(params["w1"], np.float32)
    Cin, Chid = w1.shape
    Cout = int(np.asarray(params["branch_b"]).shape[-1])
    assert Chid % g == 0 and Cout % g == 0
    cig, cog = Chid // g, Cout // g
    nbC, nbG, HW = nb * Cout, nb * g, H * W

    # Branch weights: dense block-diagonal per tap, all branches packed on the
    # output lanes, dx taps packed into the contraction, dy as leading axis.
    wpack = np.zeros((Kmax, Kmax * Chid, nbC), np.float32)
    for bi, K in enumerate(incep_ker):
        off = pmax - K // 2                       # centre-align K inside Kmax grid
        w = np.asarray(params["branch_w_hwio"][bi], np.float32)   # (K,K,cig,Cout)
        for ky in range(K):
            for kx in range(K):
                tap = np.zeros((Chid, Cout), np.float32)
                for gi in range(g):
                    tap[gi * cig:(gi + 1) * cig, gi * cog:(gi + 1) * cog] = (
                        w[ky, kx, :, gi * cog:(gi + 1) * cog])
                wpack[ky + off,
                      (kx + off) * Chid:(kx + off + 1) * Chid,
                      bi * Cout:(bi + 1) * Cout] = tap

    bias_pack = np.asarray(params["branch_b"], np.float32).reshape(1, nbC)
    gamma_pack = np.asarray(params["branch_gamma"], np.float32).reshape(1, nbC)
    beta_pack = np.asarray(params["branch_beta"], np.float32).reshape(1, nbC)

    # One-hot channel->group reduce (with 1/count folded in) and group->channel
    # scatter, plus the branch-sum matrix for the final 128 -> Cout reduction.
    lane = np.arange(nbC)
    grp = (lane // Cout) * g + (lane % Cout) // cog
    gred = np.zeros((nbC, nbG), np.float32)
    gred[lane, grp] = 1.0 / float(HW * cog)
    gscat = np.zeros((nbG, nbC), np.float32)
    gscat[grp, lane] = 1.0
    bsum = np.zeros((nbC, Cout), np.float32)
    bsum[lane, lane % Cout] = 1.0

    return dict(
        w1=jnp.asarray(w1, compute_dtype),
        b1=jnp.asarray(params["b1"], jnp.float32).reshape(1, Chid),
        wpack=jnp.asarray(wpack, compute_dtype),
        bias=jnp.asarray(bias_pack),
        gamma=jnp.asarray(gamma_pack),
        beta=jnp.asarray(beta_pack),
        gred=jnp.asarray(gred),
        gscat=jnp.asarray(gscat),
        bsum=jnp.asarray(bsum),
        meta=dict(Cin=Cin, Chid=Chid, Cout=Cout, nb=nb, Kmax=Kmax, g=g,
                  H=H, W=W, compute_dtype=compute_dtype),
    )


# --------------------------------------------------------------------------- #
# pallas_call wrappers
# --------------------------------------------------------------------------- #
def inception_pallas_nhwc(x_nhwc, packed, *, epilogue_dtype=jnp.float32):
    """Fused Inception forward, NHWC in / NHWC out.
    epilogue_dtype=jnp.bfloat16 halves epilogue VPU traffic on v6e/v7x
    (keep float32 on v5e: no bf16 VPU)."""
    meta = packed["meta"]
    N, H, W, Cin = x_nhwc.shape
    assert (H, W, Cin) == (meta["H"], meta["W"], meta["Cin"])
    assert W % 8 == 0, "W must be a multiple of 8 (sublane alignment)"
    Chid, Cout, nb, Kmax = meta["Chid"], meta["Cout"], meta["nb"], meta["Kmax"]
    cdt = meta["compute_dtype"]
    pmax = Kmax // 2
    wpad = ((pmax + 7) // 8) * 8          # aligned column halo (>= pmax)
    HW = H * W
    nbC = nb * Cout
    nbG = nb * meta["g"]
    Hrows = H + 2 * pmax

    kernel = _make_inception_kernel(H, W, Cin, Chid, Cout, nb, Kmax, wpad,
                                    epilogue_dtype)

    const2 = lambda n: (0, 0)
    const3 = lambda n: (0, 0, 0)
    in_specs = [
        pl.BlockSpec((1, H, W, Cin), lambda n: (n, 0, 0, 0)),     # x
        pl.BlockSpec((Cin, Chid), const2),                        # conv1 weight
        pl.BlockSpec((1, Chid), const2),                          # conv1 bias
        pl.BlockSpec((Kmax, Kmax * Chid, nbC), const3),           # packed tap weights
        pl.BlockSpec((1, nbC), const2),                           # packed conv biases
        pl.BlockSpec((1, nbC), const2),                           # packed GN gamma
        pl.BlockSpec((1, nbC), const2),                           # packed GN beta
        pl.BlockSpec((nbC, nbG), const2),                         # C->G reduce (scaled)
        pl.BlockSpec((nbG, nbC), const2),                         # G->C scatter
        pl.BlockSpec((nbC, Cout), const2),                        # branch-sum matrix
    ]

    cost = pl.CostEstimate(
        flops=int(2 * N * HW * (Cin * Chid + Kmax * Kmax * Chid * nbC
                                + nbC * Cout)),
        transcendentals=int(N * nbG),
        bytes_accessed=int(x_nhwc.size * x_nhwc.dtype.itemsize
                           + packed["wpack"].size * packed["wpack"].dtype.itemsize
                           + N * HW * Cout * 4),
    )

    out = pl.pallas_call(
        kernel,
        out_shape=jax.ShapeDtypeStruct((N, HW, Cout), jnp.float32),
        grid_spec=pltpu.PrefetchScalarGridSpec(
            num_scalar_prefetch=0,
            grid=(N,),
            in_specs=in_specs,
            out_specs=pl.BlockSpec((1, HW, Cout), lambda n: (n, 0, 0)),
            scratch_shapes=[
                pltpu.VMEM((Hrows, W + 2 * wpad, Chid), cdt),     # halo-padded h
                pltpu.VMEM((Hrows * W, Kmax * Chid), cdt),        # dx-im2col slab
            ],
        ),
        compiler_params=pltpu.CompilerParams(
            dimension_semantics=("parallel",),
            vmem_limit_bytes=48 * 1024 * 1024,
        ),
        cost_estimate=cost,
    )(x_nhwc, packed["w1"], packed["b1"], packed["wpack"],
      packed["bias"], packed["gamma"], packed["beta"],
      packed["gred"], packed["gscat"], packed["bsum"])

    return out.reshape(N, H, W, Cout)


def inception_forward(x_nchw, packed, *, epilogue_dtype=jnp.float32):
    """PyTorch-layout (NCHW) convenience wrapper around the NHWC fused kernel."""
    x = jnp.transpose(x_nchw, (0, 2, 3, 1))
    y = inception_pallas_nhwc(x, packed, epilogue_dtype=epilogue_dtype)
    return jnp.transpose(y, (0, 3, 1, 2))


# --------------------------------------------------------------------------- #
# Parameters (PyTorch-like shapes / init) and pure-JAX reference
# --------------------------------------------------------------------------- #
def init_inception_params(key, C_in, C_hid, C_out, incep_ker=(3, 5, 7, 11),
                          groups=8):
    g = groups if C_hid % groups == 0 else 1      # GroupConv2d fallback rule
    assert C_out % g == 0, "out_channels must be divisible by groups"
    cig = C_hid // g
    nb = len(incep_ker)
    keys = jax.random.split(key, 2 + 4 * nb)
    ki = iter(range(len(keys)))

    b = 1.0 / np.sqrt(C_in)
    w1 = jax.random.uniform(keys[next(ki)], (C_in, C_hid), jnp.float32, -b, b)
    b1 = jax.random.uniform(keys[next(ki)], (1, C_hid), jnp.float32, -b, b)

    w_hwio, biases, gammas, betas = [], [], [], []
    for K in incep_ker:
        bb = 1.0 / np.sqrt(cig * K * K)
        w_hwio.append(jax.random.uniform(keys[next(ki)], (K, K, cig, C_out),
                                         jnp.float32, -bb, bb))
        biases.append(jax.random.uniform(keys[next(ki)], (C_out,), jnp.float32,
                                         -bb, bb))
        gammas.append(jax.random.uniform(keys[next(ki)], (C_out,), jnp.float32,
                                         0.5, 1.5))
        betas.append(jax.random.uniform(keys[next(ki)], (C_out,), jnp.float32,
                                        -0.5, 0.5))

    return dict(w1=w1, b1=b1, branch_w_hwio=w_hwio,
                branch_b=jnp.stack(biases), branch_gamma=jnp.stack(gammas),
                branch_beta=jnp.stack(betas), groups_eff=g)


def inception_ref_nhwc(x, params, incep_ker=(3, 5, 7, 11)):
    g = params["groups_eff"]
    h = jnp.einsum("nhwc,cd->nhwd", x, params["w1"]) + params["b1"][0]
    out = 0.0
    for bi, K in enumerate(incep_ker):
        p = K // 2
        y = jax.lax.conv_general_dilated(
            h, params["branch_w_hwio"][bi], window_strides=(1, 1),
            padding=[(p, p), (p, p)],
            dimension_numbers=("NHWC", "HWIO", "NHWC"), feature_group_count=g)
        y = y + params["branch_b"][bi]
        Nn, Hh, Ww, Cc = y.shape
        yg = y.reshape(Nn, Hh * Ww, g, Cc // g)
        mean = jnp.mean(yg, axis=(1, 3), keepdims=True)
        var = jnp.mean((yg - mean) ** 2, axis=(1, 3), keepdims=True)
        yn = ((yg - mean) * jax.lax.rsqrt(var + GN_EPS)).reshape(Nn, Hh, Ww, Cc)
        z = yn * params["branch_gamma"][bi] + params["branch_beta"][bi]
        out = out + jnp.where(z >= 0, z, LEAKY_SLOPE * z)
    return out


def inception_ref(x_nchw, params, incep_ker=(3, 5, 7, 11)):
    x = jnp.transpose(x_nchw, (0, 2, 3, 1))
    return jnp.transpose(inception_ref_nhwc(x, params, incep_ker), (0, 3, 1, 2))


# --------------------------------------------------------------------------- #
if __name__ == "__main__":
    # Small shapes consistent with the module: channels divisible by groups=8.
    N, C_IN, C_HID, C_OUT, H, W = 2, 16, 32, 32, 16, 16
    INCEP_KER = (3, 5, 7, 11)
    GROUPS = 8

    key = jax.random.PRNGKey(0)
    kx, kp = jax.random.split(key)
    x = jax.random.normal(kx, (N, C_IN, H, W), jnp.float32)
    params = init_inception_params(kp, C_IN, C_HID, C_OUT, INCEP_KER, GROUPS)
    packed = pack_inception_params(params, H, W, INCEP_KER)

    fwd = jax.jit(lambda xx: inception_forward(xx, packed))
    out = jax.block_until_ready(fwd(x))

    ref = jax.block_until_ready(inception_ref(x, params, INCEP_KER))

    # bf16 MXU operands / bf16-staged h with f32 accumulation and f32 GroupNorm
    # stats -> compare against the all-f32 XLA reference with a bf16-aware tol.
    np.testing.assert_allclose(np.asarray(out), np.asarray(ref),
                               rtol=5e-2, atol=8e-2)
    print("KERNEL_OK")
</pallas_src>

<mosaic_0001>
module attributes {stable_mosaic.version = 11 : i64} {
  func.func @kernel(%arg0: i32, %arg1: memref<1x16x16x16xf32, #tpu.memory_space<vmem>>, %arg2: memref<16x32xbf16, #tpu.memory_space<vmem>>, %arg3: memref<1x32xf32, #tpu.memory_space<vmem>>, %arg4: memref<11x352x128xbf16, #tpu.memory_space<vmem>>, %arg5: memref<1x128xf32, #tpu.memory_space<vmem>>, %arg6: memref<1x128xf32, #tpu.memory_space<vmem>>, %arg7: memref<1x128xf32, #tpu.memory_space<vmem>>, %arg8: memref<128x32xf32, #tpu.memory_space<vmem>>, %arg9: memref<32x128xf32, #tpu.memory_space<vmem>>, %arg10: memref<128x32xf32, #tpu.memory_space<vmem>>, %arg11: memref<1x256x32xf32, #tpu.memory_space<vmem>>, %arg12: memref<26x32x32xbf16, #tpu.memory_space<vmem>>, %arg13: memref<416x352xbf16, #tpu.memory_space<vmem>>) attributes {dimension_semantics = [#tpu.dimension_semantics<parallel>], iteration_bounds = array<i64: 2>, scalar_prefetch = 0 : i64, scratch_operands = 2 : i64, tpu.core_type = #tpu.core_type<tc>, window_params = [{transform_indices = @transform_0, window_bounds = array<i64: 1, 16, 16, 16>}, {pipeline_mode = #tpu.pipeline_mode<synchronous>, transform_indices = @transform_1, window_bounds = array<i64: 16, 32>}, {pipeline_mode = #tpu.pipeline_mode<synchronous>, transform_indices = @transform_2, window_bounds = array<i64: 1, 32>}, {pipeline_mode = #tpu.pipeline_mode<synchronous>, transform_indices = @transform_3, window_bounds = array<i64: 11, 352, 128>}, {pipeline_mode = #tpu.pipeline_mode<synchronous>, transform_indices = @transform_4, window_bounds = array<i64: 1, 128>}, {pipeline_mode = #tpu.pipeline_mode<synchronous>, transform_indices = @transform_5, window_bounds = array<i64: 1, 128>}, {pipeline_mode = #tpu.pipeline_mode<synchronous>, transform_indices = @transform_6, window_bounds = array<i64: 1, 128>}, {pipeline_mode = #tpu.pipeline_mode<synchronous>, transform_indices = @transform_7, window_bounds = array<i64: 128, 32>}, {pipeline_mode = #tpu.pipeline_mode<synchronous>, transform_indices = @transform_8, window_bounds = array<i64: 32, 128>}, {pipeline_mode = #tpu.pipeline_mode<synchronous>, transform_indices = @transform_9, window_bounds = array<i64: 128, 32>}, {transform_indices = @transform_10, window_bounds = array<i64: 1, 256, 32>}]} {
    %c0 = arith.constant 0 : index
    %c0_0 = arith.constant 0 : index
    %c0_1 = arith.constant 0 : index
    %c0_2 = arith.constant 0 : index
    %0 = vector.load %arg1[%c0, %c0_0, %c0_1, %c0_2] : memref<1x16x16x16xf32, #tpu.memory_space<vmem>>, vector<1x16x16x16xf32>
    %1 = vector.shape_cast %0 : vector<1x16x16x16xf32> to vector<16x16x16xf32>
    %2 = vector.shape_cast %1 : vector<16x16x16xf32> to vector<256x16xf32>
    %3 = arith.truncf %2 : vector<256x16xf32> to vector<256x16xbf16>
    %c0_3 = arith.constant 0 : index
    %c0_4 = arith.constant 0 : index
    %4 = vector.load %arg2[%c0_3, %c0_4] : memref<16x32xbf16, #tpu.memory_space<vmem>>, vector<16x32xbf16>
    %cst = arith.constant dense<0.000000e+00> : vector<256x32xf32>
    %5 = tpu.matmul %3, %4, %cst {dimension_numbers = #tpu.dot_dimension_numbers<[1], [0], [0], [1], [0, 0, 1, 1], [], []>} : vector<256x16xbf16>, vector<16x32xbf16>, vector<256x32xf32> -> vector<256x32xf32>
    %c0_5 = arith.constant 0 : index
    %c0_6 = arith.constant 0 : index
    %6 = vector.load %arg3[%c0_5, %c0_6] : memref<1x32xf32, #tpu.memory_space<vmem>>, vector<1x32xf32>
    %7 = vector.broadcast %6 : vector<1x32xf32> to vector<256x32xf32>
    %8 = arith.addf %5, %7 : vector<256x32xf32>
    %cst_7 = arith.constant 0.000000e+00 : bf16
    %9 = vector.broadcast %cst_7 : bf16 to vector<5x32x32xbf16>
    %c0_8 = arith.constant 0 : index
    %c0_9 = arith.constant 0 : index
    %c0_10 = arith.constant 0 : index
    %10 = vector.load %arg12[%c0_8, %c0_9, %c0_10] : memref<26x32x32xbf16, #tpu.memory_space<vmem>>, vector<5x32x32xbf16>
    tpu.vector_store %arg12[%c0_8, %c0_9, %c0_10], %9 {strides = array<i32>} : memref<26x32x32xbf16, #tpu.memory_space<vmem>>, vector<5x32x32xbf16>,
    %cst_11 = arith.constant 0.000000e+00 : bf16
    %11 = vector.broadcast %cst_11 : bf16 to vector<5x32x32xbf16>
    %c21 = arith.constant 21 : index
    %c0_12 = arith.constant 0 : index
    %c0_13 = arith.constant 0 : index
    %12 = vector.load %arg12[%c21, %c0_12, %c0_13] : memref<26x32x32xbf16, #tpu.memory_space<vmem>>, vector<5x32x32xbf16>
    tpu.vector_store %arg12[%c21, %c0_12, %c0_13], %11 {strides = array<i32>} : memref<26x32x32xbf16, #tpu.memory_space<vmem>>, vector<5x32x32xbf16>,
    %cst_14 = arith.constant 0.000000e+00 : bf16
    %13 = vector.broadcast %cst_14 : bf16 to vector<16x8x32xbf16>
    %c5 = arith.constant 5 : index
    %c0_15 = arith.constant 0 : index
    %c0_16 = arith.constant 0 : index
    %14 = vector.load %arg12[%c5, %c0_15, %c0_16] : memref<26x32x32xbf16, #tpu.memory_space<vmem>>, vector<16x8x32xbf16>
    tpu.vector_store %arg12[%c5, %c0_15, %c0_16], %13 {strides = array<i32>} : memref<26x32x32xbf16, #tpu.memory_space<vmem>>, vector<16x8x32xbf16>,
    %cst_17 = arith.constant 0.000000e+00 : bf16
    %15 = vector.broadcast %cst_17 : bf16 to vector<16x8x32xbf16>
    %c5_18 = arith.constant 5 : index
    %c24 = arith.constant 24 : index
    %c0_19 = arith.constant 0 : index
    %16 = vector.load %arg12[%c5_18, %c24, %c0_19] : memref<26x32x32xbf16, #tpu.memory_space<vmem>>, vector<16x8x32xbf16>
    tpu.vector_store %arg12[%c5_18, %c24, %c0_19], %15 {strides = array<i32>} : memref<26x32x32xbf16, #tpu.memory_space<vmem>>, vector<16x8x32xbf16>,
    %17 = vector.shape_cast %8 : vector<256x32xf32> to vector<16x16x32xf32>
    %18 = arith.truncf %17 : vector<16x16x32xf32> to vector<16x16x32xbf16>
    %c5_20 = arith.constant 5 : index
    %c8 = arith.constant 8 : index
    %c0_21 = arith.constant 0 : index
    %19 = vector.load %arg12[%c5_20, %c8, %c0_21] : memref<26x32x32xbf16, #tpu.memory_space<vmem>>, vector<16x16x32xbf16>
    tpu.vector_store %arg12[%c5_20, %c8, %c0_21], %18 {strides = array<i32>} : memref<26x32x32xbf16, #tpu.memory_space<vmem>>, vector<16x16x32xbf16>,
    %c0_22 = arith.constant 0 : index
    %c3 = arith.constant 3 : index
    %c0_23 = arith.constant 0 : index
    %20 = vector.load %arg12[%c0_22, %c3, %c0_23] : memref<26x32x32xbf16, #tpu.memory_space<vmem>>, vector<26x16x32xbf16>
    %21 = vector.shape_cast %20 : vector<26x16x32xbf16> to vector<416x32xbf16>
    %c0_24 = arith.constant 0 : index
    %c4 = arith.constant 4 : index
    %c0_25 = arith.constant 0 : index
    %22 = vector.load %arg12[%c0_24, %c4, %c0_25] : memref<26x32x32xbf16, #tpu.memory_space<vmem>>, vector<26x16x32xbf16>
    %23 = vector.shape_cast %22 : vector<26x16x32xbf16> to vector<416x32xbf16>
    %c0_26 = arith.constant 0 : index
    %c5_27 = arith.constant 5 : index
    %c0_28 = arith.constant 0 : index
    %24 = vector.load %arg12[%c0_26, %c5_27, %c0_28] : memref<26x32x32xbf16, #tpu.memory_space<vmem>>, vector<26x16x32xbf16>
    %25 = vector.shape_cast %24 : vector<26x16x32xbf16> to vector<416x32xbf16>
    %c0_29 = arith.constant 0 : index
    %c6 = arith.constant 6 : index
    %c0_30 = arith.constant 0 : index
    %26 = vector.load %arg12[%c0_29, %c6, %c0_30] : memref<26x32x32xbf16, #tpu.memory_space<vmem>>, vector<26x16x32xbf16>
    %27 = vector.shape_cast %26 : vector<26x16x32xbf16> to vector<416x32xbf16>
    %28 = tpu.concatenate %21, %23, %25, %27 in 1 : vector<416x32xbf16>, vector<416x32xbf16>, vector<416x32xbf16>, vector<416x32xbf16> -> vector<416x128xbf16>
    %c0_31 = arith.constant 0 : index
    %c0_32 = arith.constant 0 : index
    %29 = vector.load %arg13[%c0_31, %c0_32] : memref<416x352xbf16, #tpu.memory_space<vmem>>, vector<416x128xbf16>
    tpu.vector_store %arg13[%c0_31, %c0_32], %28 {strides = array<i32>} : memref<416x352xbf16, #tpu.memory_space<vmem>>, vector<416x128xbf16>,
    %c0_33 = arith.constant 0 : index
    %c7 = arith.constant 7 : index
    %c0_34 = arith.constant 0 : index
    %30 = vector.load %arg12[%c0_33, %c7, %c0_34] : memref<26x32x32xbf16, #tpu.memory_space<vmem>>, vector<26x16x32xbf16>
    %31 = vector.shape_cast %30 : vector<26x16x32xbf16> to vector<416x32xbf16>
    %c0_35 = arith.constant 0 : index
    %c8_36 = arith.constant 8 : index
    %c0_37 = arith.constant 0 : index
    %32 = vector.load %arg12[%c0_35, %c8_36, %c0_37] : memref<26x32x32xbf16, #tpu.memory_space<vmem>>, vector<26x16x32xbf16>
    %33 = vector.shape_cast %32 : vector<26x16x32xbf16> to vector<416x32xbf16>
    %c0_38 = arith.constant 0 : index
    %c9 = arith.constant 9 : index
    %c0_39 = arith.constant 0 : index
    %34 = vector.load %arg12[%c0_38, %c9, %c0_39] : memref<26x32x32xbf16, #tpu.memory_space<vmem>>, vector<26x16x32xbf16>
    %35 = vector.shape_cast %34 : vector<26x16x32xbf16> to vector<416x32xbf16>
    %c0_40 = arith.constant 0 : index
    %c10 = arith.constant 10 : index
    %c0_41 = arith.constant 0 : index
    %36 = vector.load %arg12[%c0_40, %c10, %c0_41] : memref<26x32x32xbf16, #tpu.memory_space<vmem>>, vector<26x16x32xbf16>
    %37 = vector.shape_cast %36 : vector<26x16x32xbf16> to vector<416x32xbf16>
    %38 = tpu.concatenate %31, %33, %35, %37 in 1 : vector<416x32xbf16>, vector<416x32xbf16>, vector<416x32xbf16>, vector<416x32xbf16> -> vector<416x128xbf16>
    %c0_42 = arith.constant 0 : index
    %c128 = arith.constant 128 : index
    %39 = vector.load %arg13[%c0_42, %c128] : memref<416x352xbf16, #tpu.memory_space<vmem>>, vector<416x128xbf16>
    tpu.vector_store %arg13[%c0_42, %c128], %38 {strides = array<i32>} : memref<416x352xbf16, #tpu.memory_space<vmem>>, vector<416x128xbf16>,
    %c0_43 = arith.constant 0 : index
    %c11 = arith.constant 11 : index
    %c0_44 = arith.constant 0 : index
    %40 = vector.load %arg12[%c0_43, %c11, %c0_44] : memref<26x32x32xbf16, #tpu.memory_space<vmem>>, vector<26x16x32xbf16>
    %41 = vector.shape_cast %40 : vector<26x16x32xbf16> to vector<416x32xbf16>
    %c0_45 = arith.constant 0 : index
    %c12 = arith.constant 12 : index
    %c0_46 = arith.constant 0 : index
    %42 = vector.load %arg12[%c0_45, %c12, %c0_46] : memref<26x32x32xbf16, #tpu.memory_space<vmem>>, vector<26x16x32xbf16>
    %43 = vector.shape_cast %42 : vector<26x16x32xbf16> to vector<416x32xbf16>
    %c0_47 = arith.constant 0 : index
    %c13 = arith.constant 13 : index
    %c0_48 = arith.constant 0 : index
    %44 = vector.load %arg12[%c0_47, %c13, %c0_48] : memref<26x32x32xbf16, #tpu.memory_space<vmem>>, vector<26x16x32xbf16>
    %45 = vector.shape_cast %44 : vector<26x16x32xbf16> to vector<416x32xbf16>
    %46 = tpu.concatenate %41, %43, %45 in 1 : vector<416x32xbf16>, vector<416x32xbf16>, vector<416x32xbf16> -> vector<416x96xbf16>
    %c0_49 = arith.constant 0 : index
    %c256 = arith.constant 256 : index
    %47 = vector.load %arg13[%c0_49, %c256] : memref<416x352xbf16, #tpu.memory_space<vmem>>, vector<416x96xbf16>
    tpu.vector_store %arg13[%c0_49, %c256], %46 {strides = array<i32>} : memref<416x352xbf16, #tpu.memory_space<vmem>>, vector<416x96xbf16>,
    %cst_50 = arith.constant 0.000000e+00 : f32
    %48 = vector.broadcast %cst_50 : f32 to vector<256x128xf32>
    %c0_51 = arith.constant 0 : index
    %c0_52 = arith.constant 0 : index
    %49 = vector.load %arg13[%c0_51, %c0_52] : memref<416x352xbf16, #tpu.memory_space<vmem>>, vector<256x352xbf16>
    %c0_53 = arith.constant 0 : index
    %c0_54 = arith.constant 0 : index
    %c0_55 = arith.constant 0 : index
    %50 = vector.load %arg4[%c0_53, %c0_54, %c0_55] : memref<11x352x128xbf16, #tpu.memory_space<vmem>>, vector<1x352x128xbf16>
    %51 = vector.shape_cast %50 : vector<1x352x128xbf16> to vector<352x128xbf16>
    %cst_56 = arith.constant dense<0.000000e+00> : vector<256x128xf32>
    %52 = tpu.matmul %49, %51, %cst_56 {dimension_numbers = #tpu.dot_dimension_numbers<[1], [0], [0], [1], [0, 0, 1, 1], [], []>} : vector<256x352xbf16>, vector<352x128xbf16>, vector<256x128xf32> -> vector<256x128xf32>
    %53 = arith.addf %48, %52 : vector<256x128xf32>
    %c16 = arith.constant 16 : index
    %c0_57 = arith.constant 0 : index
    %54 = vector.load %arg13[%c16, %c0_57] : memref<416x352xbf16, #tpu.memory_space<vmem>>, vector<256x352xbf16>
    %c1 = arith.constant 1 : index
    %c0_58 = arith.constant 0 : index
    %c0_59 = arith.constant 0 : index
    %55 = vector.load %arg4[%c1, %c0_58, %c0_59] : memref<11x352x128xbf16, #tpu.memory_space<vmem>>, vector<1x352x128xbf16>
    %56 = vector.shape_cast %55 : vector<1x352x128xbf16> to vector<352x128xbf16>
    %cst_60 = arith.constant dense<0.000000e+00> : vector<256x128xf32>
    %57 = tpu.matmul %54, %56, %cst_60 {dimension_numbers = #tpu.dot_dimension_numbers<[1], [0], [0], [1], [0, 0, 1, 1], [], []>} : vector<256x352xbf16>, vector<352x128xbf16>, vector<256x128xf32> -> vector<256x128xf32>
    %58 = arith.addf %53, %57 : vector<256x128xf32>
    %c32 = arith.constant 32 : index
    %c0_61 = arith.constant 0 : index
    %59 = vector.load %arg13[%c32, %c0_61] : memref<416x352xbf16, #tpu.memory_space<vmem>>, vector<256x352xbf16>
    %c2 = arith.constant 2 : index
    %c0_62 = arith.constant 0 : index
    %c0_63 = arith.constant 0 : index
    %60 = vector.load %arg4[%c2, %c0_62, %c0_63] : memref<11x352x128xbf16, #tpu.memory_space<vmem>>, vector<1x352x128xbf16>
    %61 = vector.shape_cast %60 : vector<1x352x128xbf16> to vector<352x128xbf16>
    %cst_64 = arith.constant dense<0.000000e+00> : vector<256x128xf32>
    %62 = tpu.matmul %59, %61, %cst_64 {dimension_numbers = #tpu.dot_dimension_numbers<[1], [0], [0], [1], [0, 0, 1, 1], [], []>} : vector<256x352xbf16>, vector<352x128xbf16>, vector<256x128xf32> -> vector<256x128xf32>
    %63 = arith.addf %58, %62 : vector<256x128xf32>
    %c48 = arith.constant 48 : index
    %c0_65 = arith.constant 0 : index
    %64 = vector.load %arg13[%c48, %c0_65] : memref<416x352xbf16, #tpu.memory_space<vmem>>, vector<256x352xbf16>
    %c3_66 = arith.constant 3 : index
    %c0_67 = arith.constant 0 : index
    %c0_68 = arith.constant 0 : index
    %65 = vector.load %arg4[%c3_66, %c0_67, %c0_68] : memref<11x352x128xbf16, #tpu.memory_space<vmem>>, vector<1x352x128xbf16>
    %66 = vector.shape_cast %65 : vector<1x352x128xbf16> to vector<352x128xbf16>
    %cst_69 = arith.constant dense<0.000000e+00> : vector<256x128xf32>
    %67 = tpu.matmul %64, %66, %cst_69 {dimension_numbers = #tpu.dot_dimension_numbers<[1], [0], [0], [1], [0, 0, 1, 1], [], []>} : vector<256x352xbf16>, vector<352x128xbf16>, vector<256x128xf32> -> vector<256x128xf32>
    %68 = arith.addf %63, %67 : vector<256x128xf32>
    %c64 = arith.constant 64 : index
    %c0_70 = arith.constant 0 : index
    %69 = vector.load %arg13[%c64, %c0_70] : memref<416x352xbf16, #tpu.memory_space<vmem>>, vector<256x352xbf16>
    %c4_71 = arith.constant 4 : index
    %c0_72 = arith.constant 0 : index
    %c0_73 = arith.constant 0 : index
    %70 = vector.load %arg4[%c4_71, %c0_72, %c0_73] : memref<11x352x128xbf16, #tpu.memory_space<vmem>>, vector<1x352x128xbf16>
    %71 = vector.shape_cast %70 : vector<1x352x128xbf16> to vector<352x128xbf16>
    %cst_74 = arith.constant dense<0.000000e+00> : vector<256x128xf32>
    %72 = tpu.matmul %69, %71, %cst_74 {dimension_numbers = #tpu.dot_dimension_numbers<[1], [0], [0], [1], [0, 0, 1, 1], [], []>} : vector<256x352xbf16>, vector<352x128xbf16>, vector<256x128xf32> -> vector<256x128xf32>
    %73 = arith.addf %68, %72 : vector<256x128xf32>
    %c80 = arith.constant 80 : index
    %c0_75 = arith.constant 0 : index
    %74 = vector.load %arg13[%c80, %c0_75] : memref<416x352xbf16, #tpu.memory_space<vmem>>, vector<256x352xbf16>
    %c5_76 = arith.constant 5 : index
    %c0_77 = arith.constant 0 : index
    %c0_78 = arith.constant 0 : index
    %75 = vector.load %arg4[%c5_76, %c0_77, %c0_78] : memref<11x352x128xbf16, #tpu.memory_space<vmem>>, vector<1x352x128xbf16>
    %76 = vector.shape_cast %75 : vector<1x352x128xbf16> to vector<352x128xbf16>
    %cst_79 = arith.constant dense<0.000000e+00> : vector<256x128xf32>
    %77 = tpu.matmul %74, %76, %cst_79 {dimension_numbers = #tpu.dot_dimension_numbers<[1], [0], [0], [1], [0, 0, 1, 1], [], []>} : vector<256x352xbf16>, vector<352x128xbf16>, vector<256x128xf32> -> vector<256x128xf32>
    %78 = arith.addf %73, %77 : vector<256x128xf32>
    %c96 = arith.constant 96 : index
    %c0_80 = arith.constant 0 : index
    %79 = vector.load %arg13[%c96, %c0_80] : memref<416x352xbf16, #tpu.memory_space<vmem>>, vector<256x352xbf16>
    %c6_81 = arith.constant 6 : index
    %c0_82 = arith.constant 0 : index
    %c0_83 = arith.constant 0 : index
    %80 = vector.load %arg4[%c6_81, %c0_82, %c0_83] : memref<11x352x128xbf16, #tpu.memory_space<vmem>>, vector<1x352x128xbf16>
    %81 = vector.shape_cast %80 : vector<1x352x128xbf16> to vector<352x128xbf16>
    %cst_84 = arith.constant dense<0.000000e+00> : vector<256x128xf32>
    %82 = tpu.matmul %79, %81, %cst_84 {dimension_numbers = #tpu.dot_dimension_numbers<[1], [0], [0], [1], [0, 0, 1, 1], [], []>} : vector<256x352xbf16>, vector<352x128xbf16>, vector<256x128xf32> -> vector<256x128xf32>
    %83 = arith.addf %78, %82 : vector<256x128xf32>
    %c112 = arith.constant 112 : index
    %c0_85 = arith.constant 0 : index
    %84 = vector.load %arg13[%c112, %c0_85] : memref<416x352xbf16, #tpu.memory_space<vmem>>, vector<256x352xbf16>
    %c7_86 = arith.constant 7 : index
    %c0_87 = arith.constant 0 : index
    %c0_88 = arith.constant 0 : index
    %85 = vector.load %arg4[%c7_86, %c0_87, %c0_88] : memref<11x352x128xbf16, #tpu.memory_space<vmem>>, vector<1x352x128xbf16>
    %86 = vector.shape_cast %85 : vector<1x352x128xbf16> to vector<352x128xbf16>
    %cst_89 = arith.constant dense<0.000000e+00> : vector<256x128xf32>
    %87 = tpu.matmul %84, %86, %cst_89 {dimension_numbers = #tpu.dot_dimension_numbers<[1], [0], [0], [1], [0, 0, 1, 1], [], []>} : vector<256x352xbf16>, vector<352x128xbf16>, vector<256x128xf32> -> vector<256x128xf32>
    %88 = arith.addf %83, %87 : vector<256x128xf32>
    %c128_90 = arith.constant 128 : index
    %c0_91 = arith.constant 0 : index
    %89 = vector.load %arg13[%c128_90, %c0_91] : memref<416x352xbf16, #tpu.memory_space<vmem>>, vector<256x352xbf16>
    %c8_92 = arith.constant 8 : index
    %c0_93 = arith.constant 0 : index
    %c0_94 = arith.constant 0 : index
    %90 = vector.load %arg4[%c8_92, %c0_93, %c0_94] : memref<11x352x128xbf16, #tpu.memory_space<vmem>>, vector<1x352x128xbf16>
    %91 = vector.shape_cast %90 : vector<1x352x128xbf16> to vector<352x128xbf16>
    %cst_95 = arith.constant dense<0.000000e+00> : vector<256x128xf32>
    %92 = tpu.matmul %89, %91, %cst_95 {dimension_numbers = #tpu.dot_dimension_numbers<[1], [0], [0], [1], [0, 0, 1, 1], [], []>} : vector<256x352xbf16>, vector<352x128xbf16>, vector<256x128xf32> -> vector<256x128xf32>
    %93 = arith.addf %88, %92 : vector<256x128xf32>
    %c144 = arith.constant 144 : index
    %c0_96 = arith.constant 0 : index
    %94 = vector.load %arg13[%c144, %c0_96] : memref<416x352xbf16, #tpu.memory_space<vmem>>, vector<256x352xbf16>
    %c9_97 = arith.constant 9 : index
    %c0_98 = arith.constant 0 : index
    %c0_99 = arith.constant 0 : index
    %95 = vector.load %arg4[%c9_97, %c0_98, %c0_99] : memref<11x352x128xbf16, #tpu.memory_space<vmem>>, vector<1x352x128xbf16>
    %96 = vector.shape_cast %95 : vector<1x352x128xbf16> to vector<352x128xbf16>
    %cst_100 = arith.constant dense<0.000000e+00> : vector<256x128xf32>
    %97 = tpu.matmul %94, %96, %cst_100 {dimension_numbers = #tpu.dot_dimension_numbers<[1], [0], [0], [1], [0, 0, 1, 1], [], []>} : vector<256x352xbf16>, vector<352x128xbf16>, vector<256x128xf32> -> vector<256x128xf32>
    %98 = arith.addf %93, %97 : vector<256x128xf32>
    %c160 = arith.constant 160 : index
    %c0_101 = arith.constant 0 : index
    %99 = vector.load %arg13[%c160, %c0_101] : memref<416x352xbf16, #tpu.memory_space<vmem>>, vector<256x352xbf16>
    %c10_102 = arith.constant 10 : index
    %c0_103 = arith.constant 0 : index
    %c0_104 = arith.constant 0 : index
    %100 = vector.load %arg4[%c10_102, %c0_103, %c0_104] : memref<11x352x128xbf16, #tpu.memory_space<vmem>>, vector<1x352x128xbf16>
    %101 = vector.shape_cast %100 : vector<1x352x128xbf16> to vector<352x128xbf16>
    %cst_105 = arith.constant dense<0.000000e+00> : vector<256x128xf32>
    %102 = tpu.matmul %99, %101, %cst_105 {dimension_numbers = #tpu.dot_dimension_numbers<[1], [0], [0], [1], [0, 0, 1, 1], [], []>} : vector<256x352xbf16>, vector<352x128xbf16>, vector<256x128xf32> -> vector<256x128xf32>
    %103 = arith.addf %98, %102 : vector<256x128xf32>
    %c0_106 = arith.constant 0 : index
    %c0_107 = arith.constant 0 : index
    %104 = vector.load %arg5[%c0_106, %c0_107] : memref<1x128xf32, #tpu.memory_space<vmem>>, vector<1x128xf32>
    %105 = vector.broadcast %104 : vector<1x128xf32> to vector<256x128xf32>
    %106 = arith.addf %103, %105 : vector<256x128xf32>
    %cst_108 = arith.constant dense<0.000000e+00> : vector<128xf32>
    %107 = vector.multi_reduction <add>, %106, %cst_108 [0] : vector<256x128xf32> to vector<128xf32>
    %108 = vector.shape_cast %107 : vector<128xf32> to vector<1x128xf32>
    %c0_109 = arith.constant 0 : index
    %c0_110 = arith.constant 0 : index
    %109 = vector.load %arg8[%c0_109, %c0_110] : memref<128x32xf32, #tpu.memory_space<vmem>>, vector<128x32xf32>
    %cst_111 = arith.constant dense<0.000000e+00> : vector<1x32xf32>
    %110 = tpu.matmul %108, %109, %cst_111 {dimension_numbers = #tpu.dot_dimension_numbers<[1], [0], [0], [1], [0, 0, 1, 1], [], []>} : vector<1x128xf32>, vector<128x32xf32>, vector<1x32xf32> -> vector<1x32xf32>
    %c0_112 = arith.constant 0 : index
    %c0_113 = arith.constant 0 : index
    %111 = vector.load %arg9[%c0_112, %c0_113] : memref<32x128xf32, #tpu.memory_space<vmem>>, vector<32x128xf32>
    %cst_114 = arith.constant dense<0.000000e+00> : vector<1x128xf32>
    %112 = tpu.matmul %110, %111, %cst_114 {dimension_numbers = #tpu.dot_dimension_numbers<[1], [0], [0], [1], [0, 0, 1, 1], [], []>} : vector<1x32xf32>, vector<32x128xf32>, vector<1x128xf32> -> vector<1x128xf32>
    %113 = vector.broadcast %112 : vector<1x128xf32> to vector<256x128xf32>
    %114 = arith.subf %106, %113 : vector<256x128xf32>
    %115 = arith.mulf %114, %114 : vector<256x128xf32>
    %cst_115 = arith.constant dense<0.000000e+00> : vector<128xf32>
    %116 = vector.multi_reduction <add>, %115, %cst_115 [0] : vector<256x128xf32> to vector<128xf32>
    %117 = vector.shape_cast %116 : vector<128xf32> to vector<1x128xf32>
    %c0_116 = arith.constant 0 : index
    %c0_117 = arith.constant 0 : index
    %118 = vector.load %arg8[%c0_116, %c0_117] : memref<128x32xf32, #tpu.memory_space<vmem>>, vector<128x32xf32>
    %cst_118 = arith.constant dense<0.000000e+00> : vector<1x32xf32>
    %119 = tpu.matmul %117, %118, %cst_118 {dimension_numbers = #tpu.dot_dimension_numbers<[1], [0], [0], [1], [0, 0, 1, 1], [], []>} : vector<1x128xf32>, vector<128x32xf32>, vector<1x32xf32> -> vector<1x32xf32>
    %cst_119 = arith.constant 9.99999974E-6 : f32
    %120 = vector.broadcast %cst_119 : f32 to vector<1x32xf32>
    %121 = arith.addf %119, %120 : vector<1x32xf32>
    %122 = math.rsqrt %121 : vector<1x32xf32>
    %c0_120 = arith.constant 0 : index
    %c0_121 = arith.constant 0 : index
    %123 = vector.load %arg9[%c0_120, %c0_121] : memref<32x128xf32, #tpu.memory_space<vmem>>, vector<32x128xf32>
    %cst_122 = arith.constant dense<0.000000e+00> : vector<1x128xf32>
    %124 = tpu.matmul %122, %123, %cst_122 {dimension_numbers = #tpu.dot_dimension_numbers<[1], [0], [0], [1], [0, 0, 1, 1], [], []>} : vector<1x32xf32>, vector<32x128xf32>, vector<1x128xf32> -> vector<1x128xf32>
    %c0_123 = arith.constant 0 : index
    %c0_124 = arith.constant 0 : index
    %125 = vector.load %arg6[%c0_123, %c0_124] : memref<1x128xf32, #tpu.memory_space<vmem>>, vector<1x128xf32>
    %126 = arith.mulf %124, %125 : vector<1x128xf32>
    %c0_125 = arith.constant 0 : index
    %c0_126 = arith.constant 0 : index
    %127 = vector.load %arg7[%c0_125, %c0_126] : memref<1x128xf32, #tpu.memory_space<vmem>>, vector<1x128xf32>
    %128 = vector.broadcast %126 : vector<1x128xf32> to vector<256x128xf32>
    %129 = arith.mulf %114, %128 : vector<256x128xf32>
    %130 = vector.broadcast %127 : vector<1x128xf32> to vector<256x128xf32>
    %131 = arith.addf %129, %130 : vector<256x128xf32>
    %cst_127 = arith.constant 0.000000e+00 : f32
    %132 = vector.broadcast %cst_127 : f32 to vector<256x128xf32>
    %133 = arith.cmpf oge, %131, %132 : vector<256x128xf32>
    %cst_128 = arith.constant 2.000000e-01 : f32
    %134 = vector.broadcast %cst_128 : f32 to vector<256x128xf32>
    %135 = arith.mulf %134, %131 : vector<256x128xf32>
    %136 = arith.select %133, %131, %135 : vector<256x128xi1>, vector<256x128xf32>
    %c0_129 = arith.constant 0 : index
    %c0_130 = arith.constant 0 : index
    %137 = vector.load %arg10[%c0_129, %c0_130] : memref<128x32xf32, #tpu.memory_space<vmem>>, vector<128x32xf32>
    %cst_131 = arith.constant dense<0.000000e+00> : vector<256x32xf32>
    %138 = tpu.matmul %136, %137, %cst_131 {dimension_numbers = #tpu.dot_dimension_numbers<[1], [0], [0], [1], [0, 0, 1, 1], [], []>} : vector<256x128xf32>, vector<128x32xf32>, vector<256x32xf32> -> vector<256x32xf32>
    %c0_132 = arith.constant 0 : index
    %c0_133 = arith.constant 0 : index
    %c0_134 = arith.constant 0 : index
    %139 = vector.load %arg11[%c0_132, %c0_133, %c0_134] : memref<1x256x32xf32, #tpu.memory_space<vmem>>, vector<1x256x32xf32>
    %140 = vector.shape_cast %139 : vector<1x256x32xf32> to vector<256x32xf32>
    %141 = vector.shape_cast %138 : vector<256x32xf32> to vector<1x256x32xf32>
    tpu.vector_store %arg11[%c0_132, %c0_133, %c0_134], %141 {strides = array<i32>} : memref<1x256x32xf32, #tpu.memory_space<vmem>>, vector<1x256x32xf32>,
    return
  }
  func.func @transform_0(%arg0: i32) -> (i32, i32, i32, i32) {
    %c0_i32 = arith.constant 0 : i32
    %c0_i32_0 = arith.constant 0 : i32
    %c0_i32_1 = arith.constant 0 : i32
    %c0_i32_2 = arith.constant 0 : i32
    return %arg0, %c0_i32, %c0_i32_0, %c0_i32_1 : i32, i32, i32, i32
  }
  func.func @transform_1(%arg0: i32) -> (i32, i32) {
    %c0_i32 = arith.constant 0 : i32
    %c0_i32_0 = arith.constant 0 : i32
    %c0_i32_1 = arith.constant 0 : i32
    return %c0_i32, %c0_i32_0 : i32, i32
  }
  func.func @transform_2(%arg0: i32) -> (i32, i32) {
    %c0_i32 = arith.constant 0 : i32
    %c0_i32_0 = arith.constant 0 : i32
    %c0_i32_1 = arith.constant 0 : i32
    return %c0_i32, %c0_i32_0 : i32, i32
  }
  func.func @transform_3(%arg0: i32) -> (i32, i32, i32) {
    %c0_i32 = arith.constant 0 : i32
    %c0_i32_0 = arith.constant 0 : i32
    %c0_i32_1 = arith.constant 0 : i32
    %c0_i32_2 = arith.constant 0 : i32
    return %c0_i32, %c0_i32_0, %c0_i32_1 : i32, i32, i32
  }
  func.func @transform_4(%arg0: i32) -> (i32, i32) {
    %c0_i32 = arith.constant 0 : i32
    %c0_i32_0 = arith.constant 0 : i32
    %c0_i32_1 = arith.constant 0 : i32
    return %c0_i32, %c0_i32_0 : i32, i32
  }
  func.func @transform_5(%arg0: i32) -> (i32, i32) {
    %c0_i32 = arith.constant 0 : i32
    %c0_i32_0 = arith.constant 0 : i32
    %c0_i32_1 = arith.constant 0 : i32
    return %c0_i32, %c0_i32_0 : i32, i32
  }
  func.func @transform_6(%arg0: i32) -> (i32, i32) {
    %c0_i32 = arith.constant 0 : i32
    %c0_i32_0 = arith.constant 0 : i32
    %c0_i32_1 = arith.constant 0 : i32
    return %c0_i32, %c0_i32_0 : i32, i32
  }
  func.func @transform_7(%arg0: i32) -> (i32, i32) {
    %c0_i32 = arith.constant 0 : i32
    %c0_i32_0 = arith.constant 0 : i32
    %c0_i32_1 = arith.constant 0 : i32
    return %c0_i32, %c0_i32_0 : i32, i32
  }
  func.func @transform_8(%arg0: i32) -> (i32, i32) {
    %c0_i32 = arith.constant 0 : i32
    %c0_i32_0 = arith.constant 0 : i32
    %c0_i32_1 = arith.constant 0 : i32
    return %c0_i32, %c0_i32_0 : i32, i32
  }
  func.func @transform_9(%arg0: i32) -> (i32, i32) {
    %c0_i32 = arith.constant 0 : i32
    %c0_i32_0 = arith.constant 0 : i32
    %c0_i32_1 = arith.constant 0 : i32
    return %c0_i32, %c0_i32_0 : i32, i32
  }
  func.func @transform_10(%arg0: i32) -> (i32, i32, i32) {
    %c0_i32 = arith.constant 0 : i32
    %c0_i32_0 = arith.constant 0 : i32
    %c0_i32_1 = arith.constant 0 : i32
    return %arg0, %c0_i32, %c0_i32_0 : i32, i32, i32
  }
}

</mosaic_0001>

<bundles_post_ra>
// kernel: _lambda_.1
= control target key start
LH: loop header
LB: loop body
LE: loop exit
PB: predicated region body
PF: predicated region fallthrough
CT: control target
= control target key end

     0   :  { %15 = vsyncpa [#allocation5], 0  ;;  %s21919_s0 = inlined_call_operand.vmem [shape: f32[2,16,16,16], index: 0, kind: input, shape index: {}]   ;;  %s21920_s1 = inlined_call_operand.vmem [shape: bf16[16,32], index: 1, kind: input, shape index: {}]   ;;  %s21921_s2 = inlined_call_operand.vmem [shape: f32[1,32], index: 2, kind: input, shape index: {}]   ;;  %s21922_s3 = inlined_call_operand.hbm [shape: bf16[11,352,128], index: 3, kind: input, shape index: {}]   ;;  %s21923_s4 = inlined_call_operand.vmem [shape: f32[1,128], index: 4, kind: input, shape index: {}]   ;;  %s21924_s5 = inlined_call_operand.vmem [shape: f32[1,128], index: 5, kind: input, shape index: {}]   ;;  %s21925_s6 = inlined_call_operand.vmem [shape: f32[1,128], index: 6, kind: input, shape index: {}]   ;;  %s21926_s7 = inlined_call_operand.vmem [shape: f32[128,32], index: 7, kind: input, shape index: {}]   ;;  %s21927_s8 = inlined_call_operand.vmem [shape: f32[32,128], index: 8, kind: input, shape index: {}]   ;;  %s21928_s9 = inlined_call_operand.vmem [shape: f32[128,32], index: 9, kind: input, shape index: {}]   ;;  %s21929_s10 = inlined_call_operand.hbm [shape: f32[2,256,32], index: 10, kind: output, shape index: {}]  }
   0x1   :  { %16 = vsyncpa [#allocation6], 0 }
   0x2   :  { %18 = vsyncpa [#allocation6 + $0x1], 0  ;;  %s17345_s13 = smov 0   ;;  %s17347_s14 = smov 0  }
   0x3   :  { %s17349_s15 = smov 0   ;;  %s17351_s16 = smov 0  }
   0x4 LB: > { %s17366_s17 = sadd.s32 4294967295, %s17275_s16   ;;  %s13309_s18 = sadd.s32 4294967294, %s17275_s16   ;;  %s17275_s16 = sphi %s17351_s16, %s22164_s16   ;;  %s17271_s15 = sphi %s17349_s15, %s22163_s15   ;;  %s17267_s14 = sphi %s17347_s14, %s22162_s14   ;;  %s17263_s13 = sphi %s17345_s13, %s22161_s13  }
   0x5   : > { %s17370_s19 = sadd.s32 1, %s17275_s16   ;;  %s246_s20 = sadd.s32 1, %s17271_s15 }
   0x6   : > { %s243_s21 = ssub.s32 %s17275_s16, %s17370_s19  ;;  %p256_p0 = scmp.ne.s32.totalorder %s17271_s15, %s17267_s14 }
   0x7   : > { %p244_p1 = scmp.eq.s32.totalorder %s243_s21, 0  ;;  %p257_p2 = scmp.eq.s32.totalorder %s17366_s17, 1 }
   0x8   : > { %p262_p3 = scmp.ne.s32.totalorder %s17267_s14, %s17263_s13  ;;  %p263_p4 = scmp.eq.s32.totalorder %s13309_s18, 1 }
   0x9   : > { %s17381_s22 = scalar_select %p244_p1, %s17271_s15, %s246_s20  }
   0xa   : > { %p17383_p5 = por %p257_p2, %p256_p0  ;;  %p17387_p6 = por %p263_p4, %p262_p3 }
   0xb   : > { %p13310_p7 = scmp.ge.s32.totalorder %s17275_s16, 1  ;;  %p270_p8 = scmp.lt.s32.totalorder %s17275_s16, 3 }
   0xc   : > { %s21961_s23 = scalar_select %p17383_p5, 1, 0 }
   0xd   : > { %s21962_s24 = scalar_select %p17387_p6, 1, 0 }
   0xe   : > { %p21930_p9 = scmp.eq.s32.totalorder %s17366_s17, 0  ;;  %p17394_p10 = pnand %p13310_p7, %p270_p8 }
   0xf   : > { %s17277_s26 = smov [#allocation4]   ;;  %s17181_s11 = scalar_lea.hbm %s21922_s3, 30976 }
  0x10   : > { %s21963_s25 = scalar_select %p17394_p10, 1, 0 }
  0x11   : > { %s288_s27 = sshll.u32 %s17277_s26, 4  ;;  %p16808_p11 = pneg %p17394_p10  ;;  %s289_s27 = int_to_ptr.vmem [resolvable:$true] %s288_s27 }
  0x12   : > { %p17182_p13 = scmp.ne.s32.totalorder %s21922_s3, %s17181_s11  ;;  %p17188_p3 = scmp.lt.u32.totalorder %s17181_s11, %s21922_s3 }
  0x13   : > { %p17402_p12 = pnand %p21930_p9, %p16808_p11 }
  0x15   : > { %p17183_p0 = pneg %p17402_p12 }
  0x17   : > { %p17184_p1 = pnand %p17183_p0, %p17182_p13 }
  0x19   : > { %p17185_p2 = pneg %p17184_p1 }
  0x1b   : > { %p17190_p4 = pnand %p17188_p3, %p17185_p2 }
  0x1d   : > { %17193 = shalt.err (!%p17190_p4)
}
  0x1e   : > { %s17194_s26 = scalar_lea.vmem %s289_s27, 30976  ;;  %p17202_p9 = scmp.lt.s32.totalorder %s289_s27, %s289_s27 }
  0x1f   : > { %p17195_p7 = scmp.ne.s32.totalorder %s289_s27, %s17194_s26  ;;  %p17203_p6 = scmp.lt.s32.totalorder %s17194_s26, %s17194_s26 }
  0x21   : > { %p17197_p8 = pnand %p17195_p7, %p17183_p0  ;;  %p17204_p5 = por %p17203_p6, %p17202_p9 }
  0x23   : > { %p17198_p11 = pneg %p17197_p8 }
  0x25   : > { %p17205_p10 = pnand %p17204_p5, %p17198_p11 }
  0x27   : > { %17208 = shalt.err (!%p17205_p10)
}
  0x28   : > { %s17278_s29 = smov 64   ;;  %s17279_s30 = smov 4  }
  0x29   : > { %16811 = dma.hbm_to_vmem [thread:$0]  (!%p17402_p12), %s21922_s3, 30976, %s289_s27, [#allocation5], %s17278_s29, %s17278_s29, %s17279_s30  }
  0x2a   : > { %p21965_p13 = scmp.ne.s32.totalorder %s21963_s25, 0 }
  0x2c   : > { %330 = sbr.rel (%p21965_p13) target bundleno = 3016 (0xbc8), region = 60 }
  0x33   : > { %p21966_p1 = scmp.eq.s32.totalorder %s17366_s17, 0 }
  0x35   : > { %17254 = dma.done.wait (%p21966_p1), [#allocation5], 30976   ;;  %p21967_p0 = pmov %p21966_p1 }
  0x36   : > { %p368_p5 = scmp.lt.s32.totalorder %s17366_s17, 1  ;;  %vm647_vm0 = vcmask 261120   ;;  %v17280_v0 = vmov 0   ;;  %v16863_v1 = vld [vmem:[%s21920_s1] sm:$0xff]   ;;  %vm437_vm1 = vcmask 130048   ;;  %vm4711_vm2 = vcmask 1041408  }
  0x37   : > { %17256 = vsyncadd (%p21967_p0), [#allocation5], 4294936320  ;;  %656 = vst.msk [vmem:[#allocation2 + $0x40] sm:$0xff] %vm647_vm0, %v17280_v0  ;;  %15348 = vmatprep.subr.bf16.mxu0 %v16863_v1  ;;  %vm3043_vm3 = vcmask 1043456   ;;  %s17281_s29 = smov 32   ;;  %s17282_s30 = smov 64  }
  0x38   : > { %657 = vst.msk [vmem:[#allocation2 + $0x48] sm:$0xff] %vm647_vm0, %v17280_v0  ;;  %648 = vst.msk [vmem:[#allocation2] sm:$0xff] %vm647_vm0, %v17280_v0  ;;  %s369_s25 = scalar_select %p368_p5, %s17366_s17, 1  ;;  %15349 = vmatpush3.bf16.msra.mxu0 %v16863_v1  ;;  %vm4816_vm4 = vsmask.f32 1280  ;;  %vm1373_vm5 = vcmask 1045504  }
  0x39   : > { %649 = vst.msk [vmem:[#allocation2 + $0x8] sm:$0xff] %vm647_vm0, %v17280_v0  ;;  %650 = vst.msk [vmem:[#allocation2 + $0x10] sm:$0xff] %vm647_vm0, %v17280_v0  ;;  %vm3148_vm6 = vsmask.f32 3328  ;;  %vm1478_vm7 = vsmask.f32 5376 }
  0x3a   : > { %651 = vst.msk [vmem:[#allocation2 + $0x18] sm:$0xff] %vm647_vm0, %v17280_v0  ;;  %652 = vst.msk [vmem:[#allocation2 + $0x20] sm:$0xff] %vm647_vm0, %v17280_v0  ;;  %s13763_s27 = sshll.u32 %s369_s25, 8  ;;  %vm3669_vm8 = vcmask 1042432   ;;  %vm1999_vm9 = vcmask 1044480   ;;  %s17283_s12 = smov 96  }
  0x3b   : > { %653 = vst.msk [vmem:[#allocation2 + $0x28] sm:$0xff] %vm647_vm0, %v17280_v0  ;;  %654 = vst.msk [vmem:[#allocation2 + $0x30] sm:$0xff] %vm647_vm0, %v17280_v0  ;;  %s17475_s20 = scalar_lea.vmem %s21919_s0, %s13763_s27  ;;  %vm670_vm10 = vcmask 257024   ;;  %vm687_vm11 = vcmask 261124   ;;  %vm4190_vm12 = vsmask.f32 2304 }
  0x3c   : > { %655 = vst.msk [vmem:[#allocation2 + $0x38] sm:$0xff] %vm647_vm0, %v17280_v0  ;;  %659 = vst.msk [vmem:[#allocation2 + $0x150] sm:$0xff] %vm647_vm0, %v17280_v0  ;;  %v374_v2 = vld [vmem:[%s17475_s20] sm:$0xff]  ;;  %v375_v3 = vld [vmem:[%s17475_s20 + $0x8] sm:$0xff]  ;;  %vm2312_vm13 = vcmask 523264   ;;  %vm2365_vm14 = vcmask 785408  }
  0x3d   : > { %660 = vst.msk [vmem:[#allocation2 + $0x158] sm:$0xff] %vm647_vm0, %v17280_v0  ;;  %661 = vst.msk [vmem:[#allocation2 + $0x160] sm:$0xff] %vm647_vm0, %v17280_v0  ;;  %v376_v4 = vld [vmem:[%s17475_s20 + $0x10] sm:$0xff]  ;;  %v406_v5 = vpack.c.bf16 %v375_v3, %v374_v2  ;;  %v377_v6 = vld [vmem:[%s17475_s20 + $0x18] sm:$0xff]  ;;  %vm2522_vm15 = vsmask.f32 4352 }
  0x3e   : > { %662 = vst.msk [vmem:[#allocation2 + $0x168] sm:$0xff] %vm647_vm0, %v17280_v0  ;;  %663 = vst.msk [vmem:[#allocation2 + $0x170] sm:$0xff] %vm647_vm0, %v17280_v0  ;;  %v378_v7 = vld [vmem:[%s17475_s20 + $0x20] sm:$0xff]  ;;  %v379_v8 = vld [vmem:[%s17475_s20 + $0x28] sm:$0xff]  ;;  %v407_v9 = vpack.c.bf16 %v377_v6, %v376_v4  ;;  %p22159_p9 = scmp.ne.s32.totalorder %s21961_s23, 0  ;;  %s17287_s28 = smov [#allocation7]  }
  0x3f   : > { %664 = vst.msk [vmem:[#allocation2 + $0x178] sm:$0xff] %vm647_vm0, %v17280_v0  ;;  %665 = vst.msk [vmem:[#allocation2 + $0x180] sm:$0xff] %vm647_vm0, %v17280_v0  ;;  %v408_v10 = vpack.c.bf16 %v379_v8, %v378_v7  ;;  %15350 = vmatprep.mubr.msk.bf16.mxu0 %vm437_vm1, %v406_v5  ;;  %v380_v11 = vld [vmem:[%s17475_s20 + $0x30] sm:$0xff]  ;;  %v381_v12 = vld [vmem:[%s17475_s20 + $0x38] sm:$0xff]  ;;  %s17213_s11 = sshll.u32 %s17287_s28, 4  ;;  %s17214_s11 = int_to_ptr.vmem [resolvable:$false] %s17213_s11 }
  0x40   : > { %666 = vst.msk [vmem:[#allocation2 + $0x188] sm:$0xff] %vm647_vm0, %v17280_v0  ;;  %667 = vst.msk [vmem:[#allocation2 + $0x190] sm:$0xff] %vm647_vm0, %v17280_v0  ;;  %15351 = vmatmul.mubr.msk.bf16.vlgmr.msra.gmra.mrb[0].mxu0 %vm437_vm1, %v407_v9  ;;  %v382_v13 = vld [vmem:[%s17475_s20 + $0x40] sm:$0xff]  ;;  %v383_v14 = vld [vmem:[%s17475_s20 + $0x48] sm:$0xff]  ;;  %v409_v18 = vpack.c.bf16 %v381_v12, %v380_v11 }
  0x41   : > { %668 = vst.msk [vmem:[#allocation2 + $0x198] sm:$0xff] %vm647_vm0, %v17280_v0  ;;  %15354 = vmatprep.mubr.msk.bf16.mxu0 %vm437_vm1, %v408_v10  ;;  %v17493_v15 = vld [vmem:[#allocation2 + $0x48] sm:$0x3f]  ;;  %v17495_v16 = vld [vmem:[#allocation2 + $0x40] sm:$0xc0]  ;;  %v410_v22 = vpack.c.bf16 %v383_v14, %v382_v13  ;;  %v384_v28 = vld [vmem:[%s17475_s20 + $0x50] sm:$0xff] }
  0x42   : > { %v17497_v17 = vld [vmem:[#allocation2 + $0x18] sm:$0xf]  ;;  %v4724_v19 = vrot.slane %v17495_v16, 6  ;;  %v4725_v20 = vrot.slane %v17493_v15, 6  ;;  %v17501_v21 = vld [vmem:[#allocation2 + $0x10] sm:$0xf0] }
  0x43   : > { %v3047_v23 = vrot.slane %v17501_v21, 4  ;;  %v3048_v24 = vrot.slane %v17497_v17, 4  ;;  %v17505_v25 = vld [vmem:[#allocation2 + $0x18] sm:$0x3f]  ;;  %v4634_v27 = vld [vmem:[#allocation2 + $0x10] sm:$0xc0] }
  0x44   : > { %v4726_v26 = vsel %vm4711_vm2, %v4724_v19, %v4725_v20  ;;  %v385_v29 = vld [vmem:[%s17475_s20 + $0x58] sm:$0xff]  ;;  %v4715_v30 = vrot.slane %v4634_v27, 6  ;;  %v4716_v31 = vrot.slane %v17505_v25, 6  ;;  %v4835_v34 = vshrl.u32 %v4634_v27, 16  ;;  %v4143_v37 = vld [vmem:[#allocation2 + $0x28] sm:$0x3f] }
  0x45   : > { %5267 = vrot.lane.b32.xlu1 %v4726_v26, %s17281_s29  ;;  %v4791_v32 = vld [vmem:[#allocation2 + $0x18] sm:$0x7f]  ;;  %v3049_v33 = vsel %vm3043_vm3, %v3047_v23, %v3048_v24  ;;  %v4838_v35 = vshll.u32 %v4634_v27, 16  ;;  %v386_v38 = vld [vmem:[%s17475_s20 + $0x60] sm:$0xff]  ;;  %v411_v42 = vpack.c.bf16 %v385_v29, %v384_v28  ;;  %v387_v43 = vld [vmem:[%s17475_s20 + $0x68] sm:$0xff]  ;;  %v4719_v50 = vrot.slane %v4143_v37, 6 }
  0x46   : > { %v4843_v36 = vshrl.u32 %v4791_v32, 16  ;;  %v4717_v39 = vsel %vm4711_vm2, %v4715_v30, %v4716_v31  ;;  %v4846_v40 = vshll.u32 %v4791_v32, 16  ;;  %v4635_v41 = vld [vmem:[#allocation2 + $0x20] sm:$0xc0]  ;;  %v4837_v44 = vrot.slane %v4835_v34, 6  ;;  %v17524_v63 = vld [vmem:[%s17475_s20 + $0x70] sm:$0xff] }
  0x47   : > { %5261 = vrot.lane.b32.xlu0 %v4717_v39, %s17281_s29  ;;  %v4840_v45 = vrot.slane %v4838_v35, 7  ;;  %v4792_v47 = vld [vmem:[#allocation2 + $0x28] sm:$0x7f]  ;;  %v4718_v49 = vrot.slane %v4635_v41, 6  ;;  %v4852_v51 = vshrl.u32 %v4635_v41, 16  ;;  %v4855_v54 = vshll.u32 %v4635_v41, 16 }
  0x48   : > { %15355 = vmatmul.mubr.msk.bf16.gmra.mrb[4].mxu0 %vm437_vm1, %v409_v18  ;;  %v4845_v46 = vrot.slane %v4843_v36, 6  ;;  %v4848_v48 = vrot.slane %v4846_v40, 7  ;;  %v4145_v52 = vld [vmem:[#allocation2 + $0x38] sm:$0x3f]  ;;  %v4860_v55 = vshrl.u32 %v4792_v47, 16  ;;  %v4863_v56 = vshll.u32 %v4792_v47, 16 }
  0x49   : > { %15358 = vmatprep.mubr.msk.bf16.mxu0 %vm437_vm1, %v410_v22  ;;  %3750 = vrot.lane.b32.xlu1 %v3049_v33, %s17281_s29  ;;  %v4841_v53 = vor.u32 %v4840_v45, %v4837_v44  ;;  %v17520_v57 = vld [vmem:[#allocation2 + $0x30] sm:$0xc0]  ;;  %v412_v58 = vpack.c.bf16 %v387_v43, %v386_v38  ;;  %v4720_v60 = vsel %vm4711_vm2, %v4718_v49, %v4719_v50  ;;  %v4854_v61 = vrot.slane %v4852_v51, 6  ;;  %v4794_v62 = vld [vmem:[#allocation2 + $0x48] sm:$0x7f]  ;;  %v389_v4 = vld [vmem:[%s17475_s20 + $0x78] sm:$0xff] }
  0x4a   : > { %v4849_v59 = vor.u32 %v4848_v48, %v4845_v46  ;;  %v4857_v1 = vrot.slane %v4855_v54, 7  ;;  %v4862_v2 = vrot.slane %v4860_v55, 6  ;;  %v4865_v3 = vrot.slane %v4863_v56, 7  ;;  %v17529_v5 = vld [vmem:[%s17475_s20 + $0x80] sm:$0xff]  ;;  %v17532_v6 = vld [vmem:[%s17475_s20 + $0x88] sm:$0xff]  ;;  %v17547_v27 = vld [vmem:[%s17475_s20 + $0x90] sm:$0xff] }
  0x4b   : > { %5263 = vrot.lane.b32.xlu0 %v4720_v60, %s17281_s29  ;;  %v4721_v8 = vrot.slane %v17520_v57, 6  ;;  %v4722_v9 = vrot.slane %v4145_v52, 6  ;;  %v4886_v10 = vshrl.u32 %v17495_v16, 16  ;;  %v4889_v13 = vshll.u32 %v17495_v16, 16  ;;  %v2471_v18 = vld [vmem:[#allocation2 + $0x8] sm:$0xf] }
  0x4c   : > { %v4850_v7 = vsel %vm4816_vm4, %v4841_v53, %v4849_v59  ;;  %v4858_v11 = vor.u32 %v4857_v1, %v4854_v61  ;;  %v4866_v12 = vor.u32 %v4865_v3, %v4862_v2  ;;  %v4894_v14 = vshrl.u32 %v4794_v62, 16  ;;  %v17540_v19 = vld [vmem:[#allocation2] sm:$0xf0]  ;;  %v803_v24 = vld [vmem:[#allocation2 + $0x18] sm:$0x3]  ;;  %v395_v50 = vld [vmem:[%s17475_s20 + $0xa8] sm:$0xff] }
  0x4d   : > { %5313 = vrot.lane.b32.xlu1 %v4850_v7, %s17282_s30  ;;  %v4723_v20 = vsel %vm4711_vm2, %v4721_v8, %v4722_v9  ;;  %v4888_v22 = vrot.slane %v4886_v10, 6  ;;  %v4897_v23 = vshll.u32 %v4794_v62, 16  ;;  %v17544_v26 = vld [vmem:[#allocation2 + $0x10] sm:$0xfc]  ;;  %v4891_v16 = vrot.slane %v4889_v13, 7  ;;  %v17553_v31 = vld [vmem:[%s17475_s20 + $0x98] sm:$0xff] }
  0x4e   : > { %v4867_v28 = vsel %vm4816_vm4, %v4858_v11, %v4866_v12  ;;  %v4896_v29 = vrot.slane %v4894_v14, 6  ;;  %v413_v30 = vpack.c.bf16 %v389_v4, %v17524_v63  ;;  %v3044_v33 = vrot.slane %v17540_v19, 4  ;;  %v4793_v35 = vld [vmem:[#allocation2 + $0x38] sm:$0x7f]  ;;  %v394_v46 = vld [vmem:[%s17475_s20 + $0xa0] sm:$0xff] }
  0x4f   : > { %5265 = vrot.lane.b32.xlu0 %v4723_v20, %s17281_s29  ;;  %v4899_v32 = vrot.slane %v4897_v23, 7  ;;  %v3045_v34 = vrot.slane %v2471_v18, 4  ;;  %v414_v36 = vpack.c.bf16 %v17532_v6, %v17529_v5  ;;  %v4892_v37 = vor.u32 %v4891_v16, %v4888_v22  ;;  %v17563_v44 = vld [vmem:[#allocation2 + $0x18] sm:$0x1f]  ;;  %v17573_v55 = vld [vmem:[#allocation2] sm:$0xfc] }
  0x50   : > { %15359 = vmatmul.mubr.msk.bf16.gmra.mrb[8].mxu0 %vm437_vm1, %v411_v42  ;;  %v1377_v38 = vrot.slane %v17544_v26, 2  ;;  %v1378_v39 = vrot.slane %v803_v24, 2  ;;  %v4869_v42 = vshrl.u32 %v17520_v57, 16  ;;  %v4872_v43 = vshll.u32 %v17520_v57, 16  ;;  %v17578_v60 = vld [vmem:[#allocation2 + $0x8] sm:$0x3] }
  0x51   : > { %15362 = vmatprep.mubr.msk.bf16.mxu0 %vm437_vm1, %v412_v58  ;;  %5315 = vrot.lane.b32.xlu1 %v4867_v28, %s17282_s30  ;;  %v4900_v40 = vor.u32 %v4899_v32, %v4896_v29  ;;  %v3046_v41 = vsel %vm3043_vm3, %v3044_v33, %v3045_v34  ;;  %v415_v45 = vpack.c.bf16 %v17553_v31, %v17547_v27  ;;  %v4877_v47 = vshrl.u32 %v4793_v35, 16  ;;  %v17583_v1 = vld [vmem:[#allocation2 + $0x18] sm:$0x7]  ;;  %v17593_v14 = vld [vmem:[#allocation2 + $0x8] sm:$0x1f] }
  0x52   : > { %v4880_v48 = vshll.u32 %v4793_v35, 16  ;;  %v3167_v49 = vshrl.u32 %v17501_v21, 16  ;;  %v4871_v52 = vrot.slane %v4869_v42, 6  ;;  %v4874_v53 = vrot.slane %v4872_v43, 7  ;;  %v3592_v24 = vld [vmem:[#allocation2 + $0x10] sm:$0xe0] }
  0x53   : > { %3748 = vrot.lane.b32.xlu0 %v3046_v41, %s17281_s29  ;;  %v4901_v51 = vsel %vm4816_vm4, %v4892_v37, %v4900_v40  ;;  %v3170_v54 = vshll.u32 %v17501_v21, 16  ;;  %v4879_v56 = vrot.slane %v4877_v47, 6  ;;  %v3175_v59 = vshrl.u32 %v17563_v44, 16  ;;  %v17602_v33 = vld [vmem:[#allocation2 + $0x8] sm:$0x7] }
  0x54   : > { %v4882_v57 = vrot.slane %v4880_v48, 7  ;;  %v3169_v58 = vrot.slane %v3167_v49, 4  ;;  %v1379_v61 = vsel %vm1373_vm5, %v1377_v38, %v1378_v39  ;;  %v4875_v62 = vor.u32 %v4874_v53, %v4871_v52  ;;  %v397_v38 = vld [vmem:[%s17475_s20 + $0xb8] sm:$0xff]  ;;  %v1922_v48 = vld [vmem:[#allocation2 + $0x10] sm:$0xf8] }
  0x55   : > { %5319 = vrot.lane.b32.xlu1 %v4901_v51, %s17282_s30  ;;  %v3172_v21 = vrot.slane %v3170_v54, 5  ;;  %v3178_v63 = vshll.u32 %v17563_v44, 16  ;;  %v416_v2 = vpack.c.bf16 %v395_v50, %v394_v46  ;;  %v3177_v4 = vrot.slane %v3175_v59, 4  ;;  %671 = vst.msk [vmem:[#allocation2 + $0x50] sm:$0xf] %vm670_vm10, %v17280_v0 }
  0x56   : > { %v4883_v3 = vor.u32 %v4882_v57, %v4879_v56  ;;  %v1374_v5 = vrot.slane %v17573_v55, 2  ;;  %v1375_v8 = vrot.slane %v17578_v60, 2  ;;  %v1497_v9 = vshrl.u32 %v17544_v26, 16  ;;  %v3591_v56 = vld [vmem:[#allocation2] sm:$0xe0] }
  0x57   : > { %v3173_v6 = vor.u32 %v3172_v21, %v3169_v58  ;;  %v3180_v7 = vrot.slane %v3178_v63, 5  ;;  %v1500_v11 = vshll.u32 %v17544_v26, 16  ;;  %v1505_v12 = vshrl.u32 %v17583_v1, 16  ;;  %672 = vst.msk [vmem:[#allocation2 + $0x60] sm:$0xf] %vm670_vm10, %v17280_v0 }
  0x58   : > { %15363 = vmatmul.mubr.msk.bf16.gmra.mrb[12].mxu0 %vm437_vm1, %v413_v30  ;;  %v4884_v10 = vsel %vm4816_vm4, %v4875_v62, %v4883_v3  ;;  %v1508_v13 = vshll.u32 %v17583_v1, 16  ;;  %v1376_v20 = vsel %vm1373_vm5, %v1374_v5, %v1375_v8  ;;  %v1499_v22 = vrot.slane %v1497_v9, 2  ;;  %v1297_v3 = vld [vmem:[#allocation2 + $0x20] sm:$0xfc]  ;;  %v17624_v8 = vld [vmem:[#allocation2 + $0x28] sm:$0x1f] }
  0x59   : > { %15366 = vmatprep.mubr.msk.bf16.mxu0 %vm437_vm1, %v414_v36  ;;  %2080 = vrot.lane.b32.xlu1 %v1379_v61, %s17281_s29  ;;  %v3181_v18 = vor.u32 %v3180_v7, %v3177_v4  ;;  %v3150_v23 = vshrl.u32 %v17540_v19, 16  ;;  %v1502_v27 = vrot.slane %v1500_v11, 3  ;;  %v1507_v28 = vrot.slane %v1505_v12, 2  ;;  %v1921_v61 = vld [vmem:[#allocation2] sm:$0xf8] }
  0x5a   : > { %5317 = vrot.lane.b32.xlu0 %v4884_v10, %s17282_s30  ;;  %v1510_v26 = vrot.slane %v1508_v13, 3  ;;  %v3153_v16 = vshll.u32 %v17540_v19, 16  ;;  %v3158_v31 = vshrl.u32 %v17593_v14, 16  ;;  %v3161_v32 = vshll.u32 %v17593_v14, 16  ;;  %v396_v19 = vld [vmem:[%s17475_s20 + $0xb0] sm:$0xff] }
  0x5b   : > { %v3182_v29 = vsel %vm3148_vm6, %v3173_v6, %v3181_v18  ;;  %v3152_v30 = vrot.slane %v3150_v23, 4  ;;  %v1503_v34 = vor.u32 %v1502_v27, %v1499_v22  ;;  %v3673_v37 = vrot.slane %v3592_v24, 5  ;;  %v2967_v7 = vld [vmem:[#allocation2 + $0x20] sm:$0xf0]  ;;  %v17629_v10 = vld [vmem:[#allocation2 + $0x28] sm:$0xf] }
  0x5c   : > { %v1511_v35 = vor.u32 %v1510_v26, %v1507_v28  ;;  %v3155_v36 = vrot.slane %v3153_v16, 5  ;;  %v3160_v39 = vrot.slane %v3158_v31, 4  ;;  %v3163_v40 = vrot.slane %v3161_v32, 5  ;;  %v1454_v18 = vld [vmem:[#allocation2 + $0x28] sm:$0x7]  ;;  %v398_v24 = vld [vmem:[%s17475_s20 + $0xc0] sm:$0xff] }
  0x5d   : > { %3802 = vrot.lane.b32.xlu1 %v3182_v29, %s17282_s30  ;;  %v3674_v41 = vrot.slane %v17563_v44, 5  ;;  %v1480_v42 = vshrl.u32 %v17573_v55, 16  ;;  %v1483_v46 = vshll.u32 %v17573_v55, 16  ;;  %v1488_v47 = vshrl.u32 %v17602_v33, 16  ;;  %v399_v29 = vld [vmem:[%s17475_s20 + $0xc8] sm:$0xff] }
  0x5e   : > { %2078 = vrot.lane.b32.xlu0 %v1376_v20, %s17281_s29  ;;  %v1512_v43 = vsel %vm1478_vm7, %v1503_v34, %v1511_v35  ;;  %v3164_v49 = vor.u32 %v3163_v40, %v3160_v39  ;;  %v1491_v51 = vshll.u32 %v17602_v33, 16  ;;  %v417_v52 = vpack.c.bf16 %v397_v38, %v396_v19  ;;  %v400_v35 = vld [vmem:[%s17475_s20 + $0xd0] sm:$0xff]  ;;  %v401_v39 = vld [vmem:[%s17475_s20 + $0xd8] sm:$0xff]  ;;  %673 = vst.msk [vmem:[#allocation2 + $0x70] sm:$0xf] %vm670_vm10, %v17280_v0 }
  0x5f   : > { %v1482_v50 = vrot.slane %v1480_v42, 2  ;;  %v3675_v44 = vsel %vm3669_vm8, %v3673_v37, %v3674_v41  ;;  %v1485_v53 = vrot.slane %v1483_v46, 3  ;;  %v1490_v54 = vrot.slane %v1488_v47, 2  ;;  %674 = vst.msk [vmem:[#allocation2 + $0x80] sm:$0xf] %vm670_vm10, %v17280_v0 }
  0x60   : > { %15367 = vmatmul.mubr.msk.bf16.gmra.mrb[16].mxu0 %vm437_vm1, %v415_v45  ;;  %v3156_v45 = vor.u32 %v3155_v36, %v3152_v30  ;;  %v1493_v58 = vrot.slane %v1491_v51, 3  ;;  %v2003_v55 = vrot.slane %v1922_v48, 3  ;;  %v2004_v59 = vrot.slane %v17583_v1, 3  ;;  %v1923_v30 = vld [vmem:[#allocation2 + $0x20] sm:$0xf8] }
  0x61   : > { %15370 = vmatprep.mubr.msk.bf16.mxu0 %vm437_vm1, %v416_v2  ;;  %2132 = vrot.lane.b32.xlu1 %v1512_v43, %s17282_s30  ;;  %v4268_v62 = vshrl.u32 %v17493_v15, 16  ;;  %v4271_v21 = vshll.u32 %v17493_v15, 16  ;;  %v1486_v63 = vor.u32 %v1485_v53, %v1482_v50  ;;  %v805_v2 = vld [vmem:[#allocation2 + $0x28] sm:$0x3]  ;;  %v3670_v5 = vrot.slane %v3591_v56, 5 }
  0x62   : > { %v3165_v57 = vsel %vm3148_vm6, %v3156_v45, %v3164_v49  ;;  %v1494_v4 = vor.u32 %v1493_v58, %v1490_v54  ;;  %v3671_v6 = vrot.slane %v17593_v14, 5  ;;  %v2000_v1 = vrot.slane %v1921_v61, 3  ;;  %v3593_v48 = vld [vmem:[#allocation2 + $0x20] sm:$0xe0]  ;;  %v1298_v53 = vld [vmem:[#allocation2 + $0x30] sm:$0xfc] }
  0x63   : > { %3800 = vrot.lane.b32.xlu0 %v3165_v57, %s17282_s30  ;;  %v2001_v9 = vrot.slane %v17602_v33, 3  ;;  %v2005_v12 = vsel %vm1999_vm9, %v2003_v55, %v2004_v59  ;;  %v1380_v13 = vrot.slane %v1297_v3, 2  ;;  %v1381_v14 = vrot.slane %v805_v2, 2  ;;  %v2968_v54 = vld [vmem:[#allocation2 + $0x30] sm:$0xf0] }
  0x64   : > { %v1495_v11 = vsel %vm1478_vm7, %v1486_v63, %v1494_v4  ;;  %v3184_v20 = vshrl.u32 %v2967_v7, 16  ;;  %v3187_v22 = vshll.u32 %v2967_v7, 16  ;;  %v3192_v23 = vshrl.u32 %v17624_v8, 16  ;;  %v807_v56 = vld [vmem:[#allocation2 + $0x38] sm:$0x3] }
  0x65   : > { %3854 = vrot.lane.b32.xlu1 %v3675_v44, %s17283_s12  ;;  %v3672_v27 = vsel %vm3669_vm8, %v3670_v5, %v3671_v6  ;;  %v3195_v28 = vshll.u32 %v17624_v8, 16  ;;  %v1514_v26 = vshrl.u32 %v1297_v3, 16  ;;  %v1517_v16 = vshll.u32 %v1297_v3, 16  ;;  %v17652_v61 = vld [vmem:[#allocation2 + $0x38] sm:$0x1f] }
  0x66   : > { %v2002_v31 = vsel %vm1999_vm9, %v2000_v1, %v2001_v9  ;;  %v3050_v32 = vrot.slane %v2967_v7, 4  ;;  %v3051_v33 = vrot.slane %v17629_v10, 4  ;;  %v1522_v34 = vshrl.u32 %v1454_v18, 16  ;;  %v1455_v63 = vld [vmem:[#allocation2 + $0x38] sm:$0x7] }
  0x67   : > { %2130 = vrot.lane.b32.xlu0 %v1495_v11, %s17282_s30  ;;  %v1382_v36 = vsel %vm1373_vm5, %v1380_v13, %v1381_v14  ;;  %v1516_v37 = vrot.slane %v1514_v26, 2  ;;  %v1519_v19 = vrot.slane %v1517_v16, 3  ;;  %v1525_v38 = vshll.u32 %v1454_v18, 16  ;;  %v2477_v5 = vld [vmem:[#allocation2 + $0x38] sm:$0xf] }
  0x68   : > { %15371 = vmatmul.mubr.msk.bf16.gmra.mrb[20].mxu0 %vm437_vm1, %v417_v52  ;;  %v3186_v40 = vrot.slane %v3184_v20, 4  ;;  %v3189_v41 = vrot.slane %v3187_v22, 5  ;;  %v3194_v42 = vrot.slane %v3192_v23, 4  ;;  %v1524_v43 = vrot.slane %v1522_v34, 2  ;;  %v3594_v20 = vld [vmem:[#allocation2 + $0x30] sm:$0xe0] }
  0x69   : > { %2184 = vrot.lane.b32.xlu1 %v2005_v12, %s17283_s12  ;;  %v3197_v45 = vrot.slane %v3195_v28, 5  ;;  %v1520_v46 = vor.u32 %v1519_v19, %v1516_v37  ;;  %v1527_v47 = vrot.slane %v1525_v38, 3  ;;  %v418_v49 = vpack.c.bf16 %v399_v29, %v398_v24  ;;  %v2479_v28 = vld [vmem:[#allocation2 + $0x48] sm:$0xf]  ;;  %v2969_v26 = vld [vmem:[#allocation2 + $0x40] sm:$0xf0] }
  0x6a   : > { %v2006_v50 = vrot.slane %v1923_v30, 3  ;;  %v2007_v51 = vrot.slane %v1454_v18, 3  ;;  %v419_v52 = vpack.c.bf16 %v401_v39, %v400_v35  ;;  %v3052_v57 = vsel %vm3043_vm3, %v3050_v32, %v3051_v33  ;;  %v809_v30 = vld [vmem:[#allocation2 + $0x48] sm:$0x3]  ;;  %675 = vst.msk [vmem:[#allocation2 + $0x90] sm:$0xf] %vm670_vm10, %v17280_v0 }
  0x6b   : > { %3852 = vrot.lane.b32.xlu0 %v3672_v27, %s17283_s12  ;;  %v1528_v44 = vor.u32 %v1527_v47, %v1524_v43  ;;  %15374 = vmatprep.mubr.msk.bf16.mxu0 %vm437_vm1, %v418_v49  ;;  %v3190_v58 = vor.u32 %v3189_v41, %v3186_v40  ;;  %v3198_v55 = vor.u32 %v3197_v45, %v3194_v42  ;;  %v3676_v2 = vrot.slane %v3593_v48, 5  ;;  %v1924_v27 = vld [vmem:[#allocation2 + $0x30] sm:$0xf8] }
  0x6c   : > { %v3677_v3 = vrot.slane %v17624_v8, 5  ;;  %v2008_v4 = vsel %vm1999_vm9, %v2006_v50, %v2007_v51  ;;  %v1383_v6 = vrot.slane %v1298_v53, 2  ;;  %v1384_v7 = vrot.slane %v807_v56, 2  ;;  %676 = vst.msk [vmem:[#allocation2 + $0xa0] sm:$0xf] %vm670_vm10, %v17280_v0 }
  0x6d   : > { %2082 = vrot.lane.b32.xlu1 %v1382_v36, %s17281_s29  ;;  %v1529_v59 = vsel %vm1478_vm7, %v1520_v46, %v1528_v44  ;;  %v3201_v1 = vshrl.u32 %v2968_v54, 16  ;;  %v1531_v9 = vshrl.u32 %v1298_v53, 16  ;;  %v1534_v11 = vshll.u32 %v1298_v53, 16  ;;  %677 = vst.msk [vmem:[#allocation2 + $0xb0] sm:$0xf] %vm670_vm10, %v17280_v0 }
  0x6e   : > { %v3204_v12 = vshll.u32 %v2968_v54, 16  ;;  %v3209_v13 = vshrl.u32 %v17652_v61, 16  ;;  %v3212_v14 = vshll.u32 %v17652_v61, 16  ;;  %v1539_v18 = vshrl.u32 %v1455_v63, 16  ;;  %678 = vst.msk [vmem:[#allocation2 + $0xc0] sm:$0xf] %vm670_vm10, %v17280_v0 }
  0x6f   : > { %2182 = vrot.lane.b32.xlu0 %v2002_v31, %s17283_s12  ;;  %v3199_v22 = vsel %vm3148_vm6, %v3190_v58, %v3198_v55  ;;  %v1533_v8 = vrot.slane %v1531_v9, 2  ;;  %v1536_v23 = vrot.slane %v1534_v11, 3  ;;  %v1542_v24 = vshll.u32 %v1455_v63, 16  ;;  %v1299_v31 = vld [vmem:[#allocation2 + $0x40] sm:$0xfc] }
  0x70   : > { %15375 = vmatmul.mubr.msk.bf16.gmra.mrb[24].mxu0 %vm437_vm1, %v419_v52  ;;  %v3053_v16 = vrot.slane %v2968_v54, 4  ;;  %v1541_v29 = vrot.slane %v1539_v18, 2  ;;  %v3054_v32 = vrot.slane %v2477_v5, 4  ;;  %v1385_v33 = vsel %vm1373_vm5, %v1383_v6, %v1384_v7  ;;  %v17682_v55 = vld [vmem:[#allocation2 + $0x48] sm:$0x1f] }
  0x71   : > { %2134 = vrot.lane.b32.xlu1 %v1529_v59, %s17282_s30  ;;  %v1537_v34 = vor.u32 %v1536_v23, %v1533_v8  ;;  %v1544_v35 = vrot.slane %v1542_v24, 3  ;;  %v3203_v36 = vrot.slane %v3201_v1, 4  ;;  %v3206_v37 = vrot.slane %v3204_v12, 5  ;;  %679 = vst.msk [vmem:[#allocation2 + $0xd0] sm:$0xf] %vm670_vm10, %v17280_v0 }
  0x72   : > { %v3211_v19 = vrot.slane %v3209_v13, 4  ;;  %v3214_v38 = vrot.slane %v3212_v14, 5  ;;  %v3678_v39 = vsel %vm3669_vm8, %v3676_v2, %v3677_v3  ;;  %v3679_v41 = vrot.slane %v3594_v20, 5  ;;  %v17686_v3 = vld [vmem:[#allocation2 + $0x48] sm:$0x7] }
  0x73   : > { %3752 = vrot.lane.b32.xlu0 %v3052_v57, %s17281_s29  ;;  %v1545_v40 = vor.u32 %v1544_v35, %v1541_v29  ;;  %v3680_v42 = vrot.slane %v17652_v61, 5  ;;  %v2009_v43 = vrot.slane %v1924_v27, 3  ;;  %v2010_v45 = vrot.slane %v1455_v63, 3  ;;  %v3595_v29 = vld [vmem:[#allocation2 + $0x40] sm:$0xe0] }
  0x74   : > { %v3056_v46 = vrot.slane %v2969_v26, 4  ;;  %v3057_v47 = vrot.slane %v2479_v28, 4  ;;  %v1386_v49 = vrot.slane %v1299_v31, 2  ;;  %v1387_v50 = vrot.slane %v809_v30, 2  ;;  %680 = vst.msk [vmem:[#allocation2 + $0xe0] sm:$0xf] %vm670_vm10, %v17280_v0 }
  0x75   : > { %2186 = vrot.lane.b32.xlu1 %v2008_v4, %s17283_s12  ;;  %v1546_v48 = vsel %vm1478_vm7, %v1537_v34, %v1545_v40  ;;  %v3055_v51 = vsel %vm3043_vm3, %v3053_v16, %v3054_v32  ;;  %v3207_v52 = vor.u32 %v3206_v37, %v3203_v36  ;;  %v3215_v44 = vor.u32 %v3214_v38, %v3211_v19  ;;  %v1925_v32 = vld [vmem:[#allocation2 + $0x40] sm:$0xf8]  ;;  %v403_v38 = vld [vmem:[%s17475_s20 + $0xe8] sm:$0xff] }
  0x76   : > { %v2011_v53 = vsel %vm1999_vm9, %v2009_v43, %v2010_v45  ;;  %v1388_v56 = vsel %vm1373_vm5, %v1386_v49, %v1387_v50  ;;  %v3681_v57 = vsel %vm3669_vm8, %v3679_v41, %v3680_v42  ;;  %v3058_v58 = vsel %vm3043_vm3, %v3056_v46, %v3057_v47  ;;  %681 = vst.msk [vmem:[#allocation2 + $0xf0] sm:$0xf] %vm670_vm10, %v17280_v0  ;;  %v402_v19 = vld [vmem:[%s17475_s20 + $0xe0] sm:$0xff]  ;;  %v404_v42 = vld [vmem:[%s17475_s20 + $0xf0] sm:$0xff]  ;;  %v405_v43 = vld [vmem:[%s17475_s20 + $0xf8] sm:$0xff]  ;;  %s365_s20 = sand.u32 1, %s17267_s14  }
  0x77   : > { %3804 = vrot.lane.b32.xlu0 %v3199_v22, %s17282_s30  ;;  %v3216_v54 = vsel %vm3148_vm6, %v3207_v52, %v3215_v44  ;;  %v3218_v59 = vshrl.u32 %v2969_v26, 16  ;;  %v3221_v61 = vshll.u32 %v2969_v26, 16  ;;  %v3226_v63 = vshrl.u32 %v17682_v55, 16  ;;  %682 = vst.msk [vmem:[#allocation2 + $0x100] sm:$0xf] %vm670_vm10, %v17280_v0  ;;  %s13315_s21 = sshll.u32 %s365_s20, 8 }
  0x78   : > { %v3229_v2 = vshll.u32 %v17682_v55, 16  ;;  %v1548_v4 = vshrl.u32 %v1299_v31, 16  ;;  %v1551_v5 = vshll.u32 %v1299_v31, 16  ;;  %v1556_v6 = vshrl.u32 %v17686_v3, 16  ;;  %683 = vst.msk [vmem:[#allocation2 + $0x110] sm:$0xf] %vm670_vm10, %v17280_v0 }
  0x79   : > { %2084 = vrot.lane.b32.xlu1 %v1385_v33, %s17281_s29  ;;  %v1559_v7 = vshll.u32 %v17686_v3, 16  ;;  %v3220_v1 = vrot.slane %v3218_v59, 4  ;;  %v3223_v9 = vrot.slane %v3221_v61, 5  ;;  %v3228_v11 = vrot.slane %v3226_v63, 4  ;;  %684 = vst.msk [vmem:[#allocation2 + $0x120] sm:$0xf] %vm670_vm10, %v17280_v0 }
  0x7a   : > { %v3231_v12 = vrot.slane %v3229_v2, 5  ;;  %v1550_v13 = vrot.slane %v1548_v4, 2  ;;  %v1553_v14 = vrot.slane %v1551_v5, 3  ;;  %v1558_v18 = vrot.slane %v1556_v6, 2  ;;  %685 = vst.msk [vmem:[#allocation2 + $0x130] sm:$0xf] %vm670_vm10, %v17280_v0 }
  0x7b   : > { %3856 = vrot.lane.b32.xlu0 %v3678_v39, %s17283_s12  ;;  %v1561_v20 = vrot.slane %v1559_v7, 3  ;;  %v2549_v22 = vshrl.u32 %v17497_v17, 16  ;;  %v2552_v8 = vshll.u32 %v17497_v17, 16  ;;  %v3224_v23 = vor.u32 %v3223_v9, %v3220_v1  ;;  %686 = vst.msk [vmem:[#allocation2 + $0x140] sm:$0xf] %vm670_vm10, %v17280_v0  ;;  %v16864_v59 = vld [vmem:[#allocation4 + $0x130] sm:$0xff]  }
  0x7c   : > { %v3232_v24 = vor.u32 %v3231_v12, %v3228_v11  ;;  %v1554_v27 = vor.u32 %v1553_v14, %v1550_v13  ;;  %688 = vst.msk [vmem:[#allocation2 + $0x58] sm:$0xf0] %vm687_vm11, %v17280_v0  ;;  %689 = vst.msk [vmem:[#allocation2 + $0x68] sm:$0xf0] %vm687_vm11, %v17280_v0  ;;  %v3682_v30 = vrot.slane %v3595_v29, 5  ;;  %v3683_v31 = vrot.slane %v17682_v55, 5  ;;  %15382 = vmatprep.subr.bf16.mxu0 %v16864_v59 }
  0x7d   : > { %2136 = vrot.lane.b32.xlu1 %v1546_v48, %s17282_s30  ;;  %v1562_v28 = vor.u32 %v1561_v20, %v1558_v18  ;;  %690 = vst.msk [vmem:[#allocation2 + $0x78] sm:$0xf0] %vm687_vm11, %v17280_v0  ;;  %691 = vst.msk [vmem:[#allocation2 + $0x88] sm:$0xf0] %vm687_vm11, %v17280_v0  ;;  %v2012_v33 = vrot.slane %v1925_v32, 3  ;;  %v2013_v34 = vrot.slane %v17686_v3, 3  ;;  %v420_v41 = vpack.c.bf16 %v403_v38, %v402_v19 }
  0x7e   : > { %v3233_v26 = vsel %vm3148_vm6, %v3224_v23, %v3232_v24  ;;  %692 = vst.msk [vmem:[#allocation2 + $0x98] sm:$0xf0] %vm687_vm11, %v17280_v0  ;;  %693 = vst.msk [vmem:[#allocation2 + $0xa8] sm:$0xf0] %vm687_vm11, %v17280_v0  ;;  %v3684_v35 = vsel %vm3669_vm8, %v3682_v30, %v3683_v31  ;;  %v17771_v37 = vrot.slane %v4271_v21, 6  ;;  %v4217_v39 = vshrl.u32 %v17505_v25, 16  ;;  %15383 = vmatpush3.bf16.msra.mxu0 %v16864_v59 }
  0x7f   : > { %3754 = vrot.lane.b32.xlu0 %v3055_v51, %s17281_s29  ;;  %v1563_v16 = vsel %vm1478_vm7, %v1554_v27, %v1562_v28  ;;  %694 = vst.msk [vmem:[#allocation2 + $0xb8] sm:$0xf0] %vm687_vm11, %v17280_v0  ;;  %695 = vst.msk [vmem:[#allocation2 + $0xc8] sm:$0xf0] %vm687_vm11, %v17280_v0  ;;  %v2014_v36 = vsel %vm1999_vm9, %v2012_v33, %v2013_v34  ;;  %v4220_v40 = vshll.u32 %v17505_v25, 16  ;;  %15378 = vmatprep.mubr.msk.bf16.mxu0 %vm437_vm1, %v420_v41  ;;  %v16865_v28 = vld [vmem:[#allocation4 + $0x138] sm:$0xff]  }
  0x80   : > { %696 = vst.msk [vmem:[#allocation2 + $0xd8] sm:$0xf0] %vm687_vm11, %v17280_v0  ;;  %697 = vst.msk [vmem:[#allocation2 + $0xe8] sm:$0xf0] %vm687_vm11, %v17280_v0  ;;  %v421_v45 = vpack.c.bf16 %v405_v43, %v404_v42  ;;  %v4146_v21 = vld [vmem:[#allocation2 + $0x40] sm:$0xe0]  ;;  %15384 = vmatprep.subr.bf16.mxu0 %v16865_v28 }
  0x81   : > { %2188 = vrot.lane.b32.xlu1 %v2011_v53, %s17283_s12  ;;  %698 = vst.msk [vmem:[#allocation2 + $0xf8] sm:$0xf0] %vm687_vm11, %v17280_v0  ;;  %699 = vst.msk [vmem:[#allocation2 + $0x108] sm:$0xf0] %vm687_vm11, %v17280_v0  ;;  %v4222_v15 = vrot.slane %v4220_v40, 6  ;;  %v4260_v52 = vshrl.u32 %v4146_v21, 16 }
  0x82   : > { %700 = vst.msk [vmem:[#allocation2 + $0x118] sm:$0xf0] %vm687_vm11, %v17280_v0  ;;  %701 = vst.msk [vmem:[#allocation2 + $0x128] sm:$0xf0] %vm687_vm11, %v17280_v0  ;;  %15379 = vmatmul.mubr.msk.bf16.gmra.mrb[28].mxu0 %vm437_vm1, %v421_v45  ;;  %v17108_v46 = vld [vmem:[#allocation2 + $0x28] sm:$0x3f] }
  0x83   : > { %3806 = vrot.lane.b32.xlu0 %v3216_v54, %s17282_s30  ;;  %702 = vst.msk [vmem:[#allocation2 + $0x138] sm:$0xf0] %vm687_vm11, %v17280_v0  ;;  %703 = vst.msk [vmem:[#allocation2 + $0x148] sm:$0xf0] %vm687_vm11, %v17280_v0  ;;  %v17767_v0 = vrot.slane %v4268_v62, 5  ;;  %v4219_v62 = vrot.slane %v4217_v39, 5  ;;  %15385 = vmatpush3.bf16.msra.mxu0 %v16865_v28 }
  0x84   : > { %v4234_v47 = vshrl.u32 %v17108_v46, 16  ;;  %v4237_v48 = vshll.u32 %v17108_v46, 16  ;;  %v17109_v49 = vld [vmem:[#allocation2 + $0x38] sm:$0x3f]  ;;  %v4263_v44 = vshll.u32 %v4146_v21, 16  ;;  %v862_v63 = vshrl.u32 %v17578_v60, 16 }
  0x85   : > { %2086 = vrot.lane.b32.xlu1 %v1388_v56, %s17281_s29  ;;  %v4251_v50 = vshrl.u32 %v17109_v49, 16  ;;  %v4254_v51 = vshll.u32 %v17109_v49, 16  ;;  %v17782_v25 = vld [vmem:[#allocation2 + $0x8] sm:$0xf]  ;;  %v17786_v56 = vld [vmem:[#allocation2 + $0x18] sm:$0x3]  ;;  %v4223_v14 = vor.u32 %v4222_v15, %v4219_v62  ;;  %v4274_v20 = vor.u32 %v17771_v37, %v17767_v0 }
  0x86   : > { %v2532_v53 = vshrl.u32 %v17782_v25, 16  ;;  %v2535_v54 = vshll.u32 %v17782_v25, 16  ;;  %v4140_v61 = vld [vmem:[#allocation2 + $0x10] sm:$0xe0]  ;;  %v4262_v2 = vrot.slane %v4260_v52, 5  ;;  %v4265_v3 = vrot.slane %v4263_v44, 6 }
  0x87   : > { %3858 = vrot.lane.b32.xlu0 %v3681_v57, %s17283_s12  ;;  %v879_v57 = vshrl.u32 %v17786_v56, 16  ;;  %v4209_v5 = vshrl.u32 %v4140_v61, 16  ;;  %v865_v6 = vshll.u32 %v17578_v60, 16  ;;  %v4212_v1 = vshll.u32 %v4140_v61, 16  ;;  %v2472_v11 = vld [vmem:[#allocation2 + $0x10] sm:$0xf8] }
  0x88   : > { %v2566_v9 = vshrl.u32 %v17629_v10, 16  ;;  %v17797_v13 = vrot.slane %v2549_v22, 3  ;;  %v4266_v23 = vor.u32 %v4265_v3, %v4262_v2  ;;  %v2541_v24 = vshrl.u32 %v2472_v11, 16  ;;  %v16866_v38 = vld [vmem:[#allocation4 + $0x140] sm:$0xff]   ;;  %s21801_s26 = scalar_lea.vmem [#allocation7], %s13315_s21  ;;  %s17215_s21 = scalar_lea.vmem %s17214_s11, 8192 }
  0x89   : > { %2138 = vrot.lane.b32.xlu1 %v1563_v16, %s17282_s30  ;;  %v4211_v12 = vrot.slane %v4209_v5, 5  ;;  %v4214_v18 = vrot.slane %v4212_v1, 6  ;;  %v4236_v32 = vrot.slane %v4234_v47, 5  ;;  %v4239_v33 = vrot.slane %v4237_v48, 6  ;;  %v4144_v39 = vld [vmem:[#allocation2 + $0x30] sm:$0xe0]  ;;  %15386 = vmatprep.subr.bf16.mxu0 %v16866_v38 }
  0x8a   : > { %v2544_v37 = vshll.u32 %v2472_v11, 16  ;;  %v4253_v40 = vrot.slane %v4251_v50, 5  ;;  %v4256_v41 = vrot.slane %v4254_v51, 6  ;;  %v4275_v43 = vsel %vm4190_vm12, %v4266_v23, %v4274_v20  ;;  %15387 = vmatpush3.bf16.msra.mxu0 %v16866_v38  ;;  %v2470_v1 = vld [vmem:[#allocation2] sm:$0xf8] }
  0x8b   : > { %3756 = vrot.lane.b32.xlu0 %v3058_v58, %s17281_s29  ;;  %v882_v58 = vshll.u32 %v17786_v56, 16  ;;  %v4215_v27 = vor.u32 %v4214_v18, %v4211_v12  ;;  %v4240_v0 = vor.u32 %v4239_v33, %v4236_v32  ;;  %v4243_v15 = vshrl.u32 %v4144_v39, 16  ;;  %v802_v28 = vld [vmem:[#allocation2 + $0x10] sm:$0xfe] }
  0x8c   : > { %v4246_v21 = vshll.u32 %v4144_v39, 16  ;;  %v4257_v49 = vor.u32 %v4256_v41, %v4253_v40  ;;  %v2554_v59 = vrot.slane %v2552_v8, 4  ;;  %v2543_v61 = vrot.slane %v2541_v24, 3  ;;  %v800_v40 = vld [vmem:[#allocation2] sm:$0xfe] }
  0x8d   : > { %2190 = vrot.lane.b32.xlu1 %v2014_v36, %s17283_s12  ;;  %v4224_v22 = vsel %vm4190_vm12, %v4215_v27, %v4223_v14  ;;  %v4245_v47 = vrot.slane %v4243_v15, 5  ;;  %v2546_v2 = vrot.slane %v2544_v37, 4  ;;  %v2524_v12 = vshrl.u32 %v2470_v1, 16  ;;  %v16871_v37 = vld [vmem:[#allocation4 + $0x158] sm:$0xff]  }
  0x8e   : > { %v4248_v48 = vrot.slane %v4246_v21, 6  ;;  %v2527_v14 = vshll.u32 %v2470_v1, 16  ;;  %v2534_v17 = vrot.slane %v2532_v53, 3  ;;  %v2537_v8 = vrot.slane %v2535_v54, 4  ;;  %v17850_v1 = vld [vmem:[#allocation2 + $0x28] sm:$0x3] }
  0x8f   : > { %3808 = vrot.lane.b32.xlu0 %v3233_v26, %s17282_s30  ;;  %v4142_v26 = vld [vmem:[#allocation2 + $0x20] sm:$0xe0]  ;;  %v2555_v20 = vor.u32 %v2554_v59, %v17797_v13  ;;  %v2526_v23 = vrot.slane %v2524_v12, 3  ;;  %v874_v32 = vshll.u32 %v802_v28, 16  ;;  %v881_v25 = vrot.slane %v879_v57, 1 }
  0x90   : > { %v4226_v30 = vshrl.u32 %v4142_v26, 16  ;;  %v4229_v31 = vshll.u32 %v4142_v26, 16  ;;  %v4249_v44 = vor.u32 %v4248_v48, %v4245_v47  ;;  %v2529_v24 = vrot.slane %v2527_v14, 4  ;;  %v16868_v26 = vld [vmem:[#allocation4 + $0x150] sm:$0xff]   ;;  %v17840_v47 = vld [vmem:[#allocation2 + $0x28] sm:$0xf] }
  0x91   : > { %v884_v53 = vrot.slane %v882_v58, 2  ;;  %v2538_v13 = vor.u32 %v2537_v8, %v2534_v17  ;;  %v864_v38 = vrot.slane %v862_v63, 1  ;;  %v854_v56 = vshrl.u32 %v800_v40, 16  ;;  %v16873_v63 = vld [vmem:[#allocation4 + $0xb8] sm:$0xff]   ;;  %v16877_v14 = vld [vmem:[#allocation4 + $0xc8] sm:$0xff]  }
  0x92   : > { %v4231_v36 = vrot.slane %v4229_v31, 6  ;;  %v871_v31 = vshrl.u32 %v802_v28, 16  ;;  %v857_v57 = vshll.u32 %v800_v40, 16  ;;  %vm852_vm1 = vsmask.f32 6400  ;;  %v16883_v40 = vld [vmem:[#allocation4 + $0xe0] sm:$0xff]  }
  0x93   : > { %3860 = vrot.lane.b32.xlu0 %v3684_v35, %s17283_s12  ;;  %v4228_v35 = vrot.slane %v4226_v30, 5  ;;  %v2547_v30 = vor.u32 %v2546_v2, %v2543_v61  ;;  %v2569_v48 = vshll.u32 %v17840_v47, 16  ;;  %v16876_v61 = vld [vmem:[#allocation4 + $0x108] sm:$0xff]  }
  0x95   : > { %v4232_v45 = vor.u32 %v4231_v36, %v4228_v35  ;;  %v2556_v54 = vsel %vm2522_vm15, %v2547_v30, %v2555_v20  ;;  %v876_v35 = vrot.slane %v874_v32, 2  ;;  %v16870_v36 = vld [vmem:[#allocation4 + $0xb0] sm:$0xff]   ;;  %v17856_v20 = vld [vmem:[#allocation2 + $0x38] sm:$0xf] }
  0x96   : > { %v17866_v30 = vld [vmem:[#allocation2 + $0x38] sm:$0x3]  ;;  %v16879_v32 = vld [vmem:[#allocation4 + $0xd0] sm:$0xff]  }
  0x97   : > { %v4241_v46 = vsel %vm4190_vm12, %v4232_v45, %v4240_v0  ;;  %v859_v45 = vrot.slane %v857_v57, 2 }
  0xb7   : > { %v5268_v55 = vpop.permute.xlu1 %5267 }
  0xb8   : > { %v5377_v52 = vsel %vm647_vm0, %v4275_v43, %v5268_v55  ;;  %v4258_v55 = vsel %vm4190_vm12, %v4249_v44, %v4257_v49  ;;  %v856_v43 = vrot.slane %v854_v56, 1  ;;  %v16875_v44 = vld [vmem:[#allocation4 + $0xc0] sm:$0xff]   ;;  %v16884_v56 = vld [vmem:[#allocation4 + $0x128] sm:$0xff]  }
  0xb9   : > { %v5262_v4 = vpop.permute.xlu0 %5261 }
  0xba   : > { %v5368_v34 = vsel %vm647_vm0, %v4224_v22, %v5262_v4  ;;  %v16867_v4 = vld [vmem:[#allocation4 + $0x148] sm:$0xff]   ;;  %v2530_v22 = vor.u32 %v2529_v24, %v2526_v23  ;;  %v2583_v23 = vshrl.u32 %v17856_v20, 16  ;;  %v16878_v24 = vld [vmem:[#allocation4 + $0x110] sm:$0xff]  }
  0xbb   : > { %v17792_v7 = vpop.permute.xlu1 %3750  ;;  %15388 = vmatprep.subr.bf16.mxu0 %v16867_v4 }
  0xbc   : > { %15389 = vmatpush3.bf16.msra.mxu0 %v16867_v4  ;;  %v3909_v58 = vsel %vm647_vm0, %v2556_v54, %v17792_v7  ;;  %v2539_v41 = vsel %vm2522_vm15, %v2530_v22, %v2538_v13  ;;  %v16874_v7 = vld [vmem:[#allocation4 + $0x100] sm:$0xff]   ;;  %v916_v54 = vshll.u32 %v17866_v30, 16  ;;  %v16881_v22 = vld [vmem:[#allocation4 + $0xd8] sm:$0xff]  }
  0xbd   : > { %v5264_v16 = vpop.permute.xlu0 %5263  ;;  %15390 = vmatprep.subr.bf16.mxu0 %v16868_v26 }
  0xbe   : > { %v5371_v50 = vsel %vm647_vm0, %v4241_v46, %v5264_v16  ;;  %v16869_v16 = vld [vmem:[#allocation4 + $0xf0] sm:$0xff]  }
  0xbf   : > { %v5314_v29 = vpop.permute.xlu1 %5313  ;;  %13782 = vmatprep.subr.bf16.mxu1 %v16869_v16 }
  0xc0   : > { %v5445_v19 = vsel %vm2312_vm13, %v5368_v34, %v5314_v29  ;;  %15391 = vmatpush3.bf16.msra.mxu0 %v16868_v26  ;;  %v873_v34 = vrot.slane %v871_v31, 1  ;;  %13783 = vmatpush3.bf16.msra.mxu1 %v16870_v36  ;;  %v913_v31 = vshrl.u32 %v17866_v30, 16 }
  0xc1   : > { %v5266_v42 = vpop.permute.xlu0 %5265  ;;  %5520 = vst.msk [vmem:[#allocation3 + $0x28] sm:$0xff] %vm2365_vm14, %v5445_v19  ;;  %v16872_v19 = vld [vmem:[#allocation4 + $0xf8] sm:$0xff]   ;;  %15392 = vmatprep.subr.bf16.mxu0 %v16871_v37 }
  0xc2   : > { %v5374_v18 = vsel %vm647_vm0, %v4258_v55, %v5266_v42  ;;  %13784 = vmatprep.subr.bf16.mxu1 %v16872_v19  ;;  %v867_v42 = vrot.slane %v865_v6, 2  ;;  %v885_v6 = vor.u32 %v884_v53, %v881_v25  ;;  %v899_v55 = vshll.u32 %v17850_v1, 16 }
  0xc3   : > { %v5316_v62 = vpop.permute.xlu1 %5315 }
  0xc4   : > { %v5448_v51 = vsel %vm2312_vm13, %v5371_v50, %v5316_v62  ;;  %15393 = vmatpush3.bf16.msra.mxu0 %v16871_v37  ;;  %13785 = vmatpush3.bf16.msra.mxu1 %v16873_v63  ;;  %v868_v50 = vor.u32 %v867_v42, %v864_v38  ;;  %v17878_v38 = vld [vmem:[#allocation2 + $0x48] sm:$0x3]  ;;  %v2568_v42 = vrot.slane %v2566_v9, 3  ;;  %v804_v63 = vld [vmem:[#allocation2 + $0x20] sm:$0xfe] }
  0xc5   : > { %5521 = vst.msk [vmem:[#allocation3 + $0x40] sm:$0xff] %vm2365_vm14, %v5448_v51  ;;  %v17813_v5 = vpop.permute.xlu0 %3748  ;;  %13786 = vmatprep.subr.bf16.mxu1 %v16874_v7  ;;  %v860_v51 = vor.u32 %v859_v45, %v856_v43  ;;  %v933_v57 = vshll.u32 %v17878_v38, 16  ;;  %v2571_v43 = vrot.slane %v2569_v48, 4  ;;  %v891_v7 = vshll.u32 %v804_v63, 16 }
  0xc6   : > { %v3906_v60 = vsel %vm647_vm0, %v2539_v41, %v17813_v5  ;;  %v896_v5 = vshrl.u32 %v17850_v1, 16  ;;  %v2474_v41 = vld [vmem:[#allocation2 + $0x20] sm:$0xf8] }
  0xc7   : > { %v5320_v3 = vpop.permute.xlu1 %5319  ;;  %v869_v12 = vsel %vm852_vm1, %v860_v51, %v868_v50  ;;  %v893_v9 = vrot.slane %v891_v7, 2 }
  0xc8   : > { %v5454_v11 = vsel %vm2312_vm13, %v5377_v52, %v5320_v3  ;;  %v5550_v15 = vld [vmem:[#allocation3 + $0x28] sm:$0xff]  ;;  %v877_v52 = vor.u32 %v876_v35, %v873_v34  ;;  %13787 = vmatpush3.bf16.msra.mxu1 %v16875_v44  ;;  %v16882_v35 = vld [vmem:[#allocation4 + $0x120] sm:$0xff]  }
  0xc9   : > { %5523 = vst.msk [vmem:[#allocation3 + $0x70] sm:$0xff] %vm2365_vm14, %v5454_v11  ;;  %15394 = vmatprep.mubr.msk.bf16.mxu0 %vm2365_vm14, %v5550_v15  ;;  %13788 = vmatprep.subr.bf16.mxu1 %v16876_v61  ;;  %v2558_v15 = vshrl.u32 %v2474_v41, 16 }
  0xca   : > { %v886_v11 = vsel %vm852_vm1, %v877_v52, %v885_v6  ;;  %v901_v6 = vrot.slane %v899_v55, 2 }
  0xcb   : > { %v17824_v27 = vpop.permute.xlu1 %2080  ;;  %v2560_v52 = vrot.slane %v2558_v15, 3  ;;  %v2478_v15 = vld [vmem:[#allocation2 + $0x40] sm:$0xf8] }
  0xcc   : > { %v5318_v29 = vpop.permute.xlu0 %5317  ;;  %v5553_v21 = vld [vmem:[#allocation3 + $0x40] sm:$0xff]  ;;  %13789 = vmatpush3.bf16.msra.mxu1 %v16877_v14  ;;  %v2239_v26 = vsel %vm647_vm0, %v886_v11, %v17824_v27  ;;  %v17872_v27 = vld [vmem:[#allocation2 + $0x48] sm:$0xf] }
  0xcd   : > { %v5451_v33 = vsel %vm2312_vm13, %v5374_v18, %v5318_v29  ;;  %15395 = vmatmul.mubr.msk.bf16.vlgmr.msra.gmra.mrb[32].mxu0 %vm2365_vm14, %v5553_v21  ;;  %13790 = vmatprep.subr.bf16.mxu1 %v16878_v24  ;;  %v2586_v29 = vshll.u32 %v17856_v20, 16  ;;  %v2600_v13 = vshrl.u32 %v17872_v27, 16  ;;  %v2603_v19 = vshll.u32 %v17872_v27, 16  ;;  %v17923_v27 = vld [vmem:[%s21921_s2] ss:$0 sm:$0xff] }
  0xce   : > { %5522 = vst.msk [vmem:[#allocation3 + $0x58] sm:$0xff] %vm2365_vm14, %v5451_v33  ;;  %v16880_v33 = vld [vmem:[#allocation4 + $0x118] sm:$0xff]   ;;  %v2561_v21 = vshll.u32 %v2474_v41, 16 }
  0xcf   : > { %v3803_v0 = vpop.permute.xlu1 %3802 }
  0xd0   : > { %v2079_v39 = vpop.permute.xlu0 %2078  ;;  %v3985_v49 = vsel %vm2312_vm13, %v3909_v58, %v3803_v0  ;;  %v5559_v17 = vld [vmem:[#allocation3 + $0x70] sm:$0xff]  ;;  %13791 = vmatpush3.bf16.msra.mxu1 %v16879_v32  ;;  %v16885_v58 = vld [vmem:[#allocation4 + $0xe8] sm:$0xff]   ;;  %v2563_v50 = vrot.slane %v2561_v21, 4  ;;  %v2602_v21 = vrot.slane %v2600_v13, 3 }
  0xd1   : > { %v2236_v16 = vsel %vm647_vm0, %v869_v12, %v2079_v39  ;;  %13792 = vmatprep.subr.bf16.mxu1 %v16880_v33  ;;  %v930_v39 = vshrl.u32 %v17878_v38, 16 }
  0xd2   : > { %v2564_v44 = vor.u32 %v2563_v50, %v2560_v52  ;;  %v2595_v52 = vshll.u32 %v2478_v15, 16 }
  0xd3   : > { %v2133_v62 = vpop.permute.xlu1 %2132 }
  0xd4   : > { %v2316_v25 = vsel %vm2312_vm13, %v2239_v26, %v2133_v62  ;;  %13793 = vmatpush3.bf16.msra.mxu1 %v16881_v22  ;;  %v915_v22 = vrot.slane %v913_v31, 1 }
  0xd5   : > { %v3801_v46 = vpop.permute.xlu0 %3800  ;;  %v5556_v18 = vld [vmem:[#allocation3 + $0x58] sm:$0xff]  ;;  %13794 = vmatprep.subr.bf16.mxu1 %v16882_v35 }
  0xd6   : > { %v3983_v4 = vsel %vm2312_vm13, %v3906_v60, %v3801_v46  ;;  %15398 = vmatprep.mubr.msk.bf16.mxu0 %vm2365_vm14, %v5556_v18  ;;  %v888_v46 = vshrl.u32 %v804_v63, 16  ;;  %v898_v60 = vrot.slane %v896_v5, 1  ;;  %v2476_v18 = vld [vmem:[#allocation2 + $0x30] sm:$0xf8] }
  0xd7   : > { %v3855_v59 = vpop.permute.xlu1 %3854  ;;  %15399 = vmatmul.mubr.msk.bf16.gmra.mrb[36].mxu0 %vm2365_vm14, %v5559_v17  ;;  %v2585_v17 = vrot.slane %v2583_v23, 3  ;;  %v2578_v32 = vshll.u32 %v2476_v18, 16 }
  0xd8   : > { %v4038_v3 = vsel %vm2365_vm14, %v3985_v49, %v3855_v59  ;;  %13795 = vmatpush3.bf16.msra.mxu1 %v16883_v40  ;;  %v2572_v49 = vor.u32 %v2571_v43, %v2568_v42  ;;  %v890_v10 = vrot.slane %v888_v46, 1  ;;  %v902_v51 = vor.u32 %v901_v6, %v898_v60 }
  0xd9   : > { %v2131_v2 = vpop.permute.xlu0 %2130  ;;  %4113 = vst [vmem:[#allocation3 + $0x20] sm:$0xff] %v4038_v3  ;;  %5897 = vmatprep.mubr.bf16.mxu1 %v4038_v3  ;;  %13796 = vmatprep.subr.bf16.mxu1 %v16884_v56  ;;  %v2580_v23 = vrot.slane %v2578_v32, 4  ;;  %v2605_v46 = vrot.slane %v2603_v19, 4  ;;  %v2592_v6 = vshrl.u32 %v2478_v15, 16  ;;  %v2597_v19 = vrot.slane %v2595_v52, 4 }
  0xda   : > { %v2314_v53 = vsel %vm2312_vm13, %v2236_v16, %v2131_v2  ;;  %v894_v59 = vor.u32 %v893_v9, %v890_v10  ;;  %v2573_v61 = vsel %vm2522_vm15, %v2564_v44, %v2572_v49  ;;  %v2575_v16 = vshrl.u32 %v2476_v18, 16  ;;  %v808_v49 = vld [vmem:[#allocation2 + $0x40] sm:$0xfe] }
  0xdb   : > { %v2185_v34 = vpop.permute.xlu1 %2184  ;;  %v922_v50 = vshrl.u32 %v808_v49, 16  ;;  %v925_v10 = vshll.u32 %v808_v49, 16  ;;  %v2606_v9 = vor.u32 %v2605_v46, %v2602_v21  ;;  %v2594_v13 = vrot.slane %v2592_v6, 3 }
  0xdc   : > { %v2370_v0 = vsel %vm2365_vm14, %v2316_v25, %v2185_v34  ;;  %13797 = vmatpush3.bf16.msra.mxu1 %v16885_v58  ;;  %v903_v2 = vsel %vm852_vm1, %v894_v59, %v902_v51  ;;  %v918_v34 = vrot.slane %v916_v54, 2  ;;  %v2577_v35 = vrot.slane %v2575_v16, 3 }
  0xdd   : > { %v3853_v8 = vpop.permute.xlu0 %3852  ;;  %2445 = vst [vmem:[#allocation3 + $0x18] sm:$0xff] %v2370_v0  ;;  %v932_v51 = vrot.slane %v930_v39, 1  ;;  %v927_v44 = vrot.slane %v925_v10, 2 }
  0xde   : > { %v4035_v28 = vsel %vm2365_vm14, %v3983_v4, %v3853_v8  ;;  %v2588_v8 = vrot.slane %v2586_v29, 4  ;;  %v919_v29 = vor.u32 %v918_v34, %v915_v22  ;;  %v2581_v40 = vor.u32 %v2580_v23, %v2577_v35 }
  0xdf   : > { %4112 = vst [vmem:[#allocation3 + $0x8] sm:$0xff] %v4035_v28  ;;  %v2083_v62 = vpop.permute.xlu1 %2082  ;;  %5898 = vmatmul.mubr.bf16.vlgmr.msra.gmra.mrb[0].mxu1 %v2370_v0  ;;  %v806_v28 = vld [vmem:[#allocation2 + $0x30] sm:$0xfe] }
  0xe0   : > { %v2242_v4 = vsel %vm647_vm0, %v903_v2, %v2083_v62  ;;  %v905_v33 = vshrl.u32 %v806_v28, 16  ;;  %v908_v25 = vshll.u32 %v806_v28, 16 }
  0xe1   : > { %v2183_v36 = vpop.permute.xlu0 %2182 }
  0xe2   : > { %v2367_v37 = vsel %vm2365_vm14, %v2314_v53, %v2183_v36  ;;  %v2589_v53 = vor.u32 %v2588_v8, %v2585_v17  ;;  %v907_v36 = vrot.slane %v905_v33, 1  ;;  %v910_v20 = vrot.slane %v908_v25, 2 }
  0xe3   : > { %2444 = vst [vmem:[#allocation3] sm:$0xff] %v2367_v37  ;;  %v2135_v48 = vpop.permute.xlu1 %2134 }
  0xe4   : > { %v2318_v11 = vsel %vm2312_vm13, %v2242_v4, %v2135_v48  ;;  %v911_v56 = vor.u32 %v910_v20, %v907_v36  ;;  %v2590_v58 = vsel %vm2522_vm15, %v2581_v40, %v2589_v53  ;;  %v924_v48 = vrot.slane %v922_v50, 1 }
  0xe5   : > { %v3753_v45 = vpop.permute.xlu0 %3752  ;;  %v2598_v4 = vor.u32 %v2597_v19, %v2594_v13 }
  0xe6   : > { %v3912_v3 = vsel %vm647_vm0, %v2573_v61, %v3753_v45  ;;  %v920_v41 = vsel %vm852_vm1, %v911_v56, %v919_v29 }
  0xe7   : > { %v2187_v5 = vpop.permute.xlu1 %2186  ;;  %v2607_v38 = vsel %vm2522_vm15, %v2598_v4, %v2606_v9 }
  0xe8   : > { %v2373_v14 = vsel %vm2365_vm14, %v2318_v11, %v2187_v5 }
  0xe9   : > { %v3805_v47 = vpop.permute.xlu0 %3804  ;;  %2446 = vst [vmem:[#allocation3 + $0x30] sm:$0xff] %v2373_v14 }
  0xea   : > { %v3987_v55 = vsel %vm2312_vm13, %v3912_v3, %v3805_v47  ;;  %v935_v47 = vrot.slane %v933_v57, 2 }
  0xeb   : > { %v2085_v26 = vpop.permute.xlu1 %2084 }
  0xec   : > { %v2245_v31 = vsel %vm647_vm0, %v920_v41, %v2085_v26  ;;  %v936_v59 = vor.u32 %v935_v47, %v932_v51 }
  0xed   : > { %v3857_v1 = vpop.permute.xlu0 %3856 }
  0xee   : > { %v4041_v12 = vsel %vm2365_vm14, %v3987_v55, %v3857_v1  ;;  %v928_v1 = vor.u32 %v927_v44, %v924_v48 }
  0xef   : > { %4114 = vst [vmem:[#allocation3 + $0x38] sm:$0xff] %v4041_v12  ;;  %5905 = vmatprep.mubr.bf16.mxu1 %v4041_v12  ;;  %v2137_v37 = vpop.permute.xlu1 %2136 }
  0xf0   : > { %5906 = vmatmul.mubr.bf16.gmra.mrb[4].mxu1 %v2373_v14  ;;  %v2320_v45 = vsel %vm2312_vm13, %v2245_v31, %v2137_v37  ;;  %v937_v57 = vsel %vm852_vm1, %v928_v1, %v936_v59 }
  0xf1   : > { %v3755_v24 = vpop.permute.xlu0 %3754 }
  0xf2   : > { %v3915_v42 = vsel %vm647_vm0, %v2590_v58, %v3755_v24 }
  0xf3   : > { %v2189_v30 = vpop.permute.xlu1 %2188 }
  0xf4   : > { %v2376_v62 = vsel %vm2365_vm14, %v2320_v45, %v2189_v30 }
  0xf5   : > { %v3807_v0 = vpop.permute.xlu0 %3806  ;;  %2447 = vst [vmem:[#allocation3 + $0x48] sm:$0xff] %v2376_v62 }
  0xf6   : > { %v3989_v54 = vsel %vm2312_vm13, %v3915_v42, %v3807_v0 }
  0xf7   : > { %v2087_v60 = vpop.permute.xlu1 %2086 }
  0xf8   : > { %v2248_v18 = vsel %vm647_vm0, %v937_v57, %v2087_v60 }
  0xf9   : > { %v3859_v43 = vpop.permute.xlu0 %3858 }
  0xfa   : > { %v4044_v63 = vsel %vm2365_vm14, %v3989_v54, %v3859_v43 }
  0xfb   : > { %4115 = vst [vmem:[#allocation3 + $0x50] sm:$0xff] %v4044_v63  ;;  %5913 = vmatprep.mubr.bf16.mxu1 %v4044_v63  ;;  %v2139_v2 = vpop.permute.xlu1 %2138 }
  0xfc   : > { %5914 = vmatmul.mubr.bf16.gmra.mrb[8].mxu1 %v2376_v62  ;;  %v2322_v26 = vsel %vm2312_vm13, %v2248_v18, %v2139_v2 }
  0xfd   : > { %v3757_v7 = vpop.permute.xlu0 %3756 }
  0xfe   : > { %v3918_v14 = vsel %vm647_vm0, %v2607_v38, %v3757_v7 }
  0xff   : > { %v2191_v16 = vpop.permute.xlu1 %2190 }
 0x100   : > { %v2379_v25 = vsel %vm2365_vm14, %v2322_v26, %v2191_v16 }
 0x101   : > { %v3809_v61 = vpop.permute.xlu0 %3808  ;;  %2448 = vst [vmem:[#allocation3 + $0x60] sm:$0xff] %v2379_v25 }
 0x102   : > { %v3991_v28 = vsel %vm2312_vm13, %v3918_v14, %v3809_v61 }
 0x105   : > { %v3861_v17 = vpop.permute.xlu0 %3860 }
 0x106   : > { %v4047_v33 = vsel %vm2365_vm14, %v3991_v28, %v3861_v17 }
 0x107   : > { %4116 = vst [vmem:[#allocation3 + $0x68] sm:$0xff] %v4047_v33  ;;  %5921 = vmatprep.mubr.bf16.mxu1 %v4047_v33 }
 0x108   : > { %5922 = vmatmul.mubr.bf16.gmra.mrb[12].mxu1 %v2379_v25 }
 0x113   : > { %v15352_v3 = vpop.f32.mrb[0].mxu0 }
 0x114   : > { %v520_v5 = vpop.f32.mrb[1].mxu0  ;;  %v529_v55 = vadd.f32 %v15352_v3, %v17923_v27 }
 0x115   : > { %v15353_v39 = vpop.f32.mrb[2].mxu0  ;;  %v521_v8 = vadd.f32 %v17923_v27, %v520_v5 }
 0x116   : > { %v532_v11 = vadd.f32 %v15353_v39, %v17923_v27  ;;  %v523_v12 = vpop.f32.mrb[3].mxu0 }
 0x117   : > { %v524_v24 = vadd.f32 %v17923_v27, %v523_v12 }
 0x118   : > { %v705_v32 = vpack.c.bf16 %v532_v11, %v529_v55 }
 0x119   : > { %v704_v53 = vpack.c.bf16 %v524_v24, %v521_v8 }
 0x11a   : > { %v737_v22 = vrot.slane %v705_v32, 4 }
 0x11b   : > { %v736_v34 = vrot.slane %v704_v53, 4  ;;  %v15356_v35 = vpop.f32.mrb[4].mxu0 }
 0x11c   : > { %770 = vst.msk [vmem:[#allocation2 + $0x60] sm:$0xf0] %vm687_vm11, %v737_v22  ;;  %v545_v23 = vadd.f32 %v15356_v35, %v17923_v27  ;;  %v536_v36 = vpop.f32.mrb[5].mxu0 }
 0x11d   : > { %771 = vst.msk [vmem:[#allocation2 + $0x68] sm:$0xf] %vm670_vm10, %v737_v22  ;;  %769 = vst.msk [vmem:[#allocation2 + $0x58] sm:$0xf] %vm670_vm10, %v736_v34  ;;  %v537_v20 = vadd.f32 %v17923_v27, %v536_v36  ;;  %v15357_v29 = vpop.f32.mrb[6].mxu0 }
 0x11e   : > { %768 = vst.msk [vmem:[#allocation2 + $0x50] sm:$0xf0] %vm687_vm11, %v736_v34  ;;  %v548_v0 = vadd.f32 %v15357_v29, %v17923_v27  ;;  %v539_v37 = vpop.f32.mrb[7].mxu0 }
 0x11f   : > { %v540_v40 = vadd.f32 %v17923_v27, %v539_v37 }
 0x120   : > { %v707_v56 = vpack.c.bf16 %v548_v0, %v545_v23 }
 0x121   : > { %v706_v58 = vpack.c.bf16 %v540_v40, %v537_v20 }
 0x122   : > { %v739_v41 = vrot.slane %v707_v56, 4 }
 0x123   : > { %v17947_v31 = vld [vmem:[#allocation2 + $0x60] sm:$0xc0]  ;;  %v738_v6 = vrot.slane %v706_v58, 4  ;;  %v15360_v9 = vpop.f32.mrb[8].mxu0 }
 0x124   : > { %v17945_v42 = vld [vmem:[#allocation2 + $0x68] sm:$0x3f]  ;;  %v4730_v45 = vrot.slane %v17947_v31, 6  ;;  %v17955_v62 = vld [vmem:[#allocation2 + $0x60] sm:$0xf0]  ;;  %v561_v4 = vadd.f32 %v15360_v9, %v17923_v27  ;;  %v552_v57 = vpop.f32.mrb[9].mxu0 }
 0x125   : > { %v17949_v43 = vld [vmem:[#allocation2 + $0x68] sm:$0xf]  ;;  %v4302_v30 = vshrl.u32 %v17945_v42, 16  ;;  %v4305_v54 = vshll.u32 %v17945_v42, 16  ;;  %v4731_v63 = vrot.slane %v17945_v42, 6  ;;  %v3062_v46 = vrot.slane %v17955_v62, 4 }
 0x126   : > { %774 = vst.msk [vmem:[#allocation2 + $0x80] sm:$0xf0] %vm687_vm11, %v739_v41  ;;  %v2634_v15 = vshrl.u32 %v17949_v43, 16  ;;  %v2637_v21 = vshll.u32 %v17949_v43, 16  ;;  %v3063_v7 = vrot.slane %v17949_v43, 4  ;;  %v553_v17 = vadd.f32 %v17923_v27, %v552_v57  ;;  %v15361_v8 = vpop.f32.mrb[10].mxu0 }
 0x127   : > { %775 = vst.msk [vmem:[#allocation2 + $0x88] sm:$0xf] %vm670_vm10, %v739_v41  ;;  %v17963_v49 = vld [vmem:[#allocation2 + $0x68] sm:$0x3]  ;;  %v4732_v60 = vsel %vm4711_vm2, %v4730_v45, %v4731_v63  ;;  %v17968_v10 = vld [vmem:[#allocation2 + $0x60] sm:$0xfc]  ;;  %v564_v25 = vadd.f32 %v15361_v8, %v17923_v27 }
 0x128   : > { %v964_v52 = vshrl.u32 %v17963_v49, 16  ;;  %5271 = vrot.lane.b32.xlu1 %v4732_v60, %s17281_s29  ;;  %v3064_v51 = vsel %vm3043_vm3, %v3062_v46, %v3063_v7  ;;  %v1392_v47 = vrot.slane %v17968_v10, 2  ;;  %v1393_v13 = vrot.slane %v17963_v49, 2  ;;  %v17974_v19 = vld [vmem:[#allocation2 + $0x58] sm:$0x3f]  ;;  %v555_v32 = vpop.f32.mrb[11].mxu0 }
 0x129   : > { %v4638_v48 = vld [vmem:[#allocation2 + $0x50] sm:$0xc0]  ;;  %3760 = vrot.lane.b32.xlu0 %v3064_v51, %s17281_s29  ;;  %772 = vst.msk [vmem:[#allocation2 + $0x70] sm:$0xf0] %vm687_vm11, %v738_v6  ;;  %v4728_v2 = vrot.slane %v17974_v19, 6  ;;  %v556_v53 = vadd.f32 %v17923_v27, %v555_v32  ;;  %v709_v40 = vpack.c.bf16 %v564_v25, %v561_v4  ;;  %v16905_v43 = vld [vmem:[#allocation4 + $0x1a8] sm:$0xff]  }
 0x12a   : > { %773 = vst.msk [vmem:[#allocation2 + $0x78] sm:$0xf] %vm670_vm10, %v738_v6  ;;  %v4727_v61 = vrot.slane %v4638_v48, 6  ;;  %v17982_v3 = vld [vmem:[#allocation2 + $0x58] sm:$0xf]  ;;  %v1394_v55 = vsel %vm1373_vm5, %v1392_v47, %v1393_v13  ;;  %v4903_v7 = vshrl.u32 %v4638_v48, 16 }
 0x12b   : > { %v17987_v39 = vld [vmem:[#allocation2 + $0x50] sm:$0xf0]  ;;  %v3060_v38 = vrot.slane %v17982_v3, 4  ;;  %v17993_v14 = vld [vmem:[#allocation2 + $0x58] sm:$0x3]  ;;  %v15364_v37 = vpop.f32.mrb[12].mxu0  ;;  %v708_v56 = vpack.c.bf16 %v556_v53, %v553_v17 }
 0x12c   : > { %v4729_v11 = vsel %vm4711_vm2, %v4727_v61, %v4728_v2  ;;  %v3059_v12 = vrot.slane %v17987_v39, 4  ;;  %v17995_v18 = vld [vmem:[#allocation2 + $0x50] sm:$0xfc]  ;;  %2090 = vrot.lane.b32.xlu1 %v1394_v55, %s17281_s29  ;;  %v1390_v16 = vrot.slane %v17993_v14, 2  ;;  %v18007_v22 = vld [vmem:[#allocation2 + $0x58] sm:$0x1f]  ;;  %v577_v41 = vadd.f32 %v15364_v37, %v17923_v27 }
 0x12d   : > { %v1389_v26 = vrot.slane %v17995_v18, 2  ;;  %5269 = vrot.lane.b32.xlu0 %v4729_v11, %s17281_s29  ;;  %v3596_v34 = vld [vmem:[#allocation2 + $0x50] sm:$0xe0]  ;;  %v18009_v35 = vld [vmem:[#allocation2 + $0x58] sm:$0x7]  ;;  %v3686_v20 = vrot.slane %v18007_v22, 5 }
 0x12e   : > { %v3061_v33 = vsel %vm3043_vm3, %v3059_v12, %v3060_v38  ;;  %v3685_v36 = vrot.slane %v3596_v34, 5  ;;  %v1926_v29 = vld [vmem:[#allocation2 + $0x50] sm:$0xf8]  ;;  %v2016_v0 = vrot.slane %v18009_v35, 3  ;;  %v4795_v45 = vld [vmem:[#allocation2 + $0x58] sm:$0x7f] }
 0x12f   : > { %v1391_v23 = vsel %vm1373_vm5, %v1389_v26, %v1390_v16  ;;  %v2015_v58 = vrot.slane %v1926_v29, 3  ;;  %v568_v63 = vpop.f32.mrb[13].mxu0  ;;  %v4906_v60 = vshll.u32 %v4638_v48, 16  ;;  %v4911_v6 = vshrl.u32 %v4795_v45, 16  ;;  %v4796_v9 = vld [vmem:[#allocation2 + $0x68] sm:$0x7f] }
 0x130   : > { %2088 = vrot.lane.b32.xlu1 %v1391_v23, %s17281_s29  ;;  %v3687_v46 = vsel %vm3669_vm8, %v3685_v36, %v3686_v20  ;;  %v15365_v51 = vpop.f32.mrb[14].mxu0  ;;  %v741_v47 = vrot.slane %v709_v40, 4  ;;  %v740_v13 = vrot.slane %v708_v56, 4  ;;  %v4914_v2 = vshll.u32 %v4795_v45, 16  ;;  %v16886_v56 = vld [vmem:[#allocation4 + $0x40] sm:$0xff]  }
 0x131   : > { %3758 = vrot.lane.b32.xlu0 %v3061_v33, %s17281_s29  ;;  %v2017_v61 = vsel %vm1999_vm9, %v2015_v58, %v2016_v0  ;;  %v571_v4 = vpop.f32.mrb[15].mxu0  ;;  %v4905_v38 = vrot.slane %v4903_v7, 6  ;;  %v4908_v57 = vrot.slane %v4906_v60, 7  ;;  %v4913_v55 = vrot.slane %v4911_v6, 6  ;;  %13916 = vmatprep.subr.bf16.mxu0 %v16886_v56 }
 0x132   : > { %v4920_v11 = vshrl.u32 %v17947_v31, 16  ;;  %778 = vst.msk [vmem:[#allocation2 + $0xa0] sm:$0xf0] %vm687_vm11, %v741_v47  ;;  %776 = vst.msk [vmem:[#allocation2 + $0x90] sm:$0xf0] %vm687_vm11, %v740_v13  ;;  %v4916_v48 = vrot.slane %v4914_v2, 7  ;;  %v569_v32 = vadd.f32 %v17923_v27, %v568_v63  ;;  %v580_v33 = vadd.f32 %v15365_v51, %v17923_v27 }
 0x133   : > { %779 = vst.msk [vmem:[#allocation2 + $0xa8] sm:$0xf] %vm670_vm10, %v741_v47  ;;  %777 = vst.msk [vmem:[#allocation2 + $0x98] sm:$0xf] %vm670_vm10, %v740_v13  ;;  %v4923_v12 = vshll.u32 %v17947_v31, 16  ;;  %v4928_v17 = vshrl.u32 %v4796_v9, 16  ;;  %v4909_v26 = vor.u32 %v4908_v57, %v4905_v38  ;;  %v572_v29 = vadd.f32 %v17923_v27, %v571_v4 }
 0x134   : > { %v4931_v8 = vshll.u32 %v4796_v9, 16  ;;  %2192 = vrot.lane.b32.xlu1 %v2017_v61, %s17283_s12  ;;  %v4922_v16 = vrot.slane %v4920_v11, 6  ;;  %v15368_v25 = vpop.f32.mrb[16].mxu0  ;;  %v4917_v53 = vor.u32 %v4916_v48, %v4913_v55  ;;  %v711_v31 = vpack.c.bf16 %v580_v33, %v577_v41  ;;  %v18036_v41 = vld [vmem:[#allocation2 + $0x78] sm:$0x3f]  ;;  %v16887_v47 = vld [vmem:[#allocation4] sm:$0xff]  }
 0x135   : > { %3862 = vrot.lane.b32.xlu0 %v3687_v46, %s17283_s12  ;;  %v4925_v34 = vrot.slane %v4923_v12, 7  ;;  %v4930_v23 = vrot.slane %v4928_v17, 6  ;;  %v18029_v20 = vpop.f32.mrb[17].mxu0  ;;  %v3235_v0 = vshrl.u32 %v17987_v39, 16  ;;  %v3238_v37 = vshll.u32 %v17987_v39, 16  ;;  %v16888_v38 = vld [vmem:[#allocation4 + $0x48] sm:$0xff]   ;;  %13917 = vmatpush3.bf16.msra.mxu0 %v16887_v47 }
 0x136   : > { %v4933_v36 = vrot.slane %v4931_v8, 7  ;;  %v15369_v40 = vpop.f32.mrb[18].mxu0  ;;  %v4918_v58 = vsel %vm4816_vm4, %v4909_v26, %v4917_v53  ;;  %v3243_v46 = vshrl.u32 %v18007_v22, 16  ;;  %v743_v60 = vrot.slane %v711_v31, 4  ;;  %v4640_v4 = vld [vmem:[#allocation2 + $0x70] sm:$0xc0]  ;;  %13918 = vmatprep.subr.bf16.mxu0 %v16888_v38 }
 0x137   : > { %v4926_v45 = vor.u32 %v4925_v34, %v4922_v16  ;;  %v587_v7 = vpop.f32.mrb[19].mxu0  ;;  %v710_v6 = vpack.c.bf16 %v572_v29, %v569_v32  ;;  %v3237_v9 = vrot.slane %v3235_v0, 4  ;;  %v3240_v51 = vrot.slane %v3238_v37, 5  ;;  %v18047_v12 = vld [vmem:[#allocation2 + $0x88] sm:$0x3f] }
 0x138   : > { %v4934_v63 = vor.u32 %v4933_v36, %v4930_v23  ;;  %v3245_v13 = vrot.slane %v3243_v46, 4  ;;  %v3246_v61 = vshll.u32 %v18007_v22, 16  ;;  %v1565_v2 = vshrl.u32 %v17995_v18, 16  ;;  %782 = vst.msk [vmem:[#allocation2 + $0xc0] sm:$0xf0] %vm687_vm11, %v743_v60 }
 0x139   : > { %5321 = vrot.lane.b32.xlu0 %v4918_v58, %s17282_s30  ;;  %783 = vst.msk [vmem:[#allocation2 + $0xc8] sm:$0xf] %vm670_vm10, %v743_v60  ;;  %v742_v57 = vrot.slane %v710_v6, 4  ;;  %v3241_v55 = vor.u32 %v3240_v51, %v3237_v9  ;;  %v1568_v11 = vshll.u32 %v17995_v18, 16  ;;  %v1573_v48 = vshrl.u32 %v18009_v35, 16 }
 0x13a   : > { %v4935_v39 = vsel %vm4816_vm4, %v4926_v45, %v4934_v63  ;;  %v3248_v22 = vrot.slane %v3246_v61, 5  ;;  %v1567_v17 = vrot.slane %v1565_v2, 2  ;;  %v1576_v8 = vshll.u32 %v18009_v35, 16  ;;  %v4641_v16 = vld [vmem:[#allocation2 + $0x80] sm:$0xc0]  ;;  %v16889_v61 = vld [vmem:[#allocation4 + $0x8] sm:$0xff]  }
 0x13b   : > { %5323 = vrot.lane.b32.xlu1 %v4935_v39, %s17282_s30  ;;  %v593_v26 = vadd.f32 %v15368_v25, %v17923_v27  ;;  %780 = vst.msk [vmem:[#allocation2 + $0xb0] sm:$0xf0] %vm687_vm11, %v742_v57  ;;  %v1570_v32 = vrot.slane %v1568_v11, 3  ;;  %v1575_v33 = vrot.slane %v1573_v48, 2  ;;  %v15372_v34 = vpop.f32.mrb[20].mxu0  ;;  %v4733_v31 = vrot.slane %v4640_v4, 6  ;;  %13919 = vmatpush3.bf16.msra.mxu0 %v16889_v61 }
 0x13c   : > { %781 = vst.msk [vmem:[#allocation2 + $0xb8] sm:$0xf] %vm670_vm10, %v742_v57  ;;  %v3249_v23 = vor.u32 %v3248_v22, %v3245_v13  ;;  %v1578_v36 = vrot.slane %v1576_v8, 3  ;;  %v4734_v35 = vrot.slane %v18036_v41, 6  ;;  %v18056_v29 = vpop.f32.mrb[21].mxu0  ;;  %v4736_v56 = vrot.slane %v4641_v16, 6 }
 0x13d   : > { %v1571_v25 = vor.u32 %v1570_v32, %v1567_v17  ;;  %v4797_v58 = vld [vmem:[#allocation2 + $0x78] sm:$0x7f]  ;;  %v18060_v45 = vpop.f32.mrb[22].mxu0  ;;  %v4737_v6 = vrot.slane %v18047_v12, 6  ;;  %v585_v51 = vadd.f32 %v17923_v27, %v18029_v20  ;;  %v596_v47 = vadd.f32 %v15369_v40, %v17923_v27  ;;  %v4798_v11 = vld [vmem:[#allocation2 + $0x88] sm:$0x7f] }
 0x13e   : > { %v3250_v63 = vsel %vm3148_vm6, %v3241_v55, %v3249_v23  ;;  %v1579_v46 = vor.u32 %v1578_v36, %v1575_v33  ;;  %v4735_v60 = vsel %vm4711_vm2, %v4733_v31, %v4734_v35  ;;  %v18065_v9 = vpop.f32.mrb[23].mxu0  ;;  %v588_v39 = vadd.f32 %v17923_v27, %v587_v7  ;;  %v18075_v33 = vld [vmem:[#allocation2 + $0x98] sm:$0x3f]  ;;  %v4642_v35 = vld [vmem:[#allocation2 + $0x90] sm:$0xc0] }
 0x13f   : > { %3810 = vrot.lane.b32.xlu0 %v3250_v63, %s17282_s30  ;;  %v4937_v13 = vshrl.u32 %v4640_v4, 16  ;;  %v4738_v38 = vsel %vm4711_vm2, %v4736_v56, %v4737_v6  ;;  %v4940_v57 = vshll.u32 %v4640_v4, 16  ;;  %v4945_v55 = vshrl.u32 %v4797_v58, 16  ;;  %v18204_v0 = vld [vmem:[#allocation2 + $0x88] sm:$0xf] }
 0x140   : > { %v1580_v2 = vsel %vm1478_vm7, %v1571_v25, %v1579_v46  ;;  %v713_v48 = vpack.c.bf16 %v596_v47, %v593_v26  ;;  %v712_v22 = vpack.c.bf16 %v588_v39, %v585_v51  ;;  %v4948_v8 = vshll.u32 %v4797_v58, 16  ;;  %v18078_v46 = vld [vmem:[#allocation2 + $0xa8] sm:$0x3f]  ;;  %v16890_v58 = vld [vmem:[#allocation4 + $0x50] sm:$0xff]   ;;  %v1928_v51 = vld [vmem:[#allocation2 + $0x70] sm:$0xf8] }
 0x141   : > { %2140 = vrot.lane.b32.xlu1 %v1580_v2, %s17282_s30  ;;  %v4939_v17 = vrot.slane %v4937_v13, 6  ;;  %v4942_v20 = vrot.slane %v4940_v57, 7  ;;  %v4947_v40 = vrot.slane %v4945_v55, 6  ;;  %v4954_v32 = vshrl.u32 %v4641_v16, 16  ;;  %v4643_v47 = vld [vmem:[#allocation2 + $0xa0] sm:$0xc0]  ;;  %13920 = vmatprep.subr.bf16.mxu0 %v16890_v58 }
 0x142   : > { %v4957_v7 = vshll.u32 %v4641_v16, 16  ;;  %v745_v23 = vrot.slane %v713_v48, 4  ;;  %v744_v36 = vrot.slane %v712_v22, 4  ;;  %v4950_v4 = vrot.slane %v4948_v8, 7  ;;  %v4799_v22 = vld [vmem:[#allocation2 + $0x98] sm:$0x7f] }
 0x143   : > { %5273 = vrot.lane.b32.xlu0 %v4735_v60, %s17281_s29  ;;  %v4962_v31 = vshrl.u32 %v4798_v11, 16  ;;  %v4943_v25 = vor.u32 %v4942_v20, %v4939_v17  ;;  %v4956_v56 = vrot.slane %v4954_v32, 6  ;;  %v4965_v63 = vshll.u32 %v4798_v11, 16  ;;  %v2973_v53 = vld [vmem:[#allocation2 + $0x80] sm:$0xf0] }
 0x144   : > { %v4959_v26 = vrot.slane %v4957_v7, 7  ;;  %786 = vst.msk [vmem:[#allocation2 + $0xe0] sm:$0xf0] %vm687_vm11, %v745_v23  ;;  %784 = vst.msk [vmem:[#allocation2 + $0xd0] sm:$0xf0] %vm687_vm11, %v744_v36  ;;  %v4951_v16 = vor.u32 %v4950_v4, %v4947_v40  ;;  %v609_v6 = vadd.f32 %v15372_v34, %v17923_v27  ;;  %v4739_v2 = vrot.slane %v4642_v35, 6 }
 0x145   : > { %5275 = vrot.lane.b32.xlu1 %v4738_v38, %s17281_s29  ;;  %787 = vst.msk [vmem:[#allocation2 + $0xe8] sm:$0xf] %vm670_vm10, %v745_v23  ;;  %785 = vst.msk [vmem:[#allocation2 + $0xd8] sm:$0xf] %vm670_vm10, %v744_v36  ;;  %v4964_v60 = vrot.slane %v4962_v31, 6  ;;  %v4967_v13 = vrot.slane %v4965_v63, 7  ;;  %v601_v20 = vadd.f32 %v17923_v27, %v18056_v29  ;;  %v612_v32 = vadd.f32 %v18060_v45, %v17923_v27 }
 0x146   : > { %v4960_v39 = vor.u32 %v4959_v26, %v4956_v56  ;;  %v16891_v38 = vld [vmem:[#allocation4 + $0x10] sm:$0xff]   ;;  %v4952_v57 = vsel %vm4816_vm4, %v4943_v25, %v4951_v16  ;;  %v4740_v55 = vrot.slane %v18075_v33, 6  ;;  %v4742_v17 = vrot.slane %v4643_v47, 6  ;;  %v4800_v56 = vld [vmem:[#allocation2 + $0xa8] sm:$0x7f] }
 0x147   : > { %5325 = vrot.lane.b32.xlu0 %v4952_v57, %s17282_s30  ;;  %v4968_v34 = vor.u32 %v4967_v13, %v4964_v60  ;;  %v4743_v8 = vrot.slane %v18078_v46, 6  ;;  %13921 = vmatpush3.bf16.msra.mxu0 %v16891_v38  ;;  %v604_v7 = vadd.f32 %v17923_v27, %v18065_v9  ;;  %v4971_v23 = vshrl.u32 %v4642_v35, 16  ;;  %v18105_v9 = vld [vmem:[#allocation2 + $0xb8] sm:$0x3f]  ;;  %v4644_v57 = vld [vmem:[#allocation2 + $0xb0] sm:$0xc0] }
 0x148   : > { %v4741_v40 = vsel %vm4711_vm2, %v4739_v2, %v4740_v55  ;;  %v4974_v31 = vshll.u32 %v4642_v35, 16  ;;  %v4979_v25 = vshrl.u32 %v4799_v22, 16  ;;  %v715_v29 = vpack.c.bf16 %v612_v32, %v609_v6  ;;  %v16895_v32 = vld [vmem:[#allocation4 + $0x20] sm:$0xff]   ;;  %v18228_v1 = vld [vmem:[#allocation2 + $0x98] sm:$0x3] }
 0x149   : > { %v4969_v36 = vsel %vm4816_vm4, %v4960_v39, %v4968_v34  ;;  %v4744_v4 = vsel %vm4711_vm2, %v4742_v17, %v4743_v8  ;;  %v714_v26 = vpack.c.bf16 %v604_v7, %v601_v20  ;;  %v4973_v63 = vrot.slane %v4971_v23, 6  ;;  %v18107_v39 = vld [vmem:[#allocation2 + $0xc8] sm:$0x3f]  ;;  %v2974_v24 = vld [vmem:[#allocation2 + $0x90] sm:$0xf0] }
 0x14a   : > { %5327 = vrot.lane.b32.xlu1 %v4969_v36, %s17282_s30  ;;  %v4982_v58 = vshll.u32 %v4799_v22, 16  ;;  %v4976_v45 = vrot.slane %v4974_v31, 7  ;;  %v4981_v16 = vrot.slane %v4979_v25, 6  ;;  %v4988_v60 = vshrl.u32 %v4643_v47, 16  ;;  %v4645_v22 = vld [vmem:[#allocation2 + $0xc0] sm:$0xc0] }
 0x14b   : > { %5277 = vrot.lane.b32.xlu0 %v4741_v40, %s17281_s29  ;;  %v4991_v27 = vshll.u32 %v4643_v47, 16  ;;  %v747_v13 = vrot.slane %v715_v29, 4  ;;  %v746_v35 = vrot.slane %v714_v26, 4  ;;  %v4996_v38 = vshrl.u32 %v4800_v56, 16  ;;  %v16892_v8 = vld [vmem:[#allocation4 + $0x58] sm:$0xff]   ;;  %v16894_v29 = vld [vmem:[#allocation4 + $0x60] sm:$0xff]  }
 0x14c   : > { %v4984_v2 = vrot.slane %v4982_v58, 7  ;;  %v4977_v55 = vor.u32 %v4976_v45, %v4973_v63  ;;  %v4990_v6 = vrot.slane %v4988_v60, 6  ;;  %v4999_v17 = vshll.u32 %v4800_v56, 16  ;;  %13922 = vmatprep.subr.bf16.mxu0 %v16892_v8  ;;  %v16893_v63 = vld [vmem:[#allocation4 + $0x18] sm:$0xff]  }
 0x14d   : > { %v4993_v34 = vrot.slane %v4991_v27, 7  ;;  %790 = vst.msk [vmem:[#allocation2 + $0x100] sm:$0xf0] %vm687_vm11, %v747_v13  ;;  %788 = vst.msk [vmem:[#allocation2 + $0xf0] sm:$0xf0] %vm687_vm11, %v746_v35  ;;  %v4998_v20 = vrot.slane %v4996_v38, 6  ;;  %13923 = vmatpush3.bf16.msra.mxu0 %v16893_v63 }
 0x14e   : > { %5279 = vrot.lane.b32.xlu1 %v4744_v4, %s17281_s29  ;;  %791 = vst.msk [vmem:[#allocation2 + $0x108] sm:$0xf] %vm670_vm10, %v747_v13  ;;  %789 = vst.msk [vmem:[#allocation2 + $0xf8] sm:$0xf] %vm670_vm10, %v746_v35  ;;  %v4985_v47 = vor.u32 %v4984_v2, %v4981_v16  ;;  %v5001_v23 = vrot.slane %v4999_v17, 7  ;;  %v4745_v36 = vrot.slane %v4644_v57, 6  ;;  %13924 = vmatprep.subr.bf16.mxu0 %v16894_v29 }
 0x14f   : > { %v4994_v7 = vor.u32 %v4993_v34, %v4990_v6  ;;  %v4746_v31 = vrot.slane %v18105_v9, 6  ;;  %v4801_v4 = vld [vmem:[#allocation2 + $0xb8] sm:$0x7f]  ;;  %v4748_v26 = vrot.slane %v4645_v22, 6  ;;  %v4749_v16 = vrot.slane %v18107_v39, 6 }
 0x150   : > { %v4986_v25 = vsel %vm4816_vm4, %v4977_v55, %v4985_v47  ;;  %v5002_v58 = vor.u32 %v5001_v23, %v4998_v20  ;;  %v5005_v60 = vshrl.u32 %v4644_v57, 16  ;;  %v4802_v27 = vld [vmem:[#allocation2 + $0xc8] sm:$0x7f]  ;;  %v5008_v13 = vshll.u32 %v4644_v57, 16  ;;  %v18123_v55 = vld [vmem:[#allocation2 + $0xd8] sm:$0x3f] }
 0x151   : > { %5329 = vrot.lane.b32.xlu0 %v4986_v25, %s17282_s30  ;;  %v4747_v45 = vsel %vm4711_vm2, %v4745_v36, %v4746_v31  ;;  %v5013_v35 = vshrl.u32 %v4801_v4, 16  ;;  %v5016_v2 = vshll.u32 %v4801_v4, 16  ;;  %v5022_v38 = vshrl.u32 %v4645_v22, 16  ;;  %v4646_v47 = vld [vmem:[#allocation2 + $0xd0] sm:$0xc0]  ;;  %13925 = vmatpush3.bf16.msra.mxu0 %v16895_v32 }
 0x152   : > { %v5003_v6 = vsel %vm4816_vm4, %v4994_v7, %v5002_v58  ;;  %v4750_v34 = vsel %vm4711_vm2, %v4748_v26, %v4749_v16  ;;  %v5007_v17 = vrot.slane %v5005_v60, 6  ;;  %v5025_v8 = vshll.u32 %v4645_v22, 16  ;;  %v18128_v57 = vld [vmem:[#allocation2 + $0xe8] sm:$0x3f]  ;;  %v4647_v58 = vld [vmem:[#allocation2 + $0xe0] sm:$0xc0] }
 0x153   : > { %5331 = vrot.lane.b32.xlu1 %v5003_v6, %s17282_s30  ;;  %v5010_v20 = vrot.slane %v5008_v13, 7  ;;  %v5015_v23 = vrot.slane %v5013_v35, 6  ;;  %v5018_v36 = vrot.slane %v5016_v2, 7  ;;  %v5024_v31 = vrot.slane %v5022_v38, 6  ;;  %v4803_v38 = vld [vmem:[#allocation2 + $0xd8] sm:$0x7f] }
 0x154   : > { %v5027_v4 = vrot.slane %v5025_v8, 7  ;;  %v5030_v25 = vshrl.u32 %v4802_v27, 16  ;;  %v5033_v63 = vshll.u32 %v4802_v27, 16  ;;  %v4751_v60 = vrot.slane %v4646_v47, 6  ;;  %v18248_v59 = vld [vmem:[#allocation2 + $0xa8] sm:$0xf] }
 0x155   : > { %5281 = vrot.lane.b32.xlu0 %v4747_v45, %s17281_s29  ;;  %v5011_v26 = vor.u32 %v5010_v20, %v5007_v17  ;;  %v5019_v16 = vor.u32 %v5018_v36, %v5015_v23  ;;  %v4752_v2 = vrot.slane %v18123_v55, 6  ;;  %v4754_v17 = vrot.slane %v4647_v58, 6  ;;  %v18146_v29 = vld [vmem:[#allocation2 + $0x108] sm:$0x3f] }
 0x156   : > { %v5028_v6 = vor.u32 %v5027_v4, %v5024_v31  ;;  %v5032_v13 = vrot.slane %v5030_v25, 6  ;;  %v5035_v35 = vrot.slane %v5033_v63, 7  ;;  %v4755_v36 = vrot.slane %v18128_v57, 6  ;;  %v4804_v4 = vld [vmem:[#allocation2 + $0xe8] sm:$0x7f] }
 0x157   : > { %5283 = vrot.lane.b32.xlu1 %v4750_v34, %s17281_s29  ;;  %v5020_v45 = vsel %vm4816_vm4, %v5011_v26, %v5019_v16  ;;  %v4753_v23 = vsel %vm4711_vm2, %v4751_v60, %v4752_v2  ;;  %v5039_v31 = vshrl.u32 %v4646_v47, 16  ;;  %v5042_v25 = vshll.u32 %v4646_v47, 16  ;;  %v18141_v26 = vld [vmem:[#allocation2 + $0xf8] sm:$0x3f]  ;;  %v18250_v44 = vld [vmem:[#allocation2 + $0xa8] sm:$0x3] }
 0x158   : > { %v5036_v20 = vor.u32 %v5035_v35, %v5032_v13  ;;  %v5047_v63 = vshrl.u32 %v4803_v38, 16  ;;  %v5050_v34 = vshll.u32 %v4803_v38, 16  ;;  %v5056_v22 = vshrl.u32 %v4647_v58, 16  ;;  %v4648_v13 = vld [vmem:[#allocation2 + $0xf0] sm:$0xc0]  ;;  %21968 = vst [vmem:[#allocation10_spill] sm:$0xff] %v18250_v44 }
 0x159   : > { %5333 = vrot.lane.b32.xlu0 %v5020_v45, %s17282_s30  ;;  %v4756_v8 = vsel %vm4711_vm2, %v4754_v17, %v4755_v36  ;;  %v5041_v27 = vrot.slane %v5039_v31, 6  ;;  %v5059_v45 = vshll.u32 %v4647_v58, 16  ;;  %v5044_v60 = vrot.slane %v5042_v25, 7  ;;  %v4806_v58 = vld [vmem:[#allocation2 + $0x108] sm:$0x7f] }
 0x15a   : > { %v5037_v16 = vsel %vm4816_vm4, %v5028_v6, %v5036_v20  ;;  %v5049_v35 = vrot.slane %v5047_v63, 6  ;;  %v5052_v2 = vrot.slane %v5050_v34, 7  ;;  %v5058_v7 = vrot.slane %v5056_v22, 6  ;;  %v4649_v20 = vld [vmem:[#allocation2 + $0x100] sm:$0xc0] }
 0x15b   : > { %5335 = vrot.lane.b32.xlu1 %v5037_v16, %s17282_s30  ;;  %v5061_v47 = vrot.slane %v5059_v45, 7  ;;  %v5064_v38 = vshrl.u32 %v4804_v4, 16  ;;  %v5067_v56 = vshll.u32 %v4804_v4, 16  ;;  %v5045_v17 = vor.u32 %v5044_v60, %v5041_v27  ;;  %v4805_v34 = vld [vmem:[#allocation2 + $0xf8] sm:$0x7f] }
 0x15c   : > { %v5053_v36 = vor.u32 %v5052_v2, %v5049_v35  ;;  %v4757_v31 = vrot.slane %v4648_v13, 6  ;;  %v4758_v22 = vrot.slane %v18141_v26, 6  ;;  %v4760_v27 = vrot.slane %v4649_v20, 6  ;;  %v16896_v60 = vld [vmem:[#allocation4 + $0x68] sm:$0xff]  }
 0x15d   : > { %5285 = vrot.lane.b32.xlu0 %v4753_v23, %s17281_s29  ;;  %v5062_v16 = vor.u32 %v5061_v47, %v5058_v7  ;;  %v5066_v25 = vrot.slane %v5064_v38, 6  ;;  %v5069_v63 = vrot.slane %v5067_v56, 7  ;;  %v4761_v56 = vrot.slane %v18146_v29, 6  ;;  %13926 = vmatprep.subr.bf16.mxu0 %v16896_v60 }
 0x15e   : > { %v5054_v23 = vsel %vm4816_vm4, %v5045_v17, %v5053_v36  ;;  %v4759_v7 = vsel %vm4711_vm2, %v4757_v31, %v4758_v22  ;;  %v5073_v2 = vshrl.u32 %v4648_v13, 16  ;;  %v5076_v47 = vshll.u32 %v4648_v13, 16 }
 0x15f   : > { %5287 = vrot.lane.b32.xlu1 %v4756_v8, %s17281_s29  ;;  %v5070_v35 = vor.u32 %v5069_v63, %v5066_v25  ;;  %v5081_v38 = vshrl.u32 %v4805_v34, 16  ;;  %v5084_v8 = vshll.u32 %v4805_v34, 16  ;;  %v5090_v17 = vshrl.u32 %v4649_v20, 16 }
 0x160   : > { %v4762_v45 = vsel %vm4711_vm2, %v4760_v27, %v4761_v56  ;;  %v5075_v4 = vrot.slane %v5073_v2, 6  ;;  %v5093_v6 = vshll.u32 %v4649_v20, 16  ;;  %v5078_v31 = vrot.slane %v5076_v47, 7  ;;  %v1458_v56 = vld [vmem:[#allocation2 + $0x68] sm:$0x7] }
 0x161   : > { %5337 = vrot.lane.b32.xlu0 %v5054_v23, %s17282_s30  ;;  %v5071_v36 = vsel %vm4816_vm4, %v5062_v16, %v5070_v35  ;;  %v18161_v23 = vld [vmem:[#allocation2 + $0x68] sm:$0x1f]  ;;  %v5083_v25 = vrot.slane %v5081_v38, 6  ;;  %v5086_v63 = vrot.slane %v5084_v8, 7  ;;  %v5092_v32 = vrot.slane %v5090_v17, 6  ;;  %v16897_v17 = vld [vmem:[#allocation4 + $0x28] sm:$0xff]  }
 0x162   : > { %v5095_v13 = vrot.slane %v5093_v6, 7  ;;  %v5098_v22 = vshrl.u32 %v4806_v58, 16  ;;  %v5101_v34 = vshll.u32 %v4806_v58, 16  ;;  %v3252_v60 = vshrl.u32 %v17955_v62, 16  ;;  %v3597_v8 = vld [vmem:[#allocation2 + $0x60] sm:$0xe0]  ;;  %13927 = vmatpush3.bf16.msra.mxu0 %v16897_v17 }
 0x163   : > { %5339 = vrot.lane.b32.xlu1 %v5071_v36, %s17282_s30  ;;  %v5079_v16 = vor.u32 %v5078_v31, %v5075_v4  ;;  %v5087_v35 = vor.u32 %v5086_v63, %v5083_v25  ;;  %v3255_v27 = vshll.u32 %v17955_v62, 16  ;;  %v3260_v20 = vshrl.u32 %v18161_v23, 16 }
 0x164   : > { %v5096_v2 = vor.u32 %v5095_v13, %v5092_v32  ;;  %v5100_v36 = vrot.slane %v5098_v22, 6  ;;  %v5103_v47 = vrot.slane %v5101_v34, 7  ;;  %v3254_v38 = vrot.slane %v3252_v60, 4  ;;  %v1927_v32 = vld [vmem:[#allocation2 + $0x60] sm:$0xf8]  ;;  %v18174_v13 = vpop.f32.mrb[24].mxu0 }
 0x165   : > { %5289 = vrot.lane.b32.xlu0 %v4759_v7, %s17281_s29  ;;  %v5088_v6 = vsel %vm4816_vm4, %v5079_v16, %v5087_v35  ;;  %v3257_v58 = vrot.slane %v3255_v27, 5  ;;  %v3262_v7 = vrot.slane %v3260_v20, 4  ;;  %v3263_v4 = vshll.u32 %v18161_v23, 16  ;;  %v18176_v16 = vld [vmem:[#allocation2 + $0x78] sm:$0xf]  ;;  %v18178_v35 = vpop.f32.mrb[25].mxu0 }
 0x166   : > { %v5104_v62 = vor.u32 %v5103_v47, %v5100_v36  ;;  %v1582_v31 = vshrl.u32 %v17968_v10, 16  ;;  %v1585_v25 = vshll.u32 %v17968_v10, 16  ;;  %v1590_v63 = vshrl.u32 %v1458_v56, 16  ;;  %v16898_v10 = vld [vmem:[#allocation4 + $0x70] sm:$0xff]  }
 0x167   : > { %5291 = vrot.lane.b32.xlu1 %v4762_v45, %s17281_s29  ;;  %v3258_v22 = vor.u32 %v3257_v58, %v3254_v38  ;;  %v3265_v45 = vrot.slane %v3263_v4, 5  ;;  %v1593_v34 = vshll.u32 %v1458_v56, 16  ;;  %v3688_v60 = vrot.slane %v3597_v8, 5  ;;  %v18183_v4 = vld [vmem:[#allocation2 + $0x78] sm:$0x3]  ;;  %13928 = vmatprep.subr.bf16.mxu0 %v16898_v10 }
 0x168   : > { %v5105_v27 = vsel %vm4816_vm4, %v5096_v2, %v5104_v62  ;;  %v1584_v20 = vrot.slane %v1582_v31, 2  ;;  %v1587_v36 = vrot.slane %v1585_v25, 3  ;;  %v1592_v47 = vrot.slane %v1590_v63, 2  ;;  %v1302_v62 = vld [vmem:[#allocation2 + $0x70] sm:$0xfc] }
 0x169   : > { %5341 = vrot.lane.b32.xlu0 %v5088_v6, %s17282_s30  ;;  %v2972_v6 = vld [vmem:[#allocation2 + $0x70] sm:$0xf0]  ;;  %v3266_v17 = vor.u32 %v3265_v45, %v3262_v7  ;;  %v1595_v40 = vrot.slane %v1593_v34, 3  ;;  %v3689_v38 = vrot.slane %v18161_v23, 5  ;;  %v2018_v58 = vrot.slane %v1927_v32, 3 }
 0x16a   : > { %v1588_v8 = vor.u32 %v1587_v36, %v1584_v20  ;;  %v2019_v48 = vrot.slane %v1458_v56, 3  ;;  %v3065_v7 = vrot.slane %v2972_v6, 4  ;;  %v3129_v45 = vld [vmem:[#allocation2 + $0x78] sm:$0x1f]  ;;  %v3066_v32 = vrot.slane %v18176_v16, 4 }
 0x16b   : > { %5343 = vrot.lane.b32.xlu1 %v5105_v27, %s17282_s30  ;;  %v3267_v31 = vsel %vm3148_vm6, %v3258_v22, %v3266_v17  ;;  %v1596_v25 = vor.u32 %v1595_v40, %v1592_v47  ;;  %v3690_v63 = vsel %vm3669_vm8, %v3688_v60, %v3689_v38  ;;  %v1395_v20 = vrot.slane %v1302_v62, 2  ;;  %v1459_v36 = vld [vmem:[#allocation2 + $0x78] sm:$0x7]  ;;  %v18196_v60 = vpop.f32.mrb[26].mxu0  ;;  %v3598_v38 = vld [vmem:[#allocation2 + $0x70] sm:$0xe0] }
 0x16c   : > { %v2020_v23 = vsel %vm1999_vm9, %v2018_v58, %v2019_v48  ;;  %v1396_v22 = vrot.slane %v18183_v4, 2  ;;  %v3269_v40 = vshrl.u32 %v2972_v6, 16  ;;  %v3067_v47 = vsel %vm3043_vm3, %v3065_v7, %v3066_v32  ;;  %v16899_v58 = vld [vmem:[#allocation4 + $0x30] sm:$0xff]   ;;  %v18201_v56 = vpop.f32.mrb[27].mxu0 }
 0x16d   : > { %3812 = vrot.lane.b32.xlu0 %v3267_v31, %s17282_s30  ;;  %v1597_v27 = vsel %vm1478_vm7, %v1588_v8, %v1596_v25  ;;  %v3272_v48 = vshll.u32 %v2972_v6, 16  ;;  %v3277_v10 = vshrl.u32 %v3129_v45, 16  ;;  %v3280_v17 = vshll.u32 %v3129_v45, 16  ;;  %13929 = vmatpush3.bf16.msra.mxu0 %v16899_v58  ;;  %v1303_v58 = vld [vmem:[#allocation2 + $0x80] sm:$0xfc] }
 0x16e   : > { %v1397_v31 = vsel %vm1373_vm5, %v1395_v20, %v1396_v22  ;;  %v3271_v34 = vrot.slane %v3269_v40, 4  ;;  %v1599_v8 = vshrl.u32 %v1302_v62, 16  ;;  %v1602_v25 = vshll.u32 %v1302_v62, 16 }
 0x16f   : > { %2142 = vrot.lane.b32.xlu1 %v1597_v27, %s17282_s30  ;;  %v3274_v2 = vrot.slane %v3272_v48, 5  ;;  %v3279_v11 = vrot.slane %v3277_v10, 4  ;;  %v3282_v61 = vrot.slane %v3280_v17, 5  ;;  %v1607_v27 = vshrl.u32 %v1459_v36, 16 }
 0x170   : > { %v1601_v6 = vrot.slane %v1599_v8, 2  ;;  %v1604_v7 = vrot.slane %v1602_v25, 3  ;;  %v1610_v32 = vshll.u32 %v1459_v36, 16  ;;  %v3691_v37 = vrot.slane %v3598_v38, 5  ;;  %v16900_v8 = vld [vmem:[#allocation4 + $0x78] sm:$0xff]  }
 0x171   : > { %3864 = vrot.lane.b32.xlu0 %v3690_v63, %s17283_s12  ;;  %v3275_v20 = vor.u32 %v3274_v2, %v3271_v34  ;;  %v3283_v62 = vor.u32 %v3282_v61, %v3279_v11  ;;  %v1609_v22 = vrot.slane %v1607_v27, 2  ;;  %v3692_v40 = vrot.slane %v3129_v45, 5  ;;  %v18207_v63 = vld [vmem:[#allocation2 + $0x88] sm:$0x3]  ;;  %13930 = vmatprep.subr.bf16.mxu0 %v16900_v8  ;;  %v1929_v2 = vld [vmem:[#allocation2 + $0x80] sm:$0xf8] }
 0x172   : > { %v1605_v48 = vor.u32 %v1604_v7, %v1601_v6  ;;  %v1612_v10 = vrot.slane %v1610_v32, 3  ;;  %v2021_v17 = vrot.slane %v1928_v51, 3  ;;  %v2022_v18 = vrot.slane %v1459_v36, 3  ;;  %v3130_v51 = vld [vmem:[#allocation2 + $0x88] sm:$0x1f] }
 0x173   : > { %2194 = vrot.lane.b32.xlu1 %v2020_v23, %s17283_s12  ;;  %v3284_v38 = vsel %vm3148_vm6, %v3275_v20, %v3283_v62  ;;  %v3693_v25 = vsel %vm3669_vm8, %v3691_v37, %v3692_v40  ;;  %v3068_v23 = vrot.slane %v2973_v53, 4  ;;  %v3069_v34 = vrot.slane %v18204_v0, 4  ;;  %v1460_v6 = vld [vmem:[#allocation2 + $0x88] sm:$0x7] }
 0x174   : > { %v1613_v11 = vor.u32 %v1612_v10, %v1609_v22  ;;  %v2023_v45 = vsel %vm1999_vm9, %v2021_v17, %v2022_v18  ;;  %v1398_v27 = vrot.slane %v1303_v58, 2  ;;  %v1399_v37 = vrot.slane %v18207_v63, 2  ;;  %v3599_v10 = vld [vmem:[#allocation2 + $0x80] sm:$0xe0]  ;;  %v16901_v17 = vld [vmem:[#allocation4 + $0x38] sm:$0xff]  }
 0x175   : > { %3762 = vrot.lane.b32.xlu0 %v3067_v47, %s17281_s29  ;;  %v3070_v32 = vsel %vm3043_vm3, %v3068_v23, %v3069_v34  ;;  %v3286_v18 = vshrl.u32 %v2973_v53, 16  ;;  %v3289_v20 = vshll.u32 %v2973_v53, 16  ;;  %v3294_v22 = vshrl.u32 %v3130_v51, 16  ;;  %v18225_v34 = vld [vmem:[#allocation2 + $0x98] sm:$0xf]  ;;  %13931 = vmatpush3.bf16.msra.mxu0 %v16901_v17 }
 0x176   : > { %v1614_v7 = vsel %vm1478_vm7, %v1605_v48, %v1613_v11  ;;  %v1400_v62 = vsel %vm1373_vm5, %v1398_v27, %v1399_v37  ;;  %v1616_v40 = vshrl.u32 %v1303_v58, 16  ;;  %v1619_v36 = vshll.u32 %v1303_v58, 16  ;;  %v1930_v17 = vld [vmem:[#allocation2 + $0x90] sm:$0xf8] }
 0x177   : > { %2092 = vrot.lane.b32.xlu1 %v1397_v31, %s17281_s29  ;;  %v3297_v31 = vshll.u32 %v3130_v51, 16  ;;  %v3288_v8 = vrot.slane %v3286_v18, 4  ;;  %v3291_v47 = vrot.slane %v3289_v20, 5  ;;  %v1624_v61 = vshrl.u32 %v1460_v6, 16 }
 0x178   : > { %v3296_v48 = vrot.slane %v3294_v22, 4  ;;  %v1618_v23 = vrot.slane %v1616_v40, 2  ;;  %v1627_v53 = vshll.u32 %v1460_v6, 16  ;;  %v1621_v27 = vrot.slane %v1619_v36, 3  ;;  %v16903_v36 = vld [vmem:[#allocation4 + $0x1a0] sm:$0xff]  }
 0x179   : > { %3814 = vrot.lane.b32.xlu0 %v3284_v38, %s17282_s30  ;;  %v3299_v11 = vrot.slane %v3297_v31, 5  ;;  %v3292_v38 = vor.u32 %v3291_v47, %v3288_v8  ;;  %v1626_v37 = vrot.slane %v1624_v61, 2  ;;  %v3694_v28 = vrot.slane %v3599_v10, 5  ;;  %v1304_v47 = vld [vmem:[#allocation2 + $0x90] sm:$0xfc]  ;;  %14050 = vmatprep.subr.bf16.mxu1 %v16903_v36 }
 0x17a   : > { %v1629_v58 = vrot.slane %v1627_v53, 3  ;;  %v3695_v20 = vrot.slane %v3130_v51, 5  ;;  %v2024_v5 = vrot.slane %v1929_v2, 3  ;;  %v1622_v22 = vor.u32 %v1621_v27, %v1618_v23  ;;  %v3131_v2 = vld [vmem:[#allocation2 + $0x98] sm:$0x1f] }
 0x17b   : > { %2144 = vrot.lane.b32.xlu1 %v1614_v7, %s17282_s30  ;;  %v3300_v18 = vor.u32 %v3299_v11, %v3296_v48  ;;  %v16902_v7 = vld [vmem:[#allocation4 + $0x80] sm:$0xff]   ;;  %v2025_v31 = vrot.slane %v1460_v6, 3  ;;  %v3071_v51 = vrot.slane %v2974_v24, 4  ;;  %v3072_v6 = vrot.slane %v18225_v34, 4 }
 0x17c   : > { %v3696_v10 = vsel %vm3669_vm8, %v3694_v28, %v3695_v20  ;;  %15426 = vmatprep.subr.bf16.mxu0 %v16902_v7  ;;  %v1401_v23 = vrot.slane %v1304_v47, 2  ;;  %v1402_v53 = vrot.slane %v18228_v1, 2  ;;  %v3303_v28 = vshrl.u32 %v2974_v24, 16 }
 0x17d   : > { %3866 = vrot.lane.b32.xlu0 %v3693_v25, %s17283_s12  ;;  %v3301_v61 = vsel %vm3148_vm6, %v3292_v38, %v3300_v18  ;;  %v1630_v25 = vor.u32 %v1629_v58, %v1626_v37  ;;  %v2026_v8 = vsel %vm1999_vm9, %v2024_v5, %v2025_v31  ;;  %v1461_v38 = vld [vmem:[#allocation2 + $0x98] sm:$0x7]  ;;  %v3073_v27 = vsel %vm3043_vm3, %v3071_v51, %v3072_v6  ;;  %v3600_v58 = vld [vmem:[#allocation2 + $0x90] sm:$0xe0] }
 0x17e   : > { %v3306_v37 = vshll.u32 %v2974_v24, 16  ;;  %v3311_v5 = vshrl.u32 %v3131_v2, 16  ;;  %v3314_v18 = vshll.u32 %v3131_v2, 16  ;;  %v18245_v20 = vsel %vm1373_vm5, %v1401_v23, %v1402_v53 }
 0x17f   : > { %2196 = vrot.lane.b32.xlu1 %v2023_v45, %s17283_s12  ;;  %v1631_v45 = vsel %vm1478_vm7, %v1622_v22, %v1630_v25  ;;  %v3305_v7 = vrot.slane %v3303_v28, 4  ;;  %v1636_v31 = vshll.u32 %v1304_v47, 16  ;;  %v16904_v22 = vld [vmem:[#allocation4 + $0x160] sm:$0xff]   ;;  %v1641_v48 = vshrl.u32 %v1461_v38, 16 }
 0x180   : > { %v3308_v36 = vrot.slane %v3306_v37, 5  ;;  %v3313_v25 = vrot.slane %v3311_v5, 4  ;;  %v3316_v11 = vrot.slane %v3314_v18, 5  ;;  %v1644_v6 = vshll.u32 %v1461_v38, 16  ;;  %14051 = vmatpush3.bf16.msra.mxu1 %v16904_v22 }
 0x181   : > { %3764 = vrot.lane.b32.xlu0 %v3070_v32, %s17281_s29  ;;  %v1633_v32 = vshrl.u32 %v1304_v47, 16  ;;  %v1638_v51 = vrot.slane %v1636_v31, 3  ;;  %v3697_v40 = vrot.slane %v3600_v58, 5  ;;  %v1643_v53 = vrot.slane %v1641_v48, 2  ;;  %v2975_v47 = vld [vmem:[#allocation2 + $0xa0] sm:$0xf0]  ;;  %14052 = vmatprep.subr.bf16.mxu1 %v16905_v43 }
 0x182   : > { %v3317_v23 = vor.u32 %v3316_v11, %v3313_v25  ;;  %v3698_v28 = vrot.slane %v3131_v2, 5  ;;  %v1646_v5 = vrot.slane %v1644_v6, 3  ;;  %v2027_v18 = vrot.slane %v1930_v17, 3 }
 0x183   : > { %2094 = vrot.lane.b32.xlu1 %v1400_v62, %s17281_s29  ;;  %v1635_v24 = vrot.slane %v1633_v32, 2  ;;  %v3309_v62 = vor.u32 %v3308_v36, %v3305_v7  ;;  %v1305_v32 = vld [vmem:[#allocation2 + $0xa0] sm:$0xfc]  ;;  %v3075_v17 = vrot.slane %v18248_v59, 4  ;;  %v1405_v25 = vrot.slane %v18250_v44, 2 }
 0x184   : > { %v18255_v58 = vsel %vm3669_vm8, %v3697_v40, %v3698_v28  ;;  %v1647_v2 = vor.u32 %v1646_v5, %v1643_v53  ;;  %v1404_v36 = vrot.slane %v1305_v32, 2  ;;  %v3320_v6 = vshrl.u32 %v2975_v47, 16  ;;  %v825_v44 = vld [vmem:[#allocation2 + $0xc8] sm:$0x3] }
 0x185   : > { %3816 = vrot.lane.b32.xlu0 %v3301_v61, %s17282_s30  ;;  %v1639_v37 = vor.u32 %v1638_v51, %v1635_v24  ;;  %v2028_v61 = vrot.slane %v1461_v38, 3  ;;  %v3318_v31 = vsel %vm3148_vm6, %v3309_v62, %v3317_v23  ;;  %v18264_v38 = vld [vmem:[#allocation2 + $0xa8] sm:$0x1f]  ;;  %v3323_v62 = vshll.u32 %v2975_v47, 16 }
 0x186   : > { %v18269_v24 = vld [vmem:[#allocation2 + $0xa8] sm:$0x7]  ;;  %v18277_v23 = vsel %vm1373_vm5, %v1404_v36, %v1405_v25  ;;  %v3328_v53 = vshrl.u32 %v18264_v38, 16  ;;  %v3331_v28 = vshll.u32 %v18264_v38, 16  ;;  %v1650_v5 = vshrl.u32 %v1305_v32, 16 }
 0x187   : > { %2146 = vrot.lane.b32.xlu1 %v1631_v45, %s17282_s30  ;;  %v18261_v11 = vsel %vm1999_vm9, %v2027_v18, %v2028_v61  ;;  %v3074_v45 = vrot.slane %v2975_v47, 4  ;;  %v18281_v18 = vpop.f32.mrb[28].mxu0  ;;  %v3325_v61 = vrot.slane %v3323_v62, 5  ;;  %v1661_v36 = vshll.u32 %v18269_v24, 16 }
 0x188   : > { %v3333_v47 = vrot.slane %v3331_v28, 5  ;;  %v1652_v40 = vrot.slane %v1650_v5, 2  ;;  %v18290_v62 = vpop.f32.mrb[29].mxu0  ;;  %v3601_v5 = vld [vmem:[#allocation2 + $0xa0] sm:$0xe0] }
 0x189   : > { %3868 = vrot.lane.b32.xlu0 %v3696_v10, %s17283_s12  ;;  %v1648_v10 = vsel %vm1478_vm7, %v1639_v37, %v1647_v2  ;;  %v18274_v51 = vsel %vm3043_vm3, %v3074_v45, %v3075_v17  ;;  %v1653_v37 = vshll.u32 %v1305_v32, 16  ;;  %v1658_v2 = vshrl.u32 %v18269_v24, 16  ;;  %v4150_v45 = vld [vmem:[#allocation2 + $0x60] sm:$0xe0] }
 0x18a   : > { %v3330_v17 = vrot.slane %v3328_v53, 4  ;;  %v1663_v7 = vrot.slane %v1661_v36, 3  ;;  %v4307_v53 = vrot.slane %v4305_v54, 6  ;;  %v4294_v28 = vshrl.u32 %v4150_v45, 16 }
 0x18b   : > { %2198 = vrot.lane.b32.xlu1 %v2026_v8, %s17283_s12  ;;  %v3322_v8 = vrot.slane %v3320_v6, 4  ;;  %v1655_v22 = vrot.slane %v1653_v37, 3  ;;  %v1660_v48 = vrot.slane %v1658_v2, 2  ;;  %v2482_v6 = vld [vmem:[#allocation2 + $0x60] sm:$0xf8]  ;;  %v18299_v37 = vpop.f32.mrb[30].mxu0 }
 0x18c   : > { %v3334_v32 = vor.u32 %v3333_v47, %v3330_v17  ;;  %v4296_v17 = vrot.slane %v4294_v28, 5  ;;  %v18304_v47 = vpop.f32.mrb[31].mxu0  ;;  %v3700_v36 = vrot.slane %v3601_v5, 5  ;;  %v2493_v28 = vld [vmem:[#allocation2 + $0xb8] sm:$0xf] }
 0x18d   : > { %3766 = vrot.lane.b32.xlu0 %v3073_v27, %s17281_s29  ;;  %v3326_v25 = vor.u32 %v3325_v61, %v3322_v8  ;;  %v4304_v27 = vrot.slane %v4302_v30, 5  ;;  %v1656_v50 = vor.u32 %v1655_v22, %v1652_v40  ;;  %v2636_v8 = vrot.slane %v2634_v15, 3  ;;  %v1931_v61 = vld [vmem:[#allocation2 + $0xa0] sm:$0xf8] }
 0x18e   : > { %v2639_v30 = vrot.slane %v2637_v21, 4  ;;  %v1664_v42 = vor.u32 %v1663_v7, %v1660_v48  ;;  %v2626_v40 = vshrl.u32 %v2482_v6, 16  ;;  %v2629_v15 = vshll.u32 %v2482_v6, 16  ;;  %v4148_v7 = vld [vmem:[#allocation2 + $0x50] sm:$0xe0] }
 0x18f   : > { %2096 = vrot.lane.b32.xlu1 %v18245_v20, %s17281_s29  ;;  %v4297_v20 = vshll.u32 %v4150_v45, 16  ;;  %v18302_v2 = vsel %vm3148_vm6, %v3326_v25, %v3334_v32  ;;  %v4308_v54 = vor.u32 %v4307_v53, %v4304_v27  ;;  %v812_v45 = vld [vmem:[#allocation2 + $0x60] sm:$0xfe]  ;;  %v3701_v25 = vrot.slane %v18264_v38, 5 }
 0x190   : > { %v2640_v22 = vor.u32 %v2639_v30, %v2636_v8  ;;  %v18308_v21 = vsel %vm1478_vm7, %v1656_v50, %v1664_v42  ;;  %v2030_v32 = vrot.slane %v1931_v61, 3  ;;  %v2628_v27 = vrot.slane %v2626_v40, 3  ;;  %v18319_v30 = vld [vmem:[#allocation2 + $0xb0] sm:$0xf0]  ;;  %v823_v40 = vld [vmem:[#allocation2 + $0xb8] sm:$0x3] }
 0x191   : > { %3818 = vrot.lane.b32.xlu0 %v3318_v31, %s17282_s30  ;;  %v4299_v31 = vrot.slane %v4297_v20, 6  ;;  %v2031_v53 = vrot.slane %v18269_v24, 3  ;;  %v3702_v20 = vsel %vm3669_vm8, %v3700_v36, %v3701_v25  ;;  %v966_v50 = vrot.slane %v964_v52, 1  ;;  %v18327_v52 = vld [vmem:[#allocation2 + $0xb0] sm:$0xfc] }
 0x192   : > { %v21969_v38 = vshll.u32 %v17963_v49, 16  ;;  %v956_v8 = vshrl.u32 %v812_v45, 16  ;;  %v21970_v36 = vshrl.u32 %v17974_v19, 16 }
 0x193   : > { %2148 = vrot.lane.b32.xlu1 %v1648_v10, %s17282_s30  ;;  %v4300_v48 = vor.u32 %v4299_v31, %v4296_v17  ;;  %v2631_v10 = vrot.slane %v2629_v15, 4  ;;  %v18325_v17 = vsel %vm1999_vm9, %v2030_v32, %v2031_v53  ;;  %v959_v31 = vshll.u32 %v812_v45, 16 }
 0x194   : > { %v969_v5 = vrot.slane %v21969_v38, 2  ;;  %v958_v43 = vrot.slane %v956_v8, 1  ;;  %v4287_v25 = vrot.slane %v21970_v36, 5  ;;  %v21971_v45 = vshll.u32 %v17974_v19, 16  ;;  %v810_v19 = vld [vmem:[#allocation2 + $0x50] sm:$0xfe] }
 0x195   : > { %3870 = vrot.lane.b32.xlu0 %v18255_v58, %s17283_s12  ;;  %v16906_v58 = vld [vmem:[#allocation4 + $0x168] sm:$0xff]   ;;  %v4309_v24 = vsel %vm4190_vm12, %v4300_v48, %v4308_v54  ;;  %v2632_v42 = vor.u32 %v2631_v10, %v2628_v27  ;;  %v961_v32 = vrot.slane %v959_v31, 2  ;;  %v4277_v27 = vshrl.u32 %v4148_v7, 16 }
 0x196   : > { %v970_v15 = vor.u32 %v969_v5, %v966_v50  ;;  %14053 = vmatpush3.bf16.msra.mxu1 %v16906_v58  ;;  %v4290_v48 = vrot.slane %v21971_v45, 6  ;;  %v3077_v50 = vrot.slane %v18319_v30, 4  ;;  %v3078_v38 = vrot.slane %v2493_v28, 4 }
 0x197   : > { %2200 = vrot.lane.b32.xlu1 %v18261_v11, %s17283_s12  ;;  %v2480_v11 = vld [vmem:[#allocation2 + $0x50] sm:$0xf8]  ;;  %v2641_v54 = vsel %vm2522_vm15, %v2632_v42, %v2640_v22  ;;  %v962_v5 = vor.u32 %v961_v32, %v958_v43  ;;  %v4279_v22 = vrot.slane %v4277_v27, 5  ;;  %v1407_v58 = vrot.slane %v18327_v52, 2 }
 0x198   : > { %v3079_v42 = vsel %vm3043_vm3, %v3077_v50, %v3078_v38  ;;  %v21972_v31 = vshrl.u32 %v17982_v3, 16  ;;  %v2609_v36 = vshrl.u32 %v2480_v11, 16 }
 0x199   : > { %3768 = vrot.lane.b32.xlu0 %v18274_v51, %s17281_s29  ;;  %v4291_v51 = vor.u32 %v4290_v48, %v4287_v25  ;;  %v971_v28 = vsel %vm852_vm1, %v962_v5, %v970_v15  ;;  %v2612_v25 = vshll.u32 %v2480_v11, 16  ;;  %v21974_v48 = vshrl.u32 %v17993_v14, 16 }
 0x19a   : > { %v5272_v6 = vpop.permute.xlu1 %5271  ;;  %v2611_v15 = vrot.slane %v2609_v36, 3  ;;  %v21975_v11 = vshll.u32 %v17993_v14, 16  ;;  %v939_v5 = vshrl.u32 %v810_v19, 16 }
 0x19b   : > { %v3761_v61 = vpop.permute.xlu0 %3760  ;;  %v18330_v49 = vsel %vm647_vm0, %v4309_v24, %v5272_v6  ;;  %v4280_v6 = vshll.u32 %v4148_v7, 16  ;;  %2098 = vrot.lane.b32.xlu1 %v18277_v23, %s17281_s29  ;;  %v2619_v7 = vrot.slane %v21972_v31, 3  ;;  %v21973_v23 = vshll.u32 %v17982_v3, 16 }
 0x19c   : > { %v18340_v10 = vsel %vm647_vm0, %v2641_v54, %v3761_v61  ;;  %v1408_v61 = vrot.slane %v823_v40, 2  ;;  %v18354_v54 = vld [vmem:[#allocation2 + $0xb8] sm:$0x1f]  ;;  %v949_v27 = vrot.slane %v21974_v48, 1  ;;  %v2614_v50 = vrot.slane %v2612_v25, 4 }
 0x19d   : > { %v4282_v24 = vrot.slane %v4280_v6, 6  ;;  %3820 = vrot.lane.b32.xlu0 %v18302_v2, %s17282_s30  ;;  %v2622_v43 = vrot.slane %v21973_v23, 4  ;;  %v952_v38 = vrot.slane %v21975_v11, 2  ;;  %v941_v23 = vrot.slane %v939_v5, 1  ;;  %v2977_v5 = vld [vmem:[#allocation2 + $0xc0] sm:$0xf0] }
 0x19e   : > { %v2091_v53 = vpop.permute.xlu1 %2090  ;;  %v1409_v40 = vsel %vm1373_vm5, %v1407_v58, %v1408_v61  ;;  %v3337_v58 = vshrl.u32 %v18319_v30, 16  ;;  %v2615_v31 = vor.u32 %v2614_v50, %v2611_v15  ;;  %v3345_v36 = vshrl.u32 %v18354_v54, 16 }
 0x19f   : > { %v5270_v8 = vpop.permute.xlu0 %5269  ;;  %v18357_v32 = vsel %vm647_vm0, %v971_v28, %v2091_v53  ;;  %v4283_v45 = vor.u32 %v4282_v24, %v4279_v22  ;;  %2150 = vrot.lane.b32.xlu1 %v18308_v21, %s17282_s30  ;;  %v2623_v2 = vor.u32 %v2622_v43, %v2619_v7  ;;  %v942_v22 = vshll.u32 %v810_v19, 16  ;;  %v1463_v24 = vld [vmem:[#allocation2 + $0xb8] sm:$0x7]  ;;  %v3602_v28 = vld [vmem:[#allocation2 + $0xb0] sm:$0xe0] }
 0x1a0   : > { %v953_v21 = vor.u32 %v952_v38, %v949_v27  ;;  %v3340_v7 = vshll.u32 %v18319_v30, 16  ;;  %v3339_v14 = vrot.slane %v3337_v58, 4  ;;  %v1667_v25 = vshrl.u32 %v18327_v52, 16  ;;  %v1932_v30 = vld [vmem:[#allocation2 + $0xb0] sm:$0xf8] }
 0x1a1   : > { %v4292_v53 = vsel %vm4190_vm12, %v4283_v45, %v4291_v51  ;;  %3872 = vrot.lane.b32.xlu0 %v3702_v20, %s17283_s12  ;;  %v944_v43 = vrot.slane %v942_v22, 2  ;;  %v2624_v19 = vsel %vm2522_vm15, %v2615_v31, %v2623_v2  ;;  %v3347_v15 = vrot.slane %v3345_v36, 4  ;;  %v18390_v36 = vld [vmem:[#allocation2 + $0xc8] sm:$0x1f] }
 0x1a2   : > { %v2089_v6 = vpop.permute.xlu1 %2088  ;;  %v5380_v61 = vsel %vm647_vm0, %v4292_v53, %v5270_v8  ;;  %v3342_v20 = vrot.slane %v3340_v7, 5  ;;  %v3348_v8 = vshll.u32 %v18354_v54, 16  ;;  %v1670_v50 = vshll.u32 %v18327_v52, 16  ;;  %v2495_v53 = vld [vmem:[#allocation2 + $0xc8] sm:$0xf] }
 0x1a3   : > { %v3759_v3 = vpop.permute.xlu0 %3758  ;;  %2202 = vrot.lane.b32.xlu1 %v18325_v17, %s17283_s12  ;;  %v945_v27 = vor.u32 %v944_v43, %v941_v23  ;;  %v1669_v2 = vrot.slane %v1667_v25, 2  ;;  %v1675_v38 = vshrl.u32 %v1463_v24, 16  ;;  %v1678_v31 = vshll.u32 %v1463_v24, 16 }
 0x1a4   : > { %v18382_v48 = vsel %vm647_vm0, %v2624_v19, %v3759_v3  ;;  %v3343_v17 = vor.u32 %v3342_v20, %v3339_v14  ;;  %v3350_v11 = vrot.slane %v3348_v8, 5  ;;  %v1672_v58 = vrot.slane %v1670_v50, 3  ;;  %v1307_v3 = vld [vmem:[#allocation2 + $0xc0] sm:$0xfc] }
 0x1a5   : > { %3770 = vrot.lane.b32.xlu0 %v3079_v42, %s17281_s29  ;;  %v954_v22 = vsel %vm852_vm1, %v945_v27, %v953_v21  ;;  %v3703_v7 = vrot.slane %v3602_v28, 5  ;;  %v1677_v43 = vrot.slane %v1675_v38, 2  ;;  %v3704_v42 = vrot.slane %v18354_v54, 5  ;;  %v16908_v38 = vld [vmem:[#allocation4 + $0x1b0] sm:$0xff]  }
 0x1a6   : > { %v18372_v51 = vpop.permute.xlu1 %2192  ;;  %v2251_v23 = vsel %vm647_vm0, %v954_v22, %v2089_v6  ;;  %v3351_v52 = vor.u32 %v3350_v11, %v3347_v15  ;;  %v1673_v19 = vor.u32 %v1672_v58, %v1669_v2  ;;  %v1680_v20 = vrot.slane %v1678_v31, 3  ;;  %v18397_v15 = vld [vmem:[#allocation2 + $0xc8] sm:$0x7]  ;;  %v16909_v22 = vld [vmem:[#allocation4 + $0x170] sm:$0xff]   ;;  %14054 = vmatprep.subr.bf16.mxu1 %v16908_v38 }
 0x1a7   : > { %v18379_v45 = vpop.permute.xlu0 %3862  ;;  %2100 = vrot.lane.b32.xlu1 %v1409_v40, %s17281_s29  ;;  %v2033_v8 = vrot.slane %v1932_v30, 3  ;;  %v2034_v21 = vrot.slane %v1463_v24, 3  ;;  %v3705_v27 = vsel %vm3669_vm8, %v3703_v7, %v3704_v42  ;;  %v3080_v24 = vrot.slane %v2977_v5, 4  ;;  %14055 = vmatpush3.bf16.msra.mxu1 %v16909_v22 }
 0x1a8   : > { %v3352_v28 = vsel %vm3148_vm6, %v3343_v17, %v3351_v52  ;;  %v1681_v54 = vor.u32 %v1680_v20, %v1677_v43  ;;  %v3081_v30 = vrot.slane %v2495_v53, 4  ;;  %v1410_v17 = vrot.slane %v1307_v3, 2 }
 0x1a9   : > { %3822 = vrot.lane.b32.xlu0 %v3352_v28, %s17282_s30  ;;  %v2035_v50 = vsel %vm1999_vm9, %v2033_v8, %v2034_v21  ;;  %v1411_v11 = vrot.slane %v825_v44, 2  ;;  %v3354_v2 = vshrl.u32 %v2977_v5, 16  ;;  %v3362_v31 = vshrl.u32 %v18390_v36, 16  ;;  %v4152_v8 = vld [vmem:[#allocation2 + $0x70] sm:$0xe0] }
 0x1aa   : > { %v3082_v58 = vsel %vm3043_vm3, %v3080_v24, %v3081_v30  ;;  %v3365_v7 = vshll.u32 %v18390_v36, 16  ;;  %v1684_v42 = vshrl.u32 %v1307_v3, 16  ;;  %v1692_v20 = vshrl.u32 %v18397_v15, 16 }
 0x1ab   : > { %v5322_v14 = vpop.permute.xlu0 %5321  ;;  %v1412_v52 = vsel %vm1373_vm5, %v1410_v17, %v1411_v11  ;;  %v3356_v43 = vrot.slane %v3354_v2, 4 }
 0x1ac   : > { %v5457_v40 = vsel %vm2312_vm13, %v5380_v61, %v5322_v14  ;;  %v3357_v61 = vshll.u32 %v2977_v5, 16  ;;  %v3364_v5 = vrot.slane %v3362_v31, 4  ;;  %v3367_v14 = vrot.slane %v3365_v7, 5 }
 0x1ad   : > { %v5324_v25 = vpop.permute.xlu1 %5323  ;;  %5524 = vst.msk [vmem:[#allocation3 + $0x88] sm:$0xff] %vm2365_vm14, %v5457_v40  ;;  %3874 = vrot.lane.b32.xlu0 %v3705_v27, %s17283_s12  ;;  %v1686_v28 = vrot.slane %v1684_v42, 2  ;;  %v1695_v40 = vshll.u32 %v18397_v15, 16  ;;  %v1694_v17 = vrot.slane %v1692_v20, 2  ;;  %v21976_v7 = vshrl.u32 %v18036_v41, 16 }
 0x1ae   : > { %v5460_v6 = vsel %vm2312_vm13, %v18330_v49, %v5324_v25  ;;  %v1682_v49 = vsel %vm1478_vm7, %v1673_v19, %v1681_v54  ;;  %v3359_v53 = vrot.slane %v3357_v61, 5  ;;  %v1687_v19 = vshll.u32 %v1307_v3, 16  ;;  %v3603_v3 = vld [vmem:[#allocation2 + $0xc0] sm:$0xe0] }
 0x1af   : > { %5525 = vst.msk [vmem:[#allocation3 + $0xa0] sm:$0xff] %vm2365_vm14, %v5460_v6  ;;  %2152 = vrot.lane.b32.xlu1 %v1682_v49, %s17282_s30  ;;  %v4154_v6 = vld [vmem:[#allocation2 + $0x80] sm:$0xe0]  ;;  %v3368_v24 = vor.u32 %v3367_v14, %v3364_v5  ;;  %v1697_v2 = vrot.slane %v1695_v40, 3  ;;  %v4314_v61 = vshll.u32 %v4152_v8, 16 }
 0x1b0   : > { %v3360_v25 = vor.u32 %v3359_v53, %v3356_v43  ;;  %v1689_v30 = vrot.slane %v1687_v19, 3  ;;  %v18425_v53 = vld [vmem:[#allocation2 + $0xd0] sm:$0xf0]  ;;  %v4328_v19 = vshrl.u32 %v4154_v6, 16  ;;  %v4331_v20 = vshll.u32 %v4154_v6, 16 }
 0x1b1   : > { %v3811_v44 = vpop.permute.xlu0 %3810  ;;  %3772 = vrot.lane.b32.xlu0 %v3082_v58, %s17281_s29  ;;  %v1698_v42 = vor.u32 %v1697_v2, %v1694_v17  ;;  %v4316_v5 = vrot.slane %v4314_v61, 6  ;;  %v21977_v58 = vshll.u32 %v18036_v41, 16  ;;  %v3706_v17 = vrot.slane %v3603_v3, 5 }
 0x1b2   : > { %v3993_v21 = vsel %vm2312_vm13, %v18382_v48, %v3811_v44  ;;  %v4311_v48 = vshrl.u32 %v4152_v8, 16  ;;  %v3369_v49 = vsel %vm3148_vm6, %v3360_v25, %v3368_v24  ;;  %v1690_v31 = vor.u32 %v1689_v30, %v1686_v28 }
 0x1b3   : > { %v4050_v54 = vsel %vm2365_vm14, %v3993_v21, %v18379_v45  ;;  %v2141_v27 = vpop.permute.xlu1 %2140  ;;  %2204 = vrot.lane.b32.xlu1 %v2035_v50, %s17283_s12  ;;  %v4321_v50 = vrot.slane %v21976_v7, 5  ;;  %v4324_v14 = vrot.slane %v21977_v58, 6  ;;  %v21978_v8 = vshrl.u32 %v18047_v12, 16 }
 0x1b4   : > { %4117 = vst [vmem:[#allocation3 + $0x80] sm:$0xff] %v4050_v54  ;;  %v2324_v11 = vsel %vm2312_vm13, %v2251_v23, %v2141_v27  ;;  %v5562_v38 = vld [vmem:[#allocation3 + $0x88] sm:$0xff]  ;;  %5929 = vmatprep.mubr.bf16.mxu1 %v4050_v54  ;;  %v1933_v23 = vld [vmem:[#allocation2 + $0xc0] sm:$0xf8]  ;;  %v4313_v44 = vrot.slane %v4311_v48, 5  ;;  %v21979_v25 = vshll.u32 %v18047_v12, 16  ;;  %v1699_v41 = vsel %vm1478_vm7, %v1690_v31, %v1698_v42 }
 0x1b5   : > { %v2382_v45 = vsel %vm2365_vm14, %v2324_v11, %v18372_v51  ;;  %v5274_v43 = vpop.permute.xlu0 %5273  ;;  %15402 = vmatprep.mubr.msk.bf16.mxu0 %vm2365_vm14, %v5562_v38  ;;  %v2497_v51 = vld [vmem:[#allocation2 + $0xd8] sm:$0xf]  ;;  %v4338_v21 = vrot.slane %v21978_v8, 5  ;;  %v18434_v27 = vld [vmem:[#allocation2 + $0xd0] sm:$0xfc]  ;;  %v4325_v30 = vor.u32 %v4324_v14, %v4321_v50  ;;  %3824 = vrot.lane.b32.xlu0 %v3369_v49, %s17282_s30  ;;  %v4330_v6 = vrot.slane %v4328_v19, 5 }
 0x1b6   : > { %v5565_v22 = vld [vmem:[#allocation3 + $0xa0] sm:$0xff]  ;;  %2449 = vst [vmem:[#allocation3 + $0x78] sm:$0xff] %v2382_v45  ;;  %5930 = vmatmul.mubr.bf16.gmra.mrb[16].mxu1 %v2382_v45  ;;  %v4341_v28 = vrot.slane %v21979_v25, 6  ;;  %v827_v54 = vld [vmem:[#allocation2 + $0xd8] sm:$0x3]  ;;  %v4317_v24 = vor.u32 %v4316_v5, %v4313_v44  ;;  %v4333_v2 = vrot.slane %v4331_v20, 6 }
 0x1b7   : > { %15403 = vmatmul.mubr.msk.bf16.gmra.mrb[40].mxu0 %vm2365_vm14, %v5565_v22  ;;  %v5276_v40 = vpop.permute.xlu1 %5275  ;;  %2102 = vrot.lane.b32.xlu1 %v1412_v52, %s17281_s29  ;;  %v4156_v11 = vld [vmem:[#allocation2 + $0x90] sm:$0xe0]  ;;  %v3707_v12 = vrot.slane %v18390_v36, 5  ;;  %v2036_v38 = vrot.slane %v1933_v23, 3  ;;  %v2037_v22 = vrot.slane %v18397_v15, 3  ;;  %v3083_v52 = vrot.slane %v18425_v53, 4 }
 0x1b8   : > { %v4342_v48 = vor.u32 %v4341_v28, %v4338_v21  ;;  %v4326_v61 = vsel %vm4190_vm12, %v4317_v24, %v4325_v30  ;;  %v4334_v7 = vor.u32 %v4333_v2, %v4330_v6  ;;  %v3084_v50 = vrot.slane %v2497_v51, 4  ;;  %v4158_v44 = vld [vmem:[#allocation2 + $0xa0] sm:$0xe0]  ;;  %v18453_v51 = vld [vmem:[#allocation2 + $0xd8] sm:$0x1f] }
 0x1b9   : > { %v5326_v45 = vpop.permute.xlu0 %5325  ;;  %v5386_v31 = vsel %vm647_vm0, %v4326_v61, %v5274_v43  ;;  %v3708_v3 = vsel %vm3669_vm8, %v3706_v17, %v3707_v12  ;;  %v2038_v49 = vsel %vm1999_vm9, %v2036_v38, %v2037_v22  ;;  %v1413_v42 = vrot.slane %v18434_v27, 2 }
 0x1ba   : > { %v5463_v36 = vsel %vm2312_vm13, %v5386_v31, %v5326_v45  ;;  %v1414_v23 = vrot.slane %v827_v54, 2  ;;  %v4343_v15 = vsel %vm4190_vm12, %v4334_v7, %v4342_v48  ;;  %3876 = vrot.lane.b32.xlu0 %v3708_v3, %s17283_s12  ;;  %v3085_v5 = vsel %vm3043_vm3, %v3083_v52, %v3084_v50  ;;  %v1465_v52 = vld [vmem:[#allocation2 + $0xd8] sm:$0x7]  ;;  %v16911_v31 = vld [vmem:[#allocation4 + $0x1b8] sm:$0xff]  }
 0x1bb   : > { %2154 = vrot.lane.b32.xlu1 %v1699_v41, %s17282_s30  ;;  %5526 = vst.msk [vmem:[#allocation3 + $0xb8] sm:$0xff] %vm2365_vm14, %v5463_v36  ;;  %v4345_v58 = vshrl.u32 %v4156_v11, 16  ;;  %v4348_v14 = vshll.u32 %v4156_v11, 16  ;;  %v5389_v19 = vsel %vm647_vm0, %v4343_v15, %v5276_v40  ;;  %v21980_v8 = vshrl.u32 %v18075_v33, 16  ;;  %v3604_v36 = vld [vmem:[#allocation2 + $0xd0] sm:$0xe0]  ;;  %14056 = vmatprep.subr.bf16.mxu1 %v16911_v31 }
 0x1bc   : > { %v5328_v43 = vpop.permute.xlu1 %5327  ;;  %v1415_v20 = vsel %vm1373_vm5, %v1413_v42, %v1414_v23  ;;  %v21981_v25 = vshll.u32 %v18075_v33, 16  ;;  %v4362_v17 = vshrl.u32 %v4158_v44, 16  ;;  %v4365_v40 = vshll.u32 %v4158_v44, 16 }
 0x1bd   : > { %v4355_v21 = vrot.slane %v21980_v8, 5  ;;  %v5278_v54 = vpop.permute.xlu0 %5277  ;;  %v5466_v41 = vsel %vm2312_vm13, %v5389_v19, %v5328_v43  ;;  %v4347_v24 = vrot.slane %v4345_v58, 5  ;;  %v4350_v30 = vrot.slane %v4348_v14, 6  ;;  %v1934_v14 = vld [vmem:[#allocation2 + $0xd0] sm:$0xf8] }
 0x1be   : > { %v4358_v28 = vrot.slane %v21981_v25, 6  ;;  %5527 = vst.msk [vmem:[#allocation3 + $0xd0] sm:$0xff] %vm2365_vm14, %v5466_v41  ;;  %v21982_v6 = vshrl.u32 %v18078_v46, 16  ;;  %v21983_v48 = vshll.u32 %v18078_v46, 16  ;;  %3774 = vrot.lane.b32.xlu0 %v3085_v5, %s17281_s29  ;;  %v4364_v61 = vrot.slane %v4362_v17, 5 }
 0x1bf   : > { %2206 = vrot.lane.b32.xlu1 %v2038_v49, %s17283_s12  ;;  %v4351_v33 = vor.u32 %v4350_v30, %v4347_v24  ;;  %v3371_v22 = vshrl.u32 %v18425_v53, 16  ;;  %v3374_v45 = vshll.u32 %v18425_v53, 16  ;;  %v4367_v7 = vrot.slane %v4365_v40, 6  ;;  %v4160_v8 = vld [vmem:[#allocation2 + $0xb0] sm:$0xe0]  ;;  %v16912_v24 = vld [vmem:[#allocation4 + $0x178] sm:$0xff]  }
 0x1c0   : > { %v4359_v11 = vor.u32 %v4358_v28, %v4355_v21  ;;  %v4372_v2 = vrot.slane %v21982_v6, 5  ;;  %v4375_v12 = vrot.slane %v21983_v48, 6  ;;  %v5280_v38 = vpop.permute.xlu1 %5279  ;;  %v3379_v50 = vshrl.u32 %v18453_v51, 16  ;;  %14057 = vmatpush3.bf16.msra.mxu1 %v16912_v24 }
 0x1c1   : > { %v3382_v49 = vshll.u32 %v18453_v51, 16  ;;  %v3373_v42 = vrot.slane %v3371_v22, 4  ;;  %v3376_v23 = vrot.slane %v3374_v45, 5  ;;  %v1701_v44 = vshrl.u32 %v18434_v27, 16 }
 0x1c2   : > { %v4376_v3 = vor.u32 %v4375_v12, %v4372_v2  ;;  %v4360_v46 = vsel %vm4190_vm12, %v4351_v33, %v4359_v11  ;;  %v4368_v15 = vor.u32 %v4367_v7, %v4364_v61  ;;  %v3381_v43 = vrot.slane %v3379_v50, 4  ;;  %v5568_v19 = vld [vmem:[#allocation3 + $0xb8] sm:$0xff]  ;;  %v4162_v11 = vld [vmem:[#allocation2 + $0xc0] sm:$0xe0] }
 0x1c3   : > { %2104 = vrot.lane.b32.xlu1 %v1415_v20, %s17281_s29  ;;  %v5392_v53 = vsel %vm647_vm0, %v4360_v46, %v5278_v54  ;;  %v3384_v5 = vrot.slane %v3382_v49, 5  ;;  %v5330_v58 = vpop.permute.xlu0 %5329  ;;  %v3377_v21 = vor.u32 %v3376_v23, %v3373_v42  ;;  %v1703_v25 = vrot.slane %v1701_v44, 2  ;;  %15406 = vmatprep.mubr.msk.bf16.mxu0 %vm2365_vm14, %v5568_v19  ;;  %v2979_v7 = vld [vmem:[#allocation2 + $0xe0] sm:$0xf0] }
 0x1c4   : > { %v1704_v28 = vshll.u32 %v18434_v27, 16  ;;  %v1709_v41 = vshrl.u32 %v1465_v52, 16  ;;  %v4377_v30 = vsel %vm4190_vm12, %v4368_v15, %v4376_v3  ;;  %v1712_v17 = vshll.u32 %v1465_v52, 16  ;;  %v18489_v46 = vld [vmem:[#allocation2 + $0xe0] sm:$0xfc] }
 0x1c5   : > { %v3385_v20 = vor.u32 %v3384_v5, %v3381_v43  ;;  %v5469_v54 = vsel %vm2312_vm13, %v5392_v53, %v5330_v58  ;;  %v5395_v40 = vsel %vm647_vm0, %v4377_v30, %v5280_v38  ;;  %v5332_v48 = vpop.permute.xlu1 %5331  ;;  %v3709_v12 = vrot.slane %v3604_v36, 5  ;;  %v5571_v27 = vld [vmem:[#allocation3 + $0xd0] sm:$0xff]  ;;  %v2499_v36 = vld [vmem:[#allocation2 + $0xe8] sm:$0xf] }
 0x1c6   : > { %v1706_v6 = vrot.slane %v1704_v28, 3  ;;  %v1711_v2 = vrot.slane %v1709_v41, 2  ;;  %5528 = vst.msk [vmem:[#allocation3 + $0xe8] sm:$0xff] %vm2365_vm14, %v5469_v54  ;;  %v1714_v61 = vrot.slane %v1712_v17, 3  ;;  %v5472_v22 = vsel %vm2312_vm13, %v5395_v40, %v5332_v48  ;;  %15407 = vmatmul.mubr.msk.bf16.gmra.mrb[44].mxu0 %vm2365_vm14, %v5571_v27  ;;  %v829_v15 = vld [vmem:[#allocation2 + $0xe8] sm:$0x3] }
 0x1c7   : > { %v3386_v33 = vsel %vm3148_vm6, %v3377_v21, %v3385_v20  ;;  %v3710_v45 = vrot.slane %v18453_v51, 5  ;;  %v5282_v31 = vpop.permute.xlu0 %5281  ;;  %5529 = vst.msk [vmem:[#allocation3 + $0x100] sm:$0xff] %vm2365_vm14, %v5472_v22  ;;  %v2039_v3 = vrot.slane %v1934_v14, 3  ;;  %v2040_v50 = vrot.slane %v1465_v52, 3  ;;  %v18500_v30 = vld [vmem:[#allocation2 + $0xe8] sm:$0x1f] }
 0x1c8   : > { %3826 = vrot.lane.b32.xlu0 %v3386_v33, %s17282_s30  ;;  %v1707_v38 = vor.u32 %v1706_v6, %v1703_v25  ;;  %v4379_v49 = vshrl.u32 %v4160_v8, 16  ;;  %v1715_v42 = vor.u32 %v1714_v61, %v1711_v2  ;;  %v4382_v44 = vshll.u32 %v4160_v8, 16 }
 0x1c9   : > { %v3711_v23 = vsel %vm3669_vm8, %v3709_v12, %v3710_v45  ;;  %v21984_v51 = vshrl.u32 %v18105_v9, 16  ;;  %v2041_v43 = vsel %vm1999_vm9, %v2039_v3, %v2040_v50  ;;  %v21985_v58 = vshll.u32 %v18105_v9, 16  ;;  %v5284_v52 = vpop.permute.xlu1 %5283 }
 0x1ca   : > { %v4381_v5 = vrot.slane %v4379_v49, 5  ;;  %v4396_v14 = vshrl.u32 %v4162_v11, 16  ;;  %v1716_v21 = vsel %vm1478_vm7, %v1707_v38, %v1715_v42  ;;  %v4384_v25 = vrot.slane %v4382_v44, 6  ;;  %v18507_v38 = vld [vmem:[#allocation2 + $0xe8] sm:$0x7] }
 0x1cb   : > { %v4389_v53 = vrot.slane %v21984_v51, 5  ;;  %v4392_v19 = vrot.slane %v21985_v58, 6  ;;  %v4399_v28 = vshll.u32 %v4162_v11, 16  ;;  %v21986_v41 = vshrl.u32 %v18107_v39, 16  ;;  %v5334_v8 = vpop.permute.xlu0 %5333  ;;  %2156 = vrot.lane.b32.xlu1 %v1716_v21, %s17282_s30 }
 0x1cc   : > { %3878 = vrot.lane.b32.xlu0 %v3711_v23, %s17283_s12  ;;  %v4398_v17 = vrot.slane %v4396_v14, 5  ;;  %v21987_v9 = vshll.u32 %v18107_v39, 16  ;;  %v3086_v40 = vrot.slane %v2979_v7, 4  ;;  %v4385_v6 = vor.u32 %v4384_v25, %v4381_v5  ;;  %v4166_v25 = vld [vmem:[#allocation2 + $0xe0] sm:$0xe0] }
 0x1cd   : > { %v4406_v24 = vrot.slane %v21986_v41, 5  ;;  %v4393_v20 = vor.u32 %v4392_v19, %v4389_v53  ;;  %v4401_v2 = vrot.slane %v4399_v28, 6  ;;  %v3087_v48 = vrot.slane %v2499_v36, 4  ;;  %v5574_v12 = vld [vmem:[#allocation3 + $0xe8] sm:$0xff]  ;;  %v5336_v61 = vpop.permute.xlu1 %5335  ;;  %v4164_v19 = vld [vmem:[#allocation2 + $0xd0] sm:$0xe0] }
 0x1ce   : > { %v4409_v54 = vrot.slane %v21987_v9, 6  ;;  %v1416_v11 = vrot.slane %v18489_v46, 2  ;;  %v1417_v33 = vrot.slane %v829_v15, 2  ;;  %v3388_v22 = vshrl.u32 %v2979_v7, 16  ;;  %15410 = vmatprep.mubr.msk.bf16.mxu0 %vm2365_vm14, %v5574_v12  ;;  %v5577_v36 = vld [vmem:[#allocation3 + $0x100] sm:$0xff] }
 0x1cf   : > { %v3391_v45 = vshll.u32 %v2979_v7, 16  ;;  %v4394_v3 = vsel %vm4190_vm12, %v4385_v6, %v4393_v20  ;;  %v4402_v39 = vor.u32 %v4401_v2, %v4398_v17  ;;  %v3088_v50 = vsel %vm3043_vm3, %v3086_v40, %v3087_v48  ;;  %v18513_v42 = vpop.permute.xlu0 %5285  ;;  %2208 = vrot.lane.b32.xlu1 %v2041_v43, %s17283_s12  ;;  %15411 = vmatmul.mubr.msk.bf16.gmra.mrb[48].mxu0 %vm2365_vm14, %v5577_v36 }
 0x1d0   : > { %v4410_v27 = vor.u32 %v4409_v54, %v4406_v24  ;;  %v3396_v49 = vshrl.u32 %v18500_v30, 16  ;;  %v5398_v23 = vsel %vm647_vm0, %v4394_v3, %v5282_v31  ;;  %3776 = vrot.lane.b32.xlu0 %v3088_v50, %s17281_s29  ;;  %v1418_v7 = vsel %vm1373_vm5, %v1416_v11, %v1417_v33  ;;  %v16915_v33 = vld [vmem:[#allocation4 + $0x180] sm:$0xff]   ;;  %v1935_v50 = vld [vmem:[#allocation2 + $0xe0] sm:$0xf8] }
 0x1d1   : > { %v3390_v44 = vrot.slane %v3388_v22, 4  ;;  %v3393_v51 = vrot.slane %v3391_v45, 5  ;;  %v5475_v15 = vsel %vm2312_vm13, %v5398_v23, %v5334_v8  ;;  %v3399_v58 = vshll.u32 %v18500_v30, 16  ;;  %v18527_v28 = vpop.permute.xlu1 %5287 }
 0x1d2   : > { %v4411_v53 = vsel %vm4190_vm12, %v4402_v39, %v4410_v27  ;;  %v3398_v5 = vrot.slane %v3396_v49, 4  ;;  %5530 = vst.msk [vmem:[#allocation3 + $0x118] sm:$0xff] %vm2365_vm14, %v5475_v15  ;;  %v1718_v14 = vshrl.u32 %v18489_v46, 16  ;;  %v1721_v21 = vshll.u32 %v18489_v46, 16  ;;  %v16913_v46 = vld [vmem:[#allocation4 + $0x1c0] sm:$0xff]  }
 0x1d3   : > { %v5401_v43 = vsel %vm647_vm0, %v4411_v53, %v5284_v52  ;;  %v3394_v31 = vor.u32 %v3393_v51, %v3390_v44  ;;  %v3401_v24 = vrot.slane %v3399_v58, 5  ;;  %v1726_v8 = vshrl.u32 %v18507_v38, 16  ;;  %v5338_v17 = vpop.permute.xlu0 %5337  ;;  %2106 = vrot.lane.b32.xlu1 %v1418_v7, %s17281_s29  ;;  %v3605_v27 = vld [vmem:[#allocation2 + $0xe0] sm:$0xe0]  ;;  %14058 = vmatprep.subr.bf16.mxu1 %v16913_v46  ;;  %v2501_v51 = vld [vmem:[#allocation2 + $0xf8] sm:$0xf] }
 0x1d4   : > { %v5478_v41 = vsel %vm2312_vm13, %v5401_v43, %v5336_v61  ;;  %v1729_v20 = vshll.u32 %v18507_v38, 16  ;;  %v1720_v52 = vrot.slane %v1718_v14, 2  ;;  %v1723_v9 = vrot.slane %v1721_v21, 3  ;;  %14059 = vmatpush3.bf16.msra.mxu1 %v16915_v33  ;;  %v18546_v14 = vld [vmem:[#allocation2 + $0xf0] sm:$0xf0] }
 0x1d5   : > { %5531 = vst.msk [vmem:[#allocation3 + $0x130] sm:$0xff] %vm2365_vm14, %v5478_v41  ;;  %v4413_v54 = vshrl.u32 %v4164_v19, 16  ;;  %v4416_v40 = vshll.u32 %v4164_v19, 16  ;;  %v3402_v6 = vor.u32 %v3401_v24, %v3398_v5  ;;  %v1728_v2 = vrot.slane %v1726_v8, 2  ;;  %v5340_v49 = vpop.permute.xlu1 %5339  ;;  %v18549_v24 = vld [vmem:[#allocation2 + $0xf0] sm:$0xfc] }
 0x1d6   : > { %v1731_v48 = vrot.slane %v1729_v20, 3  ;;  %v21988_v11 = vshrl.u32 %v18123_v55, 16  ;;  %v1724_v61 = vor.u32 %v1723_v9, %v1720_v52  ;;  %v21989_v3 = vshll.u32 %v18123_v55, 16 }
 0x1d7   : > { %v4415_v22 = vrot.slane %v4413_v54, 5  ;;  %v4418_v45 = vrot.slane %v4416_v40, 6  ;;  %v3403_v36 = vsel %vm3148_vm6, %v3394_v31, %v3402_v6  ;;  %v4430_v7 = vshrl.u32 %v4166_v25, 16  ;;  %v18539_v53 = vpop.permute.xlu0 %5289  ;;  %v4168_v40 = vld [vmem:[#allocation2 + $0xf0] sm:$0xe0] }
 0x1d8   : > { %v4423_v12 = vrot.slane %v21988_v11, 5  ;;  %v4426_v39 = vrot.slane %v21989_v3, 6  ;;  %v1732_v23 = vor.u32 %v1731_v48, %v1728_v2  ;;  %v4433_v44 = vshll.u32 %v4166_v25, 16  ;;  %3828 = vrot.lane.b32.xlu0 %v3403_v36, %s17282_s30 }
 0x1d9   : > { %v4419_v15 = vor.u32 %v4418_v45, %v4415_v22  ;;  %v21990_v58 = vshrl.u32 %v18128_v57, 16  ;;  %v21991_v19 = vshll.u32 %v18128_v57, 16  ;;  %v4432_v21 = vrot.slane %v4430_v7, 5  ;;  %v5580_v8 = vld [vmem:[#allocation3 + $0x118] sm:$0xff]  ;;  %v18555_v46 = vpop.permute.xlu1 %5291 }
 0x1da   : > { %v4427_v5 = vor.u32 %v4426_v39, %v4423_v12  ;;  %v1733_v31 = vsel %vm1478_vm7, %v1724_v61, %v1732_v23  ;;  %v4435_v25 = vrot.slane %v4433_v44, 6  ;;  %v3712_v41 = vrot.slane %v3605_v27, 5  ;;  %v831_v57 = vld [vmem:[#allocation2 + $0xf8] sm:$0x3]  ;;  %15414 = vmatprep.mubr.msk.bf16.mxu0 %vm2365_vm14, %v5580_v8  ;;  %v4170_v39 = vld [vmem:[#allocation2 + $0x100] sm:$0xe0] }
 0x1db   : > { %v4440_v55 = vrot.slane %v21990_v58, 5  ;;  %v4443_v43 = vrot.slane %v21991_v19, 6  ;;  %2158 = vrot.lane.b32.xlu1 %v1733_v31, %s17282_s30  ;;  %v3713_v9 = vrot.slane %v18500_v30, 5  ;;  %v2042_v54 = vrot.slane %v1935_v50, 3  ;;  %v18561_v27 = vpop.permute.xlu0 %5341  ;;  %v18577_v44 = vld [vmem:[#allocation2 + $0xf8] sm:$0x1f] }
 0x1dc   : > { %v4428_v20 = vsel %vm4190_vm12, %v4419_v15, %v4427_v5  ;;  %v4436_v2 = vor.u32 %v4435_v25, %v4432_v21  ;;  %v2043_v48 = vrot.slane %v18507_v38, 3  ;;  %v3089_v11 = vrot.slane %v18546_v14, 4  ;;  %v5583_v12 = vld [vmem:[#allocation3 + $0x130] sm:$0xff] }
 0x1dd   : > { %v4444_v52 = vor.u32 %v4443_v43, %v4440_v55  ;;  %v5404_v6 = vsel %vm647_vm0, %v4428_v20, %v18513_v42  ;;  %v3714_v30 = vsel %vm3669_vm8, %v3712_v41, %v3713_v9  ;;  %v3090_v61 = vrot.slane %v2501_v51, 4  ;;  %15415 = vmatmul.mubr.msk.bf16.gmra.mrb[52].mxu0 %vm2365_vm14, %v5583_v12  ;;  %v3606_v51 = vld [vmem:[#allocation2 + $0xf0] sm:$0xe0]  ;;  %v5344_v15 = vpop.permute.xlu1 %5343  ;;  %v18586_v20 = vld [vmem:[#allocation2 + $0xf8] sm:$0x7] }
 0x1de   : > { %v5481_v33 = vsel %vm2312_vm13, %v5404_v6, %v5338_v17  ;;  %v1419_v22 = vrot.slane %v18549_v24, 2  ;;  %3880 = vrot.lane.b32.xlu0 %v3714_v30, %s17283_s12  ;;  %v2044_v38 = vsel %vm1999_vm9, %v2042_v54, %v2043_v48  ;;  %v1420_v42 = vrot.slane %v831_v57, 2  ;;  %v1936_v43 = vld [vmem:[#allocation2 + $0xf0] sm:$0xf8] }
 0x1df   : > { %v4445_v45 = vsel %vm4190_vm12, %v4436_v2, %v4444_v52  ;;  %5532 = vst.msk [vmem:[#allocation3 + $0x148] sm:$0xff] %vm2365_vm14, %v5481_v33  ;;  %v4447_v3 = vshrl.u32 %v4168_v40, 16  ;;  %2210 = vrot.lane.b32.xlu1 %v2044_v38, %s17283_s12  ;;  %v3091_v17 = vsel %vm3043_vm3, %v3089_v11, %v3090_v61  ;;  %v4450_v36 = vshll.u32 %v4168_v40, 16  ;;  %v18592_v57 = vpop.permute.xlu0 %3812 }
 0x1e0   : > { %v5407_v50 = vsel %vm647_vm0, %v4445_v45, %v18527_v28  ;;  %v21992_v23 = vshrl.u32 %v18141_v26, 16  ;;  %v1421_v58 = vsel %vm1373_vm5, %v1419_v22, %v1420_v42  ;;  %v21993_v19 = vshll.u32 %v18141_v26, 16  ;;  %v16916_v22 = vld [vmem:[#allocation4 + $0x1c8] sm:$0xff]  }
 0x1e1   : > { %v5484_v5 = vsel %vm2312_vm13, %v5407_v50, %v5340_v49  ;;  %v4449_v55 = vrot.slane %v4447_v3, 5  ;;  %v4452_v31 = vrot.slane %v4450_v36, 6  ;;  %v4464_v21 = vshrl.u32 %v4170_v39, 16  ;;  %v2143_v61 = vpop.permute.xlu1 %2142  ;;  %v16917_v45 = vld [vmem:[#allocation4 + $0x188] sm:$0xff]   ;;  %14060 = vmatprep.subr.bf16.mxu1 %v16916_v22 }
 0x1e2   : > { %v4457_v7 = vrot.slane %v21992_v23, 5  ;;  %v4460_v28 = vrot.slane %v21993_v19, 6  ;;  %5533 = vst.msk [vmem:[#allocation3 + $0x160] sm:$0xff] %vm2365_vm14, %v5484_v5  ;;  %v4467_v25 = vshll.u32 %v4170_v39, 16  ;;  %v21994_v41 = vshrl.u32 %v18146_v29, 16  ;;  %3778 = vrot.lane.b32.xlu0 %v3091_v17, %s17281_s29  ;;  %14061 = vmatpush3.bf16.msra.mxu1 %v16917_v45 }
 0x1e3   : > { %v21995_v52 = vshll.u32 %v18146_v29, 16  ;;  %v3715_v54 = vrot.slane %v3606_v51, 5  ;;  %v3716_v26 = vrot.slane %v18577_v44, 5  ;;  %2108 = vrot.lane.b32.xlu1 %v1421_v58, %s17281_s29  ;;  %v4453_v40 = vor.u32 %v4452_v31, %v4449_v55  ;;  %v18600_v29 = vld [vmem:[%s21921_s2] ss:$0 sm:$0xff]  ;;  %v18624_v58 = vpop.f32.mrb[0].mxu1 }
 0x1e4   : > { %v4474_v8 = vrot.slane %v21994_v41, 5  ;;  %v4461_v49 = vor.u32 %v4460_v28, %v4457_v7  ;;  %v4466_v6 = vrot.slane %v4464_v21, 5  ;;  %v4469_v2 = vrot.slane %v4467_v25, 6  ;;  %v3865_v7 = vpop.permute.xlu0 %3864  ;;  %v18630_v21 = vpop.f32.mrb[1].mxu1 }
 0x1e5   : > { %v4477_v9 = vrot.slane %v21995_v52, 6  ;;  %v2045_v48 = vrot.slane %v1936_v43, 3  ;;  %v3717_v12 = vsel %vm3669_vm8, %v3715_v54, %v3716_v26  ;;  %v2046_v30 = vrot.slane %v18586_v20, 3  ;;  %v2195_v31 = vpop.permute.xlu1 %2194 }
 0x1e6   : > { %v18604_v33 = vadd.f32 %v18600_v29, %v18174_v13  ;;  %v4462_v38 = vsel %vm4190_vm12, %v4453_v40, %v4461_v49  ;;  %v4470_v42 = vor.u32 %v4469_v2, %v4466_v6  ;;  %v18609_v3 = vadd.f32 %v18600_v29, %v18178_v35  ;;  %v5586_v50 = vld [vmem:[#allocation3 + $0x148] sm:$0xff]  ;;  %3882 = vrot.lane.b32.xlu0 %v3717_v12, %s17283_s12  ;;  %v16919_v12 = vld [vmem:[#allocation4 + $0x1d0] sm:$0xff]  }
 0x1e7   : > { %v4478_v11 = vor.u32 %v4477_v9, %v4474_v8  ;;  %v3405_v39 = vshrl.u32 %v18546_v14, 16  ;;  %v5410_v17 = vsel %vm647_vm0, %v4462_v38, %v18539_v53  ;;  %v2047_v13 = vsel %vm1999_vm9, %v2045_v48, %v2046_v30  ;;  %15418 = vmatprep.mubr.msk.bf16.mxu0 %vm2365_vm14, %v5586_v50  ;;  %v18636_v8 = vpop.f32.mrb[2].mxu1  ;;  %v16920_v30 = vld [vmem:[#allocation4 + $0x190] sm:$0xff]   ;;  %v833_v38 = vld [vmem:[#allocation2 + $0x108] sm:$0x3]  ;;  %14062 = vmatprep.subr.bf16.mxu1 %v16919_v12 }
 0x1e8   : > { %v3408_v36 = vshll.u32 %v18546_v14, 16  ;;  %v3413_v23 = vshrl.u32 %v18577_v44, 16  ;;  %2212 = vrot.lane.b32.xlu1 %v2047_v13, %s17283_s12  ;;  %v5487_v51 = vsel %vm2312_vm13, %v5410_v17, %v18561_v27  ;;  %v3416_v53 = vshll.u32 %v18577_v44, 16  ;;  %v18642_v26 = vpop.permute.xlu0 %3762  ;;  %14063 = vmatpush3.bf16.msra.mxu1 %v16920_v30 }
 0x1e9   : > { %v4479_v35 = vsel %vm4190_vm12, %v4470_v42, %v4478_v11  ;;  %v3407_v5 = vrot.slane %v3405_v39, 4  ;;  %5534 = vst.msk [vmem:[#allocation3 + $0x178] sm:$0xff] %vm2365_vm14, %v5487_v51  ;;  %v1735_v28 = vshrl.u32 %v18549_v24, 16  ;;  %v5589_v43 = vld [vmem:[#allocation3 + $0x160] sm:$0xff]  ;;  %v1738_v25 = vshll.u32 %v18549_v24, 16  ;;  %v18644_v24 = vpop.f32.mrb[3].mxu1  ;;  %v18656_v42 = vpop.permute.xlu1 %2092 }
 0x1ea   : > { %v5413_v14 = vsel %vm647_vm0, %v4479_v35, %v18555_v46  ;;  %v3410_v55 = vrot.slane %v3408_v36, 5  ;;  %v3415_v19 = vrot.slane %v3413_v23, 4  ;;  %v3418_v44 = vrot.slane %v3416_v53, 5  ;;  %15419 = vmatmul.mubr.msk.bf16.gmra.mrb[56].mxu0 %vm2365_vm14, %v5589_v43  ;;  %v2503_v46 = vld [vmem:[#allocation2 + $0x108] sm:$0xf]  ;;  %v18699_v12 = vpop.f32.mrb[4].mxu1 }
 0x1eb   : > { %v5490_v27 = vsel %vm2312_vm13, %v5413_v14, %v5344_v15  ;;  %v1743_v41 = vshrl.u32 %v18586_v20, 16  ;;  %v1737_v52 = vrot.slane %v1735_v28, 2  ;;  %v1746_v9 = vshll.u32 %v18586_v20, 16  ;;  %v2981_v15 = vld [vmem:[#allocation2 + $0x100] sm:$0xf0] }
 0x1ec   : > { %5535 = vst.msk [vmem:[#allocation3 + $0x190] sm:$0xff] %vm2365_vm14, %v5490_v27  ;;  %v3411_v49 = vor.u32 %v3410_v55, %v3407_v5  ;;  %v628_v54 = vadd.f32 %v18600_v29, %v18196_v60  ;;  %v3419_v40 = vor.u32 %v3418_v44, %v3415_v19  ;;  %v1740_v6 = vrot.slane %v1738_v25, 3  ;;  %v18648_v11 = vld [vmem:[#allocation2 + $0x100] sm:$0xfc]  ;;  %v18672_v51 = vld [vmem:[#allocation2 + $0x108] sm:$0x7] }
 0x1ed   : > { %v1745_v2 = vrot.slane %v1743_v41, 2  ;;  %v620_v48 = vadd.f32 %v18600_v29, %v18201_v56  ;;  %v1748_v22 = vrot.slane %v1746_v9, 3  ;;  %v3995_v60 = vsel %vm2312_vm13, %v18340_v10, %v18592_v57  ;;  %v18662_v57 = vld [vmem:[#allocation2 + $0x108] sm:$0x1f]  ;;  %v18681_v28 = vpop.permute.xlu1 %2144  ;;  %v2484_v41 = vld [vmem:[#allocation2 + $0x70] sm:$0xf8] }
 0x1ee   : > { %v717_v20 = vpack.c.bf16 %v628_v54, %v18604_v33  ;;  %v2326_v45 = vsel %vm2312_vm13, %v18357_v32, %v2143_v61  ;;  %v3420_v39 = vsel %vm3148_vm6, %v3411_v49, %v3419_v40  ;;  %v1741_v56 = vor.u32 %v1740_v6, %v1737_v52  ;;  %v18664_v32 = vpop.permute.xlu0 %3814  ;;  %v5546_v19 = vld [vmem:[#allocation3 + $0x8] sm:$0xff]  ;;  %v814_v54 = vld [vmem:[#allocation2 + $0x70] sm:$0xfe] }
 0x1ef   : > { %v716_v50 = vpack.c.bf16 %v620_v48, %v18609_v3  ;;  %v3092_v17 = vrot.slane %v2981_v15, 4  ;;  %3830 = vrot.lane.b32.xlu0 %v3420_v39, %s17282_s30  ;;  %v1749_v33 = vor.u32 %v1748_v22, %v1745_v2  ;;  %v3093_v36 = vrot.slane %v2503_v46, 4 }
 0x1f0   : > { %v749_v13 = vrot.slane %v717_v20, 4  ;;  %v1422_v10 = vrot.slane %v18648_v11, 2  ;;  %v1423_v23 = vrot.slane %v833_v38, 2  ;;  %v18667_v35 = vsel %vm2365_vm14, %v3995_v60, %v3865_v7  ;;  %v5592_v5 = vld [vmem:[#allocation3 + $0x178] sm:$0xff] }
 0x1f1   : > { %v748_v61 = vrot.slane %v716_v50, 4  ;;  %v18670_v3 = vsel %vm2365_vm14, %v2326_v45, %v2195_v31  ;;  %v1750_v53 = vsel %vm1478_vm7, %v1741_v56, %v1749_v33  ;;  %v3094_v14 = vsel %vm3043_vm3, %v3092_v17, %v3093_v36  ;;  %4118 = vst [vmem:[#allocation3 + $0x98] sm:$0xff] %v18667_v35  ;;  %15422 = vmatprep.mubr.msk.bf16.mxu0 %vm2365_vm14, %v5592_v5  ;;  %v18703_v45 = vpop.f32.mrb[5].mxu1  ;;  %v16923_v36 = vld [vmem:[#allocation4 + $0x198] sm:$0xff]  }
 0x1f2   : > { %794 = vst.msk [vmem:[#allocation2 + $0x120] sm:$0xf0] %vm687_vm11, %v749_v13  ;;  %2450 = vst [vmem:[#allocation3 + $0x90] sm:$0xff] %v18670_v3  ;;  %v3422_v7 = vshrl.u32 %v2981_v15, 16  ;;  %v3425_v55 = vshll.u32 %v2981_v15, 16  ;;  %5937 = vmatprep.mubr.bf16.mxu1 %v18667_v35  ;;  %2160 = vrot.lane.b32.xlu1 %v1750_v53, %s17282_s30  ;;  %v1424_v43 = vsel %vm1373_vm5, %v1422_v10, %v1423_v23  ;;  %v3430_v31 = vshrl.u32 %v18662_v57, 16  ;;  %v18696_v15 = vpop.permute.xlu0 %3866 }
 0x1f3   : > { %795 = vst.msk [vmem:[#allocation2 + $0x128] sm:$0xf] %vm670_vm10, %v749_v13  ;;  %793 = vst.msk [vmem:[#allocation2 + $0x118] sm:$0xf] %vm670_vm10, %v748_v61  ;;  %v3433_v27 = vshll.u32 %v18662_v57, 16  ;;  %v1752_v44 = vshrl.u32 %v18648_v11, 16  ;;  %5938 = vmatmul.mubr.bf16.gmra.mrb[20].mxu1 %v18670_v3  ;;  %3780 = vrot.lane.b32.xlu0 %v3094_v14, %s17281_s29 }
 0x1f4   : > { %792 = vst.msk [vmem:[#allocation2 + $0x110] sm:$0xf0] %vm687_vm11, %v748_v61  ;;  %v5639_v25 = vld [vmem:[#allocation3 + $0x190] sm:$0xff]  ;;  %v3424_v46 = vrot.slane %v3422_v7, 4  ;;  %v3427_v49 = vrot.slane %v3425_v55, 5  ;;  %v1755_v52 = vshll.u32 %v18648_v11, 16  ;;  %v18701_v11 = vpop.permute.xlu1 %2196 }
 0x1f5   : > { %v1760_v9 = vshrl.u32 %v18672_v51, 16  ;;  %15423 = vmatmul.mubr.msk.bf16.gmra.mrb[60].mxu0 %vm2365_vm14, %v5639_v25  ;;  %v3432_v40 = vrot.slane %v3430_v31, 4  ;;  %v3435_v6 = vrot.slane %v3433_v27, 5  ;;  %v1754_v2 = vrot.slane %v1752_v44, 2  ;;  %v18708_v33 = vpop.f32.mrb[6].mxu1  ;;  %v16922_v13 = vld [vmem:[#allocation4 + $0x1d8] sm:$0xff]  }
 0x1f6   : > { %v1763_v48 = vshll.u32 %v18672_v51, 16  ;;  %6354 = vmatprep.mubr.bf16.mxu0 %v5546_v19  ;;  %v3428_v30 = vor.u32 %v3427_v49, %v3424_v46  ;;  %v1757_v22 = vrot.slane %v1755_v52, 3  ;;  %v2643_v60 = vshrl.u32 %v2484_v41, 16  ;;  %2110 = vrot.lane.b32.xlu1 %v1424_v43, %s17281_s29  ;;  %v3607_v14 = vld [vmem:[#allocation2 + $0x100] sm:$0xe0]  ;;  %v18712_v7 = vpop.permute.xlu0 %3764  ;;  %v18714_v55 = vpop.f32.mrb[7].mxu1 }
 0x1f7   : > { %v1762_v20 = vrot.slane %v1760_v9, 2  ;;  %v3436_v38 = vor.u32 %v3435_v6, %v3432_v40  ;;  %v2646_v56 = vshll.u32 %v2484_v41, 16  ;;  %v21996_v50 = vshrl.u32 %v18176_v16, 16  ;;  %v1937_v44 = vld [vmem:[#allocation2 + $0x100] sm:$0xf8]  ;;  %14064 = vmatprep.subr.bf16.mxu1 %v16922_v13  ;;  %v16907_v6 = vld [vmem:[#allocation4 + $0x88] sm:$0xff]  }
 0x1f8   : > { %v1765_v39 = vrot.slane %v1763_v48, 3  ;;  %v1758_v10 = vor.u32 %v1757_v22, %v1754_v2  ;;  %v2645_v61 = vrot.slane %v2643_v60, 3  ;;  %v21997_v23 = vshll.u32 %v18176_v16, 16  ;;  %v4139_v9 = vld [vmem:[#allocation2 + $0x8] sm:$0x3f]  ;;  %v18722_v40 = vpop.permute.xlu1 %2094  ;;  %14065 = vmatpush3.bf16.msra.mxu1 %v16923_v36 }
 0x1f9   : > { %v2653_v17 = vrot.slane %v21996_v50, 3  ;;  %v973_v53 = vshrl.u32 %v814_v54, 16  ;;  %v3437_v19 = vsel %vm3148_vm6, %v3428_v30, %v3436_v38  ;;  %v2648_v31 = vrot.slane %v2646_v56, 4  ;;  %v4633_v22 = vld [vmem:[#allocation2] sm:$0xc0] }
 0x1fa   : > { %v2656_v5 = vrot.slane %v21997_v23, 4  ;;  %v1766_v43 = vor.u32 %v1765_v39, %v1762_v20  ;;  %v976_v27 = vshll.u32 %v814_v54, 16  ;;  %3832 = vrot.lane.b32.xlu0 %v3437_v19, %s17282_s30  ;;  %v21998_v16 = vshrl.u32 %v18183_v4, 16  ;;  %v5545_v20 = vld [vmem:[#allocation3] sm:$0xff]  ;;  %v18728_v56 = vpop.permute.xlu0 %3816 }
 0x1fb   : > { %v975_v41 = vrot.slane %v973_v53, 1  ;;  %v21999_v49 = vshll.u32 %v18183_v4, 16  ;;  %v2649_v54 = vor.u32 %v2648_v31, %v2645_v61  ;;  %v3718_v30 = vrot.slane %v3607_v14, 5  ;;  %v17119_v61 = vld [vmem:[#allocation4 + $0x80] sm:$0xff]   ;;  %v17120_v23 = vld [vmem:[#allocation3 + $0x20] sm:$0xff] }
 0x1fc   : > { %v2657_v25 = vor.u32 %v2656_v5, %v2653_v17  ;;  %v983_v46 = vrot.slane %v21998_v16, 1  ;;  %v1767_v2 = vsel %vm1478_vm7, %v1758_v10, %v1766_v43  ;;  %v978_v48 = vrot.slane %v976_v27, 2  ;;  %v4790_v10 = vld [vmem:[#allocation2 + $0x8] sm:$0x7f]  ;;  %v18735_v14 = vld [vmem:[#allocation2 + $0x110] sm:$0xf0]  ;;  %v18739_v43 = vpop.permute.xlu1 %2146 }
 0x1fd   : > { %v986_v52 = vrot.slane %v21999_v49, 2  ;;  %2162 = vrot.lane.b32.xlu1 %v1767_v2, %s17282_s30  ;;  %v3719_v38 = vrot.slane %v18662_v57, 5  ;;  %v2048_v39 = vrot.slane %v1937_v44, 3  ;;  %v2049_v4 = vrot.slane %v18672_v51, 3  ;;  %6355 = vmatmul.mubr.bf16.vlgmr.msra.gmra.mrb[64].mxu0 %v5545_v20  ;;  %v18737_v19 = vld [vmem:[#allocation2 + $0x80] sm:$0xf8] }
 0x1fe   : > { %v2658_v50 = vsel %vm2522_vm15, %v2649_v54, %v2657_v25  ;;  %v979_v17 = vor.u32 %v978_v48, %v975_v41  ;;  %v4712_v13 = vrot.slane %v4633_v22, 6  ;;  %v4713_v36 = vrot.slane %v4139_v9, 6  ;;  %15427 = vmatpush3.bf16.msra.mxu0 %v17119_v61  ;;  %6362 = vmatprep.mubr.bf16.mxu0 %v17120_v23  ;;  %v16910_v31 = vld [vmem:[#allocation4 + $0x90] sm:$0xff]   ;;  %v2505_v41 = vld [vmem:[#allocation2 + $0x118] sm:$0xf]  ;;  %v18753_v48 = vpop.permute.xlu0 %3868 }
 0x1ff   : > { %v987_v60 = vor.u32 %v986_v52, %v983_v46  ;;  %v3927_v5 = vsel %vm647_vm0, %v2658_v50, %v18642_v26  ;;  %v3720_v57 = vsel %vm3669_vm8, %v3718_v30, %v3719_v38  ;;  %v2050_v51 = vsel %vm1999_vm9, %v2048_v39, %v2049_v4  ;;  %15428 = vmatprep.subr.bf16.mxu0 %v16907_v6  ;;  %v835_v16 = vld [vmem:[#allocation2 + $0x118] sm:$0x3]  ;;  %v18746_v46 = vpop.f32.mrb[8].mxu1  ;;  %v18751_v54 = vld [vmem:[#allocation2 + $0x110] sm:$0xfc] }
 0x200   : > { %v4818_v53 = vshrl.u32 %v4633_v22, 16  ;;  %3884 = vrot.lane.b32.xlu0 %v3720_v57, %s17283_s12  ;;  %v3997_v26 = vsel %vm2312_vm13, %v3927_v5, %v18664_v32  ;;  %v4714_v44 = vsel %vm4711_vm2, %v4712_v13, %v4713_v36  ;;  %v4821_v25 = vshll.u32 %v4633_v22, 16  ;;  %v18755_v32 = vpop.f32.mrb[9].mxu1 }
 0x201   : > { %v988_v27 = vsel %vm852_vm1, %v979_v17, %v987_v60  ;;  %2214 = vrot.lane.b32.xlu1 %v2050_v51, %s17283_s12  ;;  %v4826_v9 = vshrl.u32 %v4790_v10, 16  ;;  %v4829_v2 = vshll.u32 %v4790_v10, 16  ;;  %v18761_v20 = vsel %vm2365_vm14, %v3997_v26, %v18696_v15  ;;  %v816_v60 = vld [vmem:[#allocation2 + $0x80] sm:$0xfe]  ;;  %v16914_v15 = vld [vmem:[#allocation4 + $0x98] sm:$0xff]   ;;  %v18772_v17 = vpop.f32.mrb[10].mxu1 }
 0x202   : > { %v2257_v49 = vsel %vm647_vm0, %v988_v27, %v18656_v42  ;;  %v4820_v52 = vrot.slane %v4818_v53, 6  ;;  %v4823_v22 = vrot.slane %v4821_v25, 7  ;;  %v3095_v42 = vrot.slane %v18735_v14, 4  ;;  %15429 = vmatpush3.bf16.msra.mxu0 %v16907_v6  ;;  %4119 = vst [vmem:[#allocation3 + $0xb0] sm:$0xff] %v18761_v20  ;;  %5945 = vmatprep.mubr.bf16.mxu1 %v18761_v20  ;;  %v18779_v10 = vpop.f32.mrb[11].mxu1  ;;  %v17121_v26 = vld [vmem:[#allocation3 + $0x18] sm:$0xff] }
 0x203   : > { %v2328_v30 = vsel %vm2312_vm13, %v2257_v49, %v18681_v28  ;;  %v4828_v38 = vrot.slane %v4826_v9, 6  ;;  %v4831_v39 = vrot.slane %v4829_v2, 7  ;;  %v3096_v50 = vrot.slane %v2505_v41, 4  ;;  %v18770_v28 = vpop.permute.xlu1 %2198  ;;  %15430 = vmatprep.subr.bf16.mxu0 %v16910_v31  ;;  %v18785_v53 = vld [vmem:[#allocation2 + $0x118] sm:$0x1f] }
 0x204   : > { %v18767_v4 = vsel %vm2365_vm14, %v2328_v30, %v18701_v11  ;;  %5259 = vrot.lane.b32.xlu0 %v4714_v44, %s17281_s29  ;;  %v4824_v6 = vor.u32 %v4823_v22, %v4820_v52  ;;  %v1425_v13 = vrot.slane %v18751_v54, 2  ;;  %v1426_v36 = vrot.slane %v835_v16, 2  ;;  %v3608_v27 = vld [vmem:[#allocation2 + $0x110] sm:$0xe0]  ;;  %v18787_v44 = vpop.permute.xlu0 %3766 }
 0x205   : > { %2451 = vst [vmem:[#allocation3 + $0xa8] sm:$0xff] %v18767_v4  ;;  %v2660_v11 = vshrl.u32 %v18737_v19, 16  ;;  %5946 = vmatmul.mubr.bf16.gmra.mrb[24].mxu1 %v18767_v4  ;;  %v4832_v61 = vor.u32 %v4831_v39, %v4828_v38  ;;  %v3097_v23 = vsel %vm3043_vm3, %v3095_v42, %v3096_v50  ;;  %v2663_v5 = vshll.u32 %v18737_v19, 16  ;;  %6363 = vmatmul.mubr.bf16.gmra.mrb[68].mxu0 %v17121_v26  ;;  %v18792_v9 = vld [vmem:[#allocation2 + $0x110] sm:$0xc0]  ;;  %v17122_v19 = vld [vmem:[#allocation3 + $0x38] sm:$0xff] }
 0x206   : > { %v22000_v57 = vshrl.u32 %v18204_v0, 16  ;;  %v1427_v25 = vsel %vm1373_vm5, %v1425_v13, %v1426_v36  ;;  %v22001_v16 = vshll.u32 %v18204_v0, 16  ;;  %v990_v52 = vshrl.u32 %v816_v60, 16  ;;  %6370 = vmatprep.mubr.bf16.mxu0 %v17122_v19  ;;  %15431 = vmatpush3.bf16.msra.mxu0 %v16910_v31  ;;  %v4173_v39 = vld [vmem:[#allocation2 + $0x118] sm:$0x3f]  ;;  %v16918_v13 = vld [vmem:[#allocation4 + $0xa0] sm:$0xff]  }
 0x207   : > { %v2662_v41 = vrot.slane %v2660_v11, 3  ;;  %v4833_v2 = vsel %vm4816_vm4, %v4824_v6, %v4832_v61  ;;  %v2665_v30 = vrot.slane %v2663_v5, 4  ;;  %v993_v22 = vshll.u32 %v816_v60, 16  ;;  %v18797_v50 = vpop.permute.xlu1 %2096  ;;  %15432 = vmatprep.subr.bf16.mxu0 %v16914_v15 }
 0x208   : > { %v2670_v51 = vrot.slane %v22000_v57, 3  ;;  %v2673_v49 = vrot.slane %v22001_v16, 4  ;;  %v22002_v42 = vshrl.u32 %v18207_v63, 16  ;;  %5311 = vrot.lane.b32.xlu1 %v4833_v2, %s17282_s30  ;;  %3782 = vrot.lane.b32.xlu0 %v3097_v23, %s17281_s29  ;;  %v992_v36 = vrot.slane %v990_v52, 1  ;;  %v18805_v26 = vpop.permute.xlu0 %3818  ;;  %v16921_v52 = vld [vmem:[#allocation4 + $0xa8] sm:$0xff]  }
 0x209   : > { %v22003_v31 = vshll.u32 %v18207_v63, 16  ;;  %v3721_v6 = vrot.slane %v3608_v27, 5  ;;  %v2666_v61 = vor.u32 %v2665_v30, %v2662_v41  ;;  %v995_v60 = vrot.slane %v993_v22, 2  ;;  %v16925_v30 = vld [vmem:[#allocation4 + $0x250] sm:$0xff]  }
 0x20a   : > { %v1000_v38 = vrot.slane %v22002_v42, 1  ;;  %v2674_v0 = vor.u32 %v2673_v49, %v2670_v51  ;;  %v3722_v5 = vrot.slane %v18785_v53, 5  ;;  %v4763_v57 = vrot.slane %v18792_v9, 6  ;;  %15433 = vmatpush3.bf16.msra.mxu0 %v16914_v15  ;;  %v18827_v42 = vld [vmem:[#allocation2 + $0x118] sm:$0x7]  ;;  %14184 = vmatprep.subr.bf16.mxu1 %v16925_v30 }
 0x20b   : > { %v1003_v11 = vrot.slane %v22003_v31, 2  ;;  %v4764_v19 = vrot.slane %v4173_v39, 6  ;;  %v18809_v2 = vadd.f32 %v18600_v29, %v18281_v18  ;;  %v18813_v23 = vadd.f32 %v18600_v29, %v18290_v62  ;;  %v18818_v49 = vpop.permute.xlu1 %2148  ;;  %15434 = vmatprep.subr.bf16.mxu0 %v16918_v13 }
 0x20c   : > { %v2675_v63 = vsel %vm2522_vm15, %v2666_v61, %v2674_v0  ;;  %v996_v51 = vor.u32 %v995_v60, %v992_v36  ;;  %v3723_v27 = vsel %vm3669_vm8, %v3721_v6, %v3722_v5  ;;  %v3439_v41 = vshrl.u32 %v18735_v14, 16  ;;  %2112 = vrot.lane.b32.xlu1 %v1427_v25, %s17281_s29  ;;  %v17123_v36 = vld [vmem:[#allocation3 + $0x30] sm:$0xff] }
 0x20d   : > { %v1004_v16 = vor.u32 %v1003_v11, %v1000_v38  ;;  %v3930_v18 = vsel %vm647_vm0, %v2675_v63, %v18712_v7  ;;  %3886 = vrot.lane.b32.xlu0 %v3723_v27, %s17283_s12  ;;  %v4765_v62 = vsel %vm4711_vm2, %v4763_v57, %v4764_v19  ;;  %v3442_v15 = vshll.u32 %v18735_v14, 16  ;;  %6371 = vmatmul.mubr.bf16.gmra.mrb[72].mxu0 %v17123_v36  ;;  %v18833_v7 = vpop.permute.xlu0 %3870  ;;  %v17124_v61 = vld [vmem:[#allocation3 + $0x50] sm:$0xff] }
 0x20e   : > { %v3447_v22 = vshrl.u32 %v18785_v53, 16  ;;  %v3999_v39 = vsel %vm2312_vm13, %v3930_v18, %v18728_v56  ;;  %v3441_v0 = vrot.slane %v3439_v41, 4  ;;  %v3450_v25 = vshll.u32 %v18785_v53, 16  ;;  %6378 = vmatprep.mubr.bf16.mxu0 %v17124_v61  ;;  %15435 = vmatpush3.bf16.msra.mxu0 %v16918_v13 }
 0x20f   : > { %v1005_v38 = vsel %vm852_vm1, %v996_v51, %v1004_v16  ;;  %v3444_v31 = vrot.slane %v3442_v15, 5  ;;  %v1769_v6 = vshrl.u32 %v18751_v54, 16  ;;  %v1772_v53 = vshll.u32 %v18751_v54, 16  ;;  %v18842_v57 = vpop.permute.xlu1 %2200  ;;  %15436 = vmatprep.subr.bf16.mxu0 %v16921_v52  ;;  %v16924_v16 = vld [vmem:[#allocation4 + $0x1e0] sm:$0xff]  }
 0x210   : > { %v2260_v14 = vsel %vm647_vm0, %v1005_v38, %v18722_v40  ;;  %v3449_v11 = vrot.slane %v3447_v22, 4  ;;  %v3452_v60 = vrot.slane %v3450_v25, 5  ;;  %v1777_v5 = vshrl.u32 %v18827_v42, 16  ;;  %5293 = vrot.lane.b32.xlu1 %v4765_v62, %s17281_s29  ;;  %v1938_v51 = vld [vmem:[#allocation2 + $0x110] sm:$0xf8] }
 0x211   : > { %v2330_v56 = vsel %vm2312_vm13, %v2260_v14, %v18739_v43  ;;  %v3445_v40 = vor.u32 %v3444_v31, %v3441_v0  ;;  %v1771_v19 = vrot.slane %v1769_v6, 2  ;;  %v1780_v63 = vshll.u32 %v18827_v42, 16  ;;  %v18848_v43 = vpop.f32.mrb[12].mxu1  ;;  %v18852_v18 = vpop.permute.xlu0 %3768  ;;  %v4807_v0 = vld [vmem:[#allocation2 + $0x118] sm:$0x7f] }
 0x212   : > { %v644_v13 = vadd.f32 %v18600_v29, %v18299_v37  ;;  %v3453_v27 = vor.u32 %v3452_v60, %v3449_v11  ;;  %v1774_v54 = vrot.slane %v1772_v53, 3  ;;  %v1779_v41 = vrot.slane %v1777_v5, 2  ;;  %v18854_v15 = vpop.f32.mrb[13].mxu1  ;;  %15437 = vmatpush3.bf16.msra.mxu0 %v16921_v52  ;;  %v818_v60 = vld [vmem:[#allocation2 + $0x90] sm:$0xfe]  ;;  %v17125_v53 = vld [vmem:[#allocation3 + $0x48] sm:$0xff] }
 0x213   : > { %v636_v30 = vadd.f32 %v18600_v29, %v18304_v47  ;;  %v1782_v62 = vrot.slane %v1780_v63, 3  ;;  %v18859_v38 = vsel %vm2365_vm14, %v3999_v39, %v18753_v48  ;;  %v18863_v37 = vsel %vm2365_vm14, %v2330_v56, %v18770_v28  ;;  %v18865_v25 = vpop.f32.mrb[14].mxu1  ;;  %v2488_v48 = vld [vmem:[#allocation2 + $0x90] sm:$0xf8]  ;;  %v18872_v39 = vpop.permute.xlu1 %2098  ;;  %15470 = vmatprep.subr.bf16.mxu0 %v16924_v16  ;;  %v17126_v63 = vld [vmem:[#allocation3 + $0x68] sm:$0xff] }
 0x214   : > { %v719_v22 = vpack.c.bf16 %v644_v13, %v18809_v2  ;;  %22004 = vst [vmem:[#allocation11_spill] sm:$0xff] %v18865_v25  ;;  %v3454_v47 = vsel %vm3148_vm6, %v3445_v40, %v3453_v27  ;;  %v1775_v29 = vor.u32 %v1774_v54, %v1771_v19  ;;  %4120 = vst [vmem:[#allocation3 + $0xc8] sm:$0xff] %v18859_v38  ;;  %v2051_v2 = vrot.slane %v1938_v51, 3  ;;  %v18874_v28 = vpop.f32.mrb[15].mxu1 }
 0x215   : > { %v718_v36 = vpack.c.bf16 %v636_v30, %v18813_v23  ;;  %2452 = vst [vmem:[#allocation3 + $0xc0] sm:$0xff] %v18863_v37  ;;  %5953 = vmatprep.mubr.bf16.mxu1 %v18859_v38  ;;  %22005 = vst [vmem:[#allocation12_spill] sm:$0xff] %v18874_v28  ;;  %3834 = vrot.lane.b32.xlu0 %v3454_v47, %s17282_s30  ;;  %v1783_v52 = vor.u32 %v1782_v62, %v1779_v41  ;;  %v2052_v31 = vrot.slane %v18827_v42, 3  ;;  %v18881_v5 = vpop.permute.xlu0 %3820 }
 0x216   : > { %v751_v14 = vrot.slane %v719_v22, 4  ;;  %v5107_v23 = vshrl.u32 %v18792_v9, 16  ;;  %5954 = vmatmul.mubr.bf16.gmra.mrb[28].mxu1 %v18863_v37  ;;  %v5110_v6 = vshll.u32 %v18792_v9, 16  ;;  %v5115_v61 = vshrl.u32 %v4807_v0, 16  ;;  %6379 = vmatmul.mubr.bf16.gmra.mrb[76].mxu0 %v17125_v53 }
 0x217   : > { %v750_v11 = vrot.slane %v718_v36, 4  ;;  %v5118_v56 = vshll.u32 %v4807_v0, 16  ;;  %v1784_v16 = vsel %vm1478_vm7, %v1775_v29, %v1783_v52  ;;  %v2053_v42 = vsel %vm1999_vm9, %v2051_v2, %v2052_v31  ;;  %6386 = vmatprep.mubr.bf16.mxu0 %v17126_v63  ;;  %v18890_v54 = vpop.permute.xlu1 %2150  ;;  %v4651_v31 = vld [vmem:[#allocation2 + $0x120] sm:$0xc0] }
 0x218   : > { %798 = vst.msk [vmem:[#allocation2 + $0x140] sm:$0xf0] %vm687_vm11, %v751_v14  ;;  %v5109_v40 = vrot.slane %v5107_v23, 6  ;;  %v2677_v19 = vshrl.u32 %v2488_v48, 16  ;;  %2164 = vrot.lane.b32.xlu1 %v1784_v16, %s17282_s30  ;;  %v5112_v9 = vrot.slane %v5110_v6, 7  ;;  %v5117_v13 = vrot.slane %v5115_v61, 6 }
 0x219   : > { %799 = vst.msk [vmem:[#allocation2 + $0x148] sm:$0xf] %vm670_vm10, %v751_v14  ;;  %797 = vst.msk [vmem:[#allocation2 + $0x138] sm:$0xf] %vm670_vm10, %v750_v11  ;;  %v5120_v51 = vrot.slane %v5118_v56, 7  ;;  %v2680_v27 = vshll.u32 %v2488_v48, 16  ;;  %2216 = vrot.lane.b32.xlu0 %v2053_v42, %s17283_s12  ;;  %v18897_v23 = vpop.permute.xlu0 %3872 }
 0x21a   : > { %796 = vst.msk [vmem:[#allocation2 + $0x130] sm:$0xf0] %vm687_vm11, %v750_v11  ;;  %v2679_v41 = vrot.slane %v2677_v19, 3  ;;  %v22006_v30 = vshrl.u32 %v18225_v34, 16  ;;  %v22007_v22 = vshll.u32 %v18225_v34, 16  ;;  %v1007_v47 = vshrl.u32 %v818_v60, 16 }
 0x21b   : > { %v5113_v29 = vor.u32 %v5112_v9, %v5109_v40  ;;  %v5121_v36 = vor.u32 %v5120_v51, %v5117_v13  ;;  %v2682_v2 = vrot.slane %v2680_v27, 4  ;;  %v1010_v52 = vshll.u32 %v818_v60, 16  ;;  %v4175_v14 = vld [vmem:[#allocation2 + $0x128] sm:$0x3f]  ;;  %v18904_v63 = vpop.permute.xlu1 %2202 }
 0x21c   : > { %v2687_v62 = vrot.slane %v22006_v30, 3  ;;  %v2690_v0 = vrot.slane %v22007_v22, 4  ;;  %v1009_v11 = vrot.slane %v1007_v47, 1  ;;  %v22008_v6 = vshrl.u32 %v18228_v1, 16  ;;  %v4808_v16 = vld [vmem:[#allocation2 + $0x128] sm:$0x7f] }
 0x21d   : > { %v22009_v56 = vshll.u32 %v18228_v1, 16  ;;  %v5122_v34 = vsel %vm4816_vm4, %v5113_v29, %v5121_v36  ;;  %v2683_v42 = vor.u32 %v2682_v2, %v2679_v41  ;;  %v1012_v40 = vrot.slane %v1010_v52, 2  ;;  %v2507_v22 = vld [vmem:[#allocation2 + $0x128] sm:$0xf]  ;;  %v17127_v47 = vld [vmem:[#allocation3 + $0x60] sm:$0xff]  ;;  %v18908_v41 = vpop.permute.xlu0 %3770 }
 0x21e   : > { %v2691_v48 = vor.u32 %v2690_v0, %v2687_v62  ;;  %v1017_v61 = vrot.slane %v22008_v6, 1  ;;  %v4766_v19 = vrot.slane %v4651_v31, 6  ;;  %5345 = vrot.lane.b32.xlu1 %v5122_v34, %s17282_s30  ;;  %v4767_v9 = vrot.slane %v4175_v14, 6  ;;  %v2983_v0 = vld [vmem:[#allocation2 + $0x120] sm:$0xf0]  ;;  %6387 = vmatmul.mubr.bf16.gmra.mrb[80].mxu0 %v17127_v47 }
 0x21f   : > { %v1020_v53 = vrot.slane %v22009_v56, 2  ;;  %v5124_v13 = vshrl.u32 %v4651_v31, 16  ;;  %v5127_v51 = vshll.u32 %v4651_v31, 16  ;;  %v1013_v30 = vor.u32 %v1012_v40, %v1009_v11  ;;  %v837_v14 = vld [vmem:[#allocation2 + $0x128] sm:$0x3]  ;;  %v17128_v6 = vld [vmem:[#allocation3 + $0x80] sm:$0xff] }
 0x220   : > { %v2692_v27 = vsel %vm2522_vm15, %v2683_v42, %v2691_v48  ;;  %v5132_v62 = vshrl.u32 %v4808_v16, 16  ;;  %v5135_v1 = vshll.u32 %v4808_v16, 16  ;;  %v4768_v36 = vsel %vm4711_vm2, %v4766_v19, %v4767_v9  ;;  %v1313_v31 = vld [vmem:[#allocation2 + $0x120] sm:$0xfc]  ;;  %6394 = vmatprep.mubr.bf16.mxu0 %v17128_v6  ;;  %v18921_v40 = vld [vmem:[#allocation2 + $0x128] sm:$0x1f] }
 0x221   : > { %v1021_v60 = vor.u32 %v1020_v53, %v1017_v61  ;;  %v3933_v29 = vsel %vm647_vm0, %v2692_v27, %v18787_v44  ;;  %v5126_v2 = vrot.slane %v5124_v13, 6  ;;  %v5129_v52 = vrot.slane %v5127_v51, 7  ;;  %5295 = vrot.lane.b32.xlu0 %v4768_v36, %s17281_s29  ;;  %v18917_v53 = vpop.permute.xlu1 %2100  ;;  %v4809_v25 = vld [vmem:[#allocation2 + $0x138] sm:$0x7f] }
 0x222   : > { %v5134_v11 = vrot.slane %v5132_v62, 6  ;;  %v5137_v61 = vrot.slane %v5135_v1, 7  ;;  %v4001_v56 = vsel %vm2312_vm13, %v3933_v29, %v18805_v26  ;;  %v3098_v34 = vrot.slane %v2983_v0, 4  ;;  %v18936_v62 = vpop.permute.xlu0 %3822 }
 0x223   : > { %v1022_v48 = vsel %vm852_vm1, %v1013_v30, %v1021_v60  ;;  %v5130_v16 = vor.u32 %v5129_v52, %v5126_v2  ;;  %v3099_v42 = vrot.slane %v2507_v22, 4  ;;  %v1428_v9 = vrot.slane %v1313_v31, 2  ;;  %v18934_v30 = vld [vmem:[#allocation2 + $0x128] sm:$0x7] }
 0x224   : > { %v2263_v44 = vsel %vm647_vm0, %v1022_v48, %v18797_v50  ;;  %v5138_v19 = vor.u32 %v5137_v61, %v5134_v11  ;;  %v1429_v13 = vrot.slane %v837_v14, 2  ;;  %v18928_v26 = vsel %vm2365_vm14, %v4001_v56, %v18833_v7  ;;  %v17129_v48 = vld [vmem:[#allocation3 + $0x78] sm:$0xff] }
 0x225   : > { %v2332_v60 = vsel %vm2312_vm13, %v2263_v44, %v18818_v49  ;;  %v3100_v51 = vsel %vm3043_vm3, %v3098_v34, %v3099_v42  ;;  %v3456_v27 = vshrl.u32 %v2983_v0, 16  ;;  %4121 = vst [vmem:[#allocation3 + $0xe0] sm:$0xff] %v18928_v26  ;;  %v3459_v7 = vshll.u32 %v2983_v0, 16  ;;  %5961 = vmatprep.mubr.bf16.mxu1 %v18928_v26  ;;  %v18950_v11 = vpop.permute.xlu1 %2152  ;;  %v820_v34 = vld [vmem:[#allocation2 + $0xa0] sm:$0xfe] }
 0x226   : > { %v18932_v50 = vsel %vm2365_vm14, %v2332_v60, %v18842_v57  ;;  %v5139_v1 = vsel %vm4816_vm4, %v5130_v16, %v5138_v19  ;;  %3784 = vrot.lane.b32.xlu0 %v3100_v51, %s17281_s29  ;;  %v1430_v49 = vsel %vm1373_vm5, %v1428_v9, %v1429_v13  ;;  %v3464_v22 = vshrl.u32 %v18921_v40, 16  ;;  %v2490_v57 = vld [vmem:[#allocation2 + $0xa0] sm:$0xf8]  ;;  %6395 = vmatmul.mubr.bf16.gmra.mrb[84].mxu0 %v17129_v48 }
 0x227   : > { %2453 = vst [vmem:[#allocation3 + $0xd8] sm:$0xff] %v18932_v50  ;;  %5347 = vrot.lane.b32.xlu1 %v5139_v1, %s17282_s30  ;;  %v3458_v47 = vrot.slane %v3456_v27, 4  ;;  %v3467_v29 = vshll.u32 %v18921_v40, 16  ;;  %v1786_v36 = vshrl.u32 %v1313_v31, 16  ;;  %v1789_v2 = vshll.u32 %v1313_v31, 16  ;;  %5962 = vmatmul.mubr.bf16.gmra.mrb[32].mxu1 %v18932_v50  ;;  %v18953_v31 = vpop.permute.xlu0 %3874 }
 0x228   : > { %v3461_v52 = vrot.slane %v3459_v7, 5  ;;  %v3466_v14 = vrot.slane %v3464_v22, 4  ;;  %v1794_v6 = vshrl.u32 %v18934_v30, 16  ;;  %v1797_v0 = vshll.u32 %v18934_v30, 16  ;;  %6402 = vmatprep.mubr.bf16.mxu0 %v18667_v35  ;;  %v3609_v22 = vld [vmem:[#allocation2 + $0x120] sm:$0xe0] }
 0x229   : > { %v3469_v61 = vrot.slane %v3467_v29, 5  ;;  %v1788_v56 = vrot.slane %v1786_v36, 2  ;;  %v1791_v44 = vrot.slane %v1789_v2, 3  ;;  %v2694_v16 = vshrl.u32 %v2490_v57, 16  ;;  %v1939_v29 = vld [vmem:[#allocation2 + $0x120] sm:$0xf8] }
 0x22a   : > { %v3462_v42 = vor.u32 %v3461_v52, %v3458_v47  ;;  %v1796_v19 = vrot.slane %v1794_v6, 2  ;;  %v1799_v60 = vrot.slane %v1797_v0, 3  ;;  %v2697_v9 = vshll.u32 %v2490_v57, 16  ;;  %v4177_v47 = vld [vmem:[#allocation2 + $0x138] sm:$0x3f]  ;;  %v18960_v52 = vpop.permute.xlu1 %2204 }
 0x22b   : > { %2114 = vrot.lane.b32.xlu1 %v1430_v49, %s17281_s29  ;;  %v3470_v13 = vor.u32 %v3469_v61, %v3466_v14  ;;  %v1792_v51 = vor.u32 %v1791_v44, %v1788_v56  ;;  %v2696_v27 = vrot.slane %v2694_v16, 3  ;;  %v22010_v1 = vshrl.u32 %v18248_v59, 16  ;;  %v22012_v14 = vld [vmem:[#allocation10_spill] sm:$0xff]  ;;  %v4652_v44 = vld [vmem:[#allocation2 + $0x130] sm:$0xc0]  ;;  %v18967_v16 = vpop.permute.xlu0 %3772 }
 0x22c   : > { %v1800_v36 = vor.u32 %v1799_v60, %v1796_v19  ;;  %v2699_v2 = vrot.slane %v2697_v9, 4  ;;  %v22011_v35 = vshll.u32 %v18248_v59, 16  ;;  %v1024_v28 = vshrl.u32 %v820_v34, 16 }
 0x22d   : > { %v2704_v7 = vrot.slane %v22010_v1, 3  ;;  %v3471_v57 = vsel %vm3148_vm6, %v3462_v42, %v3470_v13  ;;  %v1027_v49 = vshll.u32 %v820_v34, 16  ;;  %v22013_v6 = vshrl.u32 %v22012_v14, 16 }
 0x22e   : > { %v2707_v48 = vrot.slane %v22011_v35, 4  ;;  %v22014_v61 = vshll.u32 %v22012_v14, 16  ;;  %3836 = vrot.lane.b32.xlu0 %v3471_v57, %s17282_s30  ;;  %v1801_v59 = vsel %vm1478_vm7, %v1792_v51, %v1800_v36  ;;  %v2700_v19 = vor.u32 %v2699_v2, %v2696_v27  ;;  %6403 = vmatmul.mubr.bf16.gmra.mrb[88].mxu0 %v18670_v3  ;;  %v18975_v57 = vpop.permute.xlu1 %2102  ;;  %v18988_v2 = vld [vmem:[#allocation2 + $0x130] sm:$0xf0] }
 0x22f   : > { %v1034_v0 = vrot.slane %v22013_v6, 1  ;;  %v1026_v9 = vrot.slane %v1024_v28, 1  ;;  %2166 = vrot.lane.b32.xlu1 %v1801_v59, %s17282_s30  ;;  %v1029_v42 = vrot.slane %v1027_v49, 2  ;;  %v3724_v13 = vrot.slane %v3609_v22, 5  ;;  %6410 = vmatprep.mubr.bf16.mxu0 %v18761_v20  ;;  %v18993_v49 = vld [vmem:[#allocation2 + $0x130] sm:$0xfc] }
 0x230   : > { %v1037_v56 = vrot.slane %v22014_v61, 2  ;;  %v2708_v60 = vor.u32 %v2707_v48, %v2704_v7  ;;  %v3725_v1 = vrot.slane %v18921_v40, 5  ;;  %v4769_v14 = vrot.slane %v4652_v44, 6  ;;  %v18982_v40 = vpop.permute.xlu0 %3824  ;;  %v839_v59 = vld [vmem:[#allocation2 + $0x138] sm:$0x3] }
 0x231   : > { %v4770_v6 = vrot.slane %v4177_v47, 6  ;;  %v2054_v61 = vrot.slane %v1939_v29, 3  ;;  %v1030_v51 = vor.u32 %v1029_v42, %v1026_v9  ;;  %v2055_v7 = vrot.slane %v18934_v30, 3  ;;  %v2509_v47 = vld [vmem:[#allocation2 + $0x138] sm:$0xf] }
 0x232   : > { %v1038_v34 = vor.u32 %v1037_v56, %v1034_v0  ;;  %v2709_v35 = vsel %vm2522_vm15, %v2700_v19, %v2708_v60  ;;  %v3726_v27 = vsel %vm3669_vm8, %v3724_v13, %v3725_v1  ;;  %v5141_v29 = vshrl.u32 %v4652_v44, 16  ;;  %v2492_v19 = vld [vmem:[#allocation2 + $0xb0] sm:$0xf8]  ;;  %v19001_v60 = vpop.permute.xlu1 %2154 }
 0x233   : > { %v3936_v28 = vsel %vm647_vm0, %v2709_v35, %v18852_v18  ;;  %3888 = vrot.lane.b32.xlu0 %v3726_v27, %s17283_s12  ;;  %v4771_v22 = vsel %vm4711_vm2, %v4769_v14, %v4770_v6  ;;  %v5144_v36 = vshll.u32 %v4652_v44, 16  ;;  %v2056_v30 = vsel %vm1999_vm9, %v2054_v61, %v2055_v7  ;;  %v17130_v27 = vld [vmem:[#allocation2 + $0xb8] sm:$0xf] }
 0x234   : > { %v4003_v3 = vsel %vm2312_vm13, %v3936_v28, %v18881_v5  ;;  %v1039_v18 = vsel %vm852_vm1, %v1030_v51, %v1038_v34  ;;  %5297 = vrot.lane.b32.xlu1 %v4771_v22, %s17281_s29  ;;  %v5149_v20 = vshrl.u32 %v4809_v25, 16  ;;  %v5152_v48 = vshll.u32 %v4809_v25, 16  ;;  %v19008_v13 = vpop.permute.xlu0 %3876 }
 0x235   : > { %v2266_v0 = vsel %vm647_vm0, %v1039_v18, %v18872_v39  ;;  %v5143_v56 = vrot.slane %v5141_v29, 6  ;;  %v5146_v5 = vrot.slane %v5144_v36, 7  ;;  %v18999_v44 = vsel %vm2365_vm14, %v4003_v3, %v18897_v23  ;;  %v822_v39 = vld [vmem:[#allocation2 + $0xb0] sm:$0xfe] }
 0x236   : > { %v2334_v9 = vsel %vm2312_vm13, %v2266_v0, %v18890_v54  ;;  %v5151_v25 = vrot.slane %v5149_v20, 6  ;;  %v5154_v42 = vrot.slane %v5152_v48, 7  ;;  %4122 = vst [vmem:[#allocation3 + $0xf8] sm:$0xff] %v18999_v44  ;;  %v3101_v34 = vrot.slane %v18988_v2, 4  ;;  %5969 = vmatprep.mubr.bf16.mxu1 %v18999_v44  ;;  %6411 = vmatmul.mubr.bf16.gmra.mrb[92].mxu0 %v18767_v4  ;;  %v19025_v20 = vpop.permute.xlu1 %2206 }
 0x237   : > { %2218 = vrot.lane.b32.xlu0 %v2056_v30, %s17283_s12  ;;  %v5147_v23 = vor.u32 %v5146_v5, %v5143_v56  ;;  %v19013_v1 = vsel %vm2365_vm14, %v2334_v9, %v18904_v63  ;;  %v3102_v35 = vrot.slane %v2509_v47, 4  ;;  %v1431_v54 = vrot.slane %v18993_v49, 2  ;;  %v19022_v30 = vld [vmem:[#allocation2 + $0x138] sm:$0x1f]  ;;  %6418 = vmatprep.mubr.bf16.mxu0 %v18859_v38 }
 0x238   : > { %v5155_v14 = vor.u32 %v5154_v42, %v5151_v25  ;;  %2454 = vst [vmem:[#allocation3 + $0xf0] sm:$0xff] %v19013_v1  ;;  %v1432_v6 = vrot.slane %v839_v59, 2  ;;  %v2711_v61 = vshrl.u32 %v2492_v19, 16  ;;  %v2714_v28 = vshll.u32 %v2492_v19, 16  ;;  %5970 = vmatmul.mubr.bf16.gmra.mrb[36].mxu1 %v19013_v1  ;;  %v17131_v5 = vld [vmem:[#allocation2 + $0xb8] sm:$0x3]  ;;  %v19030_v25 = vpop.permute.xlu0 %3774 }
 0x239   : > { %v3103_v51 = vsel %vm3043_vm3, %v3101_v34, %v3102_v35  ;;  %v2719_v7 = vshrl.u32 %v17130_v27, 16  ;;  %v2722_v22 = vshll.u32 %v17130_v27, 16  ;;  %v1041_v3 = vshrl.u32 %v822_v39, 16 }
 0x23a   : > { %v5156_v63 = vsel %vm4816_vm4, %v5147_v23, %v5155_v14  ;;  %v1433_v29 = vsel %vm1373_vm5, %v1431_v54, %v1432_v6  ;;  %v2713_v36 = vrot.slane %v2711_v61, 3  ;;  %v2716_v18 = vrot.slane %v2714_v28, 4 }
 0x23b   : > { %5349 = vrot.lane.b32.xlu1 %v5156_v63, %s17282_s30  ;;  %3786 = vrot.lane.b32.xlu0 %v3103_v51, %s17281_s29  ;;  %v2721_v48 = vrot.slane %v2719_v7, 3  ;;  %v2724_v47 = vrot.slane %v2722_v22, 4  ;;  %v1043_v0 = vrot.slane %v1041_v3, 1  ;;  %v1044_v4 = vshll.u32 %v822_v39, 16  ;;  %v1471_v39 = vld [vmem:[#allocation2 + $0x138] sm:$0x7]  ;;  %v19040_v63 = vpop.permute.xlu1 %2104 }
 0x23c   : > { %v2717_v56 = vor.u32 %v2716_v18, %v2713_v36  ;;  %v1049_v59 = vshrl.u32 %v17131_v5, 16  ;;  %v1052_v19 = vshll.u32 %v17131_v5, 16  ;;  %v3473_v9 = vshrl.u32 %v18988_v2, 16  ;;  %v1940_v5 = vld [vmem:[#allocation2 + $0x130] sm:$0xf8] }
 0x23d   : > { %v2725_v42 = vor.u32 %v2724_v47, %v2721_v48  ;;  %v1046_v38 = vrot.slane %v1044_v4, 2  ;;  %v3476_v34 = vshll.u32 %v18988_v2, 16  ;;  %v3481_v23 = vshrl.u32 %v19022_v30, 16 }
 0x23e   : > { %v1051_v35 = vrot.slane %v1049_v59, 1  ;;  %v1054_v54 = vrot.slane %v1052_v19, 2  ;;  %v3475_v14 = vrot.slane %v3473_v9, 4  ;;  %v3484_v6 = vshll.u32 %v19022_v30, 16  ;;  %6419 = vmatmul.mubr.bf16.gmra.mrb[96].mxu0 %v18863_v37  ;;  %v19048_v59 = vpop.permute.xlu0 %3826 }
 0x23f   : > { %2116 = vrot.lane.b32.xlu1 %v1433_v29, %s17281_s29  ;;  %v2726_v61 = vsel %vm2522_vm15, %v2717_v56, %v2725_v42  ;;  %v1047_v28 = vor.u32 %v1046_v38, %v1043_v0  ;;  %v3478_v51 = vrot.slane %v3476_v34, 5  ;;  %v3483_v27 = vrot.slane %v3481_v23, 4  ;;  %v3610_v29 = vld [vmem:[#allocation2 + $0x130] sm:$0xe0]  ;;  %6426 = vmatprep.mubr.bf16.mxu0 %v18928_v26  ;;  %v19052_v38 = vld [vmem:[#allocation2 + $0x140] sm:$0xf0] }
 0x240   : > { %v3939_v7 = vsel %vm647_vm0, %v2726_v61, %v18908_v41  ;;  %v1055_v22 = vor.u32 %v1054_v54, %v1051_v35  ;;  %v3486_v2 = vrot.slane %v3484_v6, 5  ;;  %v1803_v3 = vshrl.u32 %v18993_v49, 16  ;;  %v2511_v35 = vld [vmem:[#allocation2 + $0x148] sm:$0xf]  ;;  %v19058_v26 = vld [vmem:[#allocation2 + $0x140] sm:$0xfc] }
 0x241   : > { %v3479_v36 = vor.u32 %v3478_v51, %v3475_v14  ;;  %v1806_v18 = vshll.u32 %v18993_v49, 16  ;;  %v1811_v48 = vshrl.u32 %v1471_v39, 16  ;;  %v1814_v47 = vshll.u32 %v1471_v39, 16  ;;  %v841_v61 = vld [vmem:[#allocation2 + $0x148] sm:$0x3] }
 0x242   : > { %v1056_v0 = vsel %vm852_vm1, %v1047_v28, %v1055_v22  ;;  %v3487_v4 = vor.u32 %v3486_v2, %v3483_v27  ;;  %v1805_v56 = vrot.slane %v1803_v3, 2  ;;  %v4005_v41 = vsel %vm2312_vm13, %v3939_v7, %v18936_v62  ;;  %v2494_v28 = vld [vmem:[#allocation2 + $0xc0] sm:$0xf8]  ;;  %v19071_v22 = vpop.permute.xlu1 %2156  ;;  %v19073_v2 = vpop.permute.xlu0 %3878 }
 0x243   : > { %v2269_v49 = vsel %vm647_vm0, %v1056_v0, %v18917_v53  ;;  %v1808_v19 = vrot.slane %v1806_v18, 3  ;;  %v1813_v9 = vrot.slane %v1811_v48, 2  ;;  %v1816_v42 = vrot.slane %v1814_v47, 3  ;;  %v824_v7 = vld [vmem:[#allocation2 + $0xc0] sm:$0xfe] }
 0x244   : > { %v3488_v37 = vsel %vm3148_vm6, %v3479_v36, %v3487_v4  ;;  %v2336_v34 = vsel %vm2312_vm13, %v2269_v49, %v18950_v11  ;;  %v3727_v23 = vrot.slane %v3610_v29, 5  ;;  %v3728_v62 = vrot.slane %v19022_v30, 5  ;;  %v17132_v47 = vld [vmem:[#allocation2 + $0xc8] sm:$0xf] }
 0x245   : > { %3838 = vrot.lane.b32.xlu0 %v3488_v37, %s17282_s30  ;;  %v1809_v54 = vor.u32 %v1808_v19, %v1805_v56  ;;  %v1817_v53 = vor.u32 %v1816_v42, %v1813_v9  ;;  %v2057_v14 = vrot.slane %v1940_v5, 3  ;;  %v2058_v6 = vrot.slane %v1471_v39, 3  ;;  %v19087_v42 = vld [vmem:[#allocation2 + $0x148] sm:$0x1f] }
 0x246   : > { %v3729_v51 = vsel %vm3669_vm8, %v3727_v23, %v3728_v62  ;;  %v19064_v27 = vsel %vm2365_vm14, %v4005_v41, %v18953_v31  ;;  %v19068_v11 = vsel %vm2365_vm14, %v2336_v34, %v18960_v52  ;;  %v3104_v30 = vrot.slane %v19052_v38, 4  ;;  %6427 = vmatmul.mubr.bf16.gmra.mrb[100].mxu0 %v18932_v50  ;;  %v19089_v37 = vpop.permute.xlu1 %2208 }
 0x247   : > { %v1818_v39 = vsel %vm1478_vm7, %v1809_v54, %v1817_v53  ;;  %v2059_v3 = vsel %vm1999_vm9, %v2057_v14, %v2058_v6  ;;  %4123 = vst [vmem:[#allocation3 + $0x110] sm:$0xff] %v19064_v27  ;;  %2455 = vst [vmem:[#allocation3 + $0x108] sm:$0xff] %v19068_v11  ;;  %v3105_v31 = vrot.slane %v2511_v35, 4  ;;  %v1434_v36 = vrot.slane %v19058_v26, 2  ;;  %5977 = vmatprep.mubr.bf16.mxu1 %v19064_v27  ;;  %v17133_v35 = vld [vmem:[#allocation2 + $0xc8] sm:$0x3] }
 0x248   : > { %2168 = vrot.lane.b32.xlu1 %v1818_v39, %s17282_s30  ;;  %v1435_v52 = vrot.slane %v841_v61, 2  ;;  %v2728_v18 = vshrl.u32 %v2494_v28, 16  ;;  %v2731_v48 = vshll.u32 %v2494_v28, 16  ;;  %v2736_v29 = vshrl.u32 %v17132_v47, 16  ;;  %5978 = vmatmul.mubr.bf16.gmra.mrb[40].mxu1 %v19068_v11  ;;  %v19095_v61 = vpop.permute.xlu0 %3776 }
 0x249   : > { %3890 = vrot.lane.b32.xlu0 %v3729_v51, %s17283_s12  ;;  %v3106_v0 = vsel %vm3043_vm3, %v3104_v30, %v3105_v31  ;;  %v2739_v4 = vshll.u32 %v17132_v47, 16  ;;  %v1058_v56 = vshrl.u32 %v824_v7, 16  ;;  %v1061_v41 = vshll.u32 %v824_v7, 16  ;;  %6434 = vmatprep.mubr.bf16.mxu0 %v18999_v44 }
 0x24a   : > { %v1436_v5 = vsel %vm1373_vm5, %v1434_v36, %v1435_v52  ;;  %v2730_v49 = vrot.slane %v2728_v18, 3  ;;  %v2733_v19 = vrot.slane %v2731_v48, 4  ;;  %v2738_v9 = vrot.slane %v2736_v29, 3  ;;  %v1472_v36 = vld [vmem:[#allocation2 + $0x148] sm:$0x7]  ;;  %v19100_v52 = vpop.permute.xlu1 %2106 }
 0x24b   : > { %v2741_v34 = vrot.slane %v2739_v4, 4  ;;  %v1060_v23 = vrot.slane %v1058_v56, 1  ;;  %v1063_v62 = vrot.slane %v1061_v41, 2  ;;  %v1066_v54 = vshrl.u32 %v17133_v35, 16  ;;  %v3611_v29 = vld [vmem:[#allocation2 + $0x140] sm:$0xe0] }
 0x24c   : > { %2220 = vrot.lane.b32.xlu1 %v2059_v3, %s17283_s12  ;;  %v2734_v53 = vor.u32 %v2733_v19, %v2730_v49  ;;  %v1069_v50 = vshll.u32 %v17133_v35, 16  ;;  %v3490_v14 = vshrl.u32 %v19052_v38, 16  ;;  %v3493_v6 = vshll.u32 %v19052_v38, 16 }
 0x24d   : > { %3788 = vrot.lane.b32.xlu0 %v3106_v0, %s17281_s29  ;;  %v2742_v28 = vor.u32 %v2741_v34, %v2738_v9  ;;  %v1064_v51 = vor.u32 %v1063_v62, %v1060_v23  ;;  %v1068_v44 = vrot.slane %v1066_v54, 1  ;;  %v3498_v30 = vshrl.u32 %v19087_v42, 16  ;;  %v1941_v23 = vld [vmem:[#allocation2 + $0x140] sm:$0xf8]  ;;  %v19112_v54 = vpop.permute.xlu0 %3828 }
 0x24e   : > { %v1071_v7 = vrot.slane %v1069_v50, 2  ;;  %v3492_v39 = vrot.slane %v3490_v14, 4  ;;  %v3495_v31 = vrot.slane %v3493_v6, 5  ;;  %v3501_v3 = vshll.u32 %v19087_v42, 16  ;;  %6435 = vmatmul.mubr.bf16.gmra.mrb[104].mxu0 %v19013_v1  ;;  %v4179_v6 = vld [vmem:[#allocation2 + $0x148] sm:$0x3f] }
 0x24f   : > { %v2743_v18 = vsel %vm2522_vm15, %v2734_v53, %v2742_v28  ;;  %v3500_v38 = vrot.slane %v3498_v30, 4  ;;  %v1820_v48 = vshrl.u32 %v19058_v26, 16  ;;  %v1823_v47 = vshll.u32 %v19058_v26, 16  ;;  %6442 = vmatprep.mubr.bf16.mxu0 %v19064_v27  ;;  %v4653_v28 = vld [vmem:[#allocation2 + $0x140] sm:$0xc0] }
 0x250   : > { %2118 = vrot.lane.b32.xlu1 %v1436_v5, %s17281_s29  ;;  %v3942_v0 = vsel %vm647_vm0, %v2743_v18, %v18967_v16  ;;  %v1072_v4 = vor.u32 %v1071_v7, %v1068_v44  ;;  %v3496_v56 = vor.u32 %v3495_v31, %v3492_v39  ;;  %v3503_v41 = vrot.slane %v3501_v3, 5  ;;  %v4810_v30 = vld [vmem:[#allocation2 + $0x148] sm:$0x7f]  ;;  %v19121_v7 = vpop.permute.xlu1 %2158  ;;  %v2496_v3 = vld [vmem:[#allocation2 + $0xd0] sm:$0xf8] }
 0x251   : > { %v1822_v49 = vrot.slane %v1820_v48, 2  ;;  %v1825_v19 = vrot.slane %v1823_v47, 3  ;;  %v1828_v9 = vshrl.u32 %v1472_v36, 16  ;;  %v1831_v34 = vshll.u32 %v1472_v36, 16 }
 0x252   : > { %v1073_v62 = vsel %vm852_vm1, %v1064_v51, %v1072_v4  ;;  %v3504_v35 = vor.u32 %v3503_v41, %v3500_v38  ;;  %v4007_v26 = vsel %vm2312_vm13, %v3942_v0, %v18982_v40  ;;  %v3730_v5 = vrot.slane %v3611_v29, 5  ;;  %v826_v29 = vld [vmem:[#allocation2 + $0xd0] sm:$0xfe] }
 0x253   : > { %v2272_v16 = vsel %vm647_vm0, %v1073_v62, %v18975_v57  ;;  %v1826_v53 = vor.u32 %v1825_v19, %v1822_v49  ;;  %v1830_v50 = vrot.slane %v1828_v9, 2  ;;  %v1833_v14 = vrot.slane %v1831_v34, 3 }
 0x254   : > { %v3505_v1 = vsel %vm3148_vm6, %v3496_v56, %v3504_v35  ;;  %v2338_v51 = vsel %vm2312_vm13, %v2272_v16, %v19001_v60  ;;  %v3731_v40 = vrot.slane %v19087_v42, 5  ;;  %v2060_v44 = vrot.slane %v1941_v23, 3  ;;  %v19139_v49 = vpop.permute.xlu1 %2210  ;;  %v17134_v23 = vld [vmem:[#allocation2 + $0xd8] sm:$0xf] }
 0x255   : > { %3840 = vrot.lane.b32.xlu0 %v3505_v1, %s17282_s30  ;;  %v1834_v27 = vor.u32 %v1833_v14, %v1830_v50  ;;  %v2061_v57 = vrot.slane %v1472_v36, 3  ;;  %v4071_v39 = vsel %vm2365_vm14, %v4007_v26, %v19008_v13  ;;  %v19128_v31 = vsel %vm2365_vm14, %v2338_v51, %v19025_v20  ;;  %v19135_v20 = vpop.permute.xlu0 %3880 }
 0x256   : > { %v3732_v60 = vsel %vm3669_vm8, %v3730_v5, %v3731_v40  ;;  %4124 = vst [vmem:[#allocation3 + $0x128] sm:$0xff] %v4071_v39  ;;  %2456 = vst [vmem:[#allocation3 + $0x120] sm:$0xff] %v19128_v31  ;;  %v4772_v42 = vrot.slane %v4653_v28, 6  ;;  %v4773_v18 = vrot.slane %v4179_v6, 6  ;;  %v5158_v38 = vshrl.u32 %v4653_v28, 16  ;;  %5985 = vmatprep.mubr.bf16.mxu1 %v4071_v39  ;;  %6443 = vmatmul.mubr.bf16.gmra.mrb[108].mxu0 %v19068_v11 }
 0x257   : > { %v1835_v48 = vsel %vm1478_vm7, %v1826_v53, %v1834_v27  ;;  %v2062_v36 = vsel %vm1999_vm9, %v2060_v44, %v2061_v57  ;;  %v5161_v47 = vshll.u32 %v4653_v28, 16  ;;  %v5166_v13 = vshrl.u32 %v4810_v30, 16  ;;  %5986 = vmatmul.mubr.bf16.gmra.mrb[44].mxu1 %v19128_v31  ;;  %v2498_v53 = vld [vmem:[#allocation2 + $0xe0] sm:$0xf8]  ;;  %6450 = vmatprep.mubr.bf16.mxu0 %v4071_v39 }
 0x258   : > { %2170 = vrot.lane.b32.xlu1 %v1835_v48, %s17282_s30  ;;  %v4774_v0 = vsel %vm4711_vm2, %v4772_v42, %v4773_v18  ;;  %v5160_v4 = vrot.slane %v5158_v38, 6  ;;  %v5169_v56 = vshll.u32 %v4810_v30, 16  ;;  %v2745_v41 = vshrl.u32 %v2496_v3, 16  ;;  %v17135_v30 = vld [vmem:[#allocation2 + $0xd8] sm:$0x3] }
 0x259   : > { %3892 = vrot.lane.b32.xlu0 %v3732_v60, %s17283_s12  ;;  %v5163_v19 = vrot.slane %v5161_v47, 7  ;;  %v5168_v9 = vrot.slane %v5166_v13, 6  ;;  %v2748_v34 = vshll.u32 %v2496_v3, 16  ;;  %v2753_v62 = vshrl.u32 %v17134_v23, 16  ;;  %v19143_v1 = vpop.permute.xlu0 %3778  ;;  %v828_v39 = vld [vmem:[#allocation2 + $0xe0] sm:$0xfe]  ;;  %v19148_v47 = vpop.permute.xlu1 %2108 }
 0x25a   : > { %v5171_v35 = vrot.slane %v5169_v56, 7  ;;  %v2747_v26 = vrot.slane %v2745_v41, 3  ;;  %v2756_v5 = vshll.u32 %v17134_v23, 16  ;;  %v1075_v16 = vshrl.u32 %v826_v29, 16 }
 0x25b   : > { %v5164_v50 = vor.u32 %v5163_v19, %v5160_v4  ;;  %v2750_v14 = vrot.slane %v2748_v34, 4  ;;  %v2755_v6 = vrot.slane %v2753_v62, 3  ;;  %v1078_v28 = vshll.u32 %v826_v29, 16  ;;  %v17136_v4 = vld [vmem:[#allocation2 + $0xe8] sm:$0xf] }
 0x25c   : > { %2222 = vrot.lane.b32.xlu1 %v2062_v36, %s17283_s12  ;;  %v5172_v51 = vor.u32 %v5171_v35, %v5168_v9  ;;  %v2758_v40 = vrot.slane %v2756_v5, 4  ;;  %v1077_v44 = vrot.slane %v1075_v16, 1  ;;  %v1083_v27 = vshrl.u32 %v17135_v30, 16 }
 0x25d   : > { %5299 = vrot.lane.b32.xlu0 %v4774_v0, %s17281_s29  ;;  %v2751_v11 = vor.u32 %v2750_v14, %v2747_v26  ;;  %v1080_v57 = vrot.slane %v1078_v28, 2  ;;  %v1086_v3 = vshll.u32 %v17135_v30, 16  ;;  %v2762_v60 = vshrl.u32 %v2498_v53, 16  ;;  %v19154_v26 = vpop.permute.xlu0 %3882 }
 0x25e   : > { %v5173_v42 = vsel %vm4816_vm4, %v5164_v50, %v5172_v51  ;;  %v2759_v18 = vor.u32 %v2758_v40, %v2755_v6  ;;  %v1085_v38 = vrot.slane %v1083_v27, 1  ;;  %v2765_v48 = vshll.u32 %v2498_v53, 16  ;;  %6451 = vmatmul.mubr.bf16.gmra.mrb[112].mxu0 %v19128_v31  ;;  %v2500_v40 = vld [vmem:[#allocation2 + $0xf0] sm:$0xf8]  ;;  %v19168_v27 = vpop.permute.xlu1 %2212 }
 0x25f   : > { %v1081_v36 = vor.u32 %v1080_v57, %v1077_v44  ;;  %v1088_v13 = vrot.slane %v1086_v3, 2  ;;  %v2764_v29 = vrot.slane %v2762_v60, 3  ;;  %v2770_v56 = vshrl.u32 %v17136_v4, 16 }
 0x260   : > { %5351 = vrot.lane.b32.xlu1 %v5173_v42, %s17282_s30  ;;  %v2760_v0 = vsel %vm2522_vm15, %v2751_v11, %v2759_v18  ;;  %v2767_v41 = vrot.slane %v2765_v48, 4  ;;  %v2773_v19 = vshll.u32 %v17136_v4, 16  ;;  %v1092_v9 = vshrl.u32 %v828_v39, 16  ;;  %v17138_v18 = vld [vmem:[#allocation2 + $0xf8] sm:$0xf] }
 0x261   : > { %v3945_v34 = vsel %vm647_vm0, %v2760_v0, %v19030_v25  ;;  %v1089_v23 = vor.u32 %v1088_v13, %v1085_v38  ;;  %v2772_v62 = vrot.slane %v2770_v56, 3  ;;  %v1095_v35 = vshll.u32 %v828_v39, 16  ;;  %v17137_v25 = vld [vmem:[#allocation2 + $0xe8] sm:$0x3] }
 0x262   : > { %v4009_v5 = vsel %vm2312_vm13, %v3945_v34, %v19048_v59  ;;  %v2768_v16 = vor.u32 %v2767_v41, %v2764_v29  ;;  %v2775_v53 = vrot.slane %v2773_v19, 4  ;;  %v1094_v50 = vrot.slane %v1092_v9, 1  ;;  %v2502_v41 = vld [vmem:[#allocation2 + $0x100] sm:$0xf8]  ;;  %v17139_v34 = vld [vmem:[#allocation2 + $0xf8] sm:$0x3] }
 0x263   : > { %v1090_v14 = vsel %vm852_vm1, %v1081_v36, %v1089_v23  ;;  %v4074_v6 = vsel %vm2365_vm14, %v4009_v5, %v19073_v2  ;;  %v1097_v28 = vrot.slane %v1095_v35, 2  ;;  %v1100_v51 = vshrl.u32 %v17137_v25, 16  ;;  %v3831_v36 = vpop.permute.xlu0 %3830 }
 0x264   : > { %v2275_v44 = vsel %vm647_vm0, %v1090_v14, %v19040_v63  ;;  %4125 = vst [vmem:[#allocation3 + $0x140] sm:$0xff] %v4074_v6  ;;  %v2776_v31 = vor.u32 %v2775_v53, %v2772_v62  ;;  %v1103_v30 = vshll.u32 %v17137_v25, 16  ;;  %5993 = vmatprep.mubr.bf16.mxu1 %v4074_v6  ;;  %v19166_v59 = vadd.f32 %v18630_v21, %v18624_v58  ;;  %v830_v63 = vld [vmem:[#allocation2 + $0xf0] sm:$0xfe]  ;;  %v2161_v62 = vpop.permute.xlu1 %2160 }
 0x265   : > { %6458 = vmatprep.mubr.bf16.mxu0 %v4074_v6  ;;  %v2340_v2 = vsel %vm2312_vm13, %v2275_v44, %v19071_v22  ;;  %v1098_v11 = vor.u32 %v1097_v28, %v1094_v50  ;;  %v1102_v57 = vrot.slane %v1100_v51, 1  ;;  %v19174_v3 = vadd.f32 %v18644_v24, %v18636_v8  ;;  %v832_v44 = vld [vmem:[#allocation2 + $0x100] sm:$0xfe] }
 0x266   : > { %v2406_v60 = vsel %vm2365_vm14, %v2340_v2, %v19089_v37  ;;  %v2777_v39 = vsel %vm2522_vm15, %v2768_v16, %v2776_v31  ;;  %v1105_v58 = vrot.slane %v1103_v30, 2  ;;  %v2779_v21 = vshrl.u32 %v2500_v40, 16  ;;  %v17140_v2 = vld [vmem:[#allocation2 + $0x108] sm:$0xf] }
 0x267   : > { %2457 = vst [vmem:[#allocation3 + $0x138] sm:$0xff] %v2406_v60  ;;  %v3948_v42 = vsel %vm647_vm0, %v2777_v39, %v19095_v61  ;;  %5994 = vmatmul.mubr.bf16.gmra.mrb[48].mxu1 %v2406_v60  ;;  %v2782_v22 = vshll.u32 %v2500_v40, 16  ;;  %v2787_v38 = vshrl.u32 %v17138_v18, 16  ;;  %v2790_v48 = vshll.u32 %v17138_v18, 16  ;;  %6459 = vmatmul.mubr.bf16.gmra.mrb[116].mxu0 %v2406_v60  ;;  %v3781_v16 = vpop.permute.xlu0 %3780 }
 0x268   : > { %v1106_v8 = vor.u32 %v1105_v58, %v1102_v57  ;;  %v4011_v24 = vsel %vm2312_vm13, %v3948_v42, %v19112_v54  ;;  %v2781_v13 = vrot.slane %v2779_v21, 3  ;;  %v1109_v37 = vshrl.u32 %v830_v63, 16 }
 0x269   : > { %v4077_v29 = vsel %vm2365_vm14, %v4011_v24, %v19135_v20  ;;  %v2784_v4 = vrot.slane %v2782_v22, 4  ;;  %v2789_v56 = vrot.slane %v2787_v38, 3  ;;  %v2792_v0 = vrot.slane %v2790_v48, 4  ;;  %v17141_v38 = vld [vmem:[#allocation2 + $0x108] sm:$0x3] }
 0x26a   : > { %v1107_v61 = vsel %vm852_vm1, %v1098_v11, %v1106_v8  ;;  %4126 = vst [vmem:[#allocation3 + $0x158] sm:$0xff] %v4077_v29  ;;  %v1111_v19 = vrot.slane %v1109_v37, 1  ;;  %v1112_v9 = vshll.u32 %v830_v63, 16  ;;  %v1117_v23 = vshrl.u32 %v17139_v34, 16  ;;  %6001 = vmatprep.mubr.bf16.mxu1 %v4077_v29  ;;  %6466 = vmatprep.mubr.bf16.mxu0 %v4077_v29 }
 0x26b   : > { %v2278_v54 = vsel %vm647_vm0, %v1107_v61, %v19100_v52  ;;  %v2785_v35 = vor.u32 %v2784_v4, %v2781_v13  ;;  %v2793_v20 = vor.u32 %v2792_v0, %v2789_v56  ;;  %v1120_v5 = vshll.u32 %v17139_v34, 16 }
 0x26c   : > { %v2342_v53 = vsel %vm2312_vm13, %v2278_v54, %v19121_v7  ;;  %v1114_v50 = vrot.slane %v1112_v9, 2  ;;  %v1119_v14 = vrot.slane %v1117_v23, 1  ;;  %v2796_v6 = vshrl.u32 %v2502_v41, 16  ;;  %v2111_v7 = vpop.permute.xlu1 %2110  ;;  %v3833_v8 = vpop.permute.xlu0 %3832  ;;  %v17142_v54 = vld [vmem:[#allocation2 + $0x8] sm:$0x3f] }
 0x26d   : > { %v2409_v28 = vsel %vm2365_vm14, %v2342_v53, %v19139_v49  ;;  %v2794_v25 = vsel %vm2522_vm15, %v2785_v35, %v2793_v20  ;;  %v1122_v51 = vrot.slane %v1120_v5, 2  ;;  %v2799_v40 = vshll.u32 %v2502_v41, 16 }
 0x26e   : > { %2458 = vst [vmem:[#allocation3 + $0x150] sm:$0xff] %v2409_v28  ;;  %v3951_v52 = vsel %vm647_vm0, %v2794_v25, %v19143_v1  ;;  %v1115_v31 = vor.u32 %v1114_v50, %v1111_v19  ;;  %v2798_v30 = vrot.slane %v2796_v6, 3  ;;  %v2804_v11 = vshrl.u32 %v17140_v2, 16 }
 0x26f   : > { %v1123_v57 = vor.u32 %v1122_v51, %v1119_v14  ;;  %6002 = vmatmul.mubr.bf16.gmra.mrb[52].mxu1 %v2409_v28  ;;  %v4013_v63 = vsel %vm2312_vm13, %v3951_v52, %v3831_v36  ;;  %v2801_v60 = vrot.slane %v2799_v40, 4  ;;  %v2807_v49 = vshll.u32 %v17140_v2, 16  ;;  %6467 = vmatmul.mubr.bf16.gmra.mrb[120].mxu0 %v2409_v28 }
 0x270   : > { %v4080_v39 = vsel %vm2365_vm14, %v4013_v63, %v19154_v26  ;;  %v2806_v58 = vrot.slane %v2804_v11, 3  ;;  %v1126_v21 = vshrl.u32 %v832_v44, 16  ;;  %v1129_v42 = vshll.u32 %v832_v44, 16  ;;  %v4138_v26 = vld [vmem:[#allocation2] sm:$0xe0]  ;;  %v2163_v0 = vpop.permute.xlu1 %2162 }
 0x271   : > { %v1124_v22 = vsel %vm852_vm1, %v1115_v31, %v1123_v57  ;;  %4127 = vst [vmem:[#allocation3 + $0x170] sm:$0xff] %v4080_v39  ;;  %v2802_v1 = vor.u32 %v2801_v60, %v2798_v30  ;;  %v2809_v18 = vrot.slane %v2807_v49, 4  ;;  %v1134_v48 = vshrl.u32 %v17141_v38, 16  ;;  %6009 = vmatprep.mubr.bf16.mxu1 %v4080_v39  ;;  %6474 = vmatprep.mubr.bf16.mxu0 %v4080_v39  ;;  %v17143_v11 = vld [vmem:[#allocation2 + $0x118] sm:$0xf] }
 0x272   : > { %v2281_v36 = vsel %vm647_vm0, %v1124_v22, %v19148_v47  ;;  %v1128_v24 = vrot.slane %v1126_v21, 1  ;;  %v1131_v13 = vrot.slane %v1129_v42, 2  ;;  %v1137_v37 = vshll.u32 %v17141_v38, 16  ;;  %v834_v49 = vld [vmem:[#allocation2 + $0x110] sm:$0xfe] }
 0x273   : > { %v2344_v29 = vsel %vm2312_vm13, %v2281_v36, %v2161_v62  ;;  %v2810_v4 = vor.u32 %v2809_v18, %v2806_v58  ;;  %v1136_v56 = vrot.slane %v1134_v48, 1  ;;  %v19204_v41 = vadd.f32 %v18703_v45, %v18699_v12  ;;  %v3885_v45 = vpop.permute.xlu0 %3884 }
 0x274   : > { %v2412_v61 = vsel %vm2365_vm14, %v2344_v29, %v19168_v27  ;;  %v1132_v19 = vor.u32 %v1131_v13, %v1128_v24  ;;  %v1139_v9 = vrot.slane %v1137_v37, 2  ;;  %v19210_v47 = vadd.f32 %v18714_v55, %v18708_v33  ;;  %v2504_v33 = vld [vmem:[#allocation2 + $0x110] sm:$0xf8]  ;;  %v2215_v28 = vpop.permute.xlu1 %2214  ;;  %v17144_v13 = vld [vmem:[#allocation2 + $0x118] sm:$0x3] }
 0x275   : > { %2459 = vst [vmem:[#allocation3 + $0x168] sm:$0xff] %v2412_v61  ;;  %v2811_v34 = vsel %vm2522_vm15, %v2802_v1, %v2810_v4  ;;  %v4192_v23 = vshrl.u32 %v4138_v26, 16  ;;  %v4195_v62 = vshll.u32 %v4138_v26, 16  ;;  %v4200_v35 = vshrl.u32 %v17142_v54, 16  ;;  %v22016_v29 = vld [vmem:[#allocation12_spill] sm:$0xff] }
 0x276   : > { %v3954_v20 = vsel %vm647_vm0, %v2811_v34, %v3781_v16  ;;  %v1140_v12 = vor.u32 %v1139_v9, %v1136_v56  ;;  %v4203_v5 = vshll.u32 %v17142_v54, 16  ;;  %v2813_v31 = vshrl.u32 %v2504_v33, 16 }
 0x277   : > { %v4015_v27 = vsel %vm2312_vm13, %v3954_v20, %v3833_v8  ;;  %6010 = vmatmul.mubr.bf16.gmra.mrb[56].mxu1 %v2412_v61  ;;  %v4194_v53 = vrot.slane %v4192_v23, 5  ;;  %v4197_v50 = vrot.slane %v4195_v62, 6  ;;  %v4202_v14 = vrot.slane %v4200_v35, 5  ;;  %6475 = vmatmul.mubr.bf16.gmra.mrb[124].mxu0 %v2412_v61  ;;  %v5260_v52 = vpop.permute.xlu0 %5259  ;;  %v6645_v8 = vld [vmem:[#allocation3 + $0x38] sm:$0xff]  ;;  %v16926_v62 = vld [vmem:[#allocation4 + $0x210] sm:$0xff]  }
 0x278   : > { %v1141_v55 = vsel %vm852_vm1, %v1132_v19, %v1140_v12  ;;  %v4083_v6 = vsel %vm2365_vm14, %v4015_v27, %v3885_v45  ;;  %v4205_v25 = vrot.slane %v4203_v5, 6  ;;  %v2816_v2 = vshll.u32 %v2504_v33, 16  ;;  %v17145_v20 = vld [vmem:[#allocation2 + $0x118] sm:$0x3f]  ;;  %v4174_v45 = vld [vmem:[#allocation2 + $0x120] sm:$0xe0] }
 0x279   : > { %v2284_v51 = vsel %vm647_vm0, %v1141_v55, %v2111_v7  ;;  %4128 = vst [vmem:[#allocation3 + $0x188] sm:$0xff] %v4083_v6  ;;  %v4198_v16 = vor.u32 %v4197_v50, %v4194_v53  ;;  %6017 = vmatprep.mubr.bf16.mxu1 %v4083_v6  ;;  %v2821_v57 = vshrl.u32 %v17143_v11, 16  ;;  %v2824_v60 = vshll.u32 %v17143_v11, 16  ;;  %v16927_v53 = vld [vmem:[#allocation4 + $0x1e8] sm:$0xff]   ;;  %v16928_v50 = vld [vmem:[#allocation4 + $0x258] sm:$0xff]   ;;  %v19244_v6 = vld [vmem:[#allocation3 + $0x50] sm:$0xff] }
 0x27a   : > { %v2346_v40 = vsel %vm2312_vm13, %v2284_v51, %v2163_v0  ;;  %v4206_v44 = vor.u32 %v4205_v25, %v4202_v14  ;;  %v5312_v39 = vpop.permute.xlu1 %5311  ;;  %v2815_v58 = vrot.slane %v2813_v31, 3  ;;  %v19224_v42 = vadd.f32 %v18755_v32, %v18746_v46  ;;  %v17148_v11 = vld [vmem:[#allocation3 + $0x40] sm:$0xff] }
 0x27b   : > { %v2415_v30 = vsel %vm2365_vm14, %v2346_v40, %v2215_v28  ;;  %v3783_v21 = vpop.permute.xlu0 %3782  ;;  %v19228_v22 = vadd.f32 %v18779_v10, %v18772_v17  ;;  %v2818_v18 = vrot.slane %v2816_v2, 4  ;;  %v2823_v38 = vrot.slane %v2821_v57, 3  ;;  %v4172_v17 = vld [vmem:[#allocation2 + $0x110] sm:$0xe0]  ;;  %v22015_v10 = vld [vmem:[#allocation11_spill] sm:$0xff] }
 0x27c   : > { %2460 = vst [vmem:[#allocation3 + $0x180] sm:$0xff] %v2415_v30  ;;  %v4207_v63 = vsel %vm4190_vm12, %v4198_v16, %v4206_v44  ;;  %v1143_v48 = vshrl.u32 %v834_v49, 16  ;;  %v2826_v36 = vrot.slane %v2824_v60, 4  ;;  %v1146_v24 = vshll.u32 %v834_v49, 16  ;;  %v16929_v28 = vld [vmem:[#allocation4 + $0x218] sm:$0xff]   ;;  %v17147_v2 = vld [vmem:[#allocation4 + $0x1e0] sm:$0xff]  }
 0x27d   : > { %v5365_v7 = vsel %vm647_vm0, %v4207_v63, %v5260_v52  ;;  %v1151_v37 = vshrl.u32 %v17144_v13, 16  ;;  %v1154_v26 = vshll.u32 %v17144_v13, 16  ;;  %v19234_v46 = vadd.f32 %v18854_v15, %v18848_v43  ;;  %v6644_v15 = vld [vmem:[#allocation3 + $0x30] sm:$0xff]  ;;  %v17146_v44 = vld [vmem:[#allocation3 + $0x28] sm:$0xff] }
 0x27e   : > { %v5442_v1 = vsel %vm2312_vm13, %v5365_v7, %v5312_v39  ;;  %v2113_v32 = vpop.permute.xlu1 %2112  ;;  %v19238_v4 = vadd.f32 %v22016_v29, %v22015_v10  ;;  %v2819_v56 = vor.u32 %v2818_v18, %v2815_v58  ;;  %v1145_v0 = vrot.slane %v1143_v48, 1  ;;  %v16932_v52 = vld [vmem:[#allocation4 + $0x260] sm:$0xff]   ;;  %v17149_v49 = vld [vmem:[#allocation2 + $0x128] sm:$0x3f]  ;;  %v16930_v58 = vld [vmem:[#allocation4 + $0x1f0] sm:$0xff]  }
 0x27f   : > { %6018 = vmatmul.mubr.bf16.gmra.mrb[60].mxu1 %v2415_v30  ;;  %5519 = vst.msk [vmem:[#allocation3 + $0x10] sm:$0xff] %vm2365_vm14, %v5442_v1  ;;  %v2827_v61 = vor.u32 %v2826_v36, %v2823_v38  ;;  %v1148_v19 = vrot.slane %v1146_v24, 2  ;;  %v1153_v9 = vrot.slane %v1151_v37, 1  ;;  %v1156_v34 = vrot.slane %v1154_v26, 2  ;;  %v3887_v23 = vpop.permute.xlu0 %3886  ;;  %v16933_v18 = vld [vmem:[#allocation4 + $0x220] sm:$0xff]   ;;  %v16935_v24 = vld [vmem:[#allocation4 + $0x268] sm:$0xff]  }
 0x280   : > { %6949 = vmatprep.mubr.bf16.mxu1 %v6645_v8  ;;  %v4481_v54 = vshrl.u32 %v4172_v17, 16  ;;  %v4484_v35 = vshll.u32 %v4172_v17, 16  ;;  %v4489_v12 = vshrl.u32 %v17145_v20, 16  ;;  %v4492_v43 = vshll.u32 %v17145_v20, 16  ;;  %v19258_v17 = vld [vmem:[#allocation3 + $0x48] sm:$0xff] }
 0x281   : > { %v2828_v14 = vsel %vm2522_vm15, %v2819_v56, %v2827_v61  ;;  %v1149_v33 = vor.u32 %v1148_v19, %v1145_v0  ;;  %v1157_v55 = vor.u32 %v1156_v34, %v1153_v9  ;;  %v4498_v57 = vshrl.u32 %v4174_v45, 16  ;;  %v19264_v0 = vld [vmem:[#allocation3 + $0x68] sm:$0xff]  ;;  %v16936_v9 = vld [vmem:[#allocation4 + $0x228] sm:$0xff]  }
 0x282   : > { %v19240_v5 = vpop.permute.xlu1 %5293  ;;  %v4483_v25 = vrot.slane %v4481_v54, 5  ;;  %v4486_v51 = vrot.slane %v4484_v35, 6  ;;  %v4491_v16 = vrot.slane %v4489_v12, 5  ;;  %v4494_v40 = vrot.slane %v4492_v43, 6  ;;  %v16931_v61 = vld [vmem:[#allocation4 + $0x1f8] sm:$0xff]   ;;  %v16938_v54 = vld [vmem:[#allocation4 + $0x270] sm:$0xff]  }
 0x283   : > { %v3957_v31 = vsel %vm647_vm0, %v2828_v14, %v3783_v21  ;;  %v4501_v60 = vshll.u32 %v4174_v45, 16  ;;  %v4506_v7 = vshrl.u32 %v17149_v49, 16  ;;  %v4509_v39 = vshll.u32 %v17149_v49, 16  ;;  %v2506_v12 = vld [vmem:[#allocation2 + $0x120] sm:$0xf8]  ;;  %v17151_v43 = vld [vmem:[#allocation3 + $0x70] sm:$0xff] }
 0x284   : > { %v1158_v1 = vsel %vm852_vm1, %v1149_v33, %v1157_v55  ;;  %v4487_v48 = vor.u32 %v4486_v51, %v4483_v25  ;;  %v4495_v8 = vor.u32 %v4494_v40, %v4491_v16  ;;  %v4500_v26 = vrot.slane %v4498_v57, 5  ;;  %v16934_v14 = vld [vmem:[#allocation4 + $0x200] sm:$0xff]   ;;  %v16940_v33 = vld [vmem:[#allocation4 + $0x230] sm:$0xff]   ;;  %v16942_v25 = vld [vmem:[#allocation4 + $0x278] sm:$0xff]  }
 0x285   : > { %v2287_v38 = vsel %vm647_vm0, %v1158_v1, %v2113_v32  ;;  %v4503_v29 = vrot.slane %v4501_v60, 6  ;;  %v4508_v56 = vrot.slane %v4506_v7, 5  ;;  %v4511_v32 = vrot.slane %v4509_v39, 6  ;;  %v17152_v51 = vld [vmem:[#allocation2 + $0x128] sm:$0xf] }
 0x286   : > { %v5547_v27 = vld [vmem:[#allocation3 + $0x10] sm:$0xff]  ;;  %v4496_v34 = vsel %vm4190_vm12, %v4487_v48, %v4495_v8  ;;  %v2838_v16 = vshrl.u32 %v17152_v51, 16  ;;  %v2841_v40 = vshll.u32 %v17152_v51, 16  ;;  %v16943_v57 = vld [vmem:[#allocation4 + $0x238] sm:$0xff]   ;;  %v17157_v51 = vld [vmem:[#allocation3 + $0xb8] sm:$0xff] }
 0x287   : > { %6950 = vmatmul.mubr.bf16.vlgmr.msra.gmra.mrb[64].mxu1 %v6644_v15  ;;  %15438 = vmatprep.mubr.msk.bf16.mxu0 %vm2365_vm14, %v5547_v27  ;;  %v3835_v30 = vpop.permute.xlu0 %3834  ;;  %v5416_v35 = vsel %vm647_vm0, %v4496_v34, %v19240_v5  ;;  %v4504_v27 = vor.u32 %v4503_v29, %v4500_v26  ;;  %v2830_v5 = vshrl.u32 %v2506_v12, 16  ;;  %v17153_v49 = vld [vmem:[#allocation3 + $0x88] sm:$0xff]  ;;  %v4176_v7 = vld [vmem:[#allocation2 + $0x130] sm:$0xe0] }
 0x288   : > { %14185 = vmatpush3.bf16.msra.mxu1 %v16926_v62  ;;  %15439 = vmatmul.mubr.msk.bf16.vlgmr.msra.gmra.mrb[32].mxu0 %vm2365_vm14, %v17146_v44  ;;  %v4017_v63 = vsel %vm2312_vm13, %v3957_v31, %v3835_v30  ;;  %v19275_v44 = vld [vmem:[#allocation3 + $0x60] sm:$0xff] }
 0x289   : > { %6957 = vmatprep.mubr.bf16.mxu1 %v19244_v6  ;;  %15471 = vmatpush3.bf16.msra.mxu0 %v17147_v2  ;;  %v19253_v21 = vsel %vm2365_vm14, %v4017_v63, %v3887_v23  ;;  %v13822_v19 = vpop.f32.mrb[16].mxu1  ;;  %v17150_v23 = vld [vmem:[#allocation3 + $0x58] sm:$0xff]  ;;  %v836_v31 = vld [vmem:[#allocation2 + $0x120] sm:$0xfe]  ;;  %v19283_v63 = vrot.slane %v2830_v5, 3 }
 0x28a   : > { %15442 = vmatprep.mubr.msk.bf16.mxu0 %vm2365_vm14, %v17148_v11  ;;  %15472 = vmatprep.subr.bf16.mxu0 %v16927_v53  ;;  %4129 = vst [vmem:[#allocation3 + $0x1a0] sm:$0xff] %v19253_v21  ;;  %v2165_v36 = vpop.permute.xlu1 %2164  ;;  %v13823_v62 = vpop.f32.mrb[17].mxu1  ;;  %v19279_v30 = vld [vmem:[#allocation3 + $0x80] sm:$0xff]  ;;  %v16937_v2 = vld [vmem:[#allocation4 + $0x208] sm:$0xff]   ;;  %v1160_v48 = vshrl.u32 %v836_v31, 16  ;;  %v1163_v8 = vshll.u32 %v836_v31, 16 }
 0x28b   : > { %14186 = vmatprep.subr.bf16.mxu1 %v16928_v50  ;;  %v2348_v13 = vsel %vm2312_vm13, %v2287_v38, %v2165_v36  ;;  %v2217_v37 = vpop.permute.xlu0 %2216  ;;  %v13825_v15 = vpop.f32.mrb[18].mxu1  ;;  %v19288_v39 = vadd.f32 %v13823_v62, %v13822_v19  ;;  %v2843_v38 = vrot.slane %v2841_v40, 4  ;;  %v17154_v36 = vld [vmem:[#allocation3 + $0xa0] sm:$0xff]  ;;  %v4518_v19 = vshll.u32 %v4176_v7, 16  ;;  %v16947_v62 = vld [vmem:[#allocation4 + $0x240] sm:$0xff]  }
 0x28c   : > { %14187 = vmatpush3.bf16.msra.mxu1 %v16929_v28  ;;  %v19261_v10 = vsel %vm2365_vm14, %v2348_v13, %v2217_v37  ;;  %v13826_v50 = vpop.f32.mrb[19].mxu1  ;;  %v2833_v28 = vshll.u32 %v2506_v12, 16  ;;  %v17155_v37 = vld [vmem:[#allocation2 + $0x128] sm:$0x3]  ;;  %v17158_v31 = vld [vmem:[#allocation3 + $0xd0] sm:$0xff] }
 0x28d   : > { %14188 = vmatprep.subr.bf16.mxu1 %v16932_v52  ;;  %15473 = vmatpush3.bf16.msra.mxu0 %v16927_v53  ;;  %2461 = vst [vmem:[#allocation3 + $0x198] sm:$0xff] %v19261_v10  ;;  %v4512_v53 = vor.u32 %v4511_v32, %v4508_v56  ;;  %v1168_v26 = vshrl.u32 %v17155_v37, 16  ;;  %v1171_v29 = vshll.u32 %v17155_v37, 16  ;;  %v19292_v56 = vadd.f32 %v13826_v50, %v13825_v15  ;;  %v19294_v32 = vld [vmem:[#allocation4 + $0x290] sm:$0xff]   ;;  %v19302_v50 = vld [vmem:[#allocation3 + $0x98] sm:$0xff] }
 0x28e   : > { %15474 = vmatprep.subr.bf16.mxu0 %v16930_v58  ;;  %v19285_v60 = vrot.slane %v2833_v28, 4  ;;  %v16950_v28 = vld [vmem:[#allocation4 + $0x248] sm:$0xff]  }
 0x28f   : > { %6958 = vmatmul.mubr.bf16.gmra.mrb[68].mxu1 %v19258_v17  ;;  %v4513_v52 = vsel %vm4190_vm12, %v4504_v27, %v4512_v53  ;;  %v1170_v27 = vrot.slane %v1168_v26, 1  ;;  %v1173_v53 = vrot.slane %v1171_v29, 2  ;;  %v17159_v37 = vld [vmem:[#allocation2 + $0x138] sm:$0xf]  ;;  %v19316_v29 = vld [vmem:[#allocation3 + $0xb0] sm:$0xff] }
 0x290   : > { %6965 = vmatprep.mubr.bf16.mxu1 %v19264_v0  ;;  %14189 = vmatpush3.bf16.msra.mxu1 %v16933_v18  ;;  %v5346_v20 = vpop.permute.xlu1 %5345  ;;  %v2840_v18 = vrot.slane %v2838_v16, 3  ;;  %v16952_v16 = vld [vmem:[#allocation4 + $0x300] sm:$0xff]   ;;  %v2858_v26 = vshll.u32 %v17159_v37, 16 }
 0x291   : > { %15443 = vmatmul.mubr.msk.bf16.gmra.mrb[36].mxu0 %vm2365_vm14, %v17150_v23  ;;  %14190 = vmatprep.subr.bf16.mxu1 %v16935_v24  ;;  %v5493_v45 = vsel %vm2312_vm13, %v5416_v35, %v5346_v20  ;;  %v2836_v35 = vor.u32 %v19285_v60, %v19283_v63  ;;  %v1162_v20 = vrot.slane %v1160_v48, 1  ;;  %v19312_v48 = vld [vmem:[#allocation3 + $0x90] sm:$0xff] }
 0x292   : > { %15446 = vmatprep.mubr.msk.bf16.mxu0 %vm2365_vm14, %v17151_v43  ;;  %15475 = vmatpush3.bf16.msra.mxu0 %v16930_v58  ;;  %5536 = vst.msk [vmem:[#allocation3 + $0x1a8] sm:$0xff] %vm2365_vm14, %v5493_v45  ;;  %v16945_v58 = vld [vmem:[#allocation4 + $0x280] sm:$0xff]   ;;  %v19299_v43 = vld [vmem:[#allocation3 + $0x78] sm:$0xff]  ;;  %v2844_v15 = vor.u32 %v2843_v38, %v2840_v18  ;;  %v1165_v45 = vrot.slane %v1163_v8, 2 }
 0x293   : > { %15476 = vmatprep.subr.bf16.mxu0 %v16931_v61  ;;  %v5296_v55 = vpop.permute.xlu0 %5295  ;;  %v838_v38 = vld [vmem:[#allocation2 + $0x130] sm:$0xfe] }
 0x294   : > { %14191 = vmatpush3.bf16.msra.mxu1 %v16936_v9  ;;  %v5419_v11 = vsel %vm647_vm0, %v4513_v52, %v5296_v55  ;;  %v17156_v9 = vld [vmem:[#allocation2 + $0x138] sm:$0x3f]  ;;  %v2508_v52 = vld [vmem:[#allocation2 + $0x130] sm:$0xf8] }
 0x295   : > { %14192 = vmatprep.subr.bf16.mxu1 %v16938_v54  ;;  %v4523_v34 = vshrl.u32 %v17156_v9, 16  ;;  %v4526_v23 = vshll.u32 %v17156_v9, 16  ;;  %v16949_v54 = vld [vmem:[#allocation4 + $0x288] sm:$0xff]  }
 0x296   : > { %15477 = vmatpush3.bf16.msra.mxu0 %v16931_v61  ;;  %v4515_v61 = vshrl.u32 %v4176_v7, 16 }
 0x297   : > { %6966 = vmatmul.mubr.bf16.gmra.mrb[72].mxu1 %v19275_v44  ;;  %15478 = vmatprep.subr.bf16.mxu0 %v16934_v14  ;;  %v4525_v55 = vrot.slane %v4523_v34, 5  ;;  %v4528_v5 = vrot.slane %v4526_v23, 6 }
 0x298   : > { %6973 = vmatprep.mubr.bf16.mxu1 %v19279_v30  ;;  %14193 = vmatpush3.bf16.msra.mxu1 %v16940_v33  ;;  %v3785_v13 = vpop.permute.xlu0 %3784  ;;  %v4520_v33 = vrot.slane %v4518_v19, 6 }
 0x299   : > { %15447 = vmatmul.mubr.msk.bf16.gmra.mrb[40].mxu0 %vm2365_vm14, %v17153_v49  ;;  %14194 = vmatprep.subr.bf16.mxu1 %v16942_v25  ;;  %v5348_v1 = vpop.permute.xlu1 %5347  ;;  %v4529_v49 = vor.u32 %v4528_v5, %v4525_v55  ;;  %v2860_v55 = vrot.slane %v2858_v26, 4  ;;  %v17165_v26 = vld [vmem:[#allocation3 + $0x148] sm:$0xff] }
 0x29a   : > { %15450 = vmatprep.mubr.msk.bf16.mxu0 %vm2365_vm14, %v17154_v36  ;;  %15479 = vmatpush3.bf16.msra.mxu0 %v16934_v14  ;;  %v5496_v24 = vsel %vm2312_vm13, %v5419_v11, %v5348_v1  ;;  %v4517_v14 = vrot.slane %v4515_v61, 5  ;;  %v1166_v11 = vor.u32 %v1165_v45, %v1162_v20  ;;  %v2847_v1 = vshrl.u32 %v2508_v52, 16 }
 0x29b   : > { %15480 = vmatprep.subr.bf16.mxu0 %v16937_v2  ;;  %5537 = vst.msk [vmem:[#allocation3 + $0x1c0] sm:$0xff] %vm2365_vm14, %v5496_v24  ;;  %v2850_v24 = vshll.u32 %v2508_v52, 16  ;;  %v1180_v20 = vshll.u32 %v838_v38, 16  ;;  %v19327_v52 = vld [vmem:[#allocation3 + $0xa8] sm:$0xff] }
 0x29c   : > { %14195 = vmatpush3.bf16.msra.mxu1 %v16943_v57  ;;  %v1174_v57 = vor.u32 %v1173_v53, %v1170_v27  ;;  %v4521_v60 = vor.u32 %v4520_v33, %v4517_v14  ;;  %v2849_v23 = vrot.slane %v2847_v1, 3  ;;  %v17162_v53 = vld [vmem:[#allocation3 + $0x100] sm:$0xff] }
 0x29d   : > { %14196 = vmatprep.subr.bf16.mxu1 %v16945_v58  ;;  %v2115_v12 = vpop.permute.xlu1 %2114  ;;  %v2852_v14 = vrot.slane %v2850_v24, 4  ;;  %v19342_v24 = vld [vmem:[#allocation3 + $0xe0] sm:$0xff] }
 0x29e   : > { %15481 = vmatpush3.bf16.msra.mxu0 %v16937_v2  ;;  %v2845_v2 = vsel %vm2522_vm15, %v2836_v35, %v2844_v15  ;;  %v1175_v8 = vsel %vm852_vm1, %v1166_v11, %v1174_v57  ;;  %v4530_v19 = vsel %vm4190_vm12, %v4521_v60, %v4529_v49  ;;  %v17161_v15 = vld [vmem:[#allocation2 + $0x138] sm:$0x3]  ;;  %v19331_v11 = vld [vmem:[#allocation3 + $0xc8] sm:$0xff] }
 0x29f   : > { %6974 = vmatmul.mubr.bf16.gmra.mrb[76].mxu1 %v19299_v43  ;;  %15514 = vmatprep.subr.bf16.mxu0 %v19294_v32  ;;  %v3960_v63 = vsel %vm647_vm0, %v2845_v2, %v3785_v13  ;;  %v2855_v13 = vshrl.u32 %v17159_v37, 16  ;;  %v2290_v61 = vsel %vm647_vm0, %v1175_v8, %v2115_v12  ;;  %v1185_v45 = vshrl.u32 %v17161_v15, 16  ;;  %v19339_v8 = vld [vmem:[#allocation3 + $0xc0] sm:$0xff] }
 0x2a0   : > { %6981 = vmatprep.mubr.bf16.mxu1 %v19302_v50  ;;  %14197 = vmatpush3.bf16.msra.mxu1 %v16947_v62  ;;  %v3837_v25 = vpop.permute.xlu0 %3836  ;;  %v1177_v62 = vshrl.u32 %v838_v38, 16  ;;  %v1188_v27 = vshll.u32 %v17161_v15, 16 }
 0x2a1   : > { %15451 = vmatmul.mubr.msk.bf16.gmra.mrb[44].mxu0 %vm2365_vm14, %v17157_v51  ;;  %14198 = vmatprep.subr.bf16.mxu1 %v16949_v54  ;;  %v2167_v40 = vpop.permute.xlu1 %2166  ;;  %v4019_v7 = vsel %vm2312_vm13, %v3960_v63, %v3837_v25  ;;  %v17160_v54 = vld [vmem:[#allocation3 + $0xe8] sm:$0xff]  ;;  %v2857_v33 = vrot.slane %v2855_v13, 3  ;;  %v1182_v51 = vrot.slane %v1180_v20, 2  ;;  %v17163_v63 = vld [vmem:[#allocation3 + $0x118] sm:$0xff] }
 0x2a2   : > { %15454 = vmatprep.mubr.msk.bf16.mxu0 %vm2365_vm14, %v17158_v31  ;;  %v2350_v9 = vsel %vm2312_vm13, %v2290_v61, %v2167_v40  ;;  %v1190_v40 = vrot.slane %v1188_v27, 2  ;;  %v2853_v31 = vor.u32 %v2852_v14, %v2849_v23  ;;  %v17167_v20 = vld [vmem:[#allocation2 + $0x148] sm:$0xf]  ;;  %v840_v27 = vld [vmem:[#allocation2 + $0x140] sm:$0xfe] }
 0x2a3   : > { %v2861_v2 = vor.u32 %v2860_v55, %v2857_v33  ;;  %v2872_v15 = vshrl.u32 %v17167_v20, 16  ;;  %v19355_v33 = vld [vmem:[#allocation3 + $0xf8] sm:$0xff]  ;;  %v1194_v55 = vshrl.u32 %v840_v27, 16 }
 0x2a4   : > { %14199 = vmatpush3.bf16.msra.mxu1 %v16950_v28  ;;  %v1179_v28 = vrot.slane %v1177_v62, 1 }
 0x2a5   : > { %v3889_v58 = vpop.permute.xlu0 %3888  ;;  %14318 = vmatprep.subr.bf16.mxu1 %v16952_v16  ;;  %v1187_v16 = vrot.slane %v1185_v45, 1  ;;  %v2875_v45 = vshll.u32 %v17167_v20, 16 }
 0x2a6   : > { %v4089_v18 = vsel %vm2365_vm14, %v4019_v7, %v3889_v58  ;;  %v5298_v36 = vpop.permute.xlu1 %5297  ;;  %v1183_v60 = vor.u32 %v1182_v51, %v1179_v28  ;;  %v17164_v7 = vld [vmem:[#allocation3 + $0x130] sm:$0xff]  ;;  %v2862_v58 = vsel %vm2522_vm15, %v2853_v31, %v2861_v2  ;;  %v17168_v28 = vld [vmem:[#allocation2 + $0x148] sm:$0x3]  ;;  %v2874_v2 = vrot.slane %v2872_v15, 3 }
 0x2a7   : > { %4130 = vst [vmem:[#allocation3 + $0x1b8] sm:$0xff] %v4089_v18  ;;  %6982 = vmatmul.mubr.bf16.gmra.mrb[80].mxu1 %v19312_v48  ;;  %v5422_v12 = vsel %vm647_vm0, %v4530_v19, %v5298_v36  ;;  %v1191_v49 = vor.u32 %v1190_v40, %v1187_v16  ;;  %v2510_v19 = vld [vmem:[#allocation2 + $0x140] sm:$0xf8]  ;;  %v1205_v51 = vshll.u32 %v17168_v28, 16  ;;  %v19363_v15 = vld [vmem:[#allocation3 + $0x110] sm:$0xff] }
 0x2a8   : > { %6989 = vmatprep.mubr.bf16.mxu1 %v19316_v29  ;;  %v4178_v16 = vld [vmem:[#allocation2 + $0x140] sm:$0xe0] }
 0x2a9   : > { %v2219_v34 = vpop.permute.xlu0 %2218  ;;  %15455 = vmatmul.mubr.msk.bf16.gmra.mrb[48].mxu0 %vm2365_vm14, %v17160_v54  ;;  %v1192_v38 = vsel %vm852_vm1, %v1183_v60, %v1191_v49  ;;  %v2864_v54 = vshrl.u32 %v2510_v19, 16  ;;  %v17169_v60 = vld [vmem:[#allocation3 + $0x178] sm:$0xff]  ;;  %v6646_v49 = vld [vmem:[#allocation3 + $0x40] sm:$0xff] }
 0x2aa   : > { %v2421_v35 = vsel %vm2365_vm14, %v2350_v9, %v2219_v34  ;;  %15458 = vmatprep.mubr.msk.bf16.mxu0 %vm2365_vm14, %v17162_v53  ;;  %v17166_v9 = vld [vmem:[#allocation3 + $0x160] sm:$0xff] }
 0x2ab   : > { %2462 = vst [vmem:[#allocation3 + $0x1b0] sm:$0xff] %v2421_v35  ;;  %v2867_v35 = vshll.u32 %v2510_v19, 16  ;;  %v2866_v40 = vrot.slane %v2864_v54, 3 }
 0x2ad   : > { %v5350_v5 = vpop.permute.xlu1 %5349  ;;  %v3787_v57 = vpop.permute.xlu0 %3786  ;;  %v2869_v31 = vrot.slane %v2867_v35, 4 }
 0x2ae   : > { %v5499_v25 = vsel %vm2312_vm13, %v5422_v12, %v5350_v5  ;;  %v3963_v18 = vsel %vm647_vm0, %v2862_v58, %v3787_v57  ;;  %v19351_v12 = vld [vmem:[#allocation3 + $0xd8] sm:$0xff]  ;;  %v1197_v5 = vshll.u32 %v840_v27, 16  ;;  %v2877_v57 = vrot.slane %v2875_v45, 4  ;;  %v16941_v45 = vld [vmem:[#allocation4 + $0x298] sm:$0xff]  }
 0x2af   : > { %5538 = vst.msk [vmem:[#allocation3 + $0x1d8] sm:$0xff] %vm2365_vm14, %v5499_v25  ;;  %6990 = vmatmul.mubr.bf16.gmra.mrb[84].mxu1 %v19327_v52  ;;  %v1202_v25 = vshrl.u32 %v17168_v28, 16  ;;  %v4535_v58 = vshll.u32 %v4178_v16, 16  ;;  %v2870_v19 = vor.u32 %v2869_v31, %v2866_v40 }
 0x2b0   : > { %6997 = vmatprep.mubr.bf16.mxu1 %v19331_v11 }
 0x2b1   : > { %15459 = vmatmul.mubr.msk.bf16.gmra.mrb[52].mxu0 %vm2365_vm14, %v17163_v63  ;;  %v2117_v1 = vpop.permute.xlu1 %2116  ;;  %v4537_v54 = vrot.slane %v4535_v58, 6 }
 0x2b2   : > { %15462 = vmatprep.mubr.msk.bf16.mxu0 %vm2365_vm14, %v17164_v7  ;;  %v2293_v37 = vsel %vm647_vm0, %v1192_v38, %v2117_v1  ;;  %v4532_v7 = vshrl.u32 %v4178_v16, 16  ;;  %v17170_v1 = vld [vmem:[#allocation2 + $0x148] sm:$0x3f] }
 0x2b3   : > { %v4543_v38 = vshll.u32 %v17170_v1, 16 }
 0x2b5   : > { %v4545_v20 = vrot.slane %v4543_v38, 6  ;;  %v19384_v38 = vld [vmem:[#allocation3 + $0x108] sm:$0xff] }
 0x2b7   : > { %v3839_v36 = vpop.permute.xlu0 %3838  ;;  %6998 = vmatmul.mubr.bf16.gmra.mrb[88].mxu1 %v19339_v8 }
 0x2b8   : > { %7005 = vmatprep.mubr.bf16.mxu1 %v19342_v24  ;;  %v4021_v13 = vsel %vm2312_vm13, %v3963_v18, %v3839_v36  ;;  %v4540_v18 = vshrl.u32 %v17170_v1, 16  ;;  %v1196_v36 = vrot.slane %v1194_v55, 1 }
 0x2b9   : > { %15463 = vmatmul.mubr.msk.bf16.gmra.mrb[56].mxu0 %vm2365_vm14, %v17165_v26  ;;  %v1207_v26 = vrot.slane %v1205_v51, 2 }
 0x2ba   : > { %v2169_v61 = vpop.permute.xlu1 %2168  ;;  %15466 = vmatprep.mubr.msk.bf16.mxu0 %vm2365_vm14, %v17166_v9  ;;  %v2878_v9 = vor.u32 %v2877_v57, %v2874_v2  ;;  %v4542_v35 = vrot.slane %v4540_v18, 5  ;;  %v16944_v57 = vld [vmem:[#allocation4 + $0x2a0] sm:$0xff]  }
 0x2bb   : > { %v3891_v34 = vpop.permute.xlu0 %3890  ;;  %v2352_v23 = vsel %vm2312_vm13, %v2293_v37, %v2169_v61  ;;  %v1199_v37 = vrot.slane %v1197_v5, 2  ;;  %v19371_v5 = vld [vmem:[#allocation3 + $0x70] sm:$0xff] }
 0x2bc   : > { %v4092_v62 = vsel %vm2365_vm14, %v4021_v13, %v3891_v34  ;;  %v1204_v13 = vrot.slane %v1202_v25, 1  ;;  %v19360_v34 = vld [vmem:[#allocation3 + $0xf0] sm:$0xff]  ;;  %v2879_v55 = vsel %vm2522_vm15, %v2870_v19, %v2878_v9  ;;  %v4546_v31 = vor.u32 %v4545_v20, %v4542_v35  ;;  %v19389_v19 = vld [vmem:[#allocation3 + $0x128] sm:$0xff]  ;;  %v16946_v9 = vld [vmem:[#allocation4 + $0x2a8] sm:$0xff]  }
 0x2bd   : > { %4131 = vst [vmem:[#allocation3 + $0x1d0] sm:$0xff] %v4092_v62  ;;  %v4534_v62 = vrot.slane %v4532_v7, 5  ;;  %v1200_v27 = vor.u32 %v1199_v37, %v1196_v36 }
 0x2be   : > { %v2221_v53 = vpop.permute.xlu1 %2220 }
 0x2bf   : > { %v2424_v14 = vsel %vm2365_vm14, %v2352_v23, %v2221_v53  ;;  %7006 = vmatmul.mubr.bf16.gmra.mrb[92].mxu1 %v19351_v12  ;;  %v3789_v63 = vpop.permute.xlu0 %3788  ;;  %v1208_v53 = vor.u32 %v1207_v26, %v1204_v13  ;;  %v4538_v40 = vor.u32 %v4537_v54, %v4534_v62  ;;  %v19394_v62 = vld [vmem:[#allocation3 + $0x88] sm:$0xff]  ;;  %v19399_v54 = vld [vmem:[#allocation3 + $0xa0] sm:$0xff] }
 0x2c0   : > { %2463 = vst [vmem:[#allocation3 + $0x1c8] sm:$0xff] %v2424_v14  ;;  %7013 = vmatprep.mubr.bf16.mxu1 %v19355_v33  ;;  %v19365_v14 = vld [vmem:[#allocation3 + $0x58] sm:$0xff]  ;;  %v3966_v28 = vsel %vm647_vm0, %v2879_v55, %v3789_v63  ;;  %v19405_v55 = vld [vmem:[#allocation3 + $0x120] sm:$0xff] }
 0x2c1   : > { %15467 = vmatmul.mubr.msk.bf16.gmra.mrb[60].mxu0 %vm2365_vm14, %v17169_v60  ;;  %v1209_v60 = vsel %vm852_vm1, %v1200_v27, %v1208_v53  ;;  %v4547_v13 = vsel %vm4190_vm12, %v4538_v40, %v4546_v31  ;;  %v16951_v40 = vld [vmem:[#allocation4 + $0x2b8] sm:$0xff]   ;;  %v19410_v31 = vld [vmem:[#allocation3 + $0xb8] sm:$0xff] }
 0x2c2   : > { %15482 = vmatprep.mubr.msk.bf16.mxu0 %vm2365_vm14, %v6646_v49  ;;  %v2119_v61 = vpop.permute.xlu1 %2118 }
 0x2c3   : > { %v2296_v63 = vsel %vm647_vm0, %v1209_v60, %v2119_v61  ;;  %v19418_v60 = vld [vmem:[#allocation3 + $0xd0] sm:$0xff] }
 0x2c6   : > { %v13828_v2 = vpop.f32.mrb[20].mxu1 }
 0x2c7   : > { %v3841_v23 = vpop.permute.xlu0 %3840  ;;  %7014 = vmatmul.mubr.bf16.gmra.mrb[96].mxu1 %v19360_v34  ;;  %v13829_v7 = vpop.f32.mrb[21].mxu1 }
 0x2c8   : > { %7021 = vmatprep.mubr.bf16.mxu1 %v19363_v15  ;;  %v4023_v51 = vsel %vm2312_vm13, %v3966_v28, %v3841_v23  ;;  %v13831_v58 = vpop.f32.mrb[22].mxu1 }
 0x2c9   : > { %15483 = vmatmul.mubr.msk.bf16.vlgmr.msra.gmra.mrb[32].mxu0 %vm2365_vm14, %v19365_v14  ;;  %v13832_v36 = vpop.f32.mrb[23].mxu1 }
 0x2ca   : > { %v2171_v25 = vpop.permute.xlu1 %2170  ;;  %15515 = vmatpush3.bf16.msra.mxu0 %v19294_v32  ;;  %15486 = vmatprep.mubr.msk.bf16.mxu0 %vm2365_vm14, %v19371_v5  ;;  %v19381_v32 = vadd.f32 %v13829_v7, %v13828_v2  ;;  %v19391_v61 = vadd.f32 %v13832_v36, %v13831_v58 }
 0x2cb   : > { %v3893_v16 = vpop.permute.xlu0 %3892  ;;  %15516 = vmatprep.subr.bf16.mxu0 %v16941_v45  ;;  %v2354_v1 = vsel %vm2312_vm13, %v2296_v63, %v2171_v25  ;;  %v19425_v63 = vld [vmem:[#allocation4 + $0x340] sm:$0xff]  }
 0x2cc   : > { %v4095_v49 = vsel %vm2365_vm14, %v4023_v51, %v3893_v16  ;;  %v19408_v51 = vld [vmem:[#allocation3 + $0x140] sm:$0xff] }
 0x2cd   : > { %4132 = vst [vmem:[#allocation3 + $0x1e8] sm:$0xff] %v4095_v49 }
 0x2ce   : > { %v2223_v18 = vpop.permute.xlu1 %2222  ;;  %15517 = vmatpush3.bf16.msra.mxu0 %v16941_v45  ;;  %v16948_v45 = vld [vmem:[#allocation4 + $0x2b0] sm:$0xff]  }
 0x2cf   : > { %v2427_v37 = vsel %vm2365_vm14, %v2354_v1, %v2223_v18  ;;  %v5300_v26 = vpop.permute.xlu0 %5299  ;;  %7022 = vmatmul.mubr.bf16.gmra.mrb[100].mxu1 %v19384_v38  ;;  %15518 = vmatprep.subr.bf16.mxu0 %v16944_v57 }
 0x2d0   : > { %2464 = vst [vmem:[#allocation3 + $0x1e0] sm:$0xff] %v2427_v37  ;;  %v5425_v23 = vsel %vm647_vm0, %v4547_v13, %v5300_v26  ;;  %7029 = vmatprep.mubr.bf16.mxu1 %v19389_v19  ;;  %v13932_v27 = vpop.f32.mrb[64].mxu0  ;;  %v19429_v37 = vld [vmem:[#allocation3 + $0x138] sm:$0xff] }
 0x2d1   : > { %15487 = vmatmul.mubr.msk.bf16.gmra.mrb[36].mxu0 %vm2365_vm14, %v19394_v62  ;;  %v13933_v53 = vpop.f32.mrb[65].mxu0 }
 0x2d2   : > { %v5352_v35 = vpop.permute.xlu1 %5351  ;;  %15490 = vmatprep.mubr.msk.bf16.mxu0 %vm2365_vm14, %v19399_v54  ;;  %15519 = vmatpush3.bf16.msra.mxu0 %v16944_v57  ;;  %v13934_v28 = vadd.f32 %v13933_v53, %v13932_v27  ;;  %v13935_v25 = vpop.f32.mrb[66].mxu0  ;;  %v19445_v53 = vld [vmem:[#allocation3 + $0x100] sm:$0xff] }
 0x2d3   : > { %v5502_v20 = vsel %vm2312_vm13, %v5425_v23, %v5352_v35  ;;  %15520 = vmatprep.subr.bf16.mxu0 %v16946_v9  ;;  %v13936_v16 = vpop.f32.mrb[67].mxu0 }
 0x2d4   : > { %5539 = vst.msk [vmem:[#allocation3 + $0x1f0] sm:$0xff] %vm2365_vm14, %v5502_v20  ;;  %v19414_v2 = vadd.f32 %v13934_v28, %v19166_v59  ;;  %v13937_v57 = vadd.f32 %v13936_v16, %v13935_v25  ;;  %v19437_v20 = vld [vmem:[#allocation3 + $0xe8] sm:$0xff] }
 0x2d6   : > { %15521 = vmatpush3.bf16.msra.mxu0 %v16946_v9  ;;  %v19423_v49 = vadd.f32 %v13937_v57, %v19174_v3  ;;  %v19432_v3 = vld [vmem:[#allocation3 + $0x158] sm:$0xff] }
 0x2d7   : > { %7030 = vmatmul.mubr.bf16.gmra.mrb[104].mxu1 %v19405_v55  ;;  %15522 = vmatprep.subr.bf16.mxu0 %v16948_v45 }
 0x2d8   : > { %7037 = vmatprep.mubr.bf16.mxu1 %v19408_v51  ;;  %v13834_v7 = vpop.f32.mrb[24].mxu1  ;;  %v13938_v58 = vpop.f32.mrb[68].mxu0 }
 0x2d9   : > { %15491 = vmatmul.mubr.msk.bf16.gmra.mrb[40].mxu0 %vm2365_vm14, %v19410_v31  ;;  %v13835_v59 = vpop.f32.mrb[25].mxu1  ;;  %v13939_v1 = vpop.f32.mrb[69].mxu0 }
 0x2da   : > { %15494 = vmatprep.mubr.msk.bf16.mxu0 %vm2365_vm14, %v19418_v60  ;;  %15523 = vmatpush3.bf16.msra.mxu0 %v16948_v45  ;;  %v19427_v18 = vadd.f32 %v13835_v59, %v13834_v7  ;;  %v13837_v36 = vpop.f32.mrb[26].mxu1  ;;  %v13940_v13 = vadd.f32 %v13939_v1, %v13938_v58  ;;  %v13941_v26 = vpop.f32.mrb[70].mxu0  ;;  %v19457_v59 = vld [vmem:[#allocation3 + $0x118] sm:$0xff] }
 0x2db   : > { %15524 = vmatprep.subr.bf16.mxu0 %v16951_v40  ;;  %v13838_v9 = vpop.f32.mrb[27].mxu1  ;;  %v13942_v23 = vpop.f32.mrb[71].mxu0 }
 0x2dc   : > { %v19434_v35 = vadd.f32 %v13838_v9, %v13837_v36  ;;  %v19441_v45 = vadd.f32 %v13940_v13, %v19204_v41  ;;  %v13943_v27 = vadd.f32 %v13942_v23, %v13941_v26  ;;  %v19455_v41 = vld [vmem:[#allocation3 + $0x170] sm:$0xff] }
 0x2dd   : > { %v19465_v36 = vld [vmem:[#allocation3 + $0x130] sm:$0xff] }
 0x2de   : > { %15525 = vmatpush3.bf16.msra.mxu0 %v16951_v40  ;;  %22017 = vst [vmem:[#allocation10_spill] sm:$0xff] %v19441_v45  ;;  %v19450_v28 = vadd.f32 %v13943_v27, %v19210_v47  ;;  %v19452_v40 = vld [vmem:[#allocation3 + $0x150] sm:$0xff]  ;;  %v19519_v45 = vld [vmem:[#allocation3 + $0x1a8] sm:$0xff] }
 0x2df   : > { %7038 = vmatmul.mubr.bf16.gmra.mrb[108].mxu1 %v19429_v37  ;;  %15558 = vmatprep.subr.bf16.mxu0 %v19425_v63 }
 0x2e0   : > { %7045 = vmatprep.mubr.bf16.mxu1 %v19432_v3  ;;  %22018 = vst [vmem:[#allocation11_spill] sm:$0xff] %v19450_v28  ;;  %v13944_v25 = vpop.f32.mrb[72].mxu0 }
 0x2e1   : > { %15495 = vmatmul.mubr.msk.bf16.gmra.mrb[44].mxu0 %vm2365_vm14, %v19437_v20  ;;  %v13945_v16 = vpop.f32.mrb[73].mxu0 }
 0x2e2   : > { %15498 = vmatprep.mubr.msk.bf16.mxu0 %vm2365_vm14, %v19445_v53  ;;  %v13946_v57 = vadd.f32 %v13945_v16, %v13944_v25  ;;  %v13947_v7 = vpop.f32.mrb[74].mxu0  ;;  %v19474_v16 = vld [vmem:[#allocation3 + $0x168] sm:$0xff] }
 0x2e3   : > { %v13948_v58 = vpop.f32.mrb[75].mxu0  ;;  %22021 = vst [vmem:[#allocation14_spill] sm:$0xff] %v19474_v16 }
 0x2e4   : > { %v19461_v1 = vadd.f32 %v13946_v57, %v19224_v42  ;;  %v13949_v47 = vadd.f32 %v13948_v58, %v13947_v7 }
 0x2e6   : > { %22019 = vst [vmem:[#allocation12_spill] sm:$0xff] %v19461_v1  ;;  %v19470_v13 = vadd.f32 %v13949_v47, %v19228_v22  ;;  %v19477_v1 = vld [vmem:[#allocation3 + $0x188] sm:$0xff] }
 0x2e7   : > { %7046 = vmatmul.mubr.bf16.gmra.mrb[112].mxu1 %v19452_v40  ;;  %22022 = vst [vmem:[#allocation15_spill] sm:$0xff] %v19477_v1  ;;  %v19481_v47 = vld [vmem:[#allocation3 + $0x148] sm:$0xff] }
 0x2e8   : > { %7053 = vmatprep.mubr.bf16.mxu1 %v19455_v41  ;;  %22020 = vst [vmem:[#allocation13_spill] sm:$0xff] %v19470_v13  ;;  %v19496_v13 = vld [vmem:[#allocation3 + $0x180] sm:$0xff] }
 0x2e9   : > { %15499 = vmatmul.mubr.msk.bf16.gmra.mrb[48].mxu0 %vm2365_vm14, %v19457_v59  ;;  %v13840_v26 = vpop.f32.mrb[28].mxu1  ;;  %v13950_v9 = vpop.f32.mrb[76].mxu0  ;;  %22025 = vst [vmem:[#allocation18_spill] sm:$0xff] %v19496_v13 }
 0x2ea   : > { %15502 = vmatprep.mubr.msk.bf16.mxu0 %vm2365_vm14, %v19465_v36  ;;  %v13841_v23 = vpop.f32.mrb[29].mxu1  ;;  %v13951_v25 = vpop.f32.mrb[77].mxu0 }
 0x2eb   : > { %v19472_v27 = vadd.f32 %v13841_v23, %v13840_v26  ;;  %v13843_v42 = vpop.f32.mrb[30].mxu1  ;;  %v13952_v57 = vadd.f32 %v13951_v25, %v13950_v9  ;;  %v13953_v7 = vpop.f32.mrb[78].mxu0  ;;  %v19489_v9 = vld [vmem:[#allocation3 + $0x160] sm:$0xff] }
 0x2ec   : > { %v13844_v58 = vpop.f32.mrb[31].mxu1  ;;  %v13954_v22 = vpop.f32.mrb[79].mxu0 }
 0x2ed   : > { %v19479_v28 = vadd.f32 %v13844_v58, %v13843_v42  ;;  %v19485_v26 = vadd.f32 %v13952_v57, %v19234_v46  ;;  %v13955_v23 = vadd.f32 %v13954_v22, %v13953_v7  ;;  %v19499_v57 = vld [vmem:[#allocation3 + $0x178] sm:$0xff] }
 0x2ef   : > { %7054 = vmatmul.mubr.bf16.gmra.mrb[116].mxu1 %v19474_v16  ;;  %22023 = vst [vmem:[#allocation16_spill] sm:$0xff] %v19485_v26  ;;  %v19494_v25 = vadd.f32 %v13955_v23, %v19238_v4  ;;  %v19507_v4 = vld [vmem:[#allocation3 + $0x190] sm:$0xff] }
 0x2f0   : > { %7061 = vmatprep.mubr.bf16.mxu1 %v19477_v1 }
 0x2f1   : > { %15503 = vmatmul.mubr.msk.bf16.gmra.mrb[52].mxu0 %vm2365_vm14, %v19481_v47  ;;  %22024 = vst [vmem:[#allocation17_spill] sm:$0xff] %v19494_v25  ;;  %v13956_v42 = vpop.f32.mrb[80].mxu0 }
 0x2f2   : > { %15506 = vmatprep.mubr.msk.bf16.mxu0 %vm2365_vm14, %v19489_v9  ;;  %v13957_v58 = vpop.f32.mrb[81].mxu0 }
 0x2f3   : > { %v13958_v1 = vadd.f32 %v13957_v58, %v13956_v42  ;;  %v13959_v16 = vpop.f32.mrb[82].mxu0 }
 0x2f4   : > { %v13960_v46 = vpop.f32.mrb[83].mxu0 }
 0x2f5   : > { %v19503_v7 = vadd.f32 %v13958_v1, %v19288_v39  ;;  %v13961_v22 = vadd.f32 %v13960_v46, %v13959_v16 }
 0x2f7   : > { %7062 = vmatmul.mubr.bf16.gmra.mrb[120].mxu1 %v19496_v13  ;;  %22026 = vst [vmem:[#allocation19_spill] sm:$0xff] %v19503_v7  ;;  %v19512_v23 = vadd.f32 %v13961_v22, %v19292_v56 }
 0x2f8   : > { %7069 = vmatprep.mubr.bf16.mxu1 %v19253_v21 }
 0x2f9   : > { %15507 = vmatmul.mubr.msk.bf16.gmra.mrb[56].mxu0 %vm2365_vm14, %v19499_v57  ;;  %v13962_v25 = vpop.f32.mrb[84].mxu0 }
 0x2fa   : > { %15510 = vmatprep.mubr.msk.bf16.mxu0 %vm2365_vm14, %v19507_v4  ;;  %v13846_v42 = vpop.f32.mrb[32].mxu1  ;;  %v13963_v39 = vpop.f32.mrb[85].mxu0 }
 0x2fb   : > { %v13847_v58 = vpop.f32.mrb[33].mxu1  ;;  %v13964_v16 = vadd.f32 %v13963_v39, %v13962_v25  ;;  %v13965_v46 = vpop.f32.mrb[86].mxu0 }
 0x2fc   : > { %v19514_v26 = vadd.f32 %v13847_v58, %v13846_v42  ;;  %v13849_v21 = vpop.f32.mrb[34].mxu1  ;;  %v13966_v13 = vpop.f32.mrb[87].mxu0 }
 0x2fd   : > { %v13850_v1 = vpop.f32.mrb[35].mxu1  ;;  %v19523_v56 = vadd.f32 %v13964_v16, %v19381_v32  ;;  %v13967_v22 = vadd.f32 %v13966_v13, %v13965_v46  ;;  %v16955_v32 = vld [vmem:[#allocation4 + $0x348] sm:$0xff]  }
 0x2fe   : > { %v19517_v7 = vadd.f32 %v13850_v1, %v13849_v21  ;;  %v16956_v21 = vld [vmem:[#allocation4 + $0x308] sm:$0xff]  }
 0x2ff   : > { %7070 = vmatmul.mubr.bf16.gmra.mrb[124].mxu1 %v19261_v10  ;;  %v19530_v25 = vadd.f32 %v13967_v22, %v19391_v61  ;;  %v16954_v10 = vld [vmem:[#allocation4 + $0x2c0] sm:$0xff]   ;;  %v16957_v16 = vld [vmem:[#allocation4 + $0x2c8] sm:$0xff]   ;;  %v16959_v61 = vld [vmem:[#allocation4 + $0x310] sm:$0xff]  }
 0x300   : > { %7576 = vmatprep.mubr.bf16.mxu1 %v19244_v6 }
 0x301   : > { %15511 = vmatmul.mubr.msk.bf16.gmra.mrb[60].mxu0 %vm2365_vm14, %v19519_v45  ;;  %v13968_v42 = vpop.f32.mrb[88].mxu0 }
 0x302   : > { %15526 = vmatprep.mubr.msk.bf16.mxu0 %vm2365_vm14, %v19365_v14  ;;  %v13969_v58 = vpop.f32.mrb[89].mxu0 }
 0x303   : > { %v13970_v39 = vadd.f32 %v13969_v58, %v13968_v42  ;;  %v13971_v1 = vpop.f32.mrb[90].mxu0 }
 0x304   : > { %v13972_v6 = vpop.f32.mrb[91].mxu0 }
 0x305   : > { %v19535_v13 = vadd.f32 %v13970_v39, %v19427_v18  ;;  %v13973_v14 = vadd.f32 %v13972_v6, %v13971_v1  ;;  %v16963_v39 = vld [vmem:[#allocation4 + $0x318] sm:$0xff]  }
 0x307   : > { %7577 = vmatmul.mubr.bf16.vlgmr.msra.gmra.mrb[128].mxu1 %v19258_v17  ;;  %22027 = vst [vmem:[#allocation20_spill] sm:$0xff] %v19535_v13  ;;  %v19543_v17 = vadd.f32 %v13973_v14, %v19434_v35  ;;  %v16960_v14 = vld [vmem:[#allocation4 + $0x358] sm:$0xff]  }
 0x308   : > { %14319 = vmatpush3.bf16.msra.mxu1 %v16954_v10  ;;  %7584 = vmatprep.mubr.bf16.mxu1 %v19264_v0  ;;  %v16958_v0 = vld [vmem:[#allocation4 + $0x350] sm:$0xff]  }
 0x309   : > { %15527 = vmatmul.mubr.msk.bf16.vlgmr.msra.gmra.mrb[32].mxu0 %vm2365_vm14, %v19371_v5  ;;  %14320 = vmatprep.subr.bf16.mxu1 %v16956_v21  ;;  %v13974_v22 = vpop.f32.mrb[92].mxu0  ;;  %v16961_v10 = vld [vmem:[#allocation4 + $0x2d0] sm:$0xff]  }
 0x30a   : > { %15559 = vmatpush3.bf16.msra.mxu0 %v19425_v63  ;;  %15530 = vmatprep.mubr.msk.bf16.mxu0 %vm2365_vm14, %v19394_v62  ;;  %v13975_v21 = vpop.f32.mrb[93].mxu0 }
 0x30b   : > { %v13852_v46 = vpop.f32.mrb[36].mxu1  ;;  %15560 = vmatprep.subr.bf16.mxu0 %v16955_v32  ;;  %v13976_v1 = vadd.f32 %v13975_v21, %v13974_v22  ;;  %v13977_v6 = vpop.f32.mrb[94].mxu0 }
 0x30c   : > { %v13853_v18 = vpop.f32.mrb[37].mxu1  ;;  %14321 = vmatpush3.bf16.msra.mxu1 %v16957_v16  ;;  %v13978_v35 = vpop.f32.mrb[95].mxu0 }
 0x30d   : > { %v19545_v42 = vadd.f32 %v13853_v18, %v13852_v46  ;;  %v13855_v58 = vpop.f32.mrb[38].mxu1  ;;  %14322 = vmatprep.subr.bf16.mxu1 %v16959_v61  ;;  %v19552_v16 = vadd.f32 %v13976_v1, %v19472_v27  ;;  %v13979_v46 = vadd.f32 %v13978_v35, %v13977_v6  ;;  %v16964_v61 = vld [vmem:[#allocation4 + $0x2d8] sm:$0xff]   ;;  %v16968_v27 = vld [vmem:[#allocation4 + $0x2e0] sm:$0xff]   ;;  %v16974_v1 = vld [vmem:[#allocation4 + $0x2e8] sm:$0xff]  }
 0x30e   : > { %v13856_v63 = vpop.f32.mrb[39].mxu1  ;;  %15561 = vmatpush3.bf16.msra.mxu0 %v16955_v32  ;;  %v16966_v32 = vld [vmem:[#allocation4 + $0x320] sm:$0xff]   ;;  %v16978_v6 = vld [vmem:[#allocation4 + $0x330] sm:$0xff]  }
 0x30f   : > { %v19547_v13 = vadd.f32 %v13856_v63, %v13855_v58  ;;  %7585 = vmatmul.mubr.bf16.gmra.mrb[132].mxu1 %v19275_v44  ;;  %15562 = vmatprep.subr.bf16.mxu0 %v16958_v0  ;;  %v19559_v44 = vadd.f32 %v13979_v46, %v19479_v28  ;;  %v16965_v63 = vld [vmem:[#allocation4 + $0x368] sm:$0xff]   ;;  %v16980_v46 = vld [vmem:[#allocation4 + $0x2f0] sm:$0xff]  }
 0x310   : > { %7592 = vmatprep.mubr.bf16.mxu1 %v19279_v30  ;;  %14323 = vmatpush3.bf16.msra.mxu1 %v16961_v10  ;;  %v16962_v30 = vld [vmem:[#allocation4 + $0x360] sm:$0xff]   ;;  %v16972_v10 = vld [vmem:[#allocation4 + $0x328] sm:$0xff]  }
 0x311   : > { %15531 = vmatmul.mubr.msk.bf16.gmra.mrb[36].mxu0 %vm2365_vm14, %v19399_v54  ;;  %14324 = vmatprep.subr.bf16.mxu1 %v16963_v39  ;;  %v13980_v18 = vpop.f32.mrb[96].mxu0 }
 0x312   : > { %15534 = vmatprep.mubr.msk.bf16.mxu0 %vm2365_vm14, %v19410_v31  ;;  %15563 = vmatpush3.bf16.msra.mxu0 %v16958_v0  ;;  %v13981_v22 = vpop.f32.mrb[97].mxu0 }
 0x313   : > { %15564 = vmatprep.subr.bf16.mxu0 %v16960_v14  ;;  %v13982_v58 = vadd.f32 %v13981_v22, %v13980_v18  ;;  %v13983_v21 = vpop.f32.mrb[98].mxu0 }
 0x314   : > { %14325 = vmatpush3.bf16.msra.mxu1 %v16964_v61  ;;  %v13984_v39 = vpop.f32.mrb[99].mxu0 }
 0x315   : > { %14326 = vmatprep.subr.bf16.mxu1 %v16966_v32  ;;  %v19564_v28 = vadd.f32 %v13982_v58, %v19514_v26  ;;  %v13985_v0 = vadd.f32 %v13984_v39, %v13983_v21 }
 0x316   : > { %15565 = vmatpush3.bf16.msra.mxu0 %v16960_v14 }
 0x317   : > { %7593 = vmatmul.mubr.bf16.gmra.mrb[136].mxu1 %v19299_v43  ;;  %15566 = vmatprep.subr.bf16.mxu0 %v16962_v30  ;;  %v19571_v43 = vadd.f32 %v13985_v0, %v19517_v7  ;;  %v16986_v0 = vld [vmem:[#allocation4 + $0x2f8] sm:$0xff]  }
 0x318   : > { %7600 = vmatprep.mubr.bf16.mxu1 %v19302_v50  ;;  %14327 = vmatpush3.bf16.msra.mxu1 %v16968_v27  ;;  %v16967_v50 = vld [vmem:[#allocation4 + $0x3b0] sm:$0xff]   ;;  %v16984_v27 = vld [vmem:[#allocation4 + $0x338] sm:$0xff]  }
 0x319   : > { %15535 = vmatmul.mubr.msk.bf16.gmra.mrb[40].mxu0 %vm2365_vm14, %v19418_v60  ;;  %14328 = vmatprep.subr.bf16.mxu1 %v16972_v10  ;;  %v13986_v14 = vpop.f32.mrb[100].mxu0 }
 0x31a   : > { %15538 = vmatprep.mubr.msk.bf16.mxu0 %vm2365_vm14, %v19437_v20  ;;  %15567 = vmatpush3.bf16.msra.mxu0 %v16962_v30  ;;  %v13987_v18 = vpop.f32.mrb[101].mxu0 }
 0x31b   : > { %v13858_v35 = vpop.f32.mrb[40].mxu1  ;;  %15568 = vmatprep.subr.bf16.mxu0 %v16965_v63  ;;  %v13988_v10 = vadd.f32 %v13987_v18, %v13986_v14  ;;  %v13989_v58 = vpop.f32.mrb[102].mxu0 }
 0x31c   : > { %v13859_v26 = vpop.f32.mrb[41].mxu1  ;;  %14329 = vmatpush3.bf16.msra.mxu1 %v16974_v1  ;;  %v13990_v7 = vpop.f32.mrb[103].mxu0  ;;  %v16991_v1 = vld [vmem:[#allocation4 + $0x460] sm:$0xff]  }
 0x31d   : > { %v13860_v61 = vadd.f32 %v13859_v26, %v13858_v35  ;;  %v13861_v32 = vpop.f32.mrb[42].mxu1  ;;  %14330 = vmatprep.subr.bf16.mxu1 %v16978_v6  ;;  %v19576_v30 = vadd.f32 %v13988_v10, %v19545_v42  ;;  %v13991_v39 = vadd.f32 %v13990_v7, %v13989_v58 }
 0x31e   : > { %v13862_v22 = vpop.f32.mrb[43].mxu1  ;;  %15569 = vmatpush3.bf16.msra.mxu0 %v16965_v63 }
 0x31f   : > { %v13863_v21 = vadd.f32 %v13862_v22, %v13861_v32  ;;  %7601 = vmatmul.mubr.bf16.gmra.mrb[140].mxu1 %v19312_v48  ;;  %14452 = vmatprep.subr.bf16.mxu0 %v16967_v50  ;;  %v19583_v48 = vadd.f32 %v13991_v39, %v19547_v13 }
 0x320   : > { %7608 = vmatprep.mubr.bf16.mxu1 %v19316_v29  ;;  %14331 = vmatpush3.bf16.msra.mxu1 %v16980_v46 }
 0x321   : > { %15539 = vmatmul.mubr.msk.bf16.gmra.mrb[44].mxu0 %vm2365_vm14, %v19445_v53  ;;  %14332 = vmatprep.subr.bf16.mxu1 %v16984_v27  ;;  %v13992_v63 = vpop.f32.mrb[104].mxu0 }
 0x322   : > { %15542 = vmatprep.mubr.msk.bf16.mxu0 %vm2365_vm14, %v19457_v59  ;;  %v13993_v29 = vpop.f32.mrb[105].mxu0 }
 0x323   : > { %v13994_v42 = vadd.f32 %v13993_v29, %v13992_v63  ;;  %v13995_v6 = vpop.f32.mrb[106].mxu0 }
 0x324   : > { %14333 = vmatpush3.bf16.msra.mxu1 %v16986_v0  ;;  %v13996_v35 = vpop.f32.mrb[107].mxu0 }
 0x325   : > { %14586 = vmatprep.subr.bf16.mxu1 %v16991_v1  ;;  %v19587_v50 = vadd.f32 %v13994_v42, %v13860_v61  ;;  %v13997_v26 = vadd.f32 %v13996_v35, %v13995_v6 }
 0x327   : > { %7609 = vmatmul.mubr.bf16.gmra.mrb[144].mxu1 %v19327_v52  ;;  %v19593_v13 = vadd.f32 %v13997_v26, %v13863_v21 }
 0x328   : > { %7616 = vmatprep.mubr.bf16.mxu1 %v19331_v11 }
 0x329   : > { %15543 = vmatmul.mubr.msk.bf16.gmra.mrb[48].mxu0 %vm2365_vm14, %v19465_v36  ;;  %v13998_v27 = vpop.f32.mrb[108].mxu0 }
 0x32a   : > { %v13864_v14 = vpop.f32.mrb[44].mxu1  ;;  %15546 = vmatprep.mubr.msk.bf16.mxu0 %vm2365_vm14, %v19481_v47  ;;  %v13999_v22 = vpop.f32.mrb[109].mxu0 }
 0x32b   : > { %v13865_v46 = vpop.f32.mrb[45].mxu1  ;;  %v14000_v11 = vadd.f32 %v13999_v22, %v13998_v27  ;;  %v14001_v61 = vpop.f32.mrb[110].mxu0 }
 0x32c   : > { %v13866_v32 = vadd.f32 %v13865_v46, %v13864_v14  ;;  %v13867_v18 = vpop.f32.mrb[46].mxu1  ;;  %v14002_v58 = vpop.f32.mrb[111].mxu0 }
 0x32d   : > { %v13868_v52 = vpop.f32.mrb[47].mxu1  ;;  %v14003_v39 = vadd.f32 %v14002_v58, %v14001_v61 }
 0x32e   : > { %v13869_v10 = vadd.f32 %v13868_v52, %v13867_v18  ;;  %v19597_v7 = vadd.f32 %v14000_v11, %v13866_v32 }
 0x32f   : > { %7617 = vmatmul.mubr.bf16.gmra.mrb[148].mxu1 %v19339_v8 }
 0x330   : > { %7624 = vmatprep.mubr.bf16.mxu1 %v19342_v24  ;;  %v19603_v21 = vadd.f32 %v14003_v39, %v13869_v10  ;;  %v19616_v10 = vld [vmem:[#allocation3 + $0x1c0] sm:$0xff] }
 0x331   : > { %15547 = vmatmul.mubr.msk.bf16.gmra.mrb[52].mxu0 %vm2365_vm14, %v19489_v9  ;;  %v14004_v0 = vpop.f32.mrb[112].mxu0 }
 0x332   : > { %15550 = vmatprep.mubr.msk.bf16.mxu0 %vm2365_vm14, %v19499_v57  ;;  %v14005_v1 = vpop.f32.mrb[113].mxu0 }
 0x333   : > { %v14006_v63 = vadd.f32 %v14005_v1, %v14004_v0  ;;  %v14007_v29 = vpop.f32.mrb[114].mxu0 }
 0x334   : > { %v14008_v8 = vpop.f32.mrb[115].mxu0 }
 0x335   : > { %v14009_v24 = vadd.f32 %v14008_v8, %v14007_v29 }
 0x337   : > { %7625 = vmatmul.mubr.bf16.gmra.mrb[152].mxu1 %v19351_v12 }
 0x338   : > { %7632 = vmatprep.mubr.bf16.mxu1 %v19355_v33 }
 0x339   : > { %15551 = vmatmul.mubr.msk.bf16.gmra.mrb[56].mxu0 %vm2365_vm14, %v19507_v4 }
 0x33a   : > { %v13870_v42 = vpop.f32.mrb[48].mxu1  ;;  %15554 = vmatprep.mubr.msk.bf16.mxu0 %vm2365_vm14, %v19519_v45  ;;  %v14010_v14 = vpop.f32.mrb[116].mxu0 }
 0x33b   : > { %v13871_v6 = vpop.f32.mrb[49].mxu1  ;;  %v14011_v32 = vpop.f32.mrb[117].mxu0 }
 0x33c   : > { %v13872_v35 = vadd.f32 %v13871_v6, %v13870_v42  ;;  %v13873_v26 = vpop.f32.mrb[50].mxu1  ;;  %v14012_v12 = vadd.f32 %v14011_v32, %v14010_v14  ;;  %v14013_v52 = vpop.f32.mrb[118].mxu0 }
 0x33d   : > { %v13874_v46 = vpop.f32.mrb[51].mxu1  ;;  %v14014_v33 = vpop.f32.mrb[119].mxu0 }
 0x33e   : > { %v13875_v18 = vadd.f32 %v13874_v46, %v13873_v26  ;;  %v19611_v27 = vadd.f32 %v14006_v63, %v13872_v35  ;;  %v14015_v11 = vadd.f32 %v14014_v33, %v14013_v52  ;;  %v16970_v35 = vld [vmem:[#allocation4 + $0x3b8] sm:$0xff]  }
 0x33f   : > { %7633 = vmatmul.mubr.bf16.gmra.mrb[156].mxu1 %v19360_v34  ;;  %v16971_v46 = vld [vmem:[#allocation4 + $0x378] sm:$0xff]  }
 0x340   : > { %v19614_v22 = vadd.f32 %v14009_v24, %v13875_v18  ;;  %7640 = vmatprep.mubr.bf16.mxu1 %v19363_v15  ;;  %v16969_v24 = vld [vmem:[#allocation4 + $0x370] sm:$0xff]   ;;  %v16973_v18 = vld [vmem:[#allocation4 + $0x3c0] sm:$0xff]  }
 0x341   : > { %15555 = vmatmul.mubr.msk.bf16.gmra.mrb[60].mxu0 %vm2365_vm14, %v19616_v10 }
 0x342   : > { %v13876_v61 = vpop.f32.mrb[52].mxu1  ;;  %15570 = vmatprep.mubr.msk.bf16.mxu0 %vm2365_vm14, %v19371_v5  ;;  %v14016_v1 = vpop.f32.mrb[120].mxu0 }
 0x343   : > { %v13877_v58 = vpop.f32.mrb[53].mxu1  ;;  %v14017_v63 = vpop.f32.mrb[121].mxu0 }
 0x344   : > { %v13878_v39 = vadd.f32 %v13877_v58, %v13876_v61  ;;  %v13879_v0 = vpop.f32.mrb[54].mxu1  ;;  %v14018_v42 = vadd.f32 %v14017_v63, %v14016_v1  ;;  %v14019_v15 = vpop.f32.mrb[122].mxu0 }
 0x345   : > { %v13880_v34 = vpop.f32.mrb[55].mxu1  ;;  %v14020_v6 = vpop.f32.mrb[123].mxu0 }
 0x346   : > { %v13881_v29 = vadd.f32 %v13880_v34, %v13879_v0  ;;  %v19623_v8 = vadd.f32 %v14012_v12, %v13878_v39  ;;  %v14021_v5 = vadd.f32 %v14020_v6, %v14019_v15  ;;  %v16975_v39 = vld [vmem:[#allocation4 + $0x380] sm:$0xff]  }
 0x347   : > { %7641 = vmatmul.mubr.bf16.gmra.mrb[160].mxu1 %v19384_v38 }
 0x348   : > { %v19626_v26 = vadd.f32 %v14015_v11, %v13881_v29  ;;  %7648 = vmatprep.mubr.bf16.mxu1 %v19389_v19  ;;  %v16977_v29 = vld [vmem:[#allocation4 + $0x388] sm:$0xff]  }
 0x349   : > { %15571 = vmatmul.mubr.msk.bf16.vlgmr.msra.gmra.mrb[32].mxu0 %vm2365_vm14, %v19394_v62 }
 0x34a   : > { %v13882_v14 = vpop.f32.mrb[56].mxu1  ;;  %14453 = vmatpush3.bf16.msra.mxu0 %v16969_v24  ;;  %15574 = vmatprep.mubr.msk.bf16.mxu0 %vm2365_vm14, %v19399_v54  ;;  %v14022_v52 = vpop.f32.mrb[124].mxu0  ;;  %v16976_v54 = vld [vmem:[#allocation4 + $0x3c8] sm:$0xff]  }
 0x34b   : > { %v13883_v32 = vpop.f32.mrb[57].mxu1  ;;  %14454 = vmatprep.subr.bf16.mxu0 %v16970_v35  ;;  %v14023_v11 = vpop.f32.mrb[125].mxu0 }
 0x34c   : > { %v13884_v38 = vadd.f32 %v13883_v32, %v13882_v14  ;;  %v13885_v12 = vpop.f32.mrb[58].mxu1  ;;  %v14024_v58 = vadd.f32 %v14023_v11, %v14022_v52  ;;  %v14025_v62 = vpop.f32.mrb[126].mxu0  ;;  %v16989_v11 = vld [vmem:[#allocation4 + $0x3a8] sm:$0xff]  }
 0x34d   : > { %v13886_v33 = vpop.f32.mrb[59].mxu1  ;;  %v14026_v0 = vpop.f32.mrb[127].mxu0 }
 0x34e   : > { %v13887_v61 = vadd.f32 %v13886_v33, %v13885_v12  ;;  %v19633_v19 = vadd.f32 %v14018_v42, %v13884_v38  ;;  %14455 = vmatpush3.bf16.msra.mxu0 %v16971_v46  ;;  %v14027_v34 = vadd.f32 %v14026_v0, %v14025_v62  ;;  %v16983_v46 = vld [vmem:[#allocation4 + $0x398] sm:$0xff]  }
 0x34f   : > { %7649 = vmatmul.mubr.bf16.gmra.mrb[164].mxu1 %v19405_v55  ;;  %14456 = vmatprep.subr.bf16.mxu0 %v16973_v18  ;;  %v16979_v55 = vld [vmem:[#allocation4 + $0x3d0] sm:$0xff]   ;;  %v16985_v18 = vld [vmem:[#allocation4 + $0x3e0] sm:$0xff]  }
 0x350   : > { %v19636_v1 = vadd.f32 %v14021_v5, %v13887_v61  ;;  %7656 = vmatprep.mubr.bf16.mxu1 %v19408_v51  ;;  %v16981_v51 = vld [vmem:[#allocation4 + $0x390] sm:$0xff]  }
 0x351   : > { %15575 = vmatmul.mubr.msk.bf16.gmra.mrb[36].mxu0 %vm2365_vm14, %v19410_v31  ;;  %v16982_v31 = vld [vmem:[#allocation4 + $0x3d8] sm:$0xff]  }
 0x352   : > { %15578 = vmatprep.mubr.msk.bf16.mxu0 %vm2365_vm14, %v19418_v60  ;;  %v13888_v63 = vpop.f32.mrb[60].mxu1  ;;  %14457 = vmatpush3.bf16.msra.mxu0 %v16975_v39 }
 0x353   : > { %v13889_v24 = vpop.f32.mrb[61].mxu1  ;;  %14458 = vmatprep.subr.bf16.mxu0 %v16976_v54  ;;  %v22029_v54 = vld [vmem:[#allocation14_spill] sm:$0xff] }
 0x354   : > { %v13890_v42 = vadd.f32 %v13889_v24, %v13888_v63  ;;  %v13891_v15 = vpop.f32.mrb[62].mxu1 }
 0x355   : > { %v13892_v6 = vpop.f32.mrb[63].mxu1 }
 0x356   : > { %v19643_v35 = vadd.f32 %v14024_v58, %v13890_v42  ;;  %v13893_v5 = vadd.f32 %v13892_v6, %v13891_v15  ;;  %14459 = vmatpush3.bf16.msra.mxu0 %v16977_v29  ;;  %v19665_v58 = vld [vmem:[#allocation4 + $0x3f0] sm:$0xff]   ;;  %v22032_v15 = vld [vmem:[#allocation12_spill] sm:$0xff] }
 0x357   : > { %7657 = vmatmul.mubr.bf16.gmra.mrb[168].mxu1 %v19429_v37  ;;  %14460 = vmatprep.subr.bf16.mxu0 %v16979_v55 }
 0x358   : > { %v19646_v14 = vadd.f32 %v14027_v34, %v13893_v5  ;;  %7664 = vmatprep.mubr.bf16.mxu1 %v19432_v3  ;;  %v16987_v3 = vld [vmem:[#allocation4 + $0x3a0] sm:$0xff]   ;;  %v22031_v34 = vld [vmem:[#allocation15_spill] sm:$0xff] }
 0x359   : > { %15579 = vmatmul.mubr.msk.bf16.gmra.mrb[40].mxu0 %vm2365_vm14, %v19437_v20  ;;  %v16988_v20 = vld [vmem:[#allocation4 + $0x3e8] sm:$0xff]  }
 0x35a   : > { %15582 = vmatprep.mubr.msk.bf16.mxu0 %vm2365_vm14, %v19445_v53  ;;  %v14066_v60 = vpop.f32.mrb[64].mxu1  ;;  %14461 = vmatpush3.bf16.msra.mxu0 %v16981_v51  ;;  %v19683_v51 = vld [vmem:[#allocation2 + $0x158] sm:$0xf] }
 0x35b   : > { %v14067_v32 = vpop.f32.mrb[65].mxu1  ;;  %14462 = vmatprep.subr.bf16.mxu0 %v16982_v31  ;;  %v2986_v31 = vld [vmem:[#allocation2 + $0x150] sm:$0xf0] }
 0x35c   : > { %v14068_v38 = vadd.f32 %v14067_v32, %v14066_v60  ;;  %v14069_v37 = vpop.f32.mrb[66].mxu1  ;;  %v22033_v60 = vld [vmem:[#allocation18_spill] sm:$0xff]  ;;  %v3108_v32 = vrot.slane %v19683_v51, 4 }
 0x35d   : > { %v14070_v12 = vpop.f32.mrb[67].mxu1 }
 0x35e   : > { %v19654_v52 = vadd.f32 %v19414_v2, %v14068_v38  ;;  %v14071_v33 = vadd.f32 %v14070_v12, %v14069_v37  ;;  %14463 = vmatpush3.bf16.msra.mxu0 %v16983_v46  ;;  %v19686_v46 = vld [vmem:[#allocation3 + $0x1a0] sm:$0xff]  ;;  %v3143_v12 = vld [vmem:[#allocation2 + $0x158] sm:$0x1f] }
 0x35f   : > { %7665 = vmatmul.mubr.bf16.gmra.mrb[172].mxu1 %v19452_v40  ;;  %14464 = vmatprep.subr.bf16.mxu0 %v16985_v18 }
 0x360   : > { %v19658_v53 = vadd.f32 %v19423_v49, %v14071_v33  ;;  %7672 = vmatprep.mubr.bf16.mxu1 %v19455_v41  ;;  %v22028_v49 = vld [vmem:[#allocation10_spill] sm:$0xff]  ;;  %v3507_v33 = vshrl.u32 %v2986_v31, 16 }
 0x361   : > { %15583 = vmatmul.mubr.msk.bf16.gmra.mrb[44].mxu0 %vm2365_vm14, %v19457_v59  ;;  %v22030_v59 = vld [vmem:[#allocation11_spill] sm:$0xff] }
 0x362   : > { %15586 = vmatprep.mubr.msk.bf16.mxu0 %vm2365_vm14, %v19465_v36  ;;  %v14072_v2 = vpop.f32.mrb[68].mxu1  ;;  %14465 = vmatpush3.bf16.msra.mxu0 %v16987_v3  ;;  %v3510_v3 = vshll.u32 %v2986_v31, 16 }
 0x363   : > { %v14073_v61 = vpop.f32.mrb[69].mxu1  ;;  %14466 = vmatprep.subr.bf16.mxu0 %v16988_v20 }
 0x364   : > { %v14074_v40 = vadd.f32 %v14073_v61, %v14072_v2  ;;  %v14075_v62 = vpop.f32.mrb[70].mxu1  ;;  %v3515_v2 = vshrl.u32 %v3143_v12, 16 }
 0x365   : > { %v14076_v39 = vpop.f32.mrb[71].mxu1 }
 0x366   : > { %v19668_v0 = vadd.f32 %v22028_v49, %v14074_v40  ;;  %v14077_v41 = vadd.f32 %v14076_v39, %v14075_v62  ;;  %14467 = vmatpush3.bf16.msra.mxu0 %v16989_v11  ;;  %v3518_v11 = vshll.u32 %v3143_v12, 16  ;;  %v3509_v62 = vrot.slane %v3507_v33, 4  ;;  %v1473_v33 = vld [vmem:[#allocation2 + $0x158] sm:$0x7] }
 0x367   : > { %7673 = vmatmul.mubr.bf16.gmra.mrb[176].mxu1 %v22029_v54  ;;  %15602 = vmatprep.subr.bf16.mxu0 %v19665_v58  ;;  %v3512_v39 = vrot.slane %v3510_v3, 5 }
 0x368   : > { %v19673_v36 = vadd.f32 %v22030_v59, %v14077_v41  ;;  %7680 = vmatprep.mubr.bf16.mxu1 %v22031_v34  ;;  %v3517_v41 = vrot.slane %v3515_v2, 4  ;;  %v3520_v54 = vrot.slane %v3518_v11, 5  ;;  %v22035_v59 = vld [vmem:[#allocation16_spill] sm:$0xff] }
 0x369   : > { %15587 = vmatmul.mubr.msk.bf16.gmra.mrb[48].mxu0 %vm2365_vm14, %v19481_v47  ;;  %v3107_v47 = vrot.slane %v2986_v31, 4 }
 0x36a   : > { %15590 = vmatprep.mubr.msk.bf16.mxu0 %vm2365_vm14, %v19489_v9  ;;  %v14078_v63 = vpop.f32.mrb[72].mxu1  ;;  %v22034_v9 = vld [vmem:[#allocation13_spill] sm:$0xff] }
 0x36b   : > { %v14079_v29 = vpop.f32.mrb[73].mxu1  ;;  %v3109_v38 = vsel %vm3043_vm3, %v3107_v47, %v3108_v32  ;;  %v22036_v47 = vld [vmem:[#allocation17_spill] sm:$0xff] }
 0x36c   : > { %v14080_v24 = vadd.f32 %v14079_v29, %v14078_v63  ;;  %v14081_v55 = vpop.f32.mrb[74].mxu1  ;;  %3790 = vrot.lane.b32.xlu0 %v3109_v38, %s17281_s29  ;;  %v3513_v63 = vor.u32 %v3512_v39, %v3509_v62  ;;  %v19704_v29 = vld [vmem:[#allocation2 + $0x158] sm:$0x3] }
 0x36d   : > { %v14082_v42 = vpop.f32.mrb[75].mxu1  ;;  %v1438_v31 = vrot.slane %v19704_v29, 2 }
 0x36e   : > { %v19681_v6 = vadd.f32 %v22032_v15, %v14080_v24  ;;  %v14083_v5 = vadd.f32 %v14082_v42, %v14081_v55  ;;  %v1316_v24 = vld [vmem:[#allocation2 + $0x150] sm:$0xfc]  ;;  %v19707_v42 = vld [vmem:[#allocation3 + $0x1b8] sm:$0xff]  ;;  %v3521_v15 = vor.u32 %v3520_v54, %v3517_v41  ;;  %v2064_v41 = vrot.slane %v1473_v33, 3 }
 0x36f   : > { %7681 = vmatmul.mubr.bf16.gmra.mrb[180].mxu1 %v22033_v60  ;;  %v3612_v55 = vld [vmem:[#allocation2 + $0x150] sm:$0xe0]  ;;  %v1837_v3 = vshrl.u32 %v1316_v24, 16 }
 0x370   : > { %v19690_v18 = vadd.f32 %v22034_v9, %v14083_v5  ;;  %7688 = vmatprep.mubr.bf16.mxu1 %v19686_v46  ;;  %v1437_v5 = vrot.slane %v1316_v24, 2  ;;  %v3733_v60 = vrot.slane %v3612_v55, 5  ;;  %v3734_v9 = vrot.slane %v3143_v12, 5  ;;  %v22037_v55 = vld [vmem:[#allocation19_spill] sm:$0xff] }
 0x371   : > { %15591 = vmatmul.mubr.msk.bf16.gmra.mrb[52].mxu0 %vm2365_vm14, %v19499_v57  ;;  %v19699_v57 = vld [vmem:[#allocation3 + $0x198] sm:$0xff]  ;;  %v3522_v38 = vsel %vm3148_vm6, %v3513_v63, %v3521_v15  ;;  %v1848_v12 = vshll.u32 %v1473_v33, 16 }
 0x372   : > { %15594 = vmatprep.mubr.msk.bf16.mxu0 %vm2365_vm14, %v19507_v4  ;;  %v14084_v37 = vpop.f32.mrb[76].mxu1  ;;  %3842 = vrot.lane.b32.xlu0 %v3522_v38, %s17282_s30  ;;  %v3735_v11 = vsel %vm3669_vm8, %v3733_v60, %v3734_v9  ;;  %v4654_v9 = vld [vmem:[#allocation2 + $0x150] sm:$0xc0]  ;;  %v7899_v38 = vld [vmem:[#allocation3 + $0x68] sm:$0xff] }
 0x373   : > { %v14085_v20 = vpop.f32.mrb[77].mxu1  ;;  %v1850_v63 = vrot.slane %v1848_v12, 3  ;;  %v4811_v12 = vld [vmem:[#allocation2 + $0x158] sm:$0x7f] }
 0x374   : > { %v14086_v61 = vadd.f32 %v14085_v20, %v14084_v37  ;;  %v14087_v40 = vpop.f32.mrb[78].mxu1  ;;  %v1439_v37 = vsel %vm1373_vm5, %v1437_v5, %v1438_v31  ;;  %v1840_v20 = vshll.u32 %v1316_v24, 16  ;;  %v19726_v31 = vld [vmem:[#allocation3 + $0x1b0] sm:$0xff] }
 0x375   : > { %v14088_v49 = vpop.f32.mrb[79].mxu1  ;;  %2120 = vrot.lane.b32.xlu1 %v1439_v37, %s17281_s29 }
 0x376   : > { %v19702_v4 = vadd.f32 %v22035_v59, %v14086_v61  ;;  %v14089_v34 = vadd.f32 %v14088_v49, %v14087_v40  ;;  %v1845_v61 = vshrl.u32 %v1473_v33, 16  ;;  %v1942_v40 = vld [vmem:[#allocation2 + $0x150] sm:$0xf8]  ;;  %v1842_v39 = vrot.slane %v1840_v20, 3  ;;  %3894 = vrot.lane.b32.xlu0 %v3735_v11, %s17283_s12  ;;  %v8526_v11 = vld [vmem:[#allocation3 + $0x80] sm:$0xff] }
 0x377   : > { %7689 = vmatmul.mubr.bf16.gmra.mrb[184].mxu1 %v19699_v57  ;;  %v2063_v49 = vrot.slane %v1942_v40, 3  ;;  %v4775_v33 = vrot.slane %v4654_v9, 6  ;;  %v5175_v40 = vshrl.u32 %v4654_v9, 16 }
 0x378   : > { %v19711_v32 = vadd.f32 %v22036_v47, %v14089_v34  ;;  %7696 = vmatprep.mubr.bf16.mxu1 %v19707_v42  ;;  %v1847_v34 = vrot.slane %v1845_v61, 2  ;;  %v19729_v47 = vld [vmem:[#allocation2 + $0x158] sm:$0x3f] }
 0x379   : > { %15595 = vmatmul.mubr.msk.bf16.gmra.mrb[56].mxu0 %vm2365_vm14, %v19519_v45  ;;  %v1839_v45 = vrot.slane %v1837_v3, 2  ;;  %v2065_v37 = vsel %vm1999_vm9, %v2063_v49, %v2064_v41  ;;  %v4776_v3 = vrot.slane %v19729_v47, 6  ;;  %v5186_v49 = vshll.u32 %v4811_v12, 16 }
 0x37a   : > { %15598 = vmatprep.mubr.msk.bf16.mxu0 %vm2365_vm14, %v19616_v10  ;;  %v14090_v2 = vpop.f32.mrb[80].mxu1  ;;  %v1851_v60 = vor.u32 %v1850_v63, %v1847_v34  ;;  %2224 = vrot.lane.b32.xlu0 %v2065_v37, %s17283_s12 }
 0x37b   : > { %v14091_v62 = vpop.f32.mrb[81].mxu1  ;;  %v1843_v24 = vor.u32 %v1842_v39, %v1839_v45  ;;  %v4777_v39 = vsel %vm4711_vm2, %v4775_v33, %v4776_v3  ;;  %v7898_v33 = vld [vmem:[#allocation3 + $0x60] sm:$0xff] }
 0x37c   : > { %v14092_v54 = vadd.f32 %v14091_v62, %v14090_v2  ;;  %v14093_v59 = vpop.f32.mrb[82].mxu1  ;;  %v7945_v2 = vld [vmem:[#allocation3 + $0x1d8] sm:$0xff]  ;;  %v5178_v62 = vshll.u32 %v4654_v9, 16 }
 0x37d   : > { %v14094_v10 = vpop.f32.mrb[83].mxu1  ;;  %v1852_v61 = vsel %vm1478_vm7, %v1843_v24, %v1851_v60  ;;  %v16993_v60 = vld [vmem:[#allocation4 + $0x468] sm:$0xff]  }
 0x37e   : > { %v19724_v15 = vadd.f32 %v22037_v55, %v14092_v54  ;;  %v14095_v5 = vadd.f32 %v14094_v10, %v14093_v59  ;;  %2172 = vrot.lane.b32.xlu1 %v1852_v61, %s17282_s30  ;;  %v5177_v54 = vrot.slane %v5175_v40, 6  ;;  %v5180_v59 = vrot.slane %v5178_v62, 7  ;;  %v16992_v10 = vld [vmem:[#allocation4 + $0x420] sm:$0xff]   ;;  %v16994_v40 = vld [vmem:[#allocation4 + $0x428] sm:$0xff]  }
 0x37f   : > { %7697 = vmatmul.mubr.bf16.gmra.mrb[188].mxu1 %v19726_v31  ;;  %v5188_v55 = vrot.slane %v5186_v49, 7 }
 0x380   : > { %v19735_v20 = vadd.f32 %v19512_v23, %v14095_v5  ;;  %8203 = vmatprep.mubr.bf16.mxu1 %v7899_v38  ;;  %v5183_v23 = vshrl.u32 %v4811_v12, 16  ;;  %v5181_v9 = vor.u32 %v5180_v59, %v5177_v54  ;;  %v8525_v12 = vld [vmem:[#allocation3 + $0x78] sm:$0xff]  ;;  %v16999_v59 = vld [vmem:[#allocation4 + $0x478] sm:$0xff]  }
 0x381   : > { %15599 = vmatmul.mubr.msk.bf16.gmra.mrb[60].mxu0 %vm2365_vm14, %v7945_v2  ;;  %v16995_v2 = vld [vmem:[#allocation4 + $0x3f8] sm:$0xff]  }
 0x382   : > { %8830 = vmatprep.mubr.bf16.mxu0 %v8526_v11  ;;  %v14096_v45 = vpop.f32.mrb[84].mxu1  ;;  %v5185_v24 = vrot.slane %v5183_v23, 6  ;;  %5301 = vrot.lane.b32.xlu1 %v4777_v39, %s17281_s29 }
 0x383   : > { %v14097_v41 = vpop.f32.mrb[85].mxu1 }
 0x384   : > { %v14098_v34 = vadd.f32 %v14097_v41, %v14096_v45  ;;  %v14099_v63 = vpop.f32.mrb[86].mxu1  ;;  %v5189_v3 = vor.u32 %v5188_v55, %v5185_v24  ;;  %v19750_v45 = vld [vmem:[#allocation3 + $0x98] sm:$0xff]  ;;  %v16997_v41 = vld [vmem:[#allocation4 + $0x430] sm:$0xff]   ;;  %v19761_v55 = vld [vmem:[#allocation3 + $0x90] sm:$0xff] }
 0x385   : > { %v14100_v5 = vpop.f32.mrb[87].mxu1 }
 0x386   : > { %v19744_v38 = vadd.f32 %v19523_v56, %v14098_v34  ;;  %v14101_v37 = vadd.f32 %v14100_v5, %v14099_v63  ;;  %v5190_v62 = vsel %vm4816_vm4, %v5181_v9, %v5189_v3  ;;  %v16996_v56 = vld [vmem:[#allocation4 + $0x470] sm:$0xff]   ;;  %v22038_v34 = vld [vmem:[#allocation20_spill] sm:$0xff]  ;;  %v17000_v5 = vld [vmem:[#allocation4 + $0x438] sm:$0xff]  }
 0x387   : > { %8204 = vmatmul.mubr.bf16.vlgmr.msra.gmra.mrb[192].mxu1 %v7898_v33  ;;  %5353 = vrot.lane.b32.xlu1 %v5190_v62, %s17282_s30  ;;  %v17002_v9 = vld [vmem:[#allocation4 + $0x480] sm:$0xff]   ;;  %v17004_v62 = vld [vmem:[#allocation4 + $0x488] sm:$0xff]  }
 0x388   : > { %v19747_v61 = vadd.f32 %v19530_v25, %v14101_v37  ;;  %14587 = vmatpush3.bf16.msra.mxu1 %v16992_v10  ;;  %8211 = vmatprep.mubr.bf16.mxu1 %v8526_v11  ;;  %v16998_v25 = vld [vmem:[#allocation4 + $0x400] sm:$0xff]  }
 0x389   : > { %8831 = vmatmul.mubr.bf16.vlgmr.msra.gmra.mrb[128].mxu0 %v8525_v12  ;;  %14588 = vmatprep.subr.bf16.mxu1 %v16993_v60  ;;  %v19765_v60 = vld [vmem:[#allocation3 + $0xb0] sm:$0xff] }
 0x38a   : > { %15603 = vmatpush3.bf16.msra.mxu0 %v19665_v58  ;;  %8838 = vmatprep.mubr.bf16.mxu0 %v19750_v45  ;;  %v14102_v39 = vpop.f32.mrb[88].mxu1  ;;  %v17001_v58 = vld [vmem:[#allocation4 + $0x408] sm:$0xff]  }
 0x38b   : > { %v14103_v23 = vpop.f32.mrb[89].mxu1  ;;  %15604 = vmatprep.subr.bf16.mxu0 %v16995_v2 }
 0x38c   : > { %v14104_v49 = vadd.f32 %v14103_v23, %v14102_v39  ;;  %v14105_v11 = vpop.f32.mrb[90].mxu1  ;;  %14589 = vmatpush3.bf16.msra.mxu1 %v16994_v40  ;;  %v17009_v23 = vld [vmem:[#allocation4 + $0x418] sm:$0xff]  }
 0x38d   : > { %v14106_v54 = vpop.f32.mrb[91].mxu1  ;;  %14590 = vmatprep.subr.bf16.mxu1 %v16996_v56 }
 0x38e   : > { %v19756_v63 = vadd.f32 %v22038_v34, %v14104_v49  ;;  %v14107_v10 = vadd.f32 %v14106_v54, %v14105_v11  ;;  %15605 = vmatpush3.bf16.msra.mxu0 %v16995_v2  ;;  %v19775_v49 = vld [vmem:[#allocation3 + $0xa8] sm:$0xff]  ;;  %v17005_v11 = vld [vmem:[#allocation4 + $0x448] sm:$0xff]  }
 0x38f   : > { %8212 = vmatmul.mubr.bf16.gmra.mrb[196].mxu1 %v8525_v12  ;;  %15606 = vmatprep.subr.bf16.mxu0 %v16998_v25  ;;  %v17003_v12 = vld [vmem:[#allocation4 + $0x440] sm:$0xff]  }
 0x390   : > { %v19759_v24 = vadd.f32 %v19543_v17, %v14107_v10  ;;  %8219 = vmatprep.mubr.bf16.mxu1 %v19750_v45  ;;  %14591 = vmatpush3.bf16.msra.mxu1 %v16997_v41  ;;  %v17006_v17 = vld [vmem:[#allocation4 + $0x410] sm:$0xff]   ;;  %v19779_v41 = vld [vmem:[#allocation3 + $0xc8] sm:$0xff] }
 0x391   : > { %8839 = vmatmul.mubr.bf16.gmra.mrb[132].mxu0 %v19761_v55  ;;  %14592 = vmatprep.subr.bf16.mxu1 %v16999_v59 }
 0x392   : > { %8846 = vmatprep.mubr.bf16.mxu0 %v19765_v60  ;;  %v14108_v37 = vpop.f32.mrb[92].mxu1  ;;  %15607 = vmatpush3.bf16.msra.mxu0 %v16998_v25 }
 0x393   : > { %v14109_v33 = vpop.f32.mrb[93].mxu1  ;;  %15608 = vmatprep.subr.bf16.mxu0 %v17001_v58 }
 0x394   : > { %v14110_v3 = vadd.f32 %v14109_v33, %v14108_v37  ;;  %v14111_v2 = vpop.f32.mrb[94].mxu1  ;;  %14593 = vmatpush3.bf16.msra.mxu1 %v17000_v5 }
 0x395   : > { %v14112_v40 = vpop.f32.mrb[95].mxu1  ;;  %14594 = vmatprep.subr.bf16.mxu1 %v17002_v9  ;;  %v17010_v9 = vld [vmem:[#allocation4 + $0x498] sm:$0xff]  }
 0x396   : > { %v19769_v56 = vadd.f32 %v19552_v16, %v14110_v3  ;;  %v14113_v39 = vadd.f32 %v14112_v40, %v14111_v2  ;;  %15609 = vmatpush3.bf16.msra.mxu0 %v17001_v58  ;;  %v17007_v16 = vld [vmem:[#allocation4 + $0x490] sm:$0xff]   ;;  %v17011_v2 = vld [vmem:[#allocation4 + $0x458] sm:$0xff]  }
 0x397   : > { %8220 = vmatmul.mubr.bf16.gmra.mrb[200].mxu1 %v19761_v55  ;;  %15610 = vmatprep.subr.bf16.mxu0 %v17006_v17  ;;  %v17008_v58 = vld [vmem:[#allocation4 + $0x450] sm:$0xff]  }
 0x398   : > { %v19773_v25 = vadd.f32 %v19559_v44, %v14113_v39  ;;  %8227 = vmatprep.mubr.bf16.mxu1 %v19765_v60  ;;  %14595 = vmatpush3.bf16.msra.mxu1 %v17003_v12  ;;  %v19782_v44 = vld [vmem:[#allocation4 + $0x4a0] sm:$0xff]   ;;  %v19792_v3 = vld [vmem:[#allocation3 + $0xc0] sm:$0xff] }
 0x399   : > { %8847 = vmatmul.mubr.bf16.gmra.mrb[136].mxu0 %v19775_v49  ;;  %14596 = vmatprep.subr.bf16.mxu1 %v17004_v62  ;;  %v19796_v12 = vld [vmem:[#allocation3 + $0xe0] sm:$0xff] }
 0x39a   : > { %8854 = vmatprep.mubr.bf16.mxu0 %v19779_v41  ;;  %v14114_v54 = vpop.f32.mrb[96].mxu1  ;;  %15611 = vmatpush3.bf16.msra.mxu0 %v17006_v17 }
 0x39b   : > { %v14115_v59 = vpop.f32.mrb[97].mxu1  ;;  %15612 = vmatprep.subr.bf16.mxu0 %v17009_v23 }
 0x39c   : > { %v14116_v34 = vadd.f32 %v14115_v59, %v14114_v54  ;;  %v14117_v10 = vpop.f32.mrb[98].mxu1  ;;  %14597 = vmatpush3.bf16.msra.mxu1 %v17005_v11  ;;  %v19806_v59 = vld [vmem:[#allocation3 + $0xd8] sm:$0xff] }
 0x39d   : > { %v14118_v5 = vpop.f32.mrb[99].mxu1  ;;  %14598 = vmatprep.subr.bf16.mxu1 %v17007_v16 }
 0x39e   : > { %v19785_v37 = vadd.f32 %v19564_v28, %v14116_v34  ;;  %v14119_v33 = vadd.f32 %v14118_v5, %v14117_v10  ;;  %15613 = vmatpush3.bf16.msra.mxu0 %v17009_v23  ;;  %v17013_v28 = vld [vmem:[#allocation4 + $0x510] sm:$0xff]   ;;  %v19810_v34 = vld [vmem:[#allocation3 + $0xf8] sm:$0xff] }
 0x39f   : > { %8228 = vmatmul.mubr.bf16.gmra.mrb[204].mxu1 %v19775_v49  ;;  %15646 = vmatprep.subr.bf16.mxu0 %v19782_v44 }
 0x3a0   : > { %v19790_v17 = vadd.f32 %v19571_v43, %v14119_v33  ;;  %8235 = vmatprep.mubr.bf16.mxu1 %v19779_v41  ;;  %14599 = vmatpush3.bf16.msra.mxu1 %v17008_v58 }
 0x3a1   : > { %8855 = vmatmul.mubr.bf16.gmra.mrb[140].mxu0 %v19792_v3  ;;  %14600 = vmatprep.subr.bf16.mxu1 %v17010_v9 }
 0x3a2   : > { %8862 = vmatprep.mubr.bf16.mxu0 %v19796_v12  ;;  %v14120_v40 = vpop.f32.mrb[100].mxu1 }
 0x3a3   : > { %v14121_v62 = vpop.f32.mrb[101].mxu1 }
 0x3a4   : > { %v14122_v39 = vadd.f32 %v14121_v62, %v14120_v40  ;;  %v14123_v23 = vpop.f32.mrb[102].mxu1  ;;  %14601 = vmatpush3.bf16.msra.mxu1 %v17011_v2  ;;  %v19824_v40 = vld [vmem:[#allocation3 + $0x110] sm:$0xff] }
 0x3a5   : > { %v14124_v43 = vpop.f32.mrb[103].mxu1  ;;  %14720 = vmatprep.subr.bf16.mxu1 %v17013_v28  ;;  %v19820_v28 = vld [vmem:[#allocation3 + $0xf0] sm:$0xff]  ;;  %22043 = vst [vmem:[#allocation12_spill] sm:$0xff] %v19824_v40 }
 0x3a6   : > { %v19800_v11 = vadd.f32 %v19576_v30, %v14122_v39  ;;  %v14125_v16 = vadd.f32 %v14124_v43, %v14123_v23  ;;  %22042 = vst [vmem:[#allocation15_spill] sm:$0xff] %v19820_v28 }
 0x3a7   : > { %8236 = vmatmul.mubr.bf16.gmra.mrb[208].mxu1 %v19792_v3 }
 0x3a8   : > { %v19804_v54 = vadd.f32 %v19583_v48, %v14125_v16  ;;  %8243 = vmatprep.mubr.bf16.mxu1 %v19796_v12 }
 0x3a9   : > { %8863 = vmatmul.mubr.bf16.gmra.mrb[144].mxu0 %v19806_v59 }
 0x3aa   : > { %22039 = vst [vmem:[#allocation10_spill] sm:$0xff] %v19804_v54  ;;  %8870 = vmatprep.mubr.bf16.mxu0 %v19810_v34  ;;  %v14126_v10 = vpop.f32.mrb[104].mxu1 }
 0x3ab   : > { %v14127_v58 = vpop.f32.mrb[105].mxu1 }
 0x3ac   : > { %v14128_v30 = vadd.f32 %v14127_v58, %v14126_v10  ;;  %v14129_v5 = vpop.f32.mrb[106].mxu1  ;;  %v19834_v58 = vld [vmem:[#allocation3 + $0x108] sm:$0xff] }
 0x3ad   : > { %v14130_v9 = vpop.f32.mrb[107].mxu1  ;;  %22046 = vst [vmem:[#allocation16_spill] sm:$0xff] %v19834_v58 }
 0x3ae   : > { %v19814_v33 = vadd.f32 %v19587_v50, %v14128_v30  ;;  %v14131_v48 = vadd.f32 %v14130_v9, %v14129_v5  ;;  %v19838_v30 = vld [vmem:[#allocation3 + $0x128] sm:$0xff] }
 0x3af   : > { %8244 = vmatmul.mubr.bf16.gmra.mrb[212].mxu1 %v19806_v59  ;;  %22047 = vst [vmem:[#allocation17_spill] sm:$0xff] %v19838_v30 }
 0x3b0   : > { %22040 = vst [vmem:[#allocation14_spill] sm:$0xff] %v19814_v33  ;;  %v19818_v2 = vadd.f32 %v19593_v13, %v14131_v48  ;;  %8251 = vmatprep.mubr.bf16.mxu1 %v19810_v34 }
 0x3b1   : > { %8871 = vmatmul.mubr.bf16.gmra.mrb[148].mxu0 %v19820_v28 }
 0x3b2   : > { %22041 = vst [vmem:[#allocation11_spill] sm:$0xff] %v19818_v2  ;;  %8878 = vmatprep.mubr.bf16.mxu0 %v19824_v40  ;;  %v14132_v62 = vpop.f32.mrb[108].mxu1 }
 0x3b3   : > { %v14133_v39 = vpop.f32.mrb[109].mxu1 }
 0x3b4   : > { %v14134_v50 = vadd.f32 %v14133_v39, %v14132_v62  ;;  %v14135_v23 = vpop.f32.mrb[110].mxu1 }
 0x3b5   : > { %v14136_v43 = vpop.f32.mrb[111].mxu1 }
 0x3b6   : > { %v19828_v16 = vadd.f32 %v19597_v7, %v14134_v50  ;;  %v14137_v13 = vadd.f32 %v14136_v43, %v14135_v23  ;;  %v19848_v23 = vld [vmem:[#allocation3 + $0x120] sm:$0xff] }
 0x3b7   : > { %8252 = vmatmul.mubr.bf16.gmra.mrb[216].mxu1 %v19820_v28  ;;  %v19852_v43 = vld [vmem:[#allocation3 + $0x140] sm:$0xff] }
 0x3b8   : > { %22044 = vst [vmem:[#allocation18_spill] sm:$0xff] %v19828_v16  ;;  %v19832_v10 = vadd.f32 %v19603_v21, %v14137_v13  ;;  %8259 = vmatprep.mubr.bf16.mxu1 %v19824_v40 }
 0x3b9   : > { %8879 = vmatmul.mubr.bf16.gmra.mrb[152].mxu0 %v19834_v58 }
 0x3ba   : > { %22045 = vst [vmem:[#allocation13_spill] sm:$0xff] %v19832_v10  ;;  %8886 = vmatprep.mubr.bf16.mxu0 %v19838_v30  ;;  %v14138_v5 = vpop.f32.mrb[112].mxu1 }
 0x3bb   : > { %v14139_v9 = vpop.f32.mrb[113].mxu1 }
 0x3bc   : > { %v14140_v7 = vadd.f32 %v14139_v9, %v14138_v5  ;;  %v14141_v48 = vpop.f32.mrb[114].mxu1  ;;  %v19855_v5 = vld [vmem:[#allocation2 + $0x168] sm:$0x3f] }
 0x3bd   : > { %v14142_v62 = vpop.f32.mrb[115].mxu1  ;;  %22050 = vst [vmem:[#allocation21_spill] sm:$0xff] %v19855_v5 }
 0x3be   : > { %v19842_v39 = vadd.f32 %v19611_v27, %v14140_v7  ;;  %v14143_v21 = vadd.f32 %v14142_v62, %v14141_v48  ;;  %v4655_v27 = vld [vmem:[#allocation2 + $0x160] sm:$0xc0]  ;;  %v4779_v48 = vrot.slane %v19855_v5, 6 }
 0x3bf   : > { %8260 = vmatmul.mubr.bf16.gmra.mrb[220].mxu1 %v19834_v58  ;;  %v4778_v7 = vrot.slane %v4655_v27, 6  ;;  %v5192_v62 = vshrl.u32 %v4655_v27, 16 }
 0x3c0   : > { %22048 = vst [vmem:[#allocation19_spill] sm:$0xff] %v19842_v39  ;;  %v19846_v50 = vadd.f32 %v19614_v22, %v14143_v21  ;;  %8267 = vmatprep.mubr.bf16.mxu1 %v19838_v30  ;;  %v4812_v22 = vld [vmem:[#allocation2 + $0x168] sm:$0x7f]  ;;  %v5195_v39 = vshll.u32 %v4655_v27, 16  ;;  %v19867_v27 = vld [vmem:[#allocation3 + $0x138] sm:$0xff] }
 0x3c1   : > { %8887 = vmatmul.mubr.bf16.gmra.mrb[156].mxu0 %v19848_v23  ;;  %v5200_v10 = vshrl.u32 %v4812_v22, 16  ;;  %v5203_v16 = vshll.u32 %v4812_v22, 16  ;;  %v4780_v2 = vsel %vm4711_vm2, %v4778_v7, %v4779_v48  ;;  %v5194_v58 = vrot.slane %v5192_v62, 6 }
 0x3c2   : > { %22049 = vst [vmem:[#allocation20_spill] sm:$0xff] %v19846_v50  ;;  %8894 = vmatprep.mubr.bf16.mxu0 %v19852_v43  ;;  %v14144_v13 = vpop.f32.mrb[116].mxu1  ;;  %5303 = vrot.lane.b32.xlu0 %v4780_v2, %s17281_s29  ;;  %v5197_v54 = vrot.slane %v5195_v39, 7 }
 0x3c3   : > { %v14145_v9 = vpop.f32.mrb[117].mxu1  ;;  %v5202_v28 = vrot.slane %v5200_v10, 6  ;;  %v5205_v5 = vrot.slane %v5203_v16, 7 }
 0x3c4   : > { %v14146_v21 = vadd.f32 %v14145_v9, %v14144_v13  ;;  %v14147_v50 = vpop.f32.mrb[118].mxu1  ;;  %v5198_v9 = vor.u32 %v5197_v54, %v5194_v58 }
 0x3c5   : > { %v14148_v30 = vpop.f32.mrb[119].mxu1 }
 0x3c6   : > { %v19860_v33 = vadd.f32 %v19623_v8, %v14146_v21  ;;  %v14149_v40 = vadd.f32 %v14148_v30, %v14147_v50  ;;  %v19871_v8 = vld [vmem:[#allocation3 + $0x158] sm:$0xff]  ;;  %v5206_v30 = vor.u32 %v5205_v5, %v5202_v28  ;;  %v19883_v28 = vld [vmem:[#allocation3 + $0x150] sm:$0xff] }
 0x3c7   : > { %8268 = vmatmul.mubr.bf16.gmra.mrb[224].mxu1 %v19848_v23  ;;  %v19887_v5 = vld [vmem:[#allocation3 + $0x170] sm:$0xff] }
 0x3c8   : > { %v19865_v13 = vadd.f32 %v19626_v26, %v14149_v40  ;;  %8275 = vmatprep.mubr.bf16.mxu1 %v19852_v43  ;;  %v5207_v39 = vsel %vm4816_vm4, %v5198_v9, %v5206_v30  ;;  %v19897_v30 = vld [vmem:[#allocation3 + $0x168] sm:$0xff] }
 0x3c9   : > { %8895 = vmatmul.mubr.bf16.gmra.mrb[160].mxu0 %v19867_v27  ;;  %5355 = vrot.lane.b32.xlu1 %v5207_v39, %s17282_s30 }
 0x3ca   : > { %8902 = vmatprep.mubr.bf16.mxu0 %v19871_v8  ;;  %v14150_v2 = vpop.f32.mrb[120].mxu1 }
 0x3cb   : > { %v14151_v10 = vpop.f32.mrb[121].mxu1 }
 0x3cc   : > { %v14152_v16 = vadd.f32 %v14151_v10, %v14150_v2  ;;  %v14153_v50 = vpop.f32.mrb[122].mxu1  ;;  %v19901_v2 = vld [vmem:[#allocation3 + $0x188] sm:$0xff] }
 0x3cd   : > { %v14154_v26 = vpop.f32.mrb[123].mxu1  ;;  %22054 = vst [vmem:[#allocation25_spill] sm:$0xff] %v19901_v2 }
 0x3ce   : > { %v19877_v40 = vadd.f32 %v19633_v19, %v14152_v16  ;;  %v14155_v54 = vadd.f32 %v14154_v26, %v14153_v50 }
 0x3cf   : > { %8276 = vmatmul.mubr.bf16.gmra.mrb[228].mxu1 %v19867_v27 }
 0x3d0   : > { %v19881_v58 = vadd.f32 %v19636_v1, %v14155_v54  ;;  %8283 = vmatprep.mubr.bf16.mxu1 %v19871_v8 }
 0x3d1   : > { %8903 = vmatmul.mubr.bf16.gmra.mrb[164].mxu0 %v19883_v28 }
 0x3d2   : > { %22051 = vst [vmem:[#allocation22_spill] sm:$0xff] %v19881_v58  ;;  %8910 = vmatprep.mubr.bf16.mxu0 %v19887_v5  ;;  %v14156_v7 = vpop.f32.mrb[124].mxu1 }
 0x3d3   : > { %v14157_v48 = vpop.f32.mrb[125].mxu1 }
 0x3d4   : > { %v14158_v19 = vadd.f32 %v14157_v48, %v14156_v7  ;;  %v14159_v22 = vpop.f32.mrb[126].mxu1  ;;  %v19911_v7 = vld [vmem:[#allocation3 + $0x180] sm:$0xff] }
 0x3d5   : > { %v14160_v62 = vpop.f32.mrb[127].mxu1 }
 0x3d6   : > { %v19891_v21 = vadd.f32 %v19643_v35, %v14158_v19  ;;  %v14161_v1 = vadd.f32 %v14160_v62, %v14159_v22  ;;  %v2512_v19 = vld [vmem:[#allocation2 + $0x150] sm:$0xf8]  ;;  %v2889_v22 = vshrl.u32 %v19683_v51, 16 }
 0x3d7   : > { %8284 = vmatmul.mubr.bf16.gmra.mrb[232].mxu1 %v19883_v28 }
 0x3d8   : > { %22052 = vst [vmem:[#allocation23_spill] sm:$0xff] %v19891_v21  ;;  %v19895_v9 = vadd.f32 %v19646_v14, %v14161_v1  ;;  %8291 = vmatprep.mubr.bf16.mxu1 %v19887_v5  ;;  %v2881_v1 = vshrl.u32 %v2512_v19, 16 }
 0x3d9   : > { %8911 = vmatmul.mubr.bf16.gmra.mrb[168].mxu0 %v19897_v30 }
 0x3da   : > { %22053 = vst [vmem:[#allocation24_spill] sm:$0xff] %v19895_v9  ;;  %8918 = vmatprep.mubr.bf16.mxu0 %v19901_v2  ;;  %v14200_v10 = vpop.f32.mrb[128].mxu1 }
 0x3db   : > { %v14201_v39 = vpop.f32.mrb[129].mxu1 }
 0x3dc   : > { %v14202_v35 = vadd.f32 %v14201_v39, %v14200_v10  ;;  %v14203_v16 = vpop.f32.mrb[130].mxu1  ;;  %v2884_v10 = vshll.u32 %v2512_v19, 16 }
 0x3dd   : > { %v14204_v50 = vpop.f32.mrb[131].mxu1 }
 0x3de   : > { %v19905_v26 = vadd.f32 %v19654_v52, %v14202_v35  ;;  %v14205_v14 = vadd.f32 %v14204_v50, %v14203_v16  ;;  %v2892_v52 = vshll.u32 %v19683_v51, 16  ;;  %v2891_v35 = vrot.slane %v2889_v22, 3 }
 0x3df   : > { %8292 = vmatmul.mubr.bf16.gmra.mrb[236].mxu1 %v19897_v30  ;;  %v1219_v22 = vshrl.u32 %v19704_v29, 16 }
 0x3e0   : > { %22055 = vst [vmem:[#allocation26_spill] sm:$0xff] %v19905_v26  ;;  %v19909_v54 = vadd.f32 %v19658_v53, %v14205_v14  ;;  %8299 = vmatprep.mubr.bf16.mxu1 %v19901_v2  ;;  %v2894_v16 = vrot.slane %v2892_v52, 4  ;;  %v2883_v14 = vrot.slane %v2881_v1, 3  ;;  %v3791_v2 = vpop.permute.xlu0 %3790  ;;  %v1222_v52 = vshll.u32 %v19704_v29, 16 }
 0x3e1   : > { %8919 = vmatmul.mubr.bf16.gmra.mrb[172].mxu0 %v19911_v7 }
 0x3e2   : > { %22056 = vst [vmem:[#allocation27_spill] sm:$0xff] %v19909_v54  ;;  %8926 = vmatprep.mubr.bf16.mxu0 %v19686_v46  ;;  %v14206_v48 = vpop.f32.mrb[132].mxu1  ;;  %v2886_v54 = vrot.slane %v2884_v10, 4  ;;  %v2895_v21 = vor.u32 %v2894_v16, %v2891_v35 }
 0x3e3   : > { %v14207_v62 = vpop.f32.mrb[133].mxu1 }
 0x3e4   : > { %v14208_v39 = vadd.f32 %v14207_v62, %v14206_v48  ;;  %v14209_v53 = vpop.f32.mrb[134].mxu1  ;;  %v2887_v58 = vor.u32 %v2886_v54, %v2883_v14 }
 0x3e5   : > { %v14210_v50 = vpop.f32.mrb[135].mxu1 }
 0x3e6   : > { %v19919_v26 = vadd.f32 %v19668_v0, %v14208_v39  ;;  %v14211_v9 = vadd.f32 %v14210_v50, %v14209_v53  ;;  %v2896_v48 = vsel %vm2522_vm15, %v2887_v58, %v2895_v21  ;;  %v842_v0 = vld [vmem:[#allocation2 + $0x150] sm:$0xfe]  ;;  %v1221_v39 = vrot.slane %v1219_v22, 1  ;;  %v2987_v22 = vld [vmem:[#allocation2 + $0x160] sm:$0xf0] }
 0x3e7   : > { %8300 = vmatmul.mubr.bf16.gmra.mrb[240].mxu1 %v19911_v7  ;;  %v3969_v54 = vsel %vm647_vm0, %v2896_v48, %v3791_v2  ;;  %v1211_v1 = vshrl.u32 %v842_v0, 16  ;;  %v1224_v53 = vrot.slane %v1222_v52, 2  ;;  %v2121_v16 = vpop.permute.xlu1 %2120 }
 0x3e8   : > { %22057 = vst [vmem:[#allocation28_spill] sm:$0xff] %v19919_v26  ;;  %v19923_v51 = vadd.f32 %v19673_v36, %v14211_v9  ;;  %8307 = vmatprep.mubr.bf16.mxu1 %v19686_v46  ;;  %v1214_v36 = vshll.u32 %v842_v0, 16  ;;  %v3843_v46 = vpop.permute.xlu0 %3842  ;;  %v19941_v0 = vld [vmem:[#allocation2 + $0x168] sm:$0xf] }
 0x3e9   : > { %8927 = vmatmul.mubr.bf16.gmra.mrb[176].mxu0 %v19699_v57  ;;  %v1213_v58 = vrot.slane %v1211_v1, 1  ;;  %v4025_v29 = vsel %vm2312_vm13, %v3969_v54, %v3843_v46  ;;  %v3111_v54 = vrot.slane %v19941_v0, 4  ;;  %v4180_v1 = vld [vmem:[#allocation2 + $0x150] sm:$0xe0] }
 0x3ea   : > { %22058 = vst [vmem:[#allocation29_spill] sm:$0xff] %v19923_v51  ;;  %8934 = vmatprep.mubr.bf16.mxu0 %v19707_v42  ;;  %v14212_v19 = vpop.f32.mrb[136].mxu1  ;;  %v1216_v21 = vrot.slane %v1214_v36, 2  ;;  %v1225_v51 = vor.u32 %v1224_v53, %v1221_v39  ;;  %v4557_v36 = vshrl.u32 %v19729_v47, 16  ;;  %v4549_v53 = vshrl.u32 %v4180_v1, 16 }
 0x3eb   : > { %v14213_v62 = vpop.f32.mrb[137].mxu1 }
 0x3ec   : > { %v14214_v9 = vadd.f32 %v14213_v62, %v14212_v19  ;;  %v14215_v10 = vpop.f32.mrb[138].mxu1  ;;  %v1217_v2 = vor.u32 %v1216_v21, %v1213_v58  ;;  %v3895_v19 = vpop.permute.xlu0 %3894  ;;  %v3527_v58 = vshll.u32 %v2987_v22, 16 }
 0x3ed   : > { %v14216_v35 = vpop.f32.mrb[139].mxu1  ;;  %v19948_v62 = vsel %vm2365_vm14, %v4025_v29, %v3895_v19 }
 0x3ee   : > { %v19933_v50 = vadd.f32 %v19681_v6, %v14214_v9  ;;  %v14217_v14 = vadd.f32 %v14216_v35, %v14215_v10  ;;  %v19944_v6 = vld [vmem:[#allocation3 + $0x1d0] sm:$0xff]  ;;  %v1226_v52 = vsel %vm852_vm1, %v1217_v2, %v1225_v51  ;;  %22061 = vst [vmem:[#allocation32_spill] sm:$0xff] %v19948_v62  ;;  %4133 = vst [vmem:[#allocation3 + $0x200] sm:$0xff] %v19948_v62  ;;  %v4560_v9 = vshll.u32 %v19729_v47, 16 }
 0x3ef   : > { %8308 = vmatmul.mubr.bf16.gmra.mrb[244].mxu1 %v19699_v57  ;;  %v3110_v57 = vrot.slane %v2987_v22, 4  ;;  %v3524_v10 = vshrl.u32 %v2987_v22, 16  ;;  %v4552_v35 = vshll.u32 %v4180_v1, 16  ;;  %v4559_v2 = vrot.slane %v4557_v36, 5 }
 0x3f0   : > { %22059 = vst [vmem:[#allocation30_spill] sm:$0xff] %v19933_v50  ;;  %v19938_v48 = vadd.f32 %v19690_v18, %v14217_v14  ;;  %8315 = vmatprep.mubr.bf16.mxu1 %v19707_v42  ;;  %v2299_v42 = vsel %vm647_vm0, %v1226_v52, %v2121_v16  ;;  %v2173_v46 = vpop.permute.xlu1 %2172  ;;  %v2225_v16 = vpop.permute.xlu0 %2224  ;;  %v4562_v19 = vrot.slane %v4560_v9, 6  ;;  %v3144_v52 = vld [vmem:[#allocation2 + $0x168] sm:$0x1f] }
 0x3f1   : > { %8935 = vmatmul.mubr.bf16.gmra.mrb[180].mxu0 %v19726_v31  ;;  %v3112_v39 = vsel %vm3043_vm3, %v3110_v57, %v3111_v54  ;;  %v2356_v29 = vsel %vm2312_vm13, %v2299_v42, %v2173_v46  ;;  %v4554_v50 = vrot.slane %v4552_v35, 6  ;;  %v3526_v26 = vrot.slane %v3524_v10, 4  ;;  %v19964_v42 = vld [vmem:[#allocation3 + $0x1c8] sm:$0xff] }
 0x3f2   : > { %22060 = vst [vmem:[#allocation31_spill] sm:$0xff] %v19938_v48  ;;  %8942 = vmatprep.mubr.bf16.mxu0 %v19944_v6  ;;  %v14218_v18 = vpop.f32.mrb[140].mxu1  ;;  %3792 = vrot.lane.b32.xlu0 %v3112_v39, %s17281_s29  ;;  %v2430_v47 = vsel %vm2365_vm14, %v2356_v29, %v2225_v16  ;;  %v4551_v48 = vrot.slane %v4549_v53, 5  ;;  %v4563_v54 = vor.u32 %v4562_v19, %v4559_v2  ;;  %v3532_v9 = vshrl.u32 %v3144_v52, 16  ;;  %v3613_v39 = vld [vmem:[#allocation2 + $0x160] sm:$0xe0] }
 0x3f3   : > { %v14219_v51 = vpop.f32.mrb[141].mxu1  ;;  %2465 = vst [vmem:[#allocation3 + $0x1f8] sm:$0xff] %v2430_v47  ;;  %v19973_v53 = vld [vmem:[#allocation3 + $0x1e8] sm:$0xff] }
 0x3f4   : > { %v14220_v21 = vadd.f32 %v14219_v51, %v14218_v18  ;;  %v14221_v14 = vpop.f32.mrb[142].mxu1  ;;  %v3529_v18 = vrot.slane %v3527_v58, 5  ;;  %v4555_v1 = vor.u32 %v4554_v50, %v4551_v48  ;;  %v5302_v36 = vpop.permute.xlu1 %5301  ;;  %v3535_v51 = vshll.u32 %v3144_v52, 16  ;;  %v1474_v2 = vld [vmem:[#allocation2 + $0x168] sm:$0x7] }
 0x3f5   : > { %v14222_v62 = vpop.f32.mrb[143].mxu1  ;;  %v3534_v50 = vrot.slane %v3532_v9, 4  ;;  %v1862_v9 = vshrl.u32 %v1474_v2, 16 }
 0x3f6   : > { %v19961_v57 = vadd.f32 %v19702_v4, %v14220_v21  ;;  %v14223_v22 = vadd.f32 %v14222_v62, %v14221_v14  ;;  %v3530_v10 = vor.u32 %v3529_v18, %v3526_v26  ;;  %v19970_v4 = vld [vmem:[#allocation2 + $0x168] sm:$0x3]  ;;  %v1317_v62 = vld [vmem:[#allocation2 + $0x160] sm:$0xfc]  ;;  %v3537_v48 = vrot.slane %v3535_v51, 5 }
 0x3f7   : > { %8316 = vmatmul.mubr.bf16.gmra.mrb[248].mxu1 %v19726_v31  ;;  %v4564_v31 = vsel %vm4190_vm12, %v4555_v1, %v4563_v54  ;;  %v1440_v35 = vrot.slane %v1317_v62, 2  ;;  %v1441_v58 = vrot.slane %v19970_v4, 2  ;;  %v3736_v21 = vrot.slane %v3613_v39, 5  ;;  %v1943_v51 = vld [vmem:[#allocation2 + $0x160] sm:$0xf8] }
 0x3f8   : > { %22062 = vst [vmem:[#allocation33_spill] sm:$0xff] %v19961_v57  ;;  %v19967_v46 = vadd.f32 %v19711_v32, %v14223_v22  ;;  %8323 = vmatprep.mubr.bf16.mxu1 %v19944_v6  ;;  %v3737_v26 = vrot.slane %v3144_v52, 5  ;;  %v5428_v29 = vsel %vm647_vm0, %v4564_v31, %v5302_v36  ;;  %v3538_v16 = vor.u32 %v3537_v48, %v3534_v50 }
 0x3f9   : > { %8943 = vmatmul.mubr.bf16.gmra.mrb[184].mxu0 %v19964_v42  ;;  %v1854_v19 = vshrl.u32 %v1317_v62, 16  ;;  %v1857_v47 = vshll.u32 %v1317_v62, 16  ;;  %v1442_v54 = vsel %vm1373_vm5, %v1440_v35, %v1441_v58  ;;  %v5354_v39 = vpop.permute.xlu1 %5353  ;;  %v1865_v31 = vshll.u32 %v1474_v2, 16 }
 0x3fa   : > { %22063 = vst [vmem:[#allocation34_spill] sm:$0xff] %v19967_v46  ;;  %8950 = vmatprep.mubr.bf16.mxu0 %v19973_v53  ;;  %v14224_v32 = vpop.f32.mrb[144].mxu1  ;;  %v3738_v1 = vsel %vm3669_vm8, %v3736_v21, %v3737_v26  ;;  %v3539_v57 = vsel %vm3148_vm6, %v3530_v10, %v3538_v16  ;;  %2122 = vrot.lane.b32.xlu1 %v1442_v54, %s17281_s29  ;;  %v1864_v35 = vrot.slane %v1862_v9, 2  ;;  %v2066_v58 = vrot.slane %v1943_v51, 3  ;;  %v17014_v51 = vld [vmem:[#allocation4 + $0x4d0] sm:$0xff]  }
 0x3fb   : > { %v14225_v14 = vpop.f32.mrb[145].mxu1  ;;  %v1856_v52 = vrot.slane %v1854_v19, 2  ;;  %v1859_v36 = vrot.slane %v1857_v47, 3  ;;  %3844 = vrot.lane.b32.xlu0 %v3539_v57, %s17282_s30  ;;  %v5505_v48 = vsel %vm2312_vm13, %v5428_v29, %v5354_v39  ;;  %v2067_v21 = vrot.slane %v1474_v2, 3  ;;  %v4656_v57 = vld [vmem:[#allocation2 + $0x170] sm:$0xc0] }
 0x3fc   : > { %v14226_v22 = vadd.f32 %v14225_v14, %v14224_v32  ;;  %v14227_v18 = vpop.f32.mrb[146].mxu1  ;;  %5540 = vst.msk [vmem:[#allocation3 + $0x208] sm:$0xff] %vm2365_vm14, %v5505_v48  ;;  %v1867_v32 = vrot.slane %v1865_v31, 3  ;;  %v19993_v14 = vld [vmem:[#allocation3 + $0x1e0] sm:$0xff]  ;;  %v5212_v39 = vshll.u32 %v4656_v57, 16 }
 0x3fd   : > { %v14228_v46 = vpop.f32.mrb[147].mxu1  ;;  %v1860_v10 = vor.u32 %v1859_v36, %v1856_v52  ;;  %v2068_v2 = vsel %vm1999_vm9, %v2066_v58, %v2067_v21  ;;  %v20014_v21 = vld [vmem:[#allocation3 + $0xa0] sm:$0xff] }
 0x3fe   : > { %v19984_v50 = vadd.f32 %v19724_v15, %v14226_v22  ;;  %v14229_v62 = vadd.f32 %v14228_v46, %v14227_v18  ;;  %v19996_v15 = vld [vmem:[#allocation2 + $0x178] sm:$0x3f]  ;;  %v8527_v46 = vld [vmem:[#allocation3 + $0x88] sm:$0xff]  ;;  %v1868_v29 = vor.u32 %v1867_v32, %v1864_v35  ;;  %v4781_v22 = vrot.slane %v4656_v57, 6 }
 0x3ff   : > { %8324 = vmatmul.mubr.bf16.gmra.mrb[252].mxu1 %v19964_v42  ;;  %3896 = vrot.lane.b32.xlu0 %v3738_v1, %s17283_s12  ;;  %v5209_v18 = vshrl.u32 %v4656_v57, 16  ;;  %v17016_v1 = vld [vmem:[#allocation4 + $0x518] sm:$0xff]   ;;  %v17015_v35 = vld [vmem:[#allocation4 + $0x4a8] sm:$0xff]  }
 0x400   : > { %v19991_v26 = vadd.f32 %v19735_v20, %v14229_v62  ;;  %9457 = vmatprep.mubr.bf16.mxu1 %v19750_v45  ;;  %v4813_v20 = vld [vmem:[#allocation2 + $0x178] sm:$0x7f]  ;;  %v1869_v47 = vsel %vm1478_vm7, %v1860_v10, %v1868_v29  ;;  %v4782_v45 = vrot.slane %v19996_v15, 6  ;;  %v17017_v57 = vld [vmem:[#allocation4 + $0x4d8] sm:$0xff]  }
 0x401   : > { %8951 = vmatmul.mubr.bf16.gmra.mrb[188].mxu0 %v19993_v14  ;;  %2174 = vrot.lane.b32.xlu1 %v1869_v47, %s17282_s30  ;;  %v5217_v52 = vshrl.u32 %v4813_v20, 16  ;;  %v5220_v36 = vshll.u32 %v4813_v20, 16  ;;  %v5211_v32 = vrot.slane %v5209_v18, 6  ;;  %v17021_v47 = vld [vmem:[#allocation4 + $0x4e0] sm:$0xff]  }
 0x402   : > { %15614 = vmatprep.mubr.msk.bf16.mxu0 %vm2365_vm14, %v8527_v46  ;;  %v14230_v16 = vpop.f32.mrb[148].mxu1  ;;  %v4783_v10 = vsel %vm4711_vm2, %v4781_v22, %v4782_v45 }
 0x403   : > { %v14231_v19 = vpop.f32.mrb[149].mxu1  ;;  %2226 = vrot.lane.b32.xlu0 %v2068_v2, %s17283_s12  ;;  %v5219_v46 = vrot.slane %v5217_v52, 6  ;;  %v5222_v29 = vrot.slane %v5220_v36, 7  ;;  %v20032_v52 = vld [vmem:[#allocation3 + $0xd0] sm:$0xff]  ;;  %v17024_v36 = vld [vmem:[#allocation4 + $0x4e8] sm:$0xff]  }
 0x404   : > { %v14232_v54 = vadd.f32 %v14231_v19, %v14230_v16  ;;  %v14233_v9 = vpop.f32.mrb[150].mxu1  ;;  %v17020_v16 = vld [vmem:[#allocation4 + $0x520] sm:$0xff]  }
 0x405   : > { %v14234_v31 = vpop.f32.mrb[151].mxu1  ;;  %5305 = vrot.lane.b32.xlu1 %v4783_v10, %s17281_s29  ;;  %v5223_v45 = vor.u32 %v5222_v29, %v5219_v46  ;;  %v17028_v10 = vld [vmem:[#allocation4 + $0x4f0] sm:$0xff]   ;;  %v17025_v29 = vld [vmem:[#allocation4 + $0x4c8] sm:$0xff]  }
 0x406   : > { %v20006_v62 = vadd.f32 %v19744_v38, %v14232_v54  ;;  %v14235_v48 = vadd.f32 %v14234_v31, %v14233_v9  ;;  %v5214_v38 = vrot.slane %v5212_v39, 7  ;;  %v17023_v54 = vld [vmem:[#allocation4 + $0x528] sm:$0xff]  }
 0x407   : > { %9458 = vmatmul.mubr.bf16.vlgmr.msra.gmra.mrb[0].mxu1 %v19761_v55  ;;  %v20019_v55 = vld [vmem:[#allocation3 + $0xb8] sm:$0xff] }
 0x408   : > { %v20012_v58 = vadd.f32 %v19747_v61, %v14235_v48  ;;  %14721 = vmatpush3.bf16.msra.mxu1 %v17014_v51  ;;  %9465 = vmatprep.mubr.bf16.mxu1 %v19765_v60  ;;  %v17018_v60 = vld [vmem:[#allocation4 + $0x4b0] sm:$0xff]   ;;  %v5215_v22 = vor.u32 %v5214_v38, %v5211_v32  ;;  %v17019_v51 = vld [vmem:[#allocation4 + $0x4b8] sm:$0xff]   ;;  %v17022_v48 = vld [vmem:[#allocation4 + $0x4c0] sm:$0xff]  }
 0x409   : > { %15615 = vmatmul.mubr.msk.bf16.vlgmr.msra.gmra.mrb[32].mxu0 %vm2365_vm14, %v20014_v21  ;;  %14722 = vmatprep.subr.bf16.mxu1 %v17016_v1 }
 0x40a   : > { %15647 = vmatpush3.bf16.msra.mxu0 %v19782_v44  ;;  %15618 = vmatprep.mubr.msk.bf16.mxu0 %vm2365_vm14, %v20019_v55  ;;  %v14236_v61 = vpop.f32.mrb[152].mxu1  ;;  %v5224_v31 = vsel %vm4816_vm4, %v5215_v22, %v5223_v45  ;;  %v17037_v45 = vld [vmem:[#allocation4 + $0x548] sm:$0xff]  }
 0x40b   : > { %v14237_v2 = vpop.f32.mrb[153].mxu1  ;;  %15648 = vmatprep.subr.bf16.mxu0 %v17015_v35  ;;  %5357 = vrot.lane.b32.xlu1 %v5224_v31, %s17282_s30  ;;  %v17040_v31 = vld [vmem:[#allocation4 + $0x5c0] sm:$0xff]  }
 0x40c   : > { %v14238_v20 = vadd.f32 %v14237_v2, %v14236_v61  ;;  %v14239_v19 = vpop.f32.mrb[154].mxu1  ;;  %14723 = vmatpush3.bf16.msra.mxu1 %v17017_v57  ;;  %v17030_v57 = vld [vmem:[#allocation4 + $0x538] sm:$0xff]   ;;  %v20050_v61 = vld [vmem:[#allocation3 + $0x100] sm:$0xff] }
 0x40d   : > { %v14240_v18 = vpop.f32.mrb[155].mxu1  ;;  %14724 = vmatprep.subr.bf16.mxu1 %v17020_v16  ;;  %v17031_v2 = vld [vmem:[#allocation4 + $0x4f8] sm:$0xff]  }
 0x40e   : > { %v20026_v44 = vadd.f32 %v19756_v63, %v14238_v20  ;;  %v14241_v9 = vadd.f32 %v14240_v18, %v14239_v19  ;;  %15649 = vmatpush3.bf16.msra.mxu0 %v17015_v35  ;;  %v20038_v63 = vld [vmem:[#allocation3 + $0xe8] sm:$0xff]  ;;  %v20059_v20 = vld [vmem:[#allocation4 + $0x550] sm:$0xff]  }
 0x40f   : > { %9466 = vmatmul.mubr.bf16.gmra.mrb[4].mxu1 %v19775_v49  ;;  %15650 = vmatprep.subr.bf16.mxu0 %v17018_v60  ;;  %v17026_v49 = vld [vmem:[#allocation4 + $0x530] sm:$0xff]  }
 0x410   : > { %v20030_v39 = vadd.f32 %v19759_v24, %v14241_v9  ;;  %9473 = vmatprep.mubr.bf16.mxu1 %v19779_v41  ;;  %14725 = vmatpush3.bf16.msra.mxu1 %v17021_v47  ;;  %v17035_v47 = vld [vmem:[#allocation4 + $0x500] sm:$0xff]  }
 0x411   : > { %15619 = vmatmul.mubr.msk.bf16.gmra.mrb[36].mxu0 %vm2365_vm14, %v20032_v52  ;;  %14726 = vmatprep.subr.bf16.mxu1 %v17023_v54 }
 0x412   : > { %15622 = vmatprep.mubr.msk.bf16.mxu0 %vm2365_vm14, %v20038_v63  ;;  %v14242_v24 = vpop.f32.mrb[156].mxu1  ;;  %15651 = vmatpush3.bf16.msra.mxu0 %v17018_v60  ;;  %v17033_v60 = vld [vmem:[#allocation4 + $0x540] sm:$0xff]  }
 0x413   : > { %v14243_v1 = vpop.f32.mrb[157].mxu1  ;;  %15652 = vmatprep.subr.bf16.mxu0 %v17019_v51 }
 0x414   : > { %v14244_v41 = vadd.f32 %v14243_v1, %v14242_v24  ;;  %v14245_v35 = vpop.f32.mrb[158].mxu1  ;;  %14727 = vmatpush3.bf16.msra.mxu1 %v17024_v36  ;;  %v17038_v36 = vld [vmem:[#allocation4 + $0x508] sm:$0xff]  }
 0x415   : > { %v14246_v32 = vpop.f32.mrb[159].mxu1  ;;  %14728 = vmatprep.subr.bf16.mxu1 %v17026_v49 }
 0x416   : > { %v20044_v38 = vadd.f32 %v19769_v56, %v14244_v41  ;;  %v14247_v46 = vadd.f32 %v14246_v32, %v14245_v35  ;;  %15653 = vmatpush3.bf16.msra.mxu0 %v17019_v51  ;;  %v20055_v56 = vld [vmem:[#allocation3 + $0x118] sm:$0xff]  ;;  %v20069_v51 = vld [vmem:[#allocation3 + $0x130] sm:$0xff]  ;;  %v22064_v41 = vld [vmem:[#allocation15_spill] sm:$0xff] }
 0x417   : > { %9474 = vmatmul.mubr.bf16.gmra.mrb[8].mxu1 %v19792_v3  ;;  %15654 = vmatprep.subr.bf16.mxu0 %v17022_v48  ;;  %v22065_v35 = vld [vmem:[#allocation10_spill] sm:$0xff] }
 0x418   : > { %v20048_v16 = vadd.f32 %v19773_v25, %v14247_v46  ;;  %9481 = vmatprep.mubr.bf16.mxu1 %v19796_v12  ;;  %14729 = vmatpush3.bf16.msra.mxu1 %v17028_v10  ;;  %v20085_v32 = vld [vmem:[#allocation3 + $0x160] sm:$0xff]  ;;  %v20090_v46 = vld [vmem:[#allocation3 + $0x178] sm:$0xff] }
 0x419   : > { %15623 = vmatmul.mubr.msk.bf16.gmra.mrb[40].mxu0 %vm2365_vm14, %v20050_v61  ;;  %14730 = vmatprep.subr.bf16.mxu1 %v17030_v57  ;;  %v22066_v57 = vld [vmem:[#allocation12_spill] sm:$0xff] }
 0x41a   : > { %15626 = vmatprep.mubr.msk.bf16.mxu0 %vm2365_vm14, %v20055_v56  ;;  %v14248_v3 = vpop.f32.mrb[160].mxu1  ;;  %15655 = vmatpush3.bf16.msra.mxu0 %v17022_v48 }
 0x41b   : > { %v14249_v25 = vpop.f32.mrb[161].mxu1  ;;  %15656 = vmatprep.subr.bf16.mxu0 %v17025_v29 }
 0x41c   : > { %v14250_v19 = vadd.f32 %v14249_v25, %v14248_v3  ;;  %v14251_v12 = vpop.f32.mrb[162].mxu1  ;;  %14731 = vmatpush3.bf16.msra.mxu1 %v17031_v2  ;;  %v22067_v25 = vld [vmem:[#allocation14_spill] sm:$0xff] }
 0x41d   : > { %v14252_v22 = vpop.f32.mrb[163].mxu1  ;;  %14732 = vmatprep.subr.bf16.mxu1 %v17033_v60 }
 0x41e   : > { %v20062_v18 = vadd.f32 %v19785_v37, %v14250_v19  ;;  %v14253_v54 = vadd.f32 %v14252_v22, %v14251_v12  ;;  %15657 = vmatpush3.bf16.msra.mxu0 %v17025_v29  ;;  %v20074_v37 = vld [vmem:[#allocation3 + $0x148] sm:$0xff] }
 0x41f   : > { %9482 = vmatmul.mubr.bf16.gmra.mrb[12].mxu1 %v19806_v59  ;;  %15690 = vmatprep.subr.bf16.mxu0 %v20059_v20  ;;  %v22070_v22 = vld [vmem:[#allocation11_spill] sm:$0xff] }
 0x420   : > { %v20067_v9 = vadd.f32 %v19790_v17, %v14253_v54  ;;  %9489 = vmatprep.mubr.bf16.mxu1 %v19810_v34  ;;  %14733 = vmatpush3.bf16.msra.mxu1 %v17035_v47  ;;  %v22069_v47 = vld [vmem:[#allocation16_spill] sm:$0xff] }
 0x421   : > { %15627 = vmatmul.mubr.msk.bf16.gmra.mrb[44].mxu0 %vm2365_vm14, %v20069_v51  ;;  %14734 = vmatprep.subr.bf16.mxu1 %v17037_v45  ;;  %v20101_v54 = vld [vmem:[#allocation3 + $0x190] sm:$0xff] }
 0x422   : > { %15630 = vmatprep.mubr.msk.bf16.mxu0 %vm2365_vm14, %v20074_v37  ;;  %v14254_v59 = vpop.f32.mrb[164].mxu1 }
 0x423   : > { %v14255_v49 = vpop.f32.mrb[165].mxu1 }
 0x424   : > { %v14256_v17 = vadd.f32 %v14255_v49, %v14254_v59  ;;  %v14257_v24 = vpop.f32.mrb[166].mxu1  ;;  %14735 = vmatpush3.bf16.msra.mxu1 %v17038_v36  ;;  %v22072_v36 = vld [vmem:[#allocation17_spill] sm:$0xff] }
 0x425   : > { %v14258_v1 = vpop.f32.mrb[167].mxu1  ;;  %14854 = vmatprep.subr.bf16.mxu1 %v17040_v31  ;;  %v20106_v31 = vld [vmem:[#allocation3 + $0x1a8] sm:$0xff] }
 0x426   : > { %v20079_v34 = vadd.f32 %v19800_v11, %v14256_v17  ;;  %v14259_v48 = vadd.f32 %v14258_v1, %v14257_v24 }
 0x427   : > { %9490 = vmatmul.mubr.bf16.gmra.mrb[16].mxu1 %v22064_v41 }
 0x428   : > { %v20083_v10 = vadd.f32 %v22065_v35, %v14259_v48  ;;  %9497 = vmatprep.mubr.bf16.mxu1 %v22066_v57  ;;  %v22073_v48 = vld [vmem:[#allocation18_spill] sm:$0xff]  ;;  %v22075_v57 = vld [vmem:[#allocation13_spill] sm:$0xff] }
 0x429   : > { %15631 = vmatmul.mubr.msk.bf16.gmra.mrb[48].mxu0 %vm2365_vm14, %v20085_v32 }
 0x42a   : > { %15634 = vmatprep.mubr.msk.bf16.mxu0 %vm2365_vm14, %v20090_v46  ;;  %v14260_v11 = vpop.f32.mrb[168].mxu1 }
 0x42b   : > { %v14261_v29 = vpop.f32.mrb[169].mxu1 }
 0x42c   : > { %v14262_v2 = vadd.f32 %v14261_v29, %v14260_v11  ;;  %v14263_v60 = vpop.f32.mrb[170].mxu1  ;;  %v20117_v29 = vld [vmem:[#allocation3 + $0x1c0] sm:$0xff] }
 0x42d   : > { %v14264_v3 = vpop.f32.mrb[171].mxu1 }
 0x42e   : > { %v20095_v19 = vadd.f32 %v22067_v25, %v14262_v2  ;;  %v14265_v12 = vadd.f32 %v14264_v3, %v14263_v60  ;;  %v4182_v2 = vld [vmem:[#allocation2 + $0x160] sm:$0xe0]  ;;  %v22077_v60 = vld [vmem:[#allocation21_spill] sm:$0xff] }
 0x42f   : > { %9498 = vmatmul.mubr.bf16.gmra.mrb[20].mxu1 %v22069_v47  ;;  %v4574_v3 = vshrl.u32 %v22077_v60, 16  ;;  %v4577_v25 = vshll.u32 %v22077_v60, 16  ;;  %v4566_v47 = vshrl.u32 %v4182_v2, 16 }
 0x430   : > { %22068 = vst [vmem:[#allocation15_spill] sm:$0xff] %v20095_v19  ;;  %v20099_v45 = vadd.f32 %v22070_v22, %v14265_v12  ;;  %9505 = vmatprep.mubr.bf16.mxu1 %v22072_v36  ;;  %v20124_v12 = vld [vmem:[#allocation3 + $0x1d8] sm:$0xff]  ;;  %v4569_v22 = vshll.u32 %v4182_v2, 16 }
 0x431   : > { %15635 = vmatmul.mubr.msk.bf16.gmra.mrb[52].mxu0 %vm2365_vm14, %v20101_v54  ;;  %v4576_v36 = vrot.slane %v4574_v3, 5  ;;  %v22079_v3 = vld [vmem:[#allocation20_spill] sm:$0xff] }
 0x432   : > { %22071 = vst [vmem:[#allocation10_spill] sm:$0xff] %v20099_v45  ;;  %15638 = vmatprep.mubr.msk.bf16.mxu0 %vm2365_vm14, %v20106_v31  ;;  %v14266_v59 = vpop.f32.mrb[172].mxu1 }
 0x433   : > { %v14267_v49 = vpop.f32.mrb[173].mxu1 }
 0x434   : > { %v14268_v17 = vadd.f32 %v14267_v49, %v14266_v59  ;;  %v14269_v24 = vpop.f32.mrb[174].mxu1  ;;  %v4579_v59 = vrot.slane %v4577_v25, 6  ;;  %v5304_v60 = vpop.permute.xlu0 %5303 }
 0x435   : > { %v14270_v1 = vpop.f32.mrb[175].mxu1 }
 0x436   : > { %v20111_v41 = vadd.f32 %v22073_v48, %v14268_v17  ;;  %v14271_v35 = vadd.f32 %v14270_v1, %v14269_v24  ;;  %v4571_v17 = vrot.slane %v4569_v22, 6  ;;  %v4580_v48 = vor.u32 %v4579_v59, %v4576_v36 }
 0x437   : > { %9506 = vmatmul.mubr.bf16.gmra.mrb[24].mxu1 %v19848_v23 }
 0x438   : > { %22074 = vst [vmem:[#allocation12_spill] sm:$0xff] %v20111_v41  ;;  %v20115_v11 = vadd.f32 %v22075_v57, %v14271_v35  ;;  %9513 = vmatprep.mubr.bf16.mxu1 %v19852_v43  ;;  %v4568_v43 = vrot.slane %v4566_v47, 5  ;;  %v20136_v47 = vld [vmem:[#allocation3 + $0x1f0] sm:$0xff] }
 0x439   : > { %15639 = vmatmul.mubr.msk.bf16.gmra.mrb[56].mxu0 %vm2365_vm14, %v20117_v29 }
 0x43a   : > { %22076 = vst [vmem:[#allocation14_spill] sm:$0xff] %v20115_v11  ;;  %15642 = vmatprep.mubr.msk.bf16.mxu0 %vm2365_vm14, %v20124_v12  ;;  %v14272_v23 = vpop.f32.mrb[176].mxu1  ;;  %v4572_v57 = vor.u32 %v4571_v17, %v4568_v43  ;;  %v22078_v11 = vld [vmem:[#allocation19_spill] sm:$0xff]  ;;  %v17032_v17 = vld [vmem:[#allocation4 + $0x560] sm:$0xff]  }
 0x43b   : > { %v14273_v49 = vpop.f32.mrb[177].mxu1  ;;  %v5356_v2 = vpop.permute.xlu1 %5355 }
 0x43c   : > { %v14274_v24 = vadd.f32 %v14273_v49, %v14272_v23  ;;  %v14275_v1 = vpop.f32.mrb[178].mxu1  ;;  %v4581_v19 = vsel %vm4190_vm12, %v4572_v57, %v4580_v48  ;;  %v17036_v57 = vld [vmem:[#allocation4 + $0x570] sm:$0xff]  }
 0x43d   : > { %v14276_v35 = vpop.f32.mrb[179].mxu1  ;;  %v5431_v22 = vsel %vm647_vm0, %v4581_v19, %v5304_v60  ;;  %v17029_v19 = vld [vmem:[#allocation4 + $0x558] sm:$0xff]  }
 0x43e   : > { %v20129_v41 = vadd.f32 %v22078_v11, %v14274_v24  ;;  %v14277_v45 = vadd.f32 %v14276_v35, %v14275_v1  ;;  %v5508_v11 = vsel %vm2312_vm13, %v5431_v22, %v5356_v2 }
 0x43f   : > { %9514 = vmatmul.mubr.bf16.gmra.mrb[28].mxu1 %v19867_v27  ;;  %5541 = vst.msk [vmem:[#allocation3 + $0x220] sm:$0xff] %vm2365_vm14, %v5508_v11 }
 0x440   : > { %v20134_v25 = vadd.f32 %v22079_v3, %v14277_v45  ;;  %9521 = vmatprep.mubr.bf16.mxu1 %v19871_v8  ;;  %v22082_v3 = vld [vmem:[#allocation23_spill] sm:$0xff] }
 0x441   : > { %15643 = vmatmul.mubr.msk.bf16.gmra.mrb[60].mxu0 %vm2365_vm14, %v20136_v47 }
 0x442   : > { %15658 = vmatprep.mubr.msk.bf16.mxu0 %vm2365_vm14, %v20014_v21  ;;  %v14278_v27 = vpop.f32.mrb[180].mxu1 }
 0x443   : > { %v14279_v23 = vpop.f32.mrb[181].mxu1 }
 0x444   : > { %v14280_v45 = vadd.f32 %v14279_v23, %v14278_v27  ;;  %v14281_v36 = vpop.f32.mrb[182].mxu1  ;;  %v9186_v27 = vld [vmem:[#allocation3 + $0x1a0] sm:$0xff]  ;;  %v22083_v23 = vld [vmem:[#allocation24_spill] sm:$0xff] }
 0x445   : > { %v14282_v59 = vpop.f32.mrb[183].mxu1 }
 0x446   : > { %v20147_v49 = vadd.f32 %v19860_v33, %v14280_v45  ;;  %v14283_v8 = vadd.f32 %v14282_v59, %v14281_v36  ;;  %v20182_v59 = vld [vmem:[#allocation4 + $0x600] sm:$0xff]  }
 0x447   : > { %9522 = vmatmul.mubr.bf16.gmra.mrb[32].mxu1 %v19883_v28 }
 0x448   : > { %v20151_v43 = vadd.f32 %v19865_v13, %v14283_v8  ;;  %9529 = vmatprep.mubr.bf16.mxu1 %v19887_v5  ;;  %v17034_v5 = vld [vmem:[#allocation4 + $0x568] sm:$0xff]  }
 0x449   : > { %15659 = vmatmul.mubr.msk.bf16.vlgmr.msra.gmra.mrb[32].mxu0 %vm2365_vm14, %v20019_v55  ;;  %v22080_v55 = vld [vmem:[#allocation22_spill] sm:$0xff] }
 0x44a   : > { %15691 = vmatpush3.bf16.msra.mxu0 %v20059_v20  ;;  %15662 = vmatprep.mubr.msk.bf16.mxu0 %vm2365_vm14, %v20032_v52  ;;  %v14284_v21 = vpop.f32.mrb[184].mxu1  ;;  %v22081_v52 = vld [vmem:[#allocation25_spill] sm:$0xff] }
 0x44b   : > { %v14285_v33 = vpop.f32.mrb[185].mxu1  ;;  %15692 = vmatprep.subr.bf16.mxu0 %v17029_v19 }
 0x44c   : > { %v14286_v24 = vadd.f32 %v14285_v33, %v14284_v21  ;;  %v14287_v28 = vpop.f32.mrb[186].mxu1 }
 0x44d   : > { %v14288_v1 = vpop.f32.mrb[187].mxu1 }
 0x44e   : > { %v20160_v13 = vadd.f32 %v19877_v40, %v14286_v24  ;;  %v14289_v48 = vadd.f32 %v14288_v1, %v14287_v28  ;;  %15693 = vmatpush3.bf16.msra.mxu0 %v17029_v19  ;;  %v22084_v24 = vld [vmem:[#allocation26_spill] sm:$0xff] }
 0x44f   : > { %9530 = vmatmul.mubr.bf16.gmra.mrb[36].mxu1 %v19897_v30  ;;  %15694 = vmatprep.subr.bf16.mxu0 %v17032_v17 }
 0x450   : > { %v20164_v20 = vadd.f32 %v22080_v55, %v14289_v48  ;;  %9537 = vmatprep.mubr.bf16.mxu1 %v22081_v52  ;;  %v9189_v52 = vld [vmem:[#allocation3 + $0x1b8] sm:$0xff] }
 0x451   : > { %15663 = vmatmul.mubr.msk.bf16.gmra.mrb[36].mxu0 %vm2365_vm14, %v20038_v63  ;;  %v17039_v63 = vld [vmem:[#allocation4 + $0x578] sm:$0xff]  }
 0x452   : > { %15666 = vmatprep.mubr.msk.bf16.mxu0 %vm2365_vm14, %v20050_v61  ;;  %v14290_v35 = vpop.f32.mrb[188].mxu1  ;;  %15695 = vmatpush3.bf16.msra.mxu0 %v17032_v17 }
 0x453   : > { %v14291_v40 = vpop.f32.mrb[189].mxu1  ;;  %15696 = vmatprep.subr.bf16.mxu0 %v17034_v5 }
 0x454   : > { %v14292_v60 = vadd.f32 %v14291_v40, %v14290_v35  ;;  %v14293_v30 = vpop.f32.mrb[190].mxu1 }
 0x455   : > { %v14294_v2 = vpop.f32.mrb[191].mxu1 }
 0x456   : > { %v20172_v22 = vadd.f32 %v22082_v3, %v14292_v60  ;;  %v14295_v11 = vadd.f32 %v14294_v2, %v14293_v30  ;;  %15697 = vmatpush3.bf16.msra.mxu0 %v17034_v5  ;;  %v2514_v5 = vld [vmem:[#allocation2 + $0x160] sm:$0xf8]  ;;  %v22085_v2 = vld [vmem:[#allocation27_spill] sm:$0xff] }
 0x457   : > { %9538 = vmatmul.mubr.bf16.gmra.mrb[40].mxu1 %v19911_v7  ;;  %15698 = vmatprep.subr.bf16.mxu0 %v17036_v57  ;;  %v2898_v35 = vshrl.u32 %v2514_v5, 16  ;;  %v2901_v40 = vshll.u32 %v2514_v5, 16  ;;  %v9188_v5 = vld [vmem:[#allocation3 + $0x1b0] sm:$0xff] }
 0x458   : > { %v20176_v61 = vadd.f32 %v22083_v23, %v14295_v11  ;;  %9545 = vmatprep.mubr.bf16.mxu1 %v9186_v27 }
 0x459   : > { %15667 = vmatmul.mubr.msk.bf16.gmra.mrb[40].mxu0 %vm2365_vm14, %v20055_v56  ;;  %v9185_v56 = vld [vmem:[#allocation3 + $0x198] sm:$0xff]  ;;  %v2900_v11 = vrot.slane %v2898_v35, 3  ;;  %v2903_v27 = vrot.slane %v2901_v40, 4  ;;  %v1239_v40 = vshll.u32 %v19970_v4, 16 }
 0x45a   : > { %15670 = vmatprep.mubr.msk.bf16.mxu0 %vm2365_vm14, %v20069_v51  ;;  %v14334_v45 = vpop.f32.mrb[192].mxu1  ;;  %15699 = vmatpush3.bf16.msra.mxu0 %v17036_v57  ;;  %v2906_v51 = vshrl.u32 %v19941_v0, 16  ;;  %v2909_v57 = vshll.u32 %v19941_v0, 16 }
 0x45b   : > { %v14335_v36 = vpop.f32.mrb[193].mxu1  ;;  %15700 = vmatprep.subr.bf16.mxu0 %v17039_v63 }
 0x45c   : > { %v14468_v7 = vpop.f32.mrb[128].mxu0  ;;  %v14336_v8 = vadd.f32 %v14335_v36, %v14334_v45  ;;  %v14337_v19 = vpop.f32.mrb[194].mxu1  ;;  %v2911_v23 = vrot.slane %v2909_v57, 4 }
 0x45d   : > { %v14469_v21 = vpop.f32.mrb[129].mxu0  ;;  %v14338_v33 = vpop.f32.mrb[195].mxu1 }
 0x45e   : > { %v14470_v17 = vadd.f32 %v14469_v21, %v14468_v7  ;;  %v16144_v28 = vadd.f32 %v22084_v24, %v14336_v8  ;;  %v14471_v1 = vpop.f32.mrb[130].mxu0  ;;  %v14339_v48 = vadd.f32 %v14338_v33, %v14337_v19  ;;  %15701 = vmatpush3.bf16.msra.mxu0 %v17039_v63  ;;  %v2908_v63 = vrot.slane %v2906_v51, 3  ;;  %v844_v51 = vld [vmem:[#allocation2 + $0x160] sm:$0xfe] }
 0x45f   : > { %v14472_v55 = vpop.f32.mrb[131].mxu0  ;;  %9546 = vmatmul.mubr.bf16.gmra.mrb[44].mxu1 %v9185_v56  ;;  %15734 = vmatprep.subr.bf16.mxu0 %v20182_v59  ;;  %v1231_v35 = vshll.u32 %v844_v51, 16 }
 0x460   : > { %v20188_v60 = vadd.f32 %v16144_v28, %v14470_v17  ;;  %v14473_v30 = vadd.f32 %v14472_v55, %v14471_v1  ;;  %v16166_v3 = vadd.f32 %v22085_v2, %v14339_v48  ;;  %9553 = vmatprep.mubr.bf16.mxu1 %v9189_v52  ;;  %v2904_v17 = vor.u32 %v2903_v27, %v2900_v11  ;;  %v22087_v2 = vld [vmem:[#allocation29_spill] sm:$0xff] }
 0x461   : > { %15671 = vmatmul.mubr.msk.bf16.gmra.mrb[44].mxu0 %vm2365_vm14, %v20074_v37  ;;  %v2912_v24 = vor.u32 %v2911_v23, %v2908_v63  ;;  %v22086_v37 = vld [vmem:[#allocation28_spill] sm:$0xff]  ;;  %v1236_v55 = vshrl.u32 %v19970_v4, 16  ;;  %v1233_v23 = vrot.slane %v1231_v35, 2 }
 0x462   : > { %v20193_v45 = vadd.f32 %v16166_v3, %v14473_v30  ;;  %15674 = vmatprep.mubr.msk.bf16.mxu0 %vm2365_vm14, %v20085_v32  ;;  %v14340_v36 = vpop.f32.mrb[196].mxu1  ;;  %v1228_v32 = vshrl.u32 %v844_v51, 16 }
 0x463   : > { %v14341_v0 = vpop.f32.mrb[197].mxu1  ;;  %v1238_v11 = vrot.slane %v1236_v55, 1  ;;  %v2913_v27 = vsel %vm2522_vm15, %v2904_v17, %v2912_v24  ;;  %v20212_v55 = vld [vmem:[#allocation2 + $0x178] sm:$0x1f] }
 0x464   : > { %v14474_v7 = vpop.f32.mrb[132].mxu0  ;;  %v14342_v8 = vadd.f32 %v14341_v0, %v14340_v36  ;;  %v14343_v19 = vpop.f32.mrb[198].mxu1  ;;  %v1230_v63 = vrot.slane %v1228_v32, 1  ;;  %v1241_v36 = vrot.slane %v1239_v40, 2  ;;  %v2517_v0 = vld [vmem:[#allocation2 + $0x178] sm:$0xf] }
 0x465   : > { %v14475_v21 = vpop.f32.mrb[133].mxu0  ;;  %v14344_v33 = vpop.f32.mrb[199].mxu1 }
 0x466   : > { %v14476_v28 = vadd.f32 %v14475_v21, %v14474_v7  ;;  %v16133_v1 = vadd.f32 %v22086_v37, %v14342_v8  ;;  %v14477_v48 = vpop.f32.mrb[134].mxu0  ;;  %v14345_v56 = vadd.f32 %v14344_v33, %v14343_v19  ;;  %v3793_v8 = vpop.permute.xlu0 %3792  ;;  %v2988_v19 = vld [vmem:[#allocation2 + $0x170] sm:$0xf0]  ;;  %v3114_v21 = vrot.slane %v2517_v0, 4  ;;  %v20220_v0 = vld [vmem:[#allocation2 + $0x178] sm:$0x7] }
 0x467   : > { %v14478_v52 = vpop.f32.mrb[135].mxu0  ;;  %9554 = vmatmul.mubr.bf16.gmra.mrb[48].mxu1 %v9188_v5  ;;  %v1242_v37 = vor.u32 %v1241_v36, %v1238_v11  ;;  %v3972_v5 = vsel %vm647_vm0, %v2913_v27, %v3793_v8  ;;  %v22088_v11 = vld [vmem:[#allocation30_spill] sm:$0xff] }
 0x468   : > { %v20200_v57 = vadd.f32 %v16133_v1, %v14476_v28  ;;  %v14479_v30 = vadd.f32 %v14478_v52, %v14477_v48  ;;  %v16155_v3 = vadd.f32 %v22087_v2, %v14345_v56  ;;  %9561 = vmatprep.mubr.bf16.mxu1 %v19944_v6  ;;  %v847_v6 = vld [vmem:[#allocation2 + $0x178] sm:$0x3]  ;;  %v1234_v28 = vor.u32 %v1233_v23, %v1230_v63  ;;  %v1318_v1 = vld [vmem:[#allocation2 + $0x170] sm:$0xfc] }
 0x469   : > { %15675 = vmatmul.mubr.msk.bf16.gmra.mrb[48].mxu0 %vm2365_vm14, %v20090_v46  ;;  %v3113_v46 = vrot.slane %v2988_v19, 4  ;;  %v1444_v17 = vrot.slane %v847_v6, 2  ;;  %v1443_v51 = vrot.slane %v1318_v1, 2  ;;  %v3549_v2 = vshrl.u32 %v20212_v55, 16 }
 0x46a   : > { %v20207_v7 = vadd.f32 %v16155_v3, %v14479_v30  ;;  %15678 = vmatprep.mubr.msk.bf16.mxu0 %vm2365_vm14, %v20101_v54  ;;  %v14346_v4 = vpop.f32.mrb[200].mxu1  ;;  %v3541_v54 = vshrl.u32 %v2988_v19, 16  ;;  %v1243_v35 = vsel %vm852_vm1, %v1234_v28, %v1242_v37  ;;  %v3544_v30 = vshll.u32 %v2988_v19, 16 }
 0x46b   : > { %v14347_v33 = vpop.f32.mrb[201].mxu1  ;;  %v3115_v40 = vsel %vm3043_vm3, %v3113_v46, %v3114_v21  ;;  %v1445_v27 = vsel %vm1373_vm5, %v1443_v51, %v1444_v17  ;;  %v3551_v6 = vrot.slane %v3549_v2, 4  ;;  %v22089_v46 = vld [vmem:[#allocation31_spill] sm:$0xff] }
 0x46c   : > { %v14480_v24 = vpop.f32.mrb[136].mxu0  ;;  %v14348_v48 = vadd.f32 %v14347_v33, %v14346_v4  ;;  %v14349_v56 = vpop.f32.mrb[202].mxu1  ;;  %3794 = vrot.lane.b32.xlu0 %v3115_v40, %s17281_s29  ;;  %2124 = vrot.lane.b32.xlu1 %v1445_v27, %s17281_s29  ;;  %v3543_v19 = vrot.slane %v3541_v54, 4  ;;  %v3546_v21 = vrot.slane %v3544_v30, 5  ;;  %v3552_v33 = vshll.u32 %v20212_v55, 16 }
 0x46d   : > { %v14481_v52 = vpop.f32.mrb[137].mxu0  ;;  %v14350_v32 = vpop.f32.mrb[203].mxu1  ;;  %v1874_v30 = vshll.u32 %v1318_v1, 16 }
 0x46e   : > { %v14482_v3 = vadd.f32 %v14481_v52, %v14480_v24  ;;  %v16188_v63 = vadd.f32 %v22088_v11, %v14348_v48  ;;  %v14483_v23 = vpop.f32.mrb[138].mxu0  ;;  %v14351_v36 = vadd.f32 %v14350_v32, %v14349_v56  ;;  %v2123_v8 = vpop.permute.xlu1 %2122  ;;  %v4184_v56 = vld [vmem:[#allocation2 + $0x170] sm:$0xe0]  ;;  %v3547_v51 = vor.u32 %v3546_v21, %v3543_v19 }
 0x46f   : > { %v14484_v4 = vpop.f32.mrb[139].mxu0  ;;  %9562 = vmatmul.mubr.bf16.gmra.mrb[52].mxu1 %v19964_v42  ;;  %v3845_v17 = vpop.permute.xlu0 %3844  ;;  %v2302_v48 = vsel %vm647_vm0, %v1243_v35, %v2123_v8  ;;  %v3554_v54 = vrot.slane %v3552_v33, 5  ;;  %v1871_v52 = vshrl.u32 %v1318_v1, 16  ;;  %v1882_v35 = vshll.u32 %v20220_v0, 16 }
 0x470   : > { %v20225_v28 = vadd.f32 %v16188_v63, %v14482_v3  ;;  %v14485_v37 = vadd.f32 %v14484_v4, %v14483_v23  ;;  %v16210_v24 = vadd.f32 %v22089_v46, %v14351_v36  ;;  %9569 = vmatprep.mubr.bf16.mxu1 %v19973_v53  ;;  %v4027_v42 = vsel %vm2312_vm13, %v3972_v5, %v3845_v17  ;;  %v22090_v46 = vld [vmem:[#allocation33_spill] sm:$0xff] }
 0x471   : > { %15679 = vmatmul.mubr.msk.bf16.gmra.mrb[52].mxu0 %vm2365_vm14, %v20106_v31  ;;  %v1879_v53 = vshrl.u32 %v20220_v0, 16  ;;  %v3555_v3 = vor.u32 %v3554_v54, %v3551_v6  ;;  %v1873_v11 = vrot.slane %v1871_v52, 2  ;;  %v4583_v31 = vshrl.u32 %v4184_v56, 16 }
 0x472   : > { %v20233_v32 = vadd.f32 %v16210_v24, %v14485_v37  ;;  %15682 = vmatprep.mubr.msk.bf16.mxu0 %vm2365_vm14, %v20117_v29  ;;  %v14352_v40 = vpop.f32.mrb[204].mxu1  ;;  %v4586_v63 = vshll.u32 %v4184_v56, 16  ;;  %v1876_v27 = vrot.slane %v1874_v30, 3  ;;  %v1884_v8 = vrot.slane %v1882_v35, 3 }
 0x473   : > { %v14353_v2 = vpop.f32.mrb[205].mxu1  ;;  %v1881_v4 = vrot.slane %v1879_v53, 2  ;;  %v3556_v29 = vsel %vm3148_vm6, %v3547_v51, %v3555_v3  ;;  %v20240_v1 = vrot.slane %v4583_v31, 5  ;;  %v4591_v37 = vshrl.u32 %v19996_v15, 16  ;;  %v3897_v54 = vpop.permute.xlu0 %3896  ;;  %v1944_v31 = vld [vmem:[#allocation2 + $0x170] sm:$0xf8] }
 0x474   : > { %v14486_v5 = vpop.f32.mrb[140].mxu0  ;;  %v14354_v23 = vadd.f32 %v14353_v2, %v14352_v40  ;;  %v14355_v36 = vpop.f32.mrb[206].mxu1  ;;  %v20242_v33 = vrot.slane %v4586_v63, 6  ;;  %3846 = vrot.lane.b32.xlu0 %v3556_v29, %s17282_s30  ;;  %v1877_v52 = vor.u32 %v1876_v27, %v1873_v11  ;;  %v3614_v40 = vld [vmem:[#allocation2 + $0x170] sm:$0xe0]  ;;  %v4101_v51 = vsel %vm2365_vm14, %v4027_v42, %v3897_v54 }
 0x475   : > { %v14487_v19 = vpop.f32.mrb[141].mxu0  ;;  %v14356_v21 = vpop.f32.mrb[207].mxu1  ;;  %v1885_v35 = vor.u32 %v1884_v8, %v1881_v4  ;;  %v20251_v3 = vrot.slane %v4591_v37, 5  ;;  %v2989_v63 = vld [vmem:[#allocation2 + $0x180] sm:$0xf0]  ;;  %v22092_v27 = vld [vmem:[#allocation32_spill] sm:$0xff] }
 0x476   : > { %v14488_v6 = vadd.f32 %v14487_v19, %v14486_v5  ;;  %v16177_v24 = vadd.f32 %v22090_v46, %v14354_v23  ;;  %v14489_v17 = vpop.f32.mrb[142].mxu0  ;;  %v14357_v56 = vadd.f32 %v14356_v21, %v14355_v36  ;;  %v2175_v53 = vpop.permute.xlu1 %2174  ;;  %v4589_v2 = vor.u32 %v20242_v33, %v20240_v1  ;;  %v22091_v36 = vld [vmem:[#allocation34_spill] sm:$0xff]  ;;  %4134 = vst [vmem:[#allocation3 + $0x218] sm:$0xff] %v4101_v51  ;;  %v2519_v42 = vld [vmem:[#allocation2 + $0x188] sm:$0xf] }
 0x477   : > { %v14490_v30 = vpop.f32.mrb[143].mxu0  ;;  %9570 = vmatmul.mubr.bf16.gmra.mrb[56].mxu1 %v19993_v14  ;;  %v2358_v14 = vsel %vm2312_vm13, %v2302_v48, %v2175_v53  ;;  %v849_v19 = vld [vmem:[#allocation2 + $0x188] sm:$0x3]  ;;  %v1886_v4 = vsel %vm1478_vm7, %v1877_v52, %v1885_v35  ;;  %v4594_v8 = vshll.u32 %v19996_v15, 16  ;;  %v3739_v21 = vrot.slane %v3614_v40, 5  ;;  %v2227_v46 = vpop.permute.xlu0 %2226 }
 0x478   : > { %v20253_v5 = vadd.f32 %v16177_v24, %v14488_v6  ;;  %v14491_v23 = vadd.f32 %v14490_v30, %v14489_v17  ;;  %v16199_v11 = vadd.f32 %v22091_v36, %v14357_v56  ;;  %9577 = vmatprep.mubr.bf16.mxu1 %v22092_v27  ;;  %v3740_v29 = vrot.slane %v20212_v55, 5  ;;  %v20263_v37 = vld [vmem:[#allocation2 + $0x180] sm:$0xfc]  ;;  %2176 = vrot.lane.b32.xlu1 %v1886_v4, %s17282_s30 }
 0x479   : > { %15683 = vmatmul.mubr.msk.bf16.gmra.mrb[56].mxu0 %vm2365_vm14, %v20124_v12  ;;  %v2069_v24 = vrot.slane %v1944_v31, 3  ;;  %v2070_v12 = vrot.slane %v20220_v0, 3  ;;  %v3116_v17 = vrot.slane %v2989_v63, 4  ;;  %v2433_v15 = vsel %vm2365_vm14, %v2358_v14, %v2227_v46  ;;  %v20276_v0 = vld [vmem:[#allocation2 + $0x188] sm:$0x1f] }
 0x47a   : > { %v20265_v6 = vadd.f32 %v16199_v11, %v14491_v23  ;;  %15686 = vmatprep.mubr.msk.bf16.mxu0 %vm2365_vm14, %v20136_v47  ;;  %v14358_v48 = vpop.f32.mrb[208].mxu1  ;;  %v4596_v54 = vrot.slane %v4594_v8, 6  ;;  %v3741_v55 = vsel %vm3669_vm8, %v3739_v21, %v3740_v29  ;;  %v3117_v52 = vrot.slane %v2519_v42, 4  ;;  %2466 = vst [vmem:[#allocation3 + $0x210] sm:$0xff] %v2433_v15  ;;  %v9780_v21 = vld [vmem:[#allocation3 + $0xb0] sm:$0xff] }
 0x47b   : > { %v14359_v56 = vpop.f32.mrb[209].mxu1  ;;  %3898 = vrot.lane.b32.xlu0 %v3741_v55, %s17283_s12  ;;  %v2071_v47 = vsel %vm1999_vm9, %v2069_v24, %v2070_v12  ;;  %v1446_v53 = vrot.slane %v20263_v37, 2  ;;  %v1447_v35 = vrot.slane %v849_v19, 2  ;;  %v3558_v11 = vshrl.u32 %v2989_v63, 16  ;;  %v17171_v19 = vld [vmem:[#allocation3 + $0x1f8] sm:$0xff]  ;;  %v5306_v55 = vpop.permute.xlu1 %5305 }
 0x47c   : > { %v14492_v40 = vpop.f32.mrb[144].mxu0  ;;  %v14360_v30 = vadd.f32 %v14359_v56, %v14358_v48  ;;  %v14361_v51 = vpop.f32.mrb[210].mxu1  ;;  %v4597_v36 = vor.u32 %v4596_v54, %v20251_v3  ;;  %v3561_v27 = vshll.u32 %v2989_v63, 16  ;;  %2228 = vrot.lane.b32.xlu1 %v2071_v47, %s17283_s12  ;;  %v3118_v29 = vsel %vm3043_vm3, %v3116_v17, %v3117_v52  ;;  %v20284_v63 = vld [vmem:[#allocation2 + $0x188] sm:$0x7]  ;;  %v9781_v52 = vld [vmem:[#allocation3 + $0xb8] sm:$0xff] }
 0x47d   : > { %v14493_v31 = vpop.f32.mrb[145].mxu0  ;;  %v14362_v23 = vpop.f32.mrb[211].mxu1  ;;  %v1448_v46 = vsel %vm1373_vm5, %v1446_v53, %v1447_v35  ;;  %v3560_v24 = vrot.slane %v3558_v11, 4  ;;  %v3566_v3 = vshrl.u32 %v20276_v0, 16  ;;  %v20289_v54 = vld [vmem:[#allocation3 + $0x208] sm:$0xff]  ;;  %v1891_v1 = vshll.u32 %v20263_v37, 16 }
 0x47e   : > { %v14494_v14 = vadd.f32 %v14493_v31, %v14492_v40  ;;  %v16232_v42 = vadd.f32 %v19984_v50, %v14360_v30  ;;  %v14495_v4 = vpop.f32.mrb[146].mxu0  ;;  %v14363_v8 = vadd.f32 %v14362_v23, %v14361_v51  ;;  %v3563_v12 = vrot.slane %v3561_v27, 5 }
 0x47f   : > { %v14496_v48 = vpop.f32.mrb[147].mxu0  ;;  %9578 = vmatmul.mubr.bf16.gmra.mrb[60].mxu1 %v17171_v19  ;;  %v4598_v17 = vsel %vm4190_vm12, %v4589_v2, %v4597_v36  ;;  %3796 = vrot.lane.b32.xlu0 %v3118_v29, %s17281_s29  ;;  %v3568_v40 = vrot.slane %v3566_v3, 4  ;;  %v3569_v30 = vshll.u32 %v20276_v0, 16  ;;  %v1896_v33 = vshrl.u32 %v20284_v63, 16 }
 0x480   : > { %v20286_v56 = vadd.f32 %v16232_v42, %v14494_v14  ;;  %v14497_v50 = vadd.f32 %v14496_v48, %v14495_v4  ;;  %v16254_v15 = vadd.f32 %v19991_v26, %v14363_v8  ;;  %10084 = vmatprep.mubr.bf16.mxu1 %v9780_v21  ;;  %v1888_v26 = vshrl.u32 %v20263_v37, 16  ;;  %2126 = vrot.lane.b32.xlu1 %v1448_v46, %s17281_s29  ;;  %v17042_v42 = vld [vmem:[#allocation4 + $0x580] sm:$0xff]   ;;  %v17044_v37 = vld [vmem:[#allocation4 + $0x5c8] sm:$0xff]  }
 0x481   : > { %15687 = vmatmul.mubr.msk.bf16.gmra.mrb[60].mxu0 %vm2365_vm14, %v20289_v54  ;;  %v1899_v2 = vshll.u32 %v20284_v63, 16  ;;  %v5434_v35 = vsel %vm647_vm0, %v4598_v17, %v5306_v55  ;;  %v3564_v31 = vor.u32 %v3563_v12, %v3560_v24  ;;  %v3571_v23 = vrot.slane %v3569_v30, 5  ;;  %v9779_v17 = vld [vmem:[#allocation3 + $0xa8] sm:$0xff]  ;;  %v5358_v24 = vpop.permute.xlu1 %5357  ;;  %v17043_v30 = vld [vmem:[#allocation4 + $0x608] sm:$0xff]  }
 0x482   : > { %v20300_v51 = vadd.f32 %v16254_v15, %v14497_v50  ;;  %15702 = vmatprep.mubr.msk.bf16.mxu0 %vm2365_vm14, %v9781_v52  ;;  %v14364_v47 = vpop.f32.mrb[212].mxu1  ;;  %v1890_v36 = vrot.slane %v1888_v26, 2  ;;  %v1893_v4 = vrot.slane %v1891_v1, 3  ;;  %v1898_v8 = vrot.slane %v1896_v33, 2  ;;  %v9783_v52 = vld [vmem:[#allocation3 + $0xc8] sm:$0xff] }
 0x483   : > { %v14365_v53 = vpop.f32.mrb[213].mxu1  ;;  %v1901_v21 = vrot.slane %v1899_v2, 3  ;;  %v3572_v19 = vor.u32 %v3571_v23, %v3568_v40  ;;  %v5511_v26 = vsel %vm2312_vm13, %v5434_v35, %v5358_v24  ;;  %v3615_v23 = vld [vmem:[#allocation2 + $0x180] sm:$0xe0]  ;;  %v20319_v35 = vld [vmem:[#allocation3 + $0xe8] sm:$0xff] }
 0x484   : > { %v14498_v11 = vpop.f32.mrb[148].mxu0  ;;  %v14366_v27 = vadd.f32 %v14365_v53, %v14364_v47  ;;  %v14367_v14 = vpop.f32.mrb[214].mxu1  ;;  %v1894_v12 = vor.u32 %v1893_v4, %v1890_v36  ;;  %v17045_v53 = vld [vmem:[#allocation4 + $0x588] sm:$0xff]   ;;  %5542 = vst.msk [vmem:[#allocation3 + $0x238] sm:$0xff] %vm2365_vm14, %v5511_v26  ;;  %v3742_v4 = vrot.slane %v3615_v23, 5  ;;  %v17048_v26 = vld [vmem:[#allocation4 + $0x618] sm:$0xff]  }
 0x485   : > { %v14499_v29 = vpop.f32.mrb[149].mxu0  ;;  %v14368_v48 = vpop.f32.mrb[215].mxu1  ;;  %v3573_v47 = vsel %vm3148_vm6, %v3564_v31, %v3572_v19  ;;  %v1902_v1 = vor.u32 %v1901_v21, %v1898_v8  ;;  %v17047_v31 = vld [vmem:[#allocation4 + $0x5d0] sm:$0xff]   ;;  %v3743_v8 = vrot.slane %v20276_v0, 5 }
 0x486   : > { %v14500_v46 = vadd.f32 %v14499_v29, %v14498_v11  ;;  %v16221_v3 = vadd.f32 %v20006_v62, %v14366_v27  ;;  %v14501_v50 = vpop.f32.mrb[150].mxu0  ;;  %v14369_v15 = vadd.f32 %v14368_v48, %v14367_v14  ;;  %v20314_v62 = vld [vmem:[#allocation3 + $0xd0] sm:$0xff]  ;;  %v1945_v27 = vld [vmem:[#allocation2 + $0x180] sm:$0xf8]  ;;  %3848 = vrot.lane.b32.xlu0 %v3573_v47, %s17282_s30 }
 0x487   : > { %v14502_v55 = vpop.f32.mrb[151].mxu0  ;;  %10085 = vmatmul.mubr.bf16.vlgmr.msra.gmra.mrb[64].mxu1 %v9779_v17  ;;  %v1903_v36 = vsel %vm1478_vm7, %v1894_v12, %v1902_v1  ;;  %v9782_v0 = vld [vmem:[#allocation3 + $0xc0] sm:$0xff]  ;;  %v3744_v47 = vsel %vm3669_vm8, %v3742_v4, %v3743_v8  ;;  %v17056_v8 = vld [vmem:[#allocation4 + $0x5a0] sm:$0xff]  }
 0x488   : > { %v20311_v33 = vadd.f32 %v16221_v3, %v14500_v46  ;;  %v14503_v40 = vadd.f32 %v14502_v55, %v14501_v50  ;;  %v16243_v2 = vadd.f32 %v20012_v58, %v14369_v15  ;;  %14855 = vmatpush3.bf16.msra.mxu1 %v17042_v42  ;;  %10092 = vmatprep.mubr.bf16.mxu1 %v9783_v52  ;;  %v17046_v42 = vld [vmem:[#allocation4 + $0x610] sm:$0xff]   ;;  %v17051_v46 = vld [vmem:[#allocation4 + $0x5d8] sm:$0xff]   ;;  %v2072_v3 = vrot.slane %v1945_v27, 3 }
 0x489   : > { %15703 = vmatmul.mubr.msk.bf16.vlgmr.msra.gmra.mrb[32].mxu0 %vm2365_vm14, %v20314_v62  ;;  %14856 = vmatprep.subr.bf16.mxu1 %v17044_v37  ;;  %v17049_v37 = vld [vmem:[#allocation4 + $0x590] sm:$0xff]   ;;  %v2073_v50 = vrot.slane %v20284_v63, 3 }
 0x48a   : > { %v20322_v11 = vadd.f32 %v16243_v2, %v14503_v40  ;;  %15735 = vmatpush3.bf16.msra.mxu0 %v20182_v59  ;;  %15706 = vmatprep.mubr.msk.bf16.mxu0 %vm2365_vm14, %v20319_v35  ;;  %v14370_v58 = vpop.f32.mrb[216].mxu1  ;;  %v9786_v52 = vld [vmem:[#allocation3 + $0xe0] sm:$0xff] }
 0x48b   : > { %v14371_v14 = vpop.f32.mrb[217].mxu1  ;;  %15736 = vmatprep.subr.bf16.mxu0 %v17043_v30  ;;  %2178 = vrot.lane.b32.xlu1 %v1903_v36, %s17282_s30  ;;  %v20336_v63 = vld [vmem:[#allocation3 + $0x100] sm:$0xff]  ;;  %v2074_v23 = vsel %vm1999_vm9, %v2072_v3, %v2073_v50  ;;  %v9789_v50 = vld [vmem:[#allocation3 + $0xf8] sm:$0xff] }
 0x48c   : > { %v14504_v21 = vpop.f32.mrb[152].mxu0  ;;  %v14372_v29 = vadd.f32 %v14371_v14, %v14370_v58  ;;  %v14373_v48 = vpop.f32.mrb[218].mxu1  ;;  %14857 = vmatpush3.bf16.msra.mxu1 %v17045_v53  ;;  %v17054_v53 = vld [vmem:[#allocation4 + $0x5e0] sm:$0xff]   ;;  %3900 = vrot.lane.b32.xlu0 %v3744_v47, %s17283_s12 }
 0x48d   : > { %v14505_v59 = vpop.f32.mrb[153].mxu0  ;;  %v14374_v19 = vpop.f32.mrb[219].mxu1  ;;  %14858 = vmatprep.subr.bf16.mxu1 %v17047_v31  ;;  %v17050_v58 = vld [vmem:[#allocation4 + $0x620] sm:$0xff]  }
 0x48e   : > { %v14506_v15 = vadd.f32 %v14505_v59, %v14504_v21  ;;  %v16276_v17 = vadd.f32 %v20026_v44, %v14372_v29  ;;  %v14507_v24 = vpop.f32.mrb[154].mxu0  ;;  %v14375_v12 = vadd.f32 %v14374_v19, %v14373_v48  ;;  %15737 = vmatpush3.bf16.msra.mxu0 %v17043_v30  ;;  %v17052_v44 = vld [vmem:[#allocation4 + $0x598] sm:$0xff]   ;;  %v20340_v30 = vld [vmem:[#allocation3 + $0x118] sm:$0xff] }
 0x48f   : > { %v14508_v55 = vpop.f32.mrb[155].mxu0  ;;  %10093 = vmatmul.mubr.bf16.gmra.mrb[68].mxu1 %v9782_v0  ;;  %15738 = vmatprep.subr.bf16.mxu0 %v17046_v42  ;;  %v17060_v48 = vld [vmem:[#allocation4 + $0x5e8] sm:$0xff]   ;;  %v20353_v0 = vld [vmem:[#allocation3 + $0x130] sm:$0xff] }
 0x490   : > { %v20333_v1 = vadd.f32 %v16276_v17, %v14506_v15  ;;  %v14509_v40 = vadd.f32 %v14508_v55, %v14507_v24  ;;  %v16298_v2 = vadd.f32 %v20030_v39, %v14375_v12  ;;  %10100 = vmatprep.mubr.bf16.mxu1 %v9786_v52  ;;  %14859 = vmatpush3.bf16.msra.mxu1 %v17049_v37  ;;  %v17053_v15 = vld [vmem:[#allocation4 + $0x628] sm:$0xff]   ;;  %v17066_v52 = vld [vmem:[#allocation4 + $0x5f0] sm:$0xff]  }
 0x491   : > { %15707 = vmatmul.mubr.msk.bf16.gmra.mrb[36].mxu0 %vm2365_vm14, %v20336_v63  ;;  %14860 = vmatprep.subr.bf16.mxu1 %v17051_v46  ;;  %v9785_v46 = vld [vmem:[#allocation3 + $0xd8] sm:$0xff] }
 0x492   : > { %v20343_v31 = vadd.f32 %v16298_v2, %v14509_v40  ;;  %15710 = vmatprep.mubr.msk.bf16.mxu0 %vm2365_vm14, %v20340_v30  ;;  %v14376_v39 = vpop.f32.mrb[220].mxu1  ;;  %15739 = vmatpush3.bf16.msra.mxu0 %v17046_v42  ;;  %v17062_v55 = vld [vmem:[#allocation4 + $0x5a8] sm:$0xff]   ;;  %v17055_v40 = vld [vmem:[#allocation4 + $0x670] sm:$0xff]  }
 0x493   : > { %v14377_v36 = vpop.f32.mrb[221].mxu1  ;;  %15740 = vmatprep.subr.bf16.mxu0 %v17048_v26  ;;  %2230 = vrot.lane.b32.xlu1 %v2074_v23, %s17283_s12  ;;  %v17068_v23 = vld [vmem:[#allocation4 + $0x5b0] sm:$0xff]  }
 0x494   : > { %v14510_v27 = vpop.f32.mrb[156].mxu0  ;;  %v14378_v14 = vadd.f32 %v14377_v36, %v14376_v39  ;;  %v14379_v4 = vpop.f32.mrb[222].mxu1  ;;  %14861 = vmatpush3.bf16.msra.mxu1 %v17052_v44 }
 0x495   : > { %v14511_v21 = vpop.f32.mrb[157].mxu0  ;;  %v14380_v29 = vpop.f32.mrb[223].mxu1  ;;  %14862 = vmatprep.subr.bf16.mxu1 %v17054_v53 }
 0x496   : > { %v14512_v37 = vadd.f32 %v14511_v21, %v14510_v27  ;;  %v16265_v59 = vadd.f32 %v20044_v38, %v14378_v14  ;;  %v14513_v42 = vpop.f32.mrb[158].mxu0  ;;  %v14381_v19 = vadd.f32 %v14380_v29, %v14379_v4  ;;  %15741 = vmatpush3.bf16.msra.mxu0 %v17048_v26  ;;  %v20357_v38 = vld [vmem:[#allocation3 + $0x148] sm:$0xff]  ;;  %v9788_v29 = vld [vmem:[#allocation3 + $0xf0] sm:$0xff] }
 0x497   : > { %v14514_v3 = vpop.f32.mrb[159].mxu0  ;;  %10101 = vmatmul.mubr.bf16.gmra.mrb[72].mxu1 %v9785_v46  ;;  %15742 = vmatprep.subr.bf16.mxu0 %v17050_v58  ;;  %v17072_v27 = vld [vmem:[#allocation4 + $0x5f8] sm:$0xff]  }
 0x498   : > { %v20350_v17 = vadd.f32 %v16265_v59, %v14512_v37  ;;  %v14515_v24 = vadd.f32 %v14514_v3, %v14513_v42  ;;  %v16287_v12 = vadd.f32 %v20048_v16, %v14381_v19  ;;  %10108 = vmatprep.mubr.bf16.mxu1 %v9789_v50  ;;  %14863 = vmatpush3.bf16.msra.mxu1 %v17056_v8  ;;  %v20367_v19 = vld [vmem:[#allocation3 + $0x160] sm:$0xff]  ;;  %v17074_v46 = vld [vmem:[#allocation4 + $0x5b8] sm:$0xff]   ;;  %v17079_v3 = vld [vmem:[#allocation4 + $0x720] sm:$0xff]  }
 0x499   : > { %15711 = vmatmul.mubr.msk.bf16.gmra.mrb[40].mxu0 %vm2365_vm14, %v20353_v0  ;;  %14864 = vmatprep.subr.bf16.mxu1 %v17060_v48  ;;  %v9792_v48 = vld [vmem:[#allocation3 + $0x110] sm:$0xff] }
 0x49a   : > { %v20359_v26 = vadd.f32 %v16287_v12, %v14515_v24  ;;  %15714 = vmatprep.mubr.msk.bf16.mxu0 %vm2365_vm14, %v20357_v38  ;;  %v14382_v47 = vpop.f32.mrb[224].mxu1  ;;  %15743 = vmatpush3.bf16.msra.mxu0 %v17050_v58 }
 0x49b   : > { %v14383_v16 = vpop.f32.mrb[225].mxu1  ;;  %15744 = vmatprep.subr.bf16.mxu0 %v17053_v15 }
 0x49c   : > { %v14516_v2 = vpop.f32.mrb[160].mxu0  ;;  %v14384_v44 = vadd.f32 %v14383_v16, %v14382_v47  ;;  %v14385_v53 = vpop.f32.mrb[226].mxu1  ;;  %14865 = vmatpush3.bf16.msra.mxu1 %v17062_v55 }
 0x49d   : > { %v14517_v39 = vpop.f32.mrb[161].mxu0  ;;  %v14386_v36 = vpop.f32.mrb[227].mxu1  ;;  %14866 = vmatprep.subr.bf16.mxu1 %v17066_v52 }
 0x49e   : > { %v14518_v14 = vadd.f32 %v14517_v39, %v14516_v2  ;;  %v16320_v4 = vadd.f32 %v20062_v18, %v14384_v44  ;;  %v14519_v8 = vpop.f32.mrb[162].mxu0  ;;  %v14387_v21 = vadd.f32 %v14386_v36, %v14385_v53  ;;  %15745 = vmatpush3.bf16.msra.mxu0 %v17053_v15  ;;  %v20371_v18 = vld [vmem:[#allocation3 + $0x178] sm:$0xff]  ;;  %v9791_v53 = vld [vmem:[#allocation3 + $0x108] sm:$0xff] }
 0x49f   : > { %v14520_v58 = vpop.f32.mrb[163].mxu0  ;;  %10109 = vmatmul.mubr.bf16.gmra.mrb[76].mxu1 %v9788_v29  ;;  %14988 = vmatprep.subr.bf16.mxu0 %v17055_v40  ;;  %v9795_v39 = vld [vmem:[#allocation3 + $0x128] sm:$0xff] }
 0x4a0   : > { %v20364_v37 = vadd.f32 %v16320_v4, %v14518_v14  ;;  %v14521_v59 = vadd.f32 %v14520_v58, %v14519_v8  ;;  %v16342_v42 = vadd.f32 %v20067_v9, %v14387_v21  ;;  %10116 = vmatprep.mubr.bf16.mxu1 %v9792_v48  ;;  %14867 = vmatpush3.bf16.msra.mxu1 %v17068_v23  ;;  %v20381_v4 = vld [vmem:[#allocation3 + $0x190] sm:$0xff]  ;;  %v20385_v8 = vld [vmem:[#allocation3 + $0x1a8] sm:$0xff] }
 0x4a1   : > { %15715 = vmatmul.mubr.msk.bf16.gmra.mrb[44].mxu0 %vm2365_vm14, %v20367_v19  ;;  %14868 = vmatprep.subr.bf16.mxu1 %v17072_v27 }
 0x4a2   : > { %v20373_v50 = vadd.f32 %v16342_v42, %v14521_v59  ;;  %15718 = vmatprep.mubr.msk.bf16.mxu0 %vm2365_vm14, %v20371_v18  ;;  %v14388_v15 = vpop.f32.mrb[228].mxu1 }
 0x4a3   : > { %v14389_v24 = vpop.f32.mrb[229].mxu1 }
 0x4a4   : > { %v14522_v9 = vpop.f32.mrb[164].mxu0  ;;  %v14390_v12 = vadd.f32 %v14389_v24, %v14388_v15  ;;  %v14391_v55 = vpop.f32.mrb[230].mxu1  ;;  %14869 = vmatpush3.bf16.msra.mxu1 %v17074_v46 }
 0x4a5   : > { %v14523_v52 = vpop.f32.mrb[165].mxu0  ;;  %v14392_v47 = vpop.f32.mrb[231].mxu1  ;;  %15122 = vmatprep.subr.bf16.mxu1 %v17079_v3  ;;  %v22093_v3 = vld [vmem:[#allocation15_spill] sm:$0xff] }
 0x4a6   : > { %v14524_v16 = vadd.f32 %v14523_v52, %v14522_v9  ;;  %v16309_v40 = vadd.f32 %v20079_v34, %v14390_v12  ;;  %v14525_v2 = vpop.f32.mrb[166].mxu0  ;;  %v14393_v44 = vadd.f32 %v14392_v47, %v14391_v55  ;;  %v9794_v12 = vld [vmem:[#allocation3 + $0x120] sm:$0xff] }
 0x4a7   : > { %v14526_v23 = vpop.f32.mrb[167].mxu0  ;;  %10117 = vmatmul.mubr.bf16.gmra.mrb[80].mxu1 %v9791_v53  ;;  %v9798_v52 = vld [vmem:[#allocation3 + $0x140] sm:$0xff]  ;;  %v20399_v53 = vld [vmem:[#allocation3 + $0x1d8] sm:$0xff] }
 0x4a8   : > { %v20378_v36 = vadd.f32 %v16309_v40, %v14524_v16  ;;  %v14527_v27 = vadd.f32 %v14526_v23, %v14525_v2  ;;  %v16331_v14 = vadd.f32 %v20083_v10, %v14393_v44  ;;  %10124 = vmatprep.mubr.bf16.mxu1 %v9795_v39  ;;  %v22094_v40 = vld [vmem:[#allocation10_spill] sm:$0xff] }
 0x4a9   : > { %15719 = vmatmul.mubr.msk.bf16.gmra.mrb[48].mxu0 %vm2365_vm14, %v20381_v4  ;;  %v20395_v44 = vld [vmem:[#allocation3 + $0x1c0] sm:$0xff] }
 0x4aa   : > { %v20387_v34 = vadd.f32 %v16331_v14, %v14527_v27  ;;  %15722 = vmatprep.mubr.msk.bf16.mxu0 %vm2365_vm14, %v20385_v8  ;;  %v14394_v21 = vpop.f32.mrb[232].mxu1 }
 0x4ab   : > { %v14395_v29 = vpop.f32.mrb[233].mxu1 }
 0x4ac   : > { %v14528_v58 = vpop.f32.mrb[168].mxu0  ;;  %v14396_v48 = vadd.f32 %v14395_v29, %v14394_v21  ;;  %v14397_v59 = vpop.f32.mrb[234].mxu1 }
 0x4ad   : > { %v14529_v42 = vpop.f32.mrb[169].mxu0  ;;  %v14398_v10 = vpop.f32.mrb[235].mxu1 }
 0x4ae   : > { %v14530_v46 = vadd.f32 %v14529_v42, %v14528_v58  ;;  %v16364_v15 = vadd.f32 %v22093_v3, %v14396_v48  ;;  %v14531_v24 = vpop.f32.mrb[170].mxu0  ;;  %v14399_v9 = vadd.f32 %v14398_v10, %v14397_v59  ;;  %v22096_v42 = vld [vmem:[#allocation12_spill] sm:$0xff] }
 0x4af   : > { %v14532_v55 = vpop.f32.mrb[171].mxu0  ;;  %10125 = vmatmul.mubr.bf16.gmra.mrb[84].mxu1 %v9794_v12 }
 0x4b0   : > { %v20392_v47 = vadd.f32 %v16364_v15, %v14530_v46  ;;  %v14533_v16 = vadd.f32 %v14532_v55, %v14531_v24  ;;  %v16386_v2 = vadd.f32 %v22094_v40, %v14399_v9  ;;  %10132 = vmatprep.mubr.bf16.mxu1 %v9798_v52  ;;  %v9797_v15 = vld [vmem:[#allocation3 + $0x138] sm:$0xff]  ;;  %v22098_v52 = vld [vmem:[#allocation14_spill] sm:$0xff]  ;;  %v20409_v40 = vld [vmem:[#allocation3 + $0x1f0] sm:$0xff] }
 0x4b1   : > { %15723 = vmatmul.mubr.msk.bf16.gmra.mrb[52].mxu0 %vm2365_vm14, %v20395_v44  ;;  %v9801_v9 = vld [vmem:[#allocation3 + $0x158] sm:$0xff] }
 0x4b2   : > { %v20401_v23 = vadd.f32 %v16386_v2, %v14533_v16  ;;  %15726 = vmatprep.mubr.msk.bf16.mxu0 %vm2365_vm14, %v20399_v53  ;;  %v14400_v39 = vpop.f32.mrb[236].mxu1 }
 0x4b3   : > { %v14401_v27 = vpop.f32.mrb[237].mxu1 }
 0x4b4   : > { %22095 = vst [vmem:[#allocation16_spill] sm:$0xff] %v20401_v23  ;;  %v14534_v14 = vpop.f32.mrb[172].mxu0  ;;  %v14402_v21 = vadd.f32 %v14401_v27, %v14400_v39  ;;  %v14403_v29 = vpop.f32.mrb[238].mxu1 }
 0x4b5   : > { %v14535_v58 = vpop.f32.mrb[173].mxu0  ;;  %v14404_v48 = vpop.f32.mrb[239].mxu1 }
 0x4b6   : > { %v14536_v59 = vadd.f32 %v14535_v58, %v14534_v14  ;;  %v16353_v10 = vadd.f32 %v22096_v42, %v14402_v21  ;;  %v14537_v46 = vpop.f32.mrb[174].mxu0  ;;  %v14405_v3 = vadd.f32 %v14404_v48, %v14403_v29 }
 0x4b7   : > { %v14538_v24 = vpop.f32.mrb[175].mxu0  ;;  %10133 = vmatmul.mubr.bf16.gmra.mrb[88].mxu1 %v9797_v15  ;;  %v20420_v15 = vld [vmem:[#allocation3 + $0x220] sm:$0xff] }
 0x4b8   : > { %v20406_v12 = vadd.f32 %v16353_v10, %v14536_v59  ;;  %v14539_v55 = vadd.f32 %v14538_v24, %v14537_v46  ;;  %v16375_v16 = vadd.f32 %v22098_v52, %v14405_v3  ;;  %10140 = vmatprep.mubr.bf16.mxu1 %v9801_v9  ;;  %v20418_v3 = vld [vmem:[#allocation3 + $0x150] sm:$0xff] }
 0x4b9   : > { %15727 = vmatmul.mubr.msk.bf16.gmra.mrb[56].mxu0 %vm2365_vm14, %v20409_v40  ;;  %22100 = vst [vmem:[#allocation18_spill] sm:$0xff] %v20418_v3 }
 0x4ba   : > { %22097 = vst [vmem:[#allocation11_spill] sm:$0xff] %v20406_v12  ;;  %v20413_v2 = vadd.f32 %v16375_v16, %v14539_v55  ;;  %15730 = vmatprep.mubr.msk.bf16.mxu0 %vm2365_vm14, %v20289_v54  ;;  %v14406_v39 = vpop.f32.mrb[240].mxu1  ;;  %v20423_v54 = vld [vmem:[#allocation3 + $0x170] sm:$0xff] }
 0x4bb   : > { %v14407_v27 = vpop.f32.mrb[241].mxu1  ;;  %22101 = vst [vmem:[#allocation13_spill] sm:$0xff] %v20423_v54 }
 0x4bc   : > { %22099 = vst [vmem:[#allocation17_spill] sm:$0xff] %v20413_v2  ;;  %v14540_v14 = vpop.f32.mrb[176].mxu0  ;;  %v14408_v21 = vadd.f32 %v14407_v27, %v14406_v39  ;;  %v14409_v29 = vpop.f32.mrb[242].mxu1  ;;  %v20435_v39 = vld [vmem:[#allocation2 + $0x188] sm:$0x3f] }
 0x4bd   : > { %v14541_v58 = vpop.f32.mrb[177].mxu0  ;;  %v14410_v48 = vpop.f32.mrb[243].mxu1  ;;  %22104 = vst [vmem:[#allocation20_spill] sm:$0xff] %v20435_v39  ;;  %v4657_v27 = vld [vmem:[#allocation2 + $0x180] sm:$0xc0] }
 0x4be   : > { %v14542_v59 = vadd.f32 %v14541_v58, %v14540_v14  ;;  %v16408_v42 = vadd.f32 %v20129_v41, %v14408_v21  ;;  %v14543_v10 = vpop.f32.mrb[178].mxu0  ;;  %v14411_v46 = vadd.f32 %v14410_v48, %v14409_v29  ;;  %v4784_v21 = vrot.slane %v4657_v27, 6  ;;  %v4814_v58 = vld [vmem:[#allocation2 + $0x188] sm:$0x7f] }
 0x4bf   : > { %v14544_v24 = vpop.f32.mrb[179].mxu0  ;;  %10141 = vmatmul.mubr.bf16.gmra.mrb[92].mxu1 %v20418_v3  ;;  %v4785_v29 = vrot.slane %v20435_v39, 6  ;;  %v20440_v3 = vld [vmem:[#allocation3 + $0x168] sm:$0xff]  ;;  %v17057_v39 = vld [vmem:[#allocation4 + $0x630] sm:$0xff]  }
 0x4c0   : > { %v20425_v9 = vadd.f32 %v16408_v42, %v14542_v59  ;;  %v14545_v55 = vadd.f32 %v14544_v24, %v14543_v10  ;;  %v16430_v52 = vadd.f32 %v20134_v25, %v14411_v46  ;;  %10148 = vmatprep.mubr.bf16.mxu1 %v20423_v54  ;;  %v5226_v25 = vshrl.u32 %v4657_v27, 16 }
 0x4c1   : > { %15731 = vmatmul.mubr.msk.bf16.gmra.mrb[60].mxu0 %vm2365_vm14, %v20420_v15  ;;  %v5229_v10 = vshll.u32 %v4657_v27, 16  ;;  %v5234_v46 = vshrl.u32 %v4814_v58, 16  ;;  %v5237_v24 = vshll.u32 %v4814_v58, 16  ;;  %v20444_v27 = vld [vmem:[#allocation3 + $0x188] sm:$0xff] }
 0x4c2   : > { %22102 = vst [vmem:[#allocation21_spill] sm:$0xff] %v20425_v9  ;;  %v20431_v41 = vadd.f32 %v16430_v52, %v14545_v55  ;;  %15746 = vmatprep.mubr.msk.bf16.mxu0 %vm2365_vm14, %v20314_v62  ;;  %v14412_v16 = vpop.f32.mrb[244].mxu1  ;;  %v4786_v62 = vsel %vm4711_vm2, %v4784_v21, %v4785_v29  ;;  %v17058_v58 = vld [vmem:[#allocation4 + $0x678] sm:$0xff]  }
 0x4c3   : > { %v14413_v14 = vpop.f32.mrb[245].mxu1  ;;  %5307 = vrot.lane.b32.xlu0 %v4786_v62, %s17281_s29  ;;  %v5236_v23 = vrot.slane %v5234_v46, 6  ;;  %v5239_v21 = vrot.slane %v5237_v24, 7  ;;  %v17059_v46 = vld [vmem:[#allocation4 + $0x638] sm:$0xff]   ;;  %v17063_v62 = vld [vmem:[#allocation4 + $0x640] sm:$0xff]  }
 0x4c4   : > { %22103 = vst [vmem:[#allocation19_spill] sm:$0xff] %v20431_v41  ;;  %v14546_v48 = vpop.f32.mrb[180].mxu0  ;;  %v14414_v59 = vadd.f32 %v14413_v14, %v14412_v16  ;;  %v14415_v42 = vpop.f32.mrb[246].mxu1  ;;  %v5228_v41 = vrot.slane %v5226_v25, 6  ;;  %v5231_v16 = vrot.slane %v5229_v10, 7 }
 0x4c5   : > { %v14547_v55 = vpop.f32.mrb[181].mxu0  ;;  %v14416_v52 = vpop.f32.mrb[247].mxu1 }
 0x4c6   : > { %v14548_v9 = vadd.f32 %v14547_v55, %v14546_v48  ;;  %v16397_v2 = vadd.f32 %v20147_v49, %v14414_v59  ;;  %v14549_v12 = vpop.f32.mrb[182].mxu0  ;;  %v14417_v54 = vadd.f32 %v14416_v52, %v14415_v42  ;;  %v5232_v48 = vor.u32 %v5231_v16, %v5228_v41 }
 0x4c7   : > { %v14550_v14 = vpop.f32.mrb[183].mxu0  ;;  %10149 = vmatmul.mubr.bf16.gmra.mrb[96].mxu1 %v20440_v3  ;;  %v5240_v59 = vor.u32 %v5239_v21, %v5236_v23 }
 0x4c8   : > { %v20446_v29 = vadd.f32 %v16397_v2, %v14548_v9  ;;  %v14551_v25 = vadd.f32 %v14550_v14, %v14549_v12  ;;  %v16419_v49 = vadd.f32 %v20151_v43, %v14417_v54  ;;  %10156 = vmatprep.mubr.bf16.mxu1 %v20444_v27  ;;  %v17061_v12 = vld [vmem:[#allocation4 + $0x680] sm:$0xff]   ;;  %v20462_v14 = vld [vmem:[#allocation3 + $0x1a0] sm:$0xff] }
 0x4c9   : > { %15747 = vmatmul.mubr.msk.bf16.vlgmr.msra.gmra.mrb[32].mxu0 %vm2365_vm14, %v20319_v35  ;;  %v5241_v43 = vsel %vm4816_vm4, %v5232_v48, %v5240_v59  ;;  %v17065_v59 = vld [vmem:[#allocation4 + $0x648] sm:$0xff]  }
 0x4ca   : > { %v20452_v42 = vadd.f32 %v16419_v49, %v14551_v25  ;;  %14989 = vmatpush3.bf16.msra.mxu0 %v17057_v39  ;;  %15750 = vmatprep.mubr.msk.bf16.mxu0 %vm2365_vm14, %v20336_v63  ;;  %v14418_v10 = vpop.f32.mrb[248].mxu1  ;;  %v20459_v63 = vld [vmem:[#allocation3 + $0x180] sm:$0xff] }
 0x4cb   : > { %v14419_v2 = vpop.f32.mrb[249].mxu1  ;;  %14990 = vmatprep.subr.bf16.mxu0 %v17058_v58  ;;  %5359 = vrot.lane.b32.xlu1 %v5241_v43, %s17282_s30  ;;  %v17064_v58 = vld [vmem:[#allocation4 + $0x688] sm:$0xff]  }
 0x4cc   : > { %v14552_v54 = vpop.f32.mrb[184].mxu0  ;;  %v14420_v9 = vadd.f32 %v14419_v2, %v14418_v10  ;;  %v14421_v41 = vpop.f32.mrb[250].mxu1 }
 0x4cd   : > { %v14553_v35 = vpop.f32.mrb[185].mxu0  ;;  %v14422_v23 = vpop.f32.mrb[251].mxu1 }
 0x4ce   : > { %v14554_v24 = vadd.f32 %v14553_v35, %v14552_v54  ;;  %v16452_v39 = vadd.f32 %v20160_v13, %v14420_v9  ;;  %v14555_v55 = vpop.f32.mrb[186].mxu0  ;;  %v14423_v52 = vadd.f32 %v14422_v23, %v14421_v41  ;;  %14991 = vmatpush3.bf16.msra.mxu0 %v17059_v46  ;;  %v17067_v46 = vld [vmem:[#allocation4 + $0x690] sm:$0xff]   ;;  %v20475_v23 = vld [vmem:[#allocation3 + $0x198] sm:$0xff] }
 0x4cf   : > { %v14556_v16 = vpop.f32.mrb[187].mxu0  ;;  %10157 = vmatmul.mubr.bf16.gmra.mrb[100].mxu1 %v20459_v63  ;;  %14992 = vmatprep.subr.bf16.mxu0 %v17061_v12 }
 0x4d0   : > { %v20464_v21 = vadd.f32 %v16452_v39, %v14554_v24  ;;  %v14557_v25 = vadd.f32 %v14556_v16, %v14555_v55  ;;  %v16474_v49 = vadd.f32 %v20164_v20, %v14423_v52  ;;  %10164 = vmatprep.mubr.bf16.mxu1 %v20462_v14  ;;  %v20478_v39 = vld [vmem:[#allocation3 + $0x1b8] sm:$0xff]  ;;  %v17070_v55 = vld [vmem:[#allocation4 + $0x698] sm:$0xff]  }
 0x4d1   : > { %15751 = vmatmul.mubr.msk.bf16.gmra.mrb[36].mxu0 %vm2365_vm14, %v20340_v30 }
 0x4d2   : > { %v20470_v13 = vadd.f32 %v16474_v49, %v14557_v25  ;;  %15754 = vmatprep.mubr.msk.bf16.mxu0 %vm2365_vm14, %v20353_v0  ;;  %v14424_v48 = vpop.f32.mrb[252].mxu1  ;;  %14993 = vmatpush3.bf16.msra.mxu0 %v17063_v62  ;;  %v17069_v0 = vld [vmem:[#allocation4 + $0x650] sm:$0xff]   ;;  %v17073_v49 = vld [vmem:[#allocation4 + $0x6a0] sm:$0xff]  }
 0x4d3   : > { %v14425_v10 = vpop.f32.mrb[253].mxu1  ;;  %14994 = vmatprep.subr.bf16.mxu0 %v17064_v58 }
 0x4d4   : > { %v14558_v2 = vpop.f32.mrb[188].mxu0  ;;  %v14426_v12 = vadd.f32 %v14425_v10, %v14424_v48  ;;  %v14427_v43 = vpop.f32.mrb[254].mxu1  ;;  %v2516_v48 = vld [vmem:[#allocation2 + $0x170] sm:$0xf8] }
 0x4d5   : > { %v14559_v20 = vpop.f32.mrb[189].mxu0  ;;  %v14428_v54 = vpop.f32.mrb[255].mxu1 }
 0x4d6   : > { %v14560_v9 = vadd.f32 %v14559_v20, %v14558_v2  ;;  %v16441_v41 = vadd.f32 %v20172_v22, %v14426_v12  ;;  %v14561_v30 = vpop.f32.mrb[190].mxu0  ;;  %v14429_v35 = vadd.f32 %v14428_v54, %v14427_v43  ;;  %14995 = vmatpush3.bf16.msra.mxu0 %v17065_v59  ;;  %v17071_v22 = vld [vmem:[#allocation4 + $0x658] sm:$0xff]   ;;  %v17172_v59 = vld [vmem:[#allocation2 + $0x178] sm:$0xf]  ;;  %v2918_v12 = vshll.u32 %v2516_v48, 16 }
 0x4d7   : > { %v14562_v24 = vpop.f32.mrb[191].mxu0  ;;  %10165 = vmatmul.mubr.bf16.gmra.mrb[104].mxu1 %v20475_v23  ;;  %14996 = vmatprep.subr.bf16.mxu0 %v17067_v46  ;;  %v2923_v10 = vshrl.u32 %v17172_v59, 16  ;;  %v2926_v46 = vshll.u32 %v17172_v59, 16  ;;  %v846_v43 = vld [vmem:[#allocation2 + $0x170] sm:$0xfe] }
 0x4d8   : > { %v20480_v52 = vadd.f32 %v16441_v41, %v14560_v9  ;;  %v14563_v62 = vadd.f32 %v14562_v24, %v14561_v30  ;;  %v16463_v16 = vadd.f32 %v20176_v61, %v14429_v35  ;;  %10172 = vmatprep.mubr.bf16.mxu1 %v20478_v39  ;;  %v2915_v61 = vshrl.u32 %v2516_v48, 16  ;;  %v17173_v20 = vld [vmem:[#allocation2 + $0x178] sm:$0x3]  ;;  %v20493_v48 = vld [vmem:[#allocation3 + $0x1d0] sm:$0xff] }
 0x4d9   : > { %15755 = vmatmul.mubr.msk.bf16.gmra.mrb[40].mxu0 %vm2365_vm14, %v20357_v38  ;;  %v1253_v38 = vshrl.u32 %v17173_v20, 16  ;;  %v1245_v41 = vshrl.u32 %v846_v43, 16  ;;  %v1256_v30 = vshll.u32 %v17173_v20, 16  ;;  %v1248_v24 = vshll.u32 %v846_v43, 16 }
 0x4da   : > { %v20486_v58 = vadd.f32 %v16463_v16, %v14563_v62  ;;  %15758 = vmatprep.mubr.msk.bf16.mxu0 %vm2365_vm14, %v20367_v19  ;;  %v14602_v25 = vpop.f32.mrb[0].mxu1  ;;  %14997 = vmatpush3.bf16.msra.mxu0 %v17069_v0  ;;  %v2925_v19 = vrot.slane %v2923_v10, 3  ;;  %v20490_v62 = vld [vmem:[#allocation3 + $0x1b0] sm:$0xff]  ;;  %v2917_v59 = vrot.slane %v2915_v61, 3 }
 0x4db   : > { %v14603_v2 = vpop.f32.mrb[1].mxu1  ;;  %14998 = vmatprep.subr.bf16.mxu0 %v17070_v55  ;;  %v17075_v16 = vld [vmem:[#allocation4 + $0x660] sm:$0xff]   ;;  %v2928_v55 = vrot.slane %v2926_v46, 4  ;;  %v1247_v10 = vrot.slane %v1245_v41, 1  ;;  %v1250_v43 = vrot.slane %v1248_v24, 2  ;;  %v17077_v46 = vld [vmem:[#allocation4 + $0x668] sm:$0xff]  }
 0x4dc   : > { %22105 = vst [vmem:[#allocation22_spill] sm:$0xff] %v20486_v58  ;;  %v14604_v54 = vadd.f32 %v14603_v2, %v14602_v25  ;;  %v14605_v9 = vpop.f32.mrb[2].mxu1  ;;  %v2920_v58 = vrot.slane %v2918_v12, 4  ;;  %v17076_v25 = vld [vmem:[#allocation4 + $0x6a8] sm:$0xff]   ;;  %v1255_v2 = vrot.slane %v1253_v38, 1 }
 0x4dd   : > { %v14606_v35 = vpop.f32.mrb[3].mxu1 }
 0x4de   : > { %v14607_v0 = vadd.f32 %v14606_v35, %v14605_v9  ;;  %14999 = vmatpush3.bf16.msra.mxu0 %v17071_v22  ;;  %v20496_v20 = vadd.f32 %v20188_v60, %v14604_v54  ;;  %v1258_v9 = vrot.slane %v1256_v30, 2  ;;  %v2921_v61 = vor.u32 %v2920_v58, %v2917_v59  ;;  %v3795_v12 = vpop.permute.xlu0 %3794  ;;  %v20506_v54 = vld [vmem:[#allocation4 + $0x6b0] sm:$0xff]  }
 0x4df   : > { %10173 = vmatmul.mubr.bf16.gmra.mrb[108].mxu1 %v20490_v62  ;;  %15000 = vmatprep.subr.bf16.mxu0 %v17073_v49  ;;  %v2929_v60 = vor.u32 %v2928_v55, %v2925_v19  ;;  %v20515_v19 = vld [vmem:[#allocation3 + $0x1e8] sm:$0xff] }
 0x4e0   : > { %10180 = vmatprep.mubr.bf16.mxu1 %v20493_v48  ;;  %v20500_v22 = vadd.f32 %v20193_v45, %v14607_v0  ;;  %v1251_v45 = vor.u32 %v1250_v43, %v1247_v10  ;;  %v1259_v35 = vor.u32 %v1258_v9, %v1255_v2  ;;  %v2518_v10 = vld [vmem:[#allocation2 + $0x180] sm:$0xf8] }
 0x4e1   : > { %15759 = vmatmul.mubr.msk.bf16.gmra.mrb[44].mxu0 %vm2365_vm14, %v20371_v18  ;;  %v20508_v18 = vld [vmem:[#allocation3 + $0x1c8] sm:$0xff] }
 0x4e2   : > { %15762 = vmatprep.mubr.msk.bf16.mxu0 %vm2365_vm14, %v20381_v4  ;;  %v14608_v49 = vpop.f32.mrb[4].mxu1  ;;  %15001 = vmatpush3.bf16.msra.mxu0 %v17075_v16  ;;  %v2930_v4 = vsel %vm2522_vm15, %v2921_v61, %v2929_v60  ;;  %v2125_v16 = vpop.permute.xlu1 %2124  ;;  %v1260_v59 = vsel %vm852_vm1, %v1251_v45, %v1259_v35  ;;  %v17175_v45 = vld [vmem:[#allocation2 + $0x188] sm:$0x3] }
 0x4e3   : > { %v14609_v38 = vpop.f32.mrb[5].mxu1  ;;  %15002 = vmatprep.subr.bf16.mxu0 %v17076_v25  ;;  %v2305_v9 = vsel %vm647_vm0, %v1260_v59, %v2125_v16  ;;  %v1270_v35 = vshrl.u32 %v17175_v45, 16  ;;  %v20536_v59 = vld [vmem:[#allocation2 + $0x198] sm:$0xf] }
 0x4e4   : > { %v14610_v41 = vadd.f32 %v14609_v38, %v14608_v49  ;;  %v14611_v30 = vpop.f32.mrb[6].mxu1  ;;  %22110 = vst [vmem:[#allocation27_spill] sm:$0xff] %v20536_v59 }
 0x4e5   : > { %v14612_v24 = vpop.f32.mrb[7].mxu1 }
 0x4e6   : > { %v14613_v0 = vadd.f32 %v14612_v24, %v14611_v30  ;;  %15003 = vmatpush3.bf16.msra.mxu0 %v17077_v46  ;;  %v20512_v58 = vadd.f32 %v20200_v57, %v14610_v41  ;;  %v3847_v55 = vpop.permute.xlu0 %3846  ;;  %v3975_v57 = vsel %vm647_vm0, %v2930_v4, %v3795_v12  ;;  %v2932_v12 = vshrl.u32 %v2518_v10, 16  ;;  %v848_v4 = vld [vmem:[#allocation2 + $0x180] sm:$0xfe] }
 0x4e7   : > { %10181 = vmatmul.mubr.bf16.gmra.mrb[112].mxu1 %v20508_v18  ;;  %15778 = vmatprep.subr.bf16.mxu0 %v20506_v54  ;;  %v4029_v61 = vsel %vm2312_vm13, %v3975_v57, %v3847_v55  ;;  %v2990_v55 = vld [vmem:[#allocation2 + $0x190] sm:$0xf0]  ;;  %v20539_v57 = vld [vmem:[#allocation3 + $0x200] sm:$0xff] }
 0x4e8   : > { %22106 = vst [vmem:[#allocation25_spill] sm:$0xff] %v20512_v58  ;;  %10188 = vmatprep.mubr.bf16.mxu1 %v20515_v19  ;;  %v20521_v25 = vadd.f32 %v20207_v7, %v14613_v0  ;;  %v17174_v7 = vld [vmem:[#allocation2 + $0x188] sm:$0xf]  ;;  %22111 = vst [vmem:[#allocation28_spill] sm:$0xff] %v20539_v57 }
 0x4e9   : > { %15763 = vmatmul.mubr.msk.bf16.gmra.mrb[48].mxu0 %vm2365_vm14, %v20385_v8  ;;  %v2940_v38 = vshrl.u32 %v17174_v7, 16  ;;  %v2943_v41 = vshll.u32 %v17174_v7, 16  ;;  %v20530_v8 = vld [vmem:[#allocation3 + $0x1e0] sm:$0xff]  ;;  %v3119_v7 = vrot.slane %v2990_v55, 4 }
 0x4ea   : > { %22107 = vst [vmem:[#allocation23_spill] sm:$0xff] %v20521_v25  ;;  %15766 = vmatprep.mubr.msk.bf16.mxu0 %vm2365_vm14, %v20395_v44  ;;  %v14614_v2 = vpop.f32.mrb[8].mxu1  ;;  %v2177_v60 = vpop.permute.xlu1 %2176  ;;  %22108 = vst [vmem:[#allocation24_spill] sm:$0xff] %v20530_v8 }
 0x4eb   : > { %v14615_v43 = vpop.f32.mrb[9].mxu1  ;;  %v2360_v24 = vsel %vm2312_vm13, %v2305_v9, %v2177_v60  ;;  %v20547_v9 = vrot.slane %v2940_v38, 3  ;;  %v1273_v60 = vshll.u32 %v17175_v45, 16  ;;  %v3575_v45 = vshrl.u32 %v2990_v55, 16 }
 0x4ec   : > { %v14616_v49 = vadd.f32 %v14615_v43, %v14614_v2  ;;  %v14617_v46 = vpop.f32.mrb[10].mxu1  ;;  %v2935_v43 = vshll.u32 %v2518_v10, 16 }
 0x4ed   : > { %v14618_v30 = vpop.f32.mrb[11].mxu1  ;;  %v3899_v0 = vpop.permute.xlu0 %3898 }
 0x4ee   : > { %v14619_v44 = vadd.f32 %v14618_v30, %v14617_v46  ;;  %v20534_v16 = vadd.f32 %v20225_v28, %v14616_v49  ;;  %v20542_v2 = vsel %vm2365_vm14, %v4029_v61, %v3899_v0  ;;  %v3120_v46 = vrot.slane %v20536_v59, 4  ;;  %v2229_v28 = vpop.permute.xlu1 %2228 }
 0x4ef   : > { %10189 = vmatmul.mubr.bf16.gmra.mrb[116].mxu1 %v20530_v8  ;;  %22112 = vst [vmem:[#allocation29_spill] sm:$0xff] %v20542_v2  ;;  %4135 = vst [vmem:[#allocation3 + $0x230] sm:$0xff] %v20542_v2  ;;  %v20549_v49 = vrot.slane %v2943_v41, 4  ;;  %v20557_v10 = vsel %vm2365_vm14, %v2360_v24, %v2229_v28  ;;  %v1262_v61 = vshrl.u32 %v848_v4, 16  ;;  %v1265_v0 = vshll.u32 %v848_v4, 16 }
 0x4f0   : > { %22109 = vst [vmem:[#allocation26_spill] sm:$0xff] %v20534_v16  ;;  %10196 = vmatprep.mubr.bf16.mxu1 %v20539_v57  ;;  %v20552_v30 = vadd.f32 %v20233_v32, %v14619_v44  ;;  %22114 = vst [vmem:[#allocation31_spill] sm:$0xff] %v20557_v10  ;;  %v3121_v16 = vsel %vm3043_vm3, %v3119_v7, %v3120_v46  ;;  %v20563_v41 = vrot.slane %v2932_v12, 3  ;;  %v3147_v32 = vld [vmem:[#allocation2 + $0x198] sm:$0x1f]  ;;  %v20566_v24 = vrot.slane %v2935_v43, 4 }
 0x4f1   : > { %15767 = vmatmul.mubr.msk.bf16.gmra.mrb[52].mxu0 %vm2365_vm14, %v20399_v53  ;;  %2467 = vst [vmem:[#allocation3 + $0x228] sm:$0xff] %v20557_v10  ;;  %3798 = vrot.lane.b32.xlu0 %v3121_v16, %s17281_s29  ;;  %v3578_v53 = vshll.u32 %v2990_v55, 16  ;;  %v20568_v28 = vrot.slane %v1270_v35, 1  ;;  %v3583_v4 = vshrl.u32 %v3147_v32, 16  ;;  %v3586_v7 = vshll.u32 %v3147_v32, 16  ;;  %v20570_v12 = vld [vmem:[#allocation3 + $0x1f8] sm:$0xff] }
 0x4f2   : > { %22113 = vst [vmem:[#allocation30_spill] sm:$0xff] %v20552_v30  ;;  %15770 = vmatprep.mubr.msk.bf16.mxu0 %vm2365_vm14, %v20409_v40  ;;  %v14620_v38 = vpop.f32.mrb[12].mxu1  ;;  %v1275_v40 = vrot.slane %v1273_v60, 2  ;;  %v3577_v30 = vrot.slane %v3575_v45, 4  ;;  %v1264_v58 = vrot.slane %v1262_v61, 1  ;;  %v1267_v16 = vrot.slane %v1265_v0, 2 }
 0x4f3   : > { %v14621_v44 = vpop.f32.mrb[13].mxu1  ;;  %v3580_v25 = vrot.slane %v3578_v53, 5  ;;  %v3585_v59 = vrot.slane %v3583_v4, 4  ;;  %v3588_v57 = vrot.slane %v3586_v7, 5  ;;  %v2946_v43 = vor.u32 %v20549_v49, %v20547_v9  ;;  %v1320_v60 = vld [vmem:[#allocation2 + $0x190] sm:$0xfc] }
 0x4f4   : > { %v14622_v46 = vadd.f32 %v14621_v44, %v14620_v38  ;;  %v14623_v2 = vpop.f32.mrb[14].mxu1  ;;  %v20577_v38 = vld [vmem:[#allocation2 + $0x198] sm:$0x3]  ;;  %v3616_v45 = vld [vmem:[#allocation2 + $0x190] sm:$0xe0]  ;;  %v1449_v44 = vrot.slane %v1320_v60, 2 }
 0x4f5   : > { %v14624_v10 = vpop.f32.mrb[15].mxu1  ;;  %v3581_v35 = vor.u32 %v3580_v25, %v3577_v30  ;;  %v3589_v53 = vor.u32 %v3588_v57, %v3585_v59  ;;  %v1450_v61 = vrot.slane %v20577_v38, 2  ;;  %v3745_v0 = vrot.slane %v3616_v45, 5  ;;  %v10447_v4 = vld [vmem:[#allocation3 + $0x208] sm:$0xff]  ;;  %v3797_v30 = vpop.permute.xlu0 %3796 }
 0x4f6   : > { %v14625_v55 = vadd.f32 %v14624_v10, %v14623_v2  ;;  %v20575_v8 = vadd.f32 %v20253_v5, %v14622_v46  ;;  %v17176_v2 = vld [vmem:[#allocation3 + $0x218] sm:$0xff]  ;;  %v2938_v25 = vor.u32 %v20566_v24, %v20563_v41  ;;  %v1276_v5 = vor.u32 %v1275_v40, %v20568_v28  ;;  %v2127_v28 = vpop.permute.xlu1 %2126 }
 0x4f7   : > { %10197 = vmatmul.mubr.bf16.gmra.mrb[120].mxu1 %v20570_v12  ;;  %v3746_v9 = vrot.slane %v3147_v32, 5  ;;  %v3590_v59 = vsel %vm3148_vm6, %v3581_v35, %v3589_v53  ;;  %v1451_v57 = vsel %vm1373_vm5, %v1449_v44, %v1450_v61  ;;  %v1477_v10 = vld [vmem:[#allocation2 + $0x198] sm:$0x7]  ;;  %v1905_v7 = vshrl.u32 %v1320_v60, 16 }
 0x4f8   : > { %10204 = vmatprep.mubr.bf16.mxu1 %v17176_v2  ;;  %v20585_v49 = vadd.f32 %v20265_v6, %v14625_v55  ;;  %v1908_v46 = vshll.u32 %v1320_v60, 16  ;;  %v1268_v24 = vor.u32 %v1267_v16, %v1264_v58  ;;  %3850 = vrot.lane.b32.xlu0 %v3590_v59, %s17282_s30  ;;  %v1913_v32 = vshrl.u32 %v1477_v10, 16  ;;  %v1946_v55 = vld [vmem:[#allocation2 + $0x190] sm:$0xf8] }
 0x4f9   : > { %15771 = vmatmul.mubr.msk.bf16.gmra.mrb[56].mxu0 %vm2365_vm14, %v10447_v4  ;;  %v3747_v6 = vsel %vm3669_vm8, %v3745_v0, %v3746_v9  ;;  %v1916_v40 = vshll.u32 %v1477_v10, 16  ;;  %2128 = vrot.lane.b32.xlu1 %v1451_v57, %s17281_s29  ;;  %v1907_v35 = vrot.slane %v1905_v7, 2  ;;  %v2075_v44 = vrot.slane %v1946_v55, 3  ;;  %v20601_v7 = vld [vmem:[#allocation2 + $0x198] sm:$0x3f] }
 0x4fa   : > { %22115 = vst [vmem:[#allocation33_spill] sm:$0xff] %v20585_v49  ;;  %15774 = vmatprep.mubr.msk.bf16.mxu0 %vm2365_vm14, %v20420_v15  ;;  %v14626_v41 = vpop.f32.mrb[16].mxu1  ;;  %v1910_v53 = vrot.slane %v1908_v46, 3  ;;  %v2076_v60 = vrot.slane %v1477_v10, 3  ;;  %v1915_v15 = vrot.slane %v1913_v32, 2  ;;  %v2947_v16 = vsel %vm2522_vm15, %v2938_v25, %v2946_v43  ;;  %v17177_v46 = vld [vmem:[#allocation3 + $0x210] sm:$0xff]  ;;  %v3849_v32 = vpop.permute.xlu0 %3848 }
 0x4fb   : > { %v14627_v45 = vpop.f32.mrb[17].mxu1  ;;  %v1918_v2 = vrot.slane %v1916_v40, 3  ;;  %v1277_v0 = vsel %vm852_vm1, %v1268_v24, %v1276_v5  ;;  %v4658_v10 = vld [vmem:[#allocation2 + $0x190] sm:$0xc0]  ;;  %v4788_v25 = vrot.slane %v20601_v7, 6  ;;  %v10453_v55 = vld [vmem:[#allocation3 + $0x238] sm:$0xff]  ;;  %v3978_v5 = vsel %vm647_vm0, %v2947_v16, %v3797_v30 }
 0x4fc   : > { %v14628_v61 = vadd.f32 %v14627_v45, %v14626_v41  ;;  %v14629_v4 = vpop.f32.mrb[18].mxu1  ;;  %v1911_v59 = vor.u32 %v1910_v53, %v1907_v35  ;;  %3902 = vrot.lane.b32.xlu0 %v3747_v6, %s17283_s12  ;;  %v10407_v41 = vld [vmem:[#allocation3 + $0xc8] sm:$0xff]  ;;  %v2077_v40 = vsel %vm1999_vm9, %v2075_v44, %v2076_v60  ;;  %v4787_v43 = vrot.slane %v4658_v10, 6  ;;  %v11034_v45 = vld [vmem:[#allocation3 + $0xe0] sm:$0xff]  ;;  %v4815_v53 = vld [vmem:[#allocation2 + $0x198] sm:$0x7f] }
 0x4fd   : > { %v14630_v58 = vpop.f32.mrb[19].mxu1  ;;  %v1919_v9 = vor.u32 %v1918_v2, %v1915_v15  ;;  %v2179_v24 = vpop.permute.xlu1 %2178  ;;  %v2308_v35 = vsel %vm647_vm0, %v1277_v0, %v2127_v28  ;;  %v5243_v44 = vshrl.u32 %v4658_v10, 16  ;;  %v5246_v60 = vshll.u32 %v4658_v10, 16 }
 0x4fe   : > { %v14631_v49 = vadd.f32 %v14630_v58, %v14629_v4  ;;  %v20599_v57 = vadd.f32 %v20286_v56, %v14628_v61  ;;  %v4789_v30 = vsel %vm4711_vm2, %v4787_v43, %v4788_v25  ;;  %v5251_v4 = vshrl.u32 %v4815_v53, 16  ;;  %v10406_v25 = vld [vmem:[#allocation3 + $0xc0] sm:$0xff] }
 0x4ff   : > { %10205 = vmatmul.mubr.bf16.gmra.mrb[124].mxu1 %v17177_v46  ;;  %v1920_v56 = vsel %vm1478_vm7, %v1911_v59, %v1919_v9  ;;  %v5254_v15 = vshll.u32 %v4815_v53, 16  ;;  %v5245_v2 = vrot.slane %v5243_v44, 6  ;;  %v5248_v58 = vrot.slane %v5246_v60, 7  ;;  %v17080_v59 = vld [vmem:[#allocation4 + $0x6e0] sm:$0xff]   ;;  %v11033_v44 = vld [vmem:[#allocation3 + $0xd8] sm:$0xff] }
 0x500   : > { %10711 = vmatprep.mubr.bf16.mxu1 %v10407_v41  ;;  %v20608_v6 = vadd.f32 %v20300_v51, %v14631_v49  ;;  %2180 = vrot.lane.b32.xlu1 %v1920_v56, %s17282_s30  ;;  %v4031_v49 = vsel %vm2312_vm13, %v3978_v5, %v3849_v32  ;;  %v2362_v0 = vsel %vm2312_vm13, %v2308_v35, %v2179_v24  ;;  %v5253_v9 = vrot.slane %v5251_v4, 6  ;;  %v17081_v41 = vld [vmem:[#allocation4 + $0x728] sm:$0xff]   ;;  %v17083_v24 = vld [vmem:[#allocation4 + $0x6b8] sm:$0xff]   ;;  %v17084_v4 = vld [vmem:[#allocation4 + $0x730] sm:$0xff]  }
 0x501   : > { %15775 = vmatmul.mubr.msk.bf16.gmra.mrb[60].mxu0 %vm2365_vm14, %v10453_v55  ;;  %2232 = vrot.lane.b32.xlu0 %v2077_v40, %s17283_s12  ;;  %v5256_v10 = vrot.slane %v5254_v15, 7  ;;  %v3901_v55 = vpop.permute.xlu0 %3900  ;;  %v5249_v40 = vor.u32 %v5248_v58, %v5245_v2  ;;  %v17082_v60 = vld [vmem:[#allocation4 + $0x6e8] sm:$0xff]   ;;  %vm17285_vm2 = vmmov 0  }
 0x502   : > { %11338 = vmatprep.mubr.bf16.mxu0 %v11034_v45  ;;  %v14632_v61 = vpop.f32.mrb[20].mxu1  ;;  %v20619_v56 = vsel %vm2365_vm14, %v4031_v49, %v3901_v55 }
 0x503   : > { %v14633_v51 = vpop.f32.mrb[21].mxu1  ;;  %v5257_v5 = vor.u32 %v5256_v10, %v5253_v9  ;;  %4136 = vst [vmem:[#allocation3 + $0x248] sm:$0xff] %v20619_v56  ;;  %v17088_v9 = vld [vmem:[#allocation4 + $0x6f8] sm:$0xff]  }
 0x504   : > { %v14634_v16 = vadd.f32 %v14633_v51, %v14632_v61  ;;  %v14635_v28 = vpop.f32.mrb[22].mxu1  ;;  %5309 = vrot.lane.b32.xlu1 %v4789_v30, %s17281_s29  ;;  %s13764_s29 = sshll.u32 %s17366_s17, 12  ;;  %s21878_s17 = scalar_lea.sflag [#allocation6], %s365_s20 }
 0x505   : > { %v14636_v46 = vpop.f32.mrb[23].mxu1  ;;  %v2231_v32 = vpop.permute.xlu1 %2230  ;;  %v5258_v61 = vsel %vm4816_vm4, %v5249_v40, %v5257_v5  ;;  %v17094_v40 = vld [vmem:[#allocation4 + $0x6d0] sm:$0xff]   ;;  %s21868_s25 = scalar_lea.hbm %s21929_s10, %s13764_s29 }
 0x506   : > { %v14637_v43 = vadd.f32 %v14636_v46, %v14635_v28  ;;  %v20622_v53 = vadd.f32 %v20311_v33, %v14634_v16  ;;  %v20626_v35 = vsel %vm2365_vm14, %v2362_v0, %v2231_v32  ;;  %v20633_v33 = vld [vmem:[#allocation3 + $0xf8] sm:$0xff]  ;;  %v17087_v16 = vld [vmem:[#allocation4 + $0x738] sm:$0xff]   ;;  %v20641_v0 = vld [vmem:[#allocation3 + $0xf0] sm:$0xff] }
 0x507   : > { %10712 = vmatmul.mubr.bf16.vlgmr.msra.gmra.mrb[128].mxu1 %v10406_v25  ;;  %2468 = vst [vmem:[#allocation3 + $0x240] sm:$0xff] %v20626_v35  ;;  %v20648_v46 = vld [vmem:[#allocation3 + $0x110] sm:$0xff] }
 0x508   : > { %15123 = vmatpush3.bf16.msra.mxu1 %v17080_v59  ;;  %10719 = vmatprep.mubr.bf16.mxu1 %v11034_v45  ;;  %v20631_v30 = vadd.f32 %v20322_v11, %v14637_v43  ;;  %v17086_v45 = vld [vmem:[#allocation4 + $0x6c0] sm:$0xff]   ;;  %v17085_v11 = vld [vmem:[#allocation4 + $0x6f0] sm:$0xff]  }
 0x509   : > { %11339 = vmatmul.mubr.bf16.vlgmr.msra.gmra.mrb[192].mxu0 %v11033_v44  ;;  %15124 = vmatprep.subr.bf16.mxu1 %v17081_v41  ;;  %v17090_v41 = vld [vmem:[#allocation4 + $0x740] sm:$0xff]  }
 0x50a   : > { %15779 = vmatpush3.bf16.msra.mxu0 %v20506_v54  ;;  %11346 = vmatprep.mubr.bf16.mxu0 %v20633_v33  ;;  %v14638_v15 = vpop.f32.mrb[24].mxu1  ;;  %v17089_v54 = vld [vmem:[#allocation4 + $0x6c8] sm:$0xff]   ;;  %v17091_v32 = vld [vmem:[#allocation4 + $0x700] sm:$0xff]  }
 0x50b   : > { %v14639_v51 = vpop.f32.mrb[25].mxu1  ;;  %15780 = vmatprep.subr.bf16.mxu0 %v17083_v24  ;;  %5361 = vrot.lane.b32.xlu1 %v5258_v61, %s17282_s30  ;;  %v20655_v61 = vld [vmem:[#allocation3 + $0x108] sm:$0xff]  ;;  %s13235_s30 = sshll.u32 %s21801_s26, 4  ;;  %s21870_s30 = int_to_ptr.vmem [resolvable:$true] %s13235_s30 }
 0x50c   : > { %v14640_v49 = vadd.f32 %v14639_v51, %v14638_v15  ;;  %v14641_v2 = vpop.f32.mrb[26].mxu1  ;;  %15125 = vmatpush3.bf16.msra.mxu1 %v17082_v60  ;;  %v17097_v60 = vld [vmem:[#allocation4 + $0x6d8] sm:$0xff]   ;;  %s17209_s27 = scalar_lea.vmem %s21870_s30, 4096  ;;  %p17216_p2 = scmp.lt.s32.totalorder %s21870_s30, %s17214_s11 }
 0x50d   : > { %v14642_v58 = vpop.f32.mrb[27].mxu1  ;;  %15126 = vmatprep.subr.bf16.mxu1 %v17084_v4  ;;  %v17093_v4 = vld [vmem:[#allocation4 + $0x708] sm:$0xff]   ;;  %v20662_v51 = vld [vmem:[#allocation3 + $0x128] sm:$0xff]  ;;  %p17210_p6 = scmp.ne.s32.totalorder %s21870_s30, %s17209_s27  ;;  %p17217_p3 = scmp.lt.s32.totalorder %s17215_s21, %s17209_s27 }
 0x50e   : > { %v14643_v28 = vadd.f32 %v14642_v58, %v14641_v2  ;;  %15781 = vmatpush3.bf16.msra.mxu0 %v17083_v24  ;;  %v20639_v59 = vadd.f32 %v20333_v1, %v14640_v49  ;;  %v20665_v2 = vld [vmem:[#allocation4 + $0x760] sm:$0xff]  }
 0x50f   : > { %10720 = vmatmul.mubr.bf16.gmra.mrb[132].mxu1 %v11033_v44  ;;  %15782 = vmatprep.subr.bf16.mxu0 %v17086_v45  ;;  %p17211_p10 = pnand %p17210_p6, %p22159_p9  ;;  %p17218_p4 = por %p17217_p3, %p17216_p2 }
 0x510   : > { %10727 = vmatprep.mubr.bf16.mxu1 %v20633_v33  ;;  %15127 = vmatpush3.bf16.msra.mxu1 %v17085_v11  ;;  %v20645_v10 = vadd.f32 %v20343_v31, %v14643_v28  ;;  %v17092_v31 = vld [vmem:[#allocation4 + $0x748] sm:$0xff]   ;;  %v17098_v28 = vld [vmem:[#allocation4 + $0x758] sm:$0xff]  }
 0x511   : > { %11347 = vmatmul.mubr.bf16.gmra.mrb[196].mxu0 %v20641_v0  ;;  %15128 = vmatprep.subr.bf16.mxu1 %v17087_v16  ;;  %v17096_v16 = vld [vmem:[#allocation4 + $0x710] sm:$0xff]   ;;  %p17212_p12 = pneg %p17211_p10 }
 0x512   : > { %11354 = vmatprep.mubr.bf16.mxu0 %v20648_v46  ;;  %v14644_v1 = vpop.f32.mrb[28].mxu1  ;;  %15783 = vmatpush3.bf16.msra.mxu0 %v17086_v45 }
 0x513   : > { %v14645_v55 = vpop.f32.mrb[29].mxu1  ;;  %15784 = vmatprep.subr.bf16.mxu0 %v17089_v54  ;;  %p17219_p7 = pnand %p17218_p4, %p17212_p12 }
 0x514   : > { %v14646_v43 = vadd.f32 %v14645_v55, %v14644_v1  ;;  %v14647_v25 = vpop.f32.mrb[30].mxu1  ;;  %15129 = vmatpush3.bf16.msra.mxu1 %v17088_v9  ;;  %v17099_v1 = vld [vmem:[#allocation4 + $0x718] sm:$0xff]  }
 0x515   : > { %v14648_v5 = vpop.f32.mrb[31].mxu1  ;;  %15130 = vmatprep.subr.bf16.mxu1 %v17090_v41  ;;  %v20672_v41 = vld [vmem:[#allocation3 + $0x120] sm:$0xff] }
 0x516   : > { %v14649_v24 = vadd.f32 %v14648_v5, %v14647_v25  ;;  %15785 = vmatpush3.bf16.msra.mxu0 %v17089_v54  ;;  %v20652_v44 = vadd.f32 %v20350_v17, %v14646_v43  ;;  %v17095_v17 = vld [vmem:[#allocation4 + $0x750] sm:$0xff]  }
 0x517   : > { %10728 = vmatmul.mubr.bf16.gmra.mrb[136].mxu1 %v20641_v0  ;;  %15786 = vmatprep.subr.bf16.mxu0 %v17094_v40 }
 0x518   : > { %10735 = vmatprep.mubr.bf16.mxu1 %v20648_v46  ;;  %15131 = vmatpush3.bf16.msra.mxu1 %v17091_v32  ;;  %v20659_v15 = vadd.f32 %v20359_v26, %v14649_v24 }
 0x519   : > { %11355 = vmatmul.mubr.bf16.gmra.mrb[200].mxu0 %v20655_v61  ;;  %15132 = vmatprep.subr.bf16.mxu1 %v17092_v31 }
 0x51a   : > { %11362 = vmatprep.mubr.bf16.mxu0 %v20662_v51  ;;  %v14650_v45 = vpop.f32.mrb[32].mxu1  ;;  %15787 = vmatpush3.bf16.msra.mxu0 %v17094_v40  ;;  %v20679_v40 = vld [vmem:[#allocation3 + $0x140] sm:$0xff] }
 0x51b   : > { %v14651_v49 = vpop.f32.mrb[33].mxu1  ;;  %15788 = vmatprep.subr.bf16.mxu0 %v17097_v60 }
 0x51c   : > { %v14652_v11 = vadd.f32 %v14651_v49, %v14650_v45  ;;  %v14653_v58 = vpop.f32.mrb[34].mxu1  ;;  %15133 = vmatpush3.bf16.msra.mxu1 %v17093_v4  ;;  %v20693_v4 = vld [vmem:[#allocation3 + $0x158] sm:$0xff] }
 0x51d   : > { %v14654_v26 = vpop.f32.mrb[35].mxu1  ;;  %15134 = vmatprep.subr.bf16.mxu1 %v17095_v17 }
 0x51e   : > { %v14655_v54 = vadd.f32 %v14654_v26, %v14653_v58  ;;  %15789 = vmatpush3.bf16.msra.mxu0 %v17097_v60  ;;  %v20668_v9 = vadd.f32 %v20364_v37, %v14652_v11  ;;  %v20689_v60 = vld [vmem:[#allocation3 + $0x138] sm:$0xff] }
 0x51f   : > { %10736 = vmatmul.mubr.bf16.gmra.mrb[140].mxu1 %v20655_v61  ;;  %15822 = vmatprep.subr.bf16.mxu0 %v20665_v2 }
 0x520   : > { %10743 = vmatprep.mubr.bf16.mxu1 %v20662_v51  ;;  %15135 = vmatpush3.bf16.msra.mxu1 %v17096_v16  ;;  %v20676_v55 = vadd.f32 %v20373_v50, %v14655_v54  ;;  %v22118_v16 = vld [vmem:[#allocation16_spill] sm:$0xff]  ;;  %v22121_v54 = vld [vmem:[#allocation13_spill] sm:$0xff] }
 0x521   : > { %11363 = vmatmul.mubr.bf16.gmra.mrb[204].mxu0 %v20672_v41  ;;  %15136 = vmatprep.subr.bf16.mxu1 %v17098_v28  ;;  %v22120_v28 = vld [vmem:[#allocation18_spill] sm:$0xff] }
 0x522   : > { %11370 = vmatprep.mubr.bf16.mxu0 %v20679_v40  ;;  %v14656_v37 = vpop.f32.mrb[36].mxu1 }
 0x523   : > { %v14657_v43 = vpop.f32.mrb[37].mxu1 }
 0x524   : > { %v14658_v25 = vadd.f32 %v14657_v43, %v14656_v37  ;;  %v14659_v32 = vpop.f32.mrb[38].mxu1  ;;  %15137 = vmatpush3.bf16.msra.mxu1 %v17099_v1 }
 0x525   : > { %v14660_v5 = vpop.f32.mrb[39].mxu1 }
 0x526   : > { %v14661_v31 = vadd.f32 %v14660_v5, %v14659_v32  ;;  %v20683_v24 = vadd.f32 %v20378_v36, %v14658_v25  ;;  %v22122_v5 = vld [vmem:[#allocation11_spill] sm:$0xff] }
 0x527   : > { %10744 = vmatmul.mubr.bf16.gmra.mrb[144].mxu1 %v20672_v41 }
 0x528   : > { %v20687_v50 = vadd.f32 %v20387_v34, %v14661_v31  ;;  %10751 = vmatprep.mubr.bf16.mxu1 %v20679_v40 }
 0x529   : > { %11371 = vmatmul.mubr.bf16.gmra.mrb[208].mxu0 %v20689_v60 }
 0x52a   : > { %22116 = vst [vmem:[#allocation34_spill] sm:$0xff] %v20687_v50  ;;  %11378 = vmatprep.mubr.bf16.mxu0 %v20693_v4  ;;  %v14662_v17 = vpop.f32.mrb[40].mxu1 }
 0x52b   : > { %v14663_v45 = vpop.f32.mrb[41].mxu1 }
 0x52c   : > { %v14664_v49 = vadd.f32 %v14663_v45, %v14662_v17  ;;  %v14665_v36 = vpop.f32.mrb[42].mxu1  ;;  %v20709_v17 = vld [vmem:[#allocation3 + $0x150] sm:$0xff]  ;;  %v4186_v45 = vld [vmem:[#allocation2 + $0x180] sm:$0xe0] }
 0x52d   : > { %v14666_v11 = vpop.f32.mrb[43].mxu1  ;;  %22124 = vst [vmem:[#allocation12_spill] sm:$0xff] %v20709_v17 }
 0x52e   : > { %v20697_v58 = vadd.f32 %v20392_v47, %v14664_v49  ;;  %v14667_v34 = vadd.f32 %v14666_v11, %v14665_v36  ;;  %v22125_v49 = vld [vmem:[#allocation20_spill] sm:$0xff] }
 0x52f   : > { %10752 = vmatmul.mubr.bf16.gmra.mrb[148].mxu1 %v20689_v60  ;;  %v4608_v36 = vshrl.u32 %v22125_v49, 16  ;;  %v4611_v11 = vshll.u32 %v22125_v49, 16 }
 0x530   : > { %22117 = vst [vmem:[#allocation32_spill] sm:$0xff] %v20697_v58  ;;  %v20701_v26 = vadd.f32 %v22118_v16, %v14667_v34  ;;  %10759 = vmatprep.mubr.bf16.mxu1 %v20693_v4  ;;  %v20714_v34 = vld [vmem:[#allocation3 + $0x170] sm:$0xff]  ;;  %v4600_v16 = vshrl.u32 %v4186_v45, 16 }
 0x531   : > { %11379 = vmatmul.mubr.bf16.gmra.mrb[212].mxu0 %v22120_v28  ;;  %v4603_v28 = vshll.u32 %v4186_v45, 16 }
 0x532   : > { %22119 = vst [vmem:[#allocation15_spill] sm:$0xff] %v20701_v26  ;;  %11386 = vmatprep.mubr.bf16.mxu0 %v22121_v54  ;;  %v14668_v1 = vpop.f32.mrb[44].mxu1  ;;  %v22126_v54 = vld [vmem:[#allocation17_spill] sm:$0xff] }
 0x533   : > { %v14669_v37 = vpop.f32.mrb[45].mxu1 }
 0x534   : > { %v14670_v43 = vadd.f32 %v14669_v37, %v14668_v1  ;;  %v14671_v25 = vpop.f32.mrb[46].mxu1  ;;  %v4610_v37 = vrot.slane %v4608_v36, 5 }
 0x535   : > { %v14672_v32 = vpop.f32.mrb[47].mxu1  ;;  %v5308_v58 = vpop.permute.xlu0 %5307 }
 0x536   : > { %v20707_v47 = vadd.f32 %v22122_v5, %v14670_v43  ;;  %v14673_v31 = vadd.f32 %v14672_v32, %v14671_v25  ;;  %v4613_v43 = vrot.slane %v4611_v11, 6  ;;  %v4602_v25 = vrot.slane %v4600_v16, 5  ;;  %v20726_v11 = vld [vmem:[#allocation3 + $0x168] sm:$0xff] }
 0x537   : > { %10760 = vmatmul.mubr.bf16.gmra.mrb[152].mxu1 %v20709_v17  ;;  %v4605_v32 = vrot.slane %v4603_v28, 6 }
 0x538   : > { %22123 = vst [vmem:[#allocation10_spill] sm:$0xff] %v20707_v47  ;;  %v20717_v1 = vadd.f32 %v22126_v54, %v14673_v31  ;;  %10767 = vmatprep.mubr.bf16.mxu1 %v20714_v34  ;;  %v4614_v49 = vor.u32 %v4613_v43, %v4610_v37  ;;  %v22128_v54 = vld [vmem:[#allocation21_spill] sm:$0xff] }
 0x539   : > { %11387 = vmatmul.mubr.bf16.gmra.mrb[216].mxu0 %v20440_v3  ;;  %v4606_v26 = vor.u32 %v4605_v32, %v4602_v25 }
 0x53a   : > { %22127 = vst [vmem:[#allocation14_spill] sm:$0xff] %v20717_v1  ;;  %11394 = vmatprep.mubr.bf16.mxu0 %v20444_v27  ;;  %v14674_v5 = vpop.f32.mrb[48].mxu1  ;;  %v20730_v27 = vld [vmem:[#allocation3 + $0x188] sm:$0xff] }
 0x53b   : > { %v14675_v47 = vpop.f32.mrb[49].mxu1  ;;  %v4615_v31 = vsel %vm4190_vm12, %v4606_v26, %v4614_v49  ;;  %v20746_v49 = vld [vmem:[#allocation3 + $0x1a0] sm:$0xff] }
 0x53c   : > { %v14676_v50 = vadd.f32 %v14675_v47, %v14674_v5  ;;  %v14677_v45 = vpop.f32.mrb[50].mxu1  ;;  %v5437_v3 = vsel %vm647_vm0, %v4615_v31, %v5308_v58  ;;  %v22129_v47 = vld [vmem:[#allocation19_spill] sm:$0xff]  ;;  %v20743_v5 = vld [vmem:[#allocation3 + $0x180] sm:$0xff] }
 0x53d   : > { %v14678_v17 = vpop.f32.mrb[51].mxu1  ;;  %v5360_v16 = vpop.permute.xlu1 %5359 }
 0x53e   : > { %v20724_v1 = vadd.f32 %v22128_v54, %v14676_v50  ;;  %v14679_v36 = vadd.f32 %v14678_v17, %v14677_v45  ;;  %v5514_v28 = vsel %vm2312_vm13, %v5437_v3, %v5360_v16  ;;  %v20757_v16 = vld [vmem:[#allocation3 + $0x198] sm:$0xff] }
 0x53f   : > { %10768 = vmatmul.mubr.bf16.gmra.mrb[156].mxu1 %v20726_v11  ;;  %5543 = vst.msk [vmem:[#allocation3 + $0x250] sm:$0xff] %vm2365_vm14, %v5514_v28 }
 0x540   : > { %v20734_v37 = vadd.f32 %v22129_v47, %v14679_v36  ;;  %10775 = vmatprep.mubr.bf16.mxu1 %v20730_v27 }
 0x541   : > { %11395 = vmatmul.mubr.bf16.gmra.mrb[220].mxu0 %v20459_v63 }
 0x542   : > { %11402 = vmatprep.mubr.bf16.mxu0 %v20462_v14  ;;  %v14680_v50 = vpop.f32.mrb[52].mxu1 }
 0x543   : > { %v14681_v58 = vpop.f32.mrb[53].mxu1 }
 0x544   : > { %v14682_v26 = vadd.f32 %v14681_v58, %v14680_v50  ;;  %v14683_v17 = vpop.f32.mrb[54].mxu1 }
 0x545   : > { %v14684_v43 = vpop.f32.mrb[55].mxu1 }
 0x546   : > { %v20741_v25 = vadd.f32 %v20446_v29, %v14682_v26  ;;  %v14685_v32 = vadd.f32 %v14684_v43, %v14683_v17  ;;  %v22130_v17 = vld [vmem:[#allocation22_spill] sm:$0xff] }
 0x547   : > { %10776 = vmatmul.mubr.bf16.gmra.mrb[160].mxu1 %v20743_v5 }
 0x548   : > { %v20749_v45 = vadd.f32 %v20452_v42, %v14685_v32  ;;  %10783 = vmatprep.mubr.bf16.mxu1 %v20746_v49 }
 0x549   : > { %11403 = vmatmul.mubr.bf16.gmra.mrb[224].mxu0 %v20475_v23 }
 0x54a   : > { %11410 = vmatprep.mubr.bf16.mxu0 %v20478_v39  ;;  %v14686_v63 = vpop.f32.mrb[56].mxu1 }
 0x54b   : > { %v14687_v14 = vpop.f32.mrb[57].mxu1 }
 0x54c   : > { %v14688_v29 = vadd.f32 %v14687_v14, %v14686_v63  ;;  %v14689_v31 = vpop.f32.mrb[58].mxu1 }
 0x54d   : > { %v14690_v54 = vpop.f32.mrb[59].mxu1 }
 0x54e   : > { %v20755_v36 = vadd.f32 %v20464_v21, %v14688_v29  ;;  %v14691_v3 = vadd.f32 %v14690_v54, %v14689_v31  ;;  %v22135_v31 = vld [vmem:[#allocation28_spill] sm:$0xff] }
 0x54f   : > { %10784 = vmatmul.mubr.bf16.gmra.mrb[164].mxu1 %v20757_v16 }
 0x550   : > { %v20761_v42 = vadd.f32 %v20470_v13, %v14691_v3  ;;  %10791 = vmatprep.mubr.bf16.mxu1 %v20478_v39  ;;  %v2520_v3 = vld [vmem:[#allocation2 + $0x190] sm:$0xf8] }
 0x551   : > { %11411 = vmatmul.mubr.bf16.gmra.mrb[228].mxu0 %v20490_v62 }
 0x552   : > { %11418 = vmatprep.mubr.bf16.mxu0 %v20493_v48  ;;  %v14692_v23 = vpop.f32.mrb[60].mxu1 }
 0x553   : > { %v14693_v28 = vpop.f32.mrb[61].mxu1 }
 0x554   : > { %v14694_v47 = vadd.f32 %v14693_v28, %v14692_v23  ;;  %v14695_v50 = vpop.f32.mrb[62].mxu1  ;;  %v22136_v23 = vld [vmem:[#allocation27_spill] sm:$0xff] }
 0x555   : > { %v14696_v21 = vpop.f32.mrb[63].mxu1  ;;  %v2957_v28 = vshrl.u32 %v22136_v23, 16 }
 0x556   : > { %v20767_v58 = vadd.f32 %v20480_v52, %v14694_v47  ;;  %v14697_v26 = vadd.f32 %v14696_v21, %v14695_v50  ;;  %v2960_v47 = vshll.u32 %v22136_v23, 16  ;;  %v2949_v50 = vshrl.u32 %v2520_v3, 16  ;;  %v22139_v23 = vld [vmem:[#allocation23_spill] sm:$0xff] }
 0x557   : > { %10792 = vmatmul.mubr.bf16.gmra.mrb[168].mxu1 %v20490_v62  ;;  %v2952_v21 = vshll.u32 %v2520_v3, 16 }
 0x558   : > { %v20771_v13 = vadd.f32 %v22130_v17, %v14697_v26  ;;  %10799 = vmatprep.mubr.bf16.mxu1 %v20493_v48  ;;  %v22134_v48 = vld [vmem:[#allocation24_spill] sm:$0xff]  ;;  %v2959_v17 = vrot.slane %v2957_v28, 3 }
 0x559   : > { %11419 = vmatmul.mubr.bf16.gmra.mrb[232].mxu0 %v20508_v18 }
 0x55a   : > { %22131 = vst [vmem:[#allocation16_spill] sm:$0xff] %v20771_v13  ;;  %11426 = vmatprep.mubr.bf16.mxu0 %v20515_v19  ;;  %v14736_v39 = vpop.f32.mrb[64].mxu1 }
 0x55b   : > { %v14737_v43 = vpop.f32.mrb[65].mxu1 }
 0x55c   : > { %v14738_v32 = vadd.f32 %v14737_v43, %v14736_v39  ;;  %v14739_v63 = vpop.f32.mrb[66].mxu1  ;;  %v2951_v43 = vrot.slane %v2949_v50, 3 }
 0x55d   : > { %v14740_v14 = vpop.f32.mrb[67].mxu1 }
 0x55e   : > { %v20777_v52 = vadd.f32 %v20496_v20, %v14738_v32  ;;  %v14741_v29 = vadd.f32 %v14740_v14, %v14739_v63  ;;  %v22137_v32 = vld [vmem:[#allocation25_spill] sm:$0xff] }
 0x55f   : > { %10800 = vmatmul.mubr.bf16.gmra.mrb[172].mxu1 %v20508_v18 }
 0x560   : > { %22132 = vst [vmem:[#allocation18_spill] sm:$0xff] %v20777_v52  ;;  %v20781_v62 = vadd.f32 %v20500_v22, %v14741_v29  ;;  %10807 = vmatprep.mubr.bf16.mxu1 %v20515_v19  ;;  %v2962_v22 = vrot.slane %v2960_v47, 4  ;;  %v2954_v19 = vrot.slane %v2952_v21, 4  ;;  %v850_v47 = vld [vmem:[#allocation2 + $0x190] sm:$0xfe] }
 0x561   : > { %11427 = vmatmul.mubr.bf16.gmra.mrb[236].mxu0 %v22134_v48 }
 0x562   : > { %22133 = vst [vmem:[#allocation13_spill] sm:$0xff] %v20781_v62  ;;  %11434 = vmatprep.mubr.bf16.mxu0 %v22135_v31  ;;  %v14742_v54 = vpop.f32.mrb[68].mxu1  ;;  %v2963_v29 = vor.u32 %v2962_v22, %v2959_v17  ;;  %v2955_v52 = vor.u32 %v2954_v19, %v2951_v43 }
 0x563   : > { %v14743_v20 = vpop.f32.mrb[69].mxu1  ;;  %v3799_v62 = vpop.permute.xlu0 %3798 }
 0x564   : > { %v14744_v26 = vadd.f32 %v14743_v20, %v14742_v54  ;;  %v14745_v18 = vpop.f32.mrb[70].mxu1  ;;  %v20797_v54 = vld [vmem:[#allocation3 + $0x218] sm:$0xff]  ;;  %v2964_v3 = vsel %vm2522_vm15, %v2955_v52, %v2963_v29  ;;  %v1287_v20 = vshrl.u32 %v20577_v38, 16  ;;  %v22141_v29 = vld [vmem:[#allocation26_spill] sm:$0xff] }
 0x565   : > { %v14746_v39 = vpop.f32.mrb[71].mxu1  ;;  %v3981_v21 = vsel %vm647_vm0, %v2964_v3, %v3799_v62  ;;  %v22142_v3 = vld [vmem:[#allocation30_spill] sm:$0xff] }
 0x566   : > { %v20789_v63 = vadd.f32 %v22137_v32, %v14744_v26  ;;  %v14747_v14 = vadd.f32 %v14746_v39, %v14745_v18  ;;  %v1279_v26 = vshrl.u32 %v850_v47, 16  ;;  %v1282_v18 = vshll.u32 %v850_v47, 16  ;;  %v20812_v47 = vld [vmem:[#allocation3 + $0x210] sm:$0xff] }
 0x567   : > { %10808 = vmatmul.mubr.bf16.gmra.mrb[176].mxu1 %v22134_v48  ;;  %v1290_v48 = vshll.u32 %v20577_v38, 16  ;;  %v1289_v39 = vrot.slane %v1287_v20, 1 }
 0x568   : > { %22138 = vst [vmem:[#allocation11_spill] sm:$0xff] %v20789_v63  ;;  %v20793_v13 = vadd.f32 %v22139_v23, %v14747_v14  ;;  %10815 = vmatprep.mubr.bf16.mxu1 %v22135_v31  ;;  %v1281_v52 = vrot.slane %v1279_v26, 1  ;;  %v1284_v32 = vrot.slane %v1282_v18, 2  ;;  %v4188_v18 = vld [vmem:[#allocation2 + $0x190] sm:$0xe0] }
 0x569   : > { %11435 = vmatmul.mubr.bf16.gmra.mrb[240].mxu0 %v20570_v12  ;;  %v1292_v43 = vrot.slane %v1290_v48, 2 }
 0x56a   : > { %22140 = vst [vmem:[#allocation20_spill] sm:$0xff] %v20793_v13  ;;  %11442 = vmatprep.mubr.bf16.mxu0 %v20797_v54  ;;  %v14748_v28 = vpop.f32.mrb[72].mxu1  ;;  %v3851_v22 = vpop.permute.xlu0 %3850  ;;  %v1285_v62 = vor.u32 %v1284_v32, %v1281_v52 }
 0x56b   : > { %v14749_v50 = vpop.f32.mrb[73].mxu1  ;;  %v2129_v14 = vpop.permute.xlu1 %2128  ;;  %v4033_v38 = vsel %vm2312_vm13, %v3981_v21, %v3851_v22  ;;  %v1293_v63 = vor.u32 %v1292_v43, %v1289_v39  ;;  %v22144_v21 = vld [vmem:[#allocation29_spill] sm:$0xff]  ;;  %v4617_v39 = vshrl.u32 %v4188_v18, 16  ;;  %v4620_v43 = vshll.u32 %v4188_v18, 16 }
 0x56c   : > { %v14750_v31 = vadd.f32 %v14749_v50, %v14748_v28  ;;  %v14751_v17 = vpop.f32.mrb[74].mxu1 }
 0x56d   : > { %v14752_v19 = vpop.f32.mrb[75].mxu1  ;;  %v1294_v48 = vsel %vm852_vm1, %v1285_v62, %v1293_v63 }
 0x56e   : > { %v20805_v23 = vadd.f32 %v22141_v29, %v14750_v31  ;;  %v14753_v13 = vadd.f32 %v14752_v19, %v14751_v17  ;;  %v3903_v20 = vpop.permute.xlu0 %3902  ;;  %v4628_v31 = vshll.u32 %v20601_v7, 16 }
 0x56f   : > { %10816 = vmatmul.mubr.bf16.gmra.mrb[180].mxu1 %v20570_v12  ;;  %v20818_v50 = vsel %vm2365_vm14, %v4033_v38, %v3903_v20  ;;  %v2311_v12 = vsel %vm647_vm0, %v1294_v48, %v2129_v14  ;;  %v4619_v14 = vrot.slane %v4617_v39, 5  ;;  %v4622_v20 = vrot.slane %v4620_v43, 6 }
 0x570   : > { %v20810_v28 = vadd.f32 %v22142_v3, %v14753_v13  ;;  %10823 = vmatprep.mubr.bf16.mxu1 %v20797_v54  ;;  %22143 = vst [vmem:[#allocation17_spill] sm:$0xff] %v20818_v50  ;;  %v4625_v13 = vshrl.u32 %v20601_v7, 16  ;;  %v4630_v38 = vrot.slane %v4628_v31, 6 }
 0x571   : > { %11443 = vmatmul.mubr.bf16.gmra.mrb[244].mxu0 %v20812_v47 }
 0x572   : > { %11450 = vmatprep.mubr.bf16.mxu0 %v22144_v21  ;;  %v14754_v26 = vpop.f32.mrb[76].mxu1  ;;  %v2181_v22 = vpop.permute.xlu1 %2180  ;;  %v4627_v29 = vrot.slane %v4625_v13, 5  ;;  %v22146_v13 = vld [vmem:[#allocation31_spill] sm:$0xff] }
 0x573   : > { %v14755_v17 = vpop.f32.mrb[77].mxu1  ;;  %v2364_v63 = vsel %vm2312_vm13, %v2311_v12, %v2181_v22  ;;  %v2233_v32 = vpop.permute.xlu0 %2232 }
 0x574   : > { %v14756_v19 = vadd.f32 %v14755_v17, %v14754_v26  ;;  %v14757_v52 = vpop.f32.mrb[78].mxu1  ;;  %v20826_v3 = vsel %vm2365_vm14, %v2364_v63, %v2233_v32  ;;  %v4631_v50 = vor.u32 %v4630_v38, %v4627_v29  ;;  %v4623_v26 = vor.u32 %v4622_v20, %v4619_v14  ;;  %v22145_v17 = vld [vmem:[#allocation33_spill] sm:$0xff] }
 0x575   : > { %v14758_v62 = vpop.f32.mrb[79].mxu1 }
 0x576   : > { %v20829_v48 = vadd.f32 %v20575_v8, %v14756_v19  ;;  %v14759_v7 = vadd.f32 %v14758_v62, %v14757_v52  ;;  %v5310_v18 = vpop.permute.xlu1 %5309  ;;  %v4632_v31 = vsel %vm4190_vm12, %v4623_v26, %v4631_v50  ;;  %v11035_v50 = vld [vmem:[#allocation3 + $0xe8] sm:$0xff] }
 0x577   : > { %10824 = vmatmul.mubr.bf16.gmra.mrb[184].mxu1 %v20812_v47  ;;  %v5440_v39 = vsel %vm647_vm0, %v4632_v31, %v5310_v18 }
 0x578   : > { %v20833_v12 = vadd.f32 %v22145_v17, %v14759_v7  ;;  %10831 = vmatprep.mubr.bf16.mxu1 %v22144_v21  ;;  %v17102_v17 = vld [vmem:[#allocation4 + $0x770] sm:$0xff]  }
 0x579   : > { %11451 = vmatmul.mubr.bf16.gmra.mrb[248].mxu0 %v22146_v13 }
 0x57a   : > { %11458 = vmatprep.mubr.bf16.mxu0 %v20619_v56  ;;  %v14760_v22 = vpop.f32.mrb[80].mxu1 }
 0x57b   : > { %v14761_v8 = vpop.f32.mrb[81].mxu1 }
 0x57c   : > { %v14762_v43 = vadd.f32 %v14761_v8, %v14760_v22  ;;  %v14763_v19 = vpop.f32.mrb[82].mxu1  ;;  %v17103_v8 = vld [vmem:[#allocation4 + $0x778] sm:$0xff]  }
 0x57d   : > { %v14764_v52 = vpop.f32.mrb[83].mxu1  ;;  %v5362_v63 = vpop.permute.xlu1 %5361 }
 0x57e   : > { %v20841_v32 = vadd.f32 %v20599_v57, %v14762_v43  ;;  %v14765_v29 = vadd.f32 %v14764_v52, %v14763_v19  ;;  %v5517_v21 = vsel %vm2312_vm13, %v5440_v39, %v5362_v63  ;;  %v20876_v39 = vld [vmem:[#allocation3 + $0x130] sm:$0xff]  ;;  %v20881_v43 = vld [vmem:[#allocation3 + $0x148] sm:$0xff] }
 0x57f   : > { %10832 = vmatmul.mubr.bf16.gmra.mrb[188].mxu1 %v22146_v13  ;;  %5544 = vst.msk [vmem:[#allocation3 + $0x268] sm:$0xff] %vm2365_vm14, %v5517_v21  ;;  %v17104_v19 = vld [vmem:[#allocation4 + $0x780] sm:$0xff]   ;;  %v17105_v21 = vld [vmem:[#allocation4 + $0x788] sm:$0xff]  }
 0x580   : > { %v20847_v56 = vadd.f32 %v20608_v6, %v14765_v29  ;;  %11965 = vmatprep.mubr.bf16.mxu1 %v20633_v33  ;;  %v17101_v6 = vld [vmem:[#allocation4 + $0x768] sm:$0xff]   ;;  %v20859_v33 = vld [vmem:[#allocation3 + $0x100] sm:$0xff] }
 0x581   : > { %11459 = vmatmul.mubr.bf16.gmra.mrb[252].mxu0 %v20626_v35  ;;  %v20864_v35 = vld [vmem:[#allocation3 + $0x118] sm:$0xff] }
 0x582   : > { %15790 = vmatprep.mubr.msk.bf16.mxu0 %vm2365_vm14, %v11035_v50  ;;  %v14766_v38 = vpop.f32.mrb[84].mxu1 }
 0x583   : > { %v14767_v57 = vpop.f32.mrb[85].mxu1 }
 0x584   : > { %v14768_v62 = vadd.f32 %v14767_v57, %v14766_v38  ;;  %v14769_v14 = vpop.f32.mrb[86].mxu1  ;;  %v20892_v38 = vld [vmem:[#allocation3 + $0x160] sm:$0xff]  ;;  %v20897_v57 = vld [vmem:[#allocation3 + $0x178] sm:$0xff] }
 0x585   : > { %v14770_v20 = vpop.f32.mrb[87].mxu1 }
 0x586   : > { %v20853_v7 = vadd.f32 %v20622_v53, %v14768_v62  ;;  %v14771_v26 = vadd.f32 %v14770_v20, %v14769_v14 }
 0x587   : > { %11966 = vmatmul.mubr.bf16.vlgmr.msra.gmra.mrb[192].mxu1 %v20641_v0 }
 0x588   : > { %v20857_v18 = vadd.f32 %v20631_v30, %v14771_v26  ;;  %11973 = vmatprep.mubr.bf16.mxu1 %v20648_v46 }
 0x589   : > { %15791 = vmatmul.mubr.msk.bf16.vlgmr.msra.gmra.mrb[32].mxu0 %vm2365_vm14, %v20859_v33 }
 0x58a   : > { %15823 = vmatpush3.bf16.msra.mxu0 %v20665_v2  ;;  %15794 = vmatprep.mubr.msk.bf16.mxu0 %vm2365_vm14, %v20864_v35  ;;  %v14772_v53 = vpop.f32.mrb[88].mxu1 }
 0x58b   : > { %v14773_v0 = vpop.f32.mrb[89].mxu1  ;;  %15824 = vmatprep.subr.bf16.mxu0 %v17101_v6 }
 0x58c   : > { %v14774_v30 = vadd.f32 %v14773_v0, %v14772_v53  ;;  %v14775_v13 = vpop.f32.mrb[90].mxu1  ;;  %v20913_v53 = vld [vmem:[#allocation3 + $0x1a8] sm:$0xff] }
 0x58d   : > { %v14776_v31 = vpop.f32.mrb[91].mxu1 }
 0x58e   : > { %v20870_v22 = vadd.f32 %v20639_v59, %v14774_v30  ;;  %v14777_v46 = vadd.f32 %v14776_v31, %v14775_v13  ;;  %15825 = vmatpush3.bf16.msra.mxu0 %v17101_v6  ;;  %v20908_v6 = vld [vmem:[#allocation3 + $0x190] sm:$0xff] }
 0x58f   : > { %11974 = vmatmul.mubr.bf16.gmra.mrb[196].mxu1 %v20655_v61  ;;  %15826 = vmatprep.subr.bf16.mxu0 %v17102_v17  ;;  %v22147_v31 = vld [vmem:[#allocation12_spill] sm:$0xff] }
 0x590   : > { %v20874_v2 = vadd.f32 %v20645_v10, %v14777_v46  ;;  %11981 = vmatprep.mubr.bf16.mxu1 %v20662_v51 }
 0x591   : > { %15795 = vmatmul.mubr.msk.bf16.gmra.mrb[36].mxu0 %vm2365_vm14, %v20876_v39 }
 0x592   : > { %15798 = vmatprep.mubr.msk.bf16.mxu0 %vm2365_vm14, %v20881_v43  ;;  %v14778_v59 = vpop.f32.mrb[92].mxu1  ;;  %15827 = vmatpush3.bf16.msra.mxu0 %v17102_v17 }
 0x593   : > { %v14779_v61 = vpop.f32.mrb[93].mxu1  ;;  %15828 = vmatprep.subr.bf16.mxu0 %v17103_v8 }
 0x594   : > { %v14780_v52 = vadd.f32 %v14779_v61, %v14778_v59  ;;  %v14781_v10 = vpop.f32.mrb[94].mxu1  ;;  %v20929_v59 = vld [vmem:[#allocation3 + $0x1d8] sm:$0xff] }
 0x595   : > { %v14782_v63 = vpop.f32.mrb[95].mxu1 }
 0x596   : > { %v20886_v29 = vadd.f32 %v20652_v44, %v14780_v52  ;;  %v14783_v51 = vadd.f32 %v14782_v63, %v14781_v10  ;;  %15829 = vmatpush3.bf16.msra.mxu0 %v17103_v8  ;;  %v20924_v8 = vld [vmem:[#allocation3 + $0x1c0] sm:$0xff]  ;;  %v22149_v63 = vld [vmem:[#allocation32_spill] sm:$0xff] }
 0x597   : > { %11982 = vmatmul.mubr.bf16.gmra.mrb[200].mxu1 %v20672_v41  ;;  %15830 = vmatprep.subr.bf16.mxu0 %v17104_v19 }
 0x598   : > { %v20890_v50 = vadd.f32 %v20659_v15, %v14783_v51  ;;  %11989 = vmatprep.mubr.bf16.mxu1 %v20679_v40 }
 0x599   : > { %15799 = vmatmul.mubr.msk.bf16.gmra.mrb[40].mxu0 %vm2365_vm14, %v20892_v38 }
 0x59a   : > { %15802 = vmatprep.mubr.msk.bf16.mxu0 %vm2365_vm14, %v20897_v57  ;;  %v14784_v44 = vpop.f32.mrb[96].mxu1  ;;  %15831 = vmatpush3.bf16.msra.mxu0 %v17104_v19 }
 0x59b   : > { %v14785_v41 = vpop.f32.mrb[97].mxu1  ;;  %15832 = vmatprep.subr.bf16.mxu0 %v17105_v21 }
 0x59c   : > { %v14786_v62 = vadd.f32 %v14785_v41, %v14784_v44  ;;  %v14787_v14 = vpop.f32.mrb[98].mxu1  ;;  %v20940_v41 = vld [vmem:[#allocation3 + $0x1f0] sm:$0xff] }
 0x59d   : > { %v14788_v15 = vpop.f32.mrb[99].mxu1 }
 0x59e   : > { %v20902_v20 = vadd.f32 %v20668_v9, %v14786_v62  ;;  %v14789_v26 = vadd.f32 %v14788_v15, %v14787_v14  ;;  %15833 = vmatpush3.bf16.msra.mxu0 %v17105_v21  ;;  %v20945_v62 = vld [vmem:[#allocation3 + $0x208] sm:$0xff] }
 0x59f   : > { %11990 = vmatmul.mubr.bf16.gmra.mrb[204].mxu1 %v20689_v60 }
 0x5a0   : > { %v20906_v40 = vadd.f32 %v20676_v55, %v14789_v26  ;;  %11997 = vmatprep.mubr.bf16.mxu1 %v20693_v4  ;;  %v22148_v4 = vld [vmem:[#allocation34_spill] sm:$0xff] }
 0x5a1   : > { %15803 = vmatmul.mubr.msk.bf16.gmra.mrb[44].mxu0 %vm2365_vm14, %v20908_v6 }
 0x5a2   : > { %15806 = vmatprep.mubr.msk.bf16.mxu0 %vm2365_vm14, %v20913_v53  ;;  %v14790_v9 = vpop.f32.mrb[100].mxu1 }
 0x5a3   : > { %v14791_v0 = vpop.f32.mrb[101].mxu1 }
 0x5a4   : > { %v14792_v17 = vadd.f32 %v14791_v0, %v14790_v9  ;;  %v14793_v30 = vpop.f32.mrb[102].mxu1  ;;  %v22151_v0 = vld [vmem:[#allocation10_spill] sm:$0xff] }
 0x5a5   : > { %v14794_v60 = vpop.f32.mrb[103].mxu1 }
 0x5a6   : > { %v20918_v55 = vadd.f32 %v20683_v24, %v14792_v17  ;;  %v14795_v13 = vadd.f32 %v14794_v60, %v14793_v30 }
 0x5a7   : > { %11998 = vmatmul.mubr.bf16.gmra.mrb[208].mxu1 %v22147_v31  ;;  %v20961_v31 = vld [vmem:[#allocation3 + $0x238] sm:$0xff] }
 0x5a8   : > { %v20922_v46 = vadd.f32 %v22148_v4, %v14795_v13  ;;  %12005 = vmatprep.mubr.bf16.mxu1 %v20714_v34  ;;  %v22150_v34 = vld [vmem:[#allocation15_spill] sm:$0xff]  ;;  %v20956_v13 = vld [vmem:[#allocation3 + $0x220] sm:$0xff] }
 0x5a9   : > { %15807 = vmatmul.mubr.msk.bf16.gmra.mrb[48].mxu0 %vm2365_vm14, %v20924_v8 }
 0x5aa   : > { %15810 = vmatprep.mubr.msk.bf16.mxu0 %vm2365_vm14, %v20929_v59  ;;  %v14796_v24 = vpop.f32.mrb[104].mxu1 }
 0x5ab   : > { %v14797_v61 = vpop.f32.mrb[105].mxu1 }
 0x5ac   : > { %v14798_v19 = vadd.f32 %v14797_v61, %v14796_v24  ;;  %v14799_v52 = vpop.f32.mrb[106].mxu1 }
 0x5ad   : > { %v14800_v10 = vpop.f32.mrb[107].mxu1 }
 0x5ae   : > { %v20934_v51 = vadd.f32 %v22149_v63, %v14798_v19  ;;  %v14801_v21 = vadd.f32 %v14800_v10, %v14799_v52  ;;  %v20968_v63 = vld [vmem:[#allocation3 + $0x250] sm:$0xff] }
 0x5af   : > { %12006 = vmatmul.mubr.bf16.gmra.mrb[212].mxu1 %v20726_v11 }
 0x5b0   : > { %v20938_v44 = vadd.f32 %v22150_v34, %v14801_v21  ;;  %12013 = vmatprep.mubr.bf16.mxu1 %v20730_v27  ;;  %v22152_v27 = vld [vmem:[#allocation14_spill] sm:$0xff] }
 0x5b1   : > { %15811 = vmatmul.mubr.msk.bf16.gmra.mrb[52].mxu0 %vm2365_vm14, %v20940_v41 }
 0x5b2   : > { %15814 = vmatprep.mubr.msk.bf16.mxu0 %vm2365_vm14, %v20945_v62  ;;  %v14802_v14 = vpop.f32.mrb[108].mxu1 }
 0x5b3   : > { %v14803_v15 = vpop.f32.mrb[109].mxu1 }
 0x5b4   : > { %v14804_v26 = vadd.f32 %v14803_v15, %v14802_v14  ;;  %v14805_v9 = vpop.f32.mrb[110].mxu1 }
 0x5b5   : > { %v14806_v11 = vpop.f32.mrb[111].mxu1 }
 0x5b6   : > { %v20950_v17 = vadd.f32 %v22151_v0, %v14804_v26  ;;  %v14807_v30 = vadd.f32 %v14806_v11, %v14805_v9  ;;  %v11684_v11 = vld [vmem:[#allocation3 + $0x1b0] sm:$0xff] }
 0x5b7   : > { %12014 = vmatmul.mubr.bf16.gmra.mrb[216].mxu1 %v20743_v5 }
 0x5b8   : > { %v20954_v60 = vadd.f32 %v22152_v27, %v14807_v30  ;;  %12021 = vmatprep.mubr.bf16.mxu1 %v20746_v49  ;;  %v11685_v49 = vld [vmem:[#allocation3 + $0x1b8] sm:$0xff] }
 0x5b9   : > { %15815 = vmatmul.mubr.msk.bf16.gmra.mrb[56].mxu0 %vm2365_vm14, %v20956_v13 }
 0x5ba   : > { %15818 = vmatprep.mubr.msk.bf16.mxu0 %vm2365_vm14, %v20961_v31  ;;  %v14808_v4 = vpop.f32.mrb[112].mxu1 }
 0x5bb   : > { %v14809_v24 = vpop.f32.mrb[113].mxu1 }
 0x5bc   : > { %v14810_v61 = vadd.f32 %v14809_v24, %v14808_v4  ;;  %v14811_v19 = vpop.f32.mrb[114].mxu1 }
 0x5bd   : > { %v14812_v5 = vpop.f32.mrb[115].mxu1 }
 0x5be   : > { %v20966_v52 = vadd.f32 %v20724_v1, %v14810_v61  ;;  %v14813_v10 = vadd.f32 %v14812_v5, %v14811_v19  ;;  %v11687_v19 = vld [vmem:[#allocation3 + $0x1c8] sm:$0xff] }
 0x5bf   : > { %12022 = vmatmul.mubr.bf16.gmra.mrb[220].mxu1 %v20757_v16 }
 0x5c0   : > { %v20972_v21 = vadd.f32 %v20734_v37, %v14813_v10  ;;  %12029 = vmatprep.mubr.bf16.mxu1 %v11685_v49  ;;  %v11688_v37 = vld [vmem:[#allocation3 + $0x1d0] sm:$0xff] }
 0x5c1   : > { %15819 = vmatmul.mubr.msk.bf16.gmra.mrb[60].mxu0 %vm2365_vm14, %v20968_v63 }
 0x5c2   : > { %15834 = vmatprep.mubr.msk.bf16.mxu0 %vm2365_vm14, %v20859_v33  ;;  %v14814_v34 = vpop.f32.mrb[116].mxu1 }
 0x5c3   : > { %v14815_v14 = vpop.f32.mrb[117].mxu1 }
 0x5c4   : > { %v14816_v1 = vadd.f32 %v14815_v14, %v14814_v34  ;;  %v14817_v15 = vpop.f32.mrb[118].mxu1 }
 0x5c5   : > { %v14818_v26 = vpop.f32.mrb[119].mxu1 }
 0x5c6   : > { %v20979_v9 = vadd.f32 %v20741_v25, %v14816_v1  ;;  %v14819_v16 = vadd.f32 %v14818_v26, %v14817_v15  ;;  %v11690_v1 = vld [vmem:[#allocation3 + $0x1e0] sm:$0xff]  ;;  %v22153_v15 = vld [vmem:[#allocation16_spill] sm:$0xff] }
 0x5c7   : > { %12030 = vmatmul.mubr.bf16.gmra.mrb[224].mxu1 %v11684_v11 }
 0x5c8   : > { %v20982_v0 = vadd.f32 %v20749_v45, %v14819_v16  ;;  %12037 = vmatprep.mubr.bf16.mxu1 %v11688_v37  ;;  %v11691_v45 = vld [vmem:[#allocation3 + $0x1e8] sm:$0xff] }
 0x5c9   : > { %15835 = vmatmul.mubr.msk.bf16.vlgmr.msra.gmra.mrb[32].mxu0 %vm2365_vm14, %v20864_v35 }
 0x5ca   : > { %15838 = vmatprep.mubr.msk.bf16.mxu0 %vm2365_vm14, %v20876_v39  ;;  %v14820_v33 = vpop.f32.mrb[120].mxu1 }
 0x5cb   : > { %v14821_v30 = vpop.f32.mrb[121].mxu1 }
 0x5cc   : > { %v14822_v27 = vadd.f32 %v14821_v30, %v14820_v33  ;;  %v14823_v4 = vpop.f32.mrb[122].mxu1  ;;  %v22154_v30 = vld [vmem:[#allocation18_spill] sm:$0xff] }
 0x5cd   : > { %v14824_v25 = vpop.f32.mrb[123].mxu1 }
 0x5ce   : > { %v20989_v24 = vadd.f32 %v20755_v36, %v14822_v27  ;;  %v14825_v61 = vadd.f32 %v14824_v25, %v14823_v4 }
 0x5cf   : > { %12038 = vmatmul.mubr.bf16.gmra.mrb[228].mxu1 %v11687_v19  ;;  %v11693_v19 = vld [vmem:[#allocation3 + $0x1f8] sm:$0xff] }
 0x5d0   : > { %v20992_v5 = vadd.f32 %v20761_v42, %v14825_v61  ;;  %12045 = vmatprep.mubr.bf16.mxu1 %v11691_v45  ;;  %v11694_v42 = vld [vmem:[#allocation3 + $0x200] sm:$0xff] }
 0x5d1   : > { %15839 = vmatmul.mubr.msk.bf16.gmra.mrb[36].mxu0 %vm2365_vm14, %v20881_v43 }
 0x5d2   : > { %15842 = vmatprep.mubr.msk.bf16.mxu0 %vm2365_vm14, %v20892_v38  ;;  %v14826_v35 = vpop.f32.mrb[124].mxu1 }
 0x5d3   : > { %v14827_v39 = vpop.f32.mrb[125].mxu1 }
 0x5d4   : > { %v14828_v10 = vadd.f32 %v14827_v39, %v14826_v35  ;;  %v14829_v49 = vpop.f32.mrb[126].mxu1 }
 0x5d5   : > { %v14830_v36 = vpop.f32.mrb[127].mxu1 }
 0x5d6   : > { %v20999_v34 = vadd.f32 %v20767_v58, %v14828_v10  ;;  %v14831_v14 = vadd.f32 %v14830_v36, %v14829_v49 }
 0x5d7   : > { %12046 = vmatmul.mubr.bf16.gmra.mrb[232].mxu1 %v11690_v1 }
 0x5d8   : > { %v21002_v26 = vadd.f32 %v22153_v15, %v14831_v14  ;;  %12053 = vmatprep.mubr.bf16.mxu1 %v11694_v42 }
 0x5d9   : > { %15843 = vmatmul.mubr.msk.bf16.gmra.mrb[40].mxu0 %vm2365_vm14, %v20897_v57  ;;  %v22155_v57 = vld [vmem:[#allocation13_spill] sm:$0xff] }
 0x5da   : > { %15846 = vmatprep.mubr.msk.bf16.mxu0 %vm2365_vm14, %v20908_v6  ;;  %v14870_v43 = vpop.f32.mrb[128].mxu1 }
 0x5db   : > { %v14871_v38 = vpop.f32.mrb[129].mxu1 }
 0x5dc   : > { %v15004_v16 = vpop.f32.mrb[192].mxu0  ;;  %v14872_v11 = vadd.f32 %v14871_v38, %v14870_v43  ;;  %v14873_v58 = vpop.f32.mrb[130].mxu1  ;;  %v22156_v38 = vld [vmem:[#allocation11_spill] sm:$0xff] }
 0x5dd   : > { %v15005_v37 = vpop.f32.mrb[193].mxu0  ;;  %v14874_v33 = vpop.f32.mrb[131].mxu1 }
 0x5de   : > { %v16148_v27 = vadd.f32 %v22154_v30, %v14872_v11  ;;  %v15006_v4 = vadd.f32 %v15005_v37, %v15004_v16  ;;  %v15007_v25 = vpop.f32.mrb[194].mxu0  ;;  %v14875_v61 = vadd.f32 %v14874_v33, %v14873_v58  ;;  %v22157_v33 = vld [vmem:[#allocation20_spill] sm:$0xff] }
 0x5df   : > { %v15008_v45 = vpop.f32.mrb[195].mxu0  ;;  %12054 = vmatmul.mubr.bf16.gmra.mrb[236].mxu1 %v11693_v19 }
 0x5e0   : > { %v21009_v35 = vadd.f32 %v16148_v27, %v15006_v4  ;;  %v16170_v39 = vadd.f32 %v22155_v57, %v14875_v61  ;;  %v15009_v6 = vadd.f32 %v15008_v45, %v15007_v25  ;;  %12061 = vmatprep.mubr.bf16.mxu1 %v20797_v54  ;;  %v17178_v27 = vld [vmem:[#allocation3 + $0x230] sm:$0xff]  ;;  %v12363_v57 = vld [vmem:[%s21926_s7] sm:$0xff] }
 0x5e1   : > { %15847 = vmatmul.mubr.msk.bf16.gmra.mrb[44].mxu0 %vm2365_vm14, %v20913_v53 }
 0x5e2   : > { %v21015_v10 = vadd.f32 %v16170_v39, %v15009_v6  ;;  %15850 = vmatprep.mubr.msk.bf16.mxu0 %vm2365_vm14, %v20924_v8  ;;  %v14876_v49 = vpop.f32.mrb[132].mxu1  ;;  %v12364_v39 = vld [vmem:[%s21926_s7 + $0x8] sm:$0xff] }
 0x5e3   : > { %v14877_v36 = vpop.f32.mrb[133].mxu1 }
 0x5e4   : > { %v15010_v14 = vpop.f32.mrb[196].mxu0  ;;  %v14878_v1 = vadd.f32 %v14877_v36, %v14876_v49  ;;  %v14879_v42 = vpop.f32.mrb[134].mxu1  ;;  %v17284_v49 = vmov 0.0|0.0   ;;  %v16039_v36 = vpack.c.bf16 %v12364_v39, %v12363_v57 }
 0x5e5   : > { %v15011_v15 = vpop.f32.mrb[197].mxu0  ;;  %v14880_v43 = vpop.f32.mrb[135].mxu1  ;;  %16038 = vmatprep.subr.bf16.mxu1 %v17284_v49  ;;  %16068 = vmatprep.subr.bf16.mxu0 %v17284_v49 }
 0x5e6   : > { %v16137_v16 = vadd.f32 %v22156_v38, %v14878_v1  ;;  %v15012_v11 = vadd.f32 %v15011_v15, %v15010_v14  ;;  %v15013_v58 = vpop.f32.mrb[198].mxu0  ;;  %v14881_v54 = vadd.f32 %v14880_v43, %v14879_v42  ;;  %v11699_v15 = vld [vmem:[#allocation3 + $0x228] sm:$0xff]  ;;  %16070 = vmatpush3.bf16.msra.mxu0 %v16039_v36  ;;  %16040 = vmatpush3.bf16.msra.mxu1 %v16039_v36 }
 0x5e7   : > { %v15014_v37 = vpop.f32.mrb[199].mxu0  ;;  %12062 = vmatmul.mubr.bf16.gmra.mrb[240].mxu1 %v20812_v47  ;;  %16041 = vmatprep.subr.bf16.mxu1 %v17284_v49 }
 0x5e8   : > { %v21021_v53 = vadd.f32 %v16137_v16, %v15012_v11  ;;  %v16159_v30 = vadd.f32 %v22157_v33, %v14881_v54  ;;  %v15015_v8 = vadd.f32 %v15014_v37, %v15013_v58  ;;  %12069 = vmatprep.mubr.bf16.mxu1 %v17178_v27  ;;  %v17179_v58 = vld [vmem:[#allocation3 + $0x248] sm:$0xff]  ;;  %16071 = vmatprep.subr.bf16.mxu0 %v17284_v49 }
 0x5e9   : > { %15851 = vmatmul.mubr.msk.bf16.gmra.mrb[48].mxu0 %vm2365_vm14, %v20929_v59 }
 0x5ea   : > { %v21026_v4 = vadd.f32 %v16159_v30, %v15015_v8  ;;  %15854 = vmatprep.mubr.msk.bf16.mxu0 %vm2365_vm14, %v20940_v41  ;;  %v14882_v25 = vpop.f32.mrb[136].mxu1 }
 0x5eb   : > { %v14883_v61 = vpop.f32.mrb[137].mxu1 }
 0x5ec   : > { %v15016_v19 = vpop.f32.mrb[200].mxu0  ;;  %v14884_v45 = vadd.f32 %v14883_v61, %v14882_v25  ;;  %v14885_v47 = vpop.f32.mrb[138].mxu1 }
 0x5ed   : > { %v15017_v6 = vpop.f32.mrb[201].mxu0  ;;  %v14886_v59 = vpop.f32.mrb[139].mxu1 }
 0x5ee   : > { %v16192_v41 = vadd.f32 %v20805_v23, %v14884_v45  ;;  %v15018_v14 = vadd.f32 %v15017_v6, %v15016_v19  ;;  %v15019_v1 = vpop.f32.mrb[202].mxu0  ;;  %v14887_v42 = vadd.f32 %v14886_v59, %v14885_v47  ;;  %v17180_v47 = vld [vmem:[#allocation3 + $0x240] sm:$0xff]  ;;  %v22158_v6 = vld [vmem:[#allocation17_spill] sm:$0xff] }
 0x5ef   : > { %v15020_v43 = vpop.f32.mrb[203].mxu0  ;;  %12070 = vmatmul.mubr.bf16.gmra.mrb[244].mxu1 %v11699_v15 }
 0x5f0   : > { %v21039_v38 = vadd.f32 %v16192_v41, %v15018_v14  ;;  %v16214_v16 = vadd.f32 %v20810_v28, %v14887_v42  ;;  %v15021_v11 = vadd.f32 %v15020_v43, %v15019_v1  ;;  %12077 = vmatprep.mubr.bf16.mxu1 %v17179_v58  ;;  %v12366_v42 = vld [vmem:[%s21926_s7 + $0x18] sm:$0xff] }
 0x5f1   : > { %15855 = vmatmul.mubr.msk.bf16.gmra.mrb[52].mxu0 %vm2365_vm14, %v20945_v62 }
 0x5f2   : > { %v21045_v23 = vadd.f32 %v16214_v16, %v15021_v11  ;;  %15858 = vmatprep.mubr.msk.bf16.mxu0 %vm2365_vm14, %v20956_v13  ;;  %v14888_v54 = vpop.f32.mrb[140].mxu1 }
 0x5f3   : > { %v14889_v37 = vpop.f32.mrb[141].mxu1 }
 0x5f4   : > { %v15022_v33 = vpop.f32.mrb[204].mxu0  ;;  %v14890_v28 = vadd.f32 %v14889_v37, %v14888_v54  ;;  %v14891_v30 = vpop.f32.mrb[142].mxu1 }
 0x5f5   : > { %v15023_v8 = vpop.f32.mrb[205].mxu0  ;;  %v14892_v27 = vpop.f32.mrb[143].mxu1 }
 0x5f6   : > { %v16181_v25 = vadd.f32 %v20829_v48, %v14890_v28  ;;  %v15024_v61 = vadd.f32 %v15023_v8, %v15022_v33  ;;  %v15025_v62 = vpop.f32.mrb[206].mxu0  ;;  %v14893_v19 = vadd.f32 %v14892_v27, %v14891_v30  ;;  %v11707_v30 = vld [vmem:[#allocation3 + $0x268] sm:$0xff] }
 0x5f7   : > { %v15026_v45 = vpop.f32.mrb[207].mxu0  ;;  %12078 = vmatmul.mubr.bf16.gmra.mrb[248].mxu1 %v17180_v47 }
 0x5f8   : > { %v21051_v57 = vadd.f32 %v16181_v25, %v15024_v61  ;;  %v16203_v13 = vadd.f32 %v20833_v12, %v14893_v19  ;;  %v15027_v39 = vadd.f32 %v15026_v45, %v15025_v62  ;;  %12085 = vmatprep.mubr.bf16.mxu1 %v22158_v6  ;;  %v12365_v12 = vld [vmem:[%s21926_s7 + $0x10] sm:$0xff] }
 0x5f9   : > { %15859 = vmatmul.mubr.msk.bf16.gmra.mrb[56].mxu0 %vm2365_vm14, %v20961_v31  ;;  %v16042_v43 = vpack.c.bf16 %v12366_v42, %v12365_v12 }
 0x5fa   : > { %v21057_v59 = vadd.f32 %v16203_v13, %v15027_v39  ;;  %15862 = vmatprep.mubr.msk.bf16.mxu0 %vm2365_vm14, %v20968_v63  ;;  %v14894_v48 = vpop.f32.mrb[144].mxu1 }
 0x5fb   : > { %v14895_v36 = vpop.f32.mrb[145].mxu1  ;;  %16073 = vmatpush3.bf16.msra.mxu0 %v16042_v43  ;;  %16043 = vmatpush3.bf16.msra.mxu1 %v16042_v43 }
 0x5fc   : > { %v15028_v41 = vpop.f32.mrb[208].mxu0  ;;  %v14896_v14 = vadd.f32 %v14895_v36, %v14894_v48  ;;  %v14897_v1 = vpop.f32.mrb[146].mxu1  ;;  %16074 = vmatprep.subr.bf16.mxu0 %v17284_v49  ;;  %16044 = vmatprep.subr.bf16.mxu1 %v17284_v49 }
 0x5fd   : > { %v15029_v15 = vpop.f32.mrb[209].mxu0  ;;  %v14898_v31 = vpop.f32.mrb[147].mxu1 }
 0x5fe   : > { %v16236_v16 = vadd.f32 %v20841_v32, %v14896_v14  ;;  %v15030_v11 = vadd.f32 %v15029_v15, %v15028_v41  ;;  %v15031_v63 = vpop.f32.mrb[210].mxu0  ;;  %v14899_v58 = vadd.f32 %v14898_v31, %v14897_v1  ;;  %v12368_v31 = vld [vmem:[%s21926_s7 + $0x28] sm:$0xff] }
 0x5ff   : > { %v15032_v54 = vpop.f32.mrb[211].mxu0  ;;  %12086 = vmatmul.mubr.bf16.gmra.mrb[252].mxu1 %v20826_v3 }
 0x600   : > { %v21069_v37 = vadd.f32 %v16236_v16, %v15030_v11  ;;  %v16258_v33 = vadd.f32 %v20847_v56, %v14899_v58  ;;  %v15033_v28 = vadd.f32 %v15032_v54, %v15031_v63 }
 0x601   : > { %15863 = vmatmul.mubr.msk.bf16.gmra.mrb[60].mxu0 %vm2365_vm14, %v11707_v30 }
 0x602   : > { %v21075_v32 = vadd.f32 %v16258_v33, %v15033_v28  ;;  %v14900_v8 = vpop.f32.mrb[148].mxu1 }
 0x603   : > { %v14901_v27 = vpop.f32.mrb[149].mxu1 }
 0x604   : > { %v15034_v25 = vpop.f32.mrb[212].mxu0  ;;  %v14902_v3 = vadd.f32 %v14901_v27, %v14900_v8  ;;  %v14903_v61 = vpop.f32.mrb[150].mxu1 }
 0x605   : > { %v15035_v62 = vpop.f32.mrb[213].mxu0  ;;  %v14904_v19 = vpop.f32.mrb[151].mxu1 }
 0x606   : > { %v16225_v56 = vadd.f32 %v20853_v7, %v14902_v3  ;;  %v15036_v45 = vadd.f32 %v15035_v62, %v15034_v25  ;;  %v15037_v47 = vpop.f32.mrb[214].mxu0  ;;  %v14905_v13 = vadd.f32 %v14904_v19, %v14903_v61  ;;  %v12367_v7 = vld [vmem:[%s21926_s7 + $0x20] sm:$0xff] }
 0x607   : > { %v15038_v39 = vpop.f32.mrb[215].mxu0  ;;  %v16045_v11 = vpack.c.bf16 %v12368_v31, %v12367_v7 }
 0x608   : > { %v21078_v6 = vadd.f32 %v16225_v56, %v15036_v45  ;;  %v16247_v48 = vadd.f32 %v20857_v18, %v14905_v13  ;;  %v15039_v36 = vadd.f32 %v15038_v39, %v15037_v47 }
 0x609   : > { %16046 = vmatpush3.bf16.msra.mxu1 %v16045_v11  ;;  %16076 = vmatpush3.bf16.msra.mxu0 %v16045_v11 }
 0x60a   : > { %v21081_v41 = vadd.f32 %v16247_v48, %v15039_v36  ;;  %v14906_v14 = vpop.f32.mrb[152].mxu1  ;;  %16047 = vmatprep.subr.bf16.mxu1 %v17284_v49  ;;  %16077 = vmatprep.subr.bf16.mxu0 %v17284_v49 }
 0x60b   : > { %v14907_v1 = vpop.f32.mrb[153].mxu1 }
 0x60c   : > { %v15040_v12 = vpop.f32.mrb[216].mxu0  ;;  %v14908_v42 = vadd.f32 %v14907_v1, %v14906_v14  ;;  %v14909_v15 = vpop.f32.mrb[154].mxu1 }
 0x60d   : > { %v15041_v43 = vpop.f32.mrb[217].mxu0  ;;  %v14910_v16 = vpop.f32.mrb[155].mxu1 }
 0x60e   : > { %v16280_v18 = vadd.f32 %v20870_v22, %v14908_v42  ;;  %v15042_v63 = vadd.f32 %v15041_v43, %v15040_v12  ;;  %v15043_v58 = vpop.f32.mrb[218].mxu0  ;;  %v14911_v54 = vadd.f32 %v14910_v16, %v14909_v15 }
 0x60f   : > { %v15044_v33 = vpop.f32.mrb[219].mxu0 }
 0x610   : > { %v21090_v28 = vadd.f32 %v16280_v18, %v15042_v63  ;;  %v16302_v30 = vadd.f32 %v20874_v2, %v14911_v54  ;;  %v15045_v8 = vadd.f32 %v15044_v33, %v15043_v58 }
 0x612   : > { %v21095_v27 = vadd.f32 %v16302_v30, %v15045_v8  ;;  %v14912_v25 = vpop.f32.mrb[156].mxu1  ;;  %v12369_v30 = vld [vmem:[%s21926_s7 + $0x30] sm:$0xff]  ;;  %v12370_v8 = vld [vmem:[%s21926_s7 + $0x38] sm:$0xff] }
 0x613   : > { %v14913_v3 = vpop.f32.mrb[157].mxu1 }
 0x614   : > { %v15046_v22 = vpop.f32.mrb[220].mxu0  ;;  %v14914_v61 = vadd.f32 %v14913_v3, %v14912_v25  ;;  %v14915_v62 = vpop.f32.mrb[158].mxu1  ;;  %v16048_v3 = vpack.c.bf16 %v12370_v8, %v12369_v30 }
 0x615   : > { %v15047_v19 = vpop.f32.mrb[221].mxu0  ;;  %v14916_v56 = vpop.f32.mrb[159].mxu1 }
 0x616   : > { %v16269_v45 = vadd.f32 %v20886_v29, %v14914_v61  ;;  %v15048_v47 = vadd.f32 %v15047_v19, %v15046_v22  ;;  %v15049_v13 = vpop.f32.mrb[222].mxu0  ;;  %v14917_v39 = vadd.f32 %v14916_v56, %v14915_v62  ;;  %16049 = vmatpush3.bf16.msra.mxu1 %v16048_v3  ;;  %16079 = vmatpush3.bf16.msra.mxu0 %v16048_v3  ;;  %v12371_v3 = vld [vmem:[%s21926_s7 + $0x40] sm:$0xff] }
 0x617   : > { %v15050_v2 = vpop.f32.mrb[223].mxu0  ;;  %16050 = vmatprep.subr.bf16.mxu1 %v17284_v49  ;;  %16080 = vmatprep.subr.bf16.mxu0 %v17284_v49 }
 0x618   : > { %v21098_v48 = vadd.f32 %v16269_v45, %v15048_v47  ;;  %v16291_v36 = vadd.f32 %v20890_v50, %v14917_v39  ;;  %v15051_v14 = vadd.f32 %v15050_v2, %v15049_v13 }
 0x61a   : > { %v21101_v1 = vadd.f32 %v16291_v36, %v15051_v14  ;;  %v14918_v12 = vpop.f32.mrb[160].mxu1 }
 0x61b   : > { %v14919_v42 = vpop.f32.mrb[161].mxu1 }
 0x61c   : > { %v15052_v15 = vpop.f32.mrb[224].mxu0  ;;  %v14920_v7 = vadd.f32 %v14919_v42, %v14918_v12  ;;  %v14921_v31 = vpop.f32.mrb[162].mxu1 }
 0x61d   : > { %v15053_v43 = vpop.f32.mrb[225].mxu0  ;;  %v14922_v16 = vpop.f32.mrb[163].mxu1 }
 0x61e   : > { %v16324_v29 = vadd.f32 %v20902_v20, %v14920_v7  ;;  %v15054_v11 = vadd.f32 %v15053_v43, %v15052_v15  ;;  %v15055_v18 = vpop.f32.mrb[226].mxu0  ;;  %v14923_v63 = vadd.f32 %v14922_v16, %v14921_v31 }
 0x61f   : > { %v15056_v58 = vpop.f32.mrb[227].mxu0 }
 0x620   : > { %v21104_v54 = vadd.f32 %v16324_v29, %v15054_v11  ;;  %v16346_v50 = vadd.f32 %v20906_v40, %v14923_v63  ;;  %v15057_v33 = vadd.f32 %v15056_v58, %v15055_v18 }
 0x622   : > { %v21113_v25 = vadd.f32 %v16346_v50, %v15057_v33  ;;  %v14924_v20 = vpop.f32.mrb[164].mxu1 }
 0x623   : > { %v14925_v22 = vpop.f32.mrb[165].mxu1 }
 0x624   : > { %v15058_v61 = vpop.f32.mrb[228].mxu0  ;;  %v14926_v62 = vadd.f32 %v14925_v22, %v14924_v20  ;;  %v14927_v19 = vpop.f32.mrb[166].mxu1 }
 0x625   : > { %v15059_v40 = vpop.f32.mrb[229].mxu0  ;;  %v14928_v56 = vpop.f32.mrb[167].mxu1 }
 0x626   : > { %v16313_v45 = vadd.f32 %v20918_v55, %v14926_v62  ;;  %v15060_v47 = vadd.f32 %v15059_v40, %v15058_v61  ;;  %v15061_v13 = vpop.f32.mrb[230].mxu0  ;;  %v14929_v39 = vadd.f32 %v14928_v56, %v14927_v19 }
 0x627   : > { %v15062_v2 = vpop.f32.mrb[231].mxu0 }
 0x628   : > { %v21118_v36 = vadd.f32 %v16313_v45, %v15060_v47  ;;  %v16335_v14 = vadd.f32 %v20922_v46, %v14929_v39  ;;  %v15063_v12 = vadd.f32 %v15062_v2, %v15061_v13 }
 0x62a   : > { %v21121_v42 = vadd.f32 %v16335_v14, %v15063_v12  ;;  %v14930_v15 = vpop.f32.mrb[168].mxu1 }
 0x62b   : > { %v14931_v7 = vpop.f32.mrb[169].mxu1 }
 0x62c   : > { %v15064_v31 = vpop.f32.mrb[232].mxu0  ;;  %v14932_v43 = vadd.f32 %v14931_v7, %v14930_v15  ;;  %v14933_v16 = vpop.f32.mrb[170].mxu1 }
 0x62d   : > { %v15065_v29 = vpop.f32.mrb[233].mxu0  ;;  %v14934_v11 = vpop.f32.mrb[171].mxu1 }
 0x62e   : > { %v16368_v55 = vadd.f32 %v20934_v51, %v14932_v43  ;;  %v15066_v18 = vadd.f32 %v15065_v29, %v15064_v31  ;;  %v15067_v63 = vpop.f32.mrb[234].mxu0  ;;  %v14935_v58 = vadd.f32 %v14934_v11, %v14933_v16  ;;  %v12372_v51 = vld [vmem:[%s21926_s7 + $0x48] sm:$0xff] }
 0x62f   : > { %v15068_v50 = vpop.f32.mrb[235].mxu0  ;;  %v16051_v61 = vpack.c.bf16 %v12372_v51, %v12371_v3 }
 0x630   : > { %v21124_v33 = vadd.f32 %v16368_v55, %v15066_v18  ;;  %v16390_v46 = vadd.f32 %v20938_v44, %v14935_v58  ;;  %v15069_v30 = vadd.f32 %v15068_v50, %v15067_v63 }
 0x631   : > { %16052 = vmatpush3.bf16.msra.mxu1 %v16051_v61  ;;  %16082 = vmatpush3.bf16.msra.mxu0 %v16051_v61 }
 0x632   : > { %v21127_v8 = vadd.f32 %v16390_v46, %v15069_v30  ;;  %v14936_v20 = vpop.f32.mrb[172].mxu1  ;;  %16053 = vmatprep.subr.bf16.mxu1 %v17284_v49  ;;  %16083 = vmatprep.subr.bf16.mxu0 %v17284_v49 }
 0x633   : > { %v14937_v22 = vpop.f32.mrb[173].mxu1 }
 0x634   : > { %v15070_v62 = vpop.f32.mrb[236].mxu0  ;;  %v14938_v19 = vadd.f32 %v14937_v22, %v14936_v20  ;;  %v14939_v40 = vpop.f32.mrb[174].mxu1  ;;  %v12373_v22 = vld [vmem:[%s21926_s7 + $0x50] sm:$0xff] }
 0x635   : > { %v15071_v56 = vpop.f32.mrb[237].mxu0  ;;  %v14940_v45 = vpop.f32.mrb[175].mxu1 }
 0x636   : > { %v16357_v44 = vadd.f32 %v20950_v17, %v14938_v19  ;;  %v15072_v47 = vadd.f32 %v15071_v56, %v15070_v62  ;;  %v15073_v13 = vpop.f32.mrb[238].mxu0  ;;  %v14941_v39 = vadd.f32 %v14940_v45, %v14939_v40 }
 0x637   : > { %v15074_v2 = vpop.f32.mrb[239].mxu0 }
 0x638   : > { %v21138_v14 = vadd.f32 %v16357_v44, %v15072_v47  ;;  %v16379_v12 = vadd.f32 %v20954_v60, %v14941_v39  ;;  %v15075_v15 = vadd.f32 %v15074_v2, %v15073_v13 }
 0x63a   : > { %v21141_v7 = vadd.f32 %v16379_v12, %v15075_v15  ;;  %v14942_v31 = vpop.f32.mrb[176].mxu1 }
 0x63b   : > { %v14943_v43 = vpop.f32.mrb[177].mxu1 }
 0x63c   : > { %v15076_v16 = vpop.f32.mrb[240].mxu0  ;;  %v14944_v29 = vadd.f32 %v14943_v43, %v14942_v31  ;;  %v14945_v17 = vpop.f32.mrb[178].mxu1 }
 0x63d   : > { %v15077_v11 = vpop.f32.mrb[241].mxu0  ;;  %v14946_v55 = vpop.f32.mrb[179].mxu1 }
 0x63e   : > { %v16412_v18 = vadd.f32 %v20966_v52, %v14944_v29  ;;  %v15078_v63 = vadd.f32 %v15077_v11, %v15076_v16  ;;  %v15079_v58 = vpop.f32.mrb[242].mxu0  ;;  %v14947_v50 = vadd.f32 %v14946_v55, %v14945_v17  ;;  %v12374_v52 = vld [vmem:[%s21926_s7 + $0x58] sm:$0xff] }
 0x63f   : > { %v15080_v46 = vpop.f32.mrb[243].mxu0  ;;  %v16054_v62 = vpack.c.bf16 %v12374_v52, %v12373_v22 }
 0x640   : > { %v21144_v30 = vadd.f32 %v16412_v18, %v15078_v63  ;;  %v16434_v60 = vadd.f32 %v20972_v21, %v14947_v50  ;;  %v15081_v20 = vadd.f32 %v15080_v46, %v15079_v58 }
 0x641   : > { %16055 = vmatpush3.bf16.msra.mxu1 %v16054_v62  ;;  %16085 = vmatpush3.bf16.msra.mxu0 %v16054_v62 }
 0x642   : > { %v21147_v3 = vadd.f32 %v16434_v60, %v15081_v20  ;;  %v14948_v51 = vpop.f32.mrb[180].mxu1  ;;  %16056 = vmatprep.subr.bf16.mxu1 %v17284_v49  ;;  %16086 = vmatprep.subr.bf16.mxu0 %v17284_v49 }
 0x643   : > { %v14949_v61 = vpop.f32.mrb[181].mxu1 }
 0x644   : > { %v15082_v19 = vpop.f32.mrb[244].mxu0  ;;  %v14950_v40 = vadd.f32 %v14949_v61, %v14948_v51  ;;  %v14951_v56 = vpop.f32.mrb[182].mxu1  ;;  %v12375_v61 = vld [vmem:[%s21926_s7 + $0x60] sm:$0xff] }
 0x645   : > { %v15083_v45 = vpop.f32.mrb[245].mxu0  ;;  %v14952_v44 = vpop.f32.mrb[183].mxu1 }
 0x646   : > { %v16401_v21 = vadd.f32 %v20979_v9, %v14950_v40  ;;  %v15084_v47 = vadd.f32 %v15083_v45, %v15082_v19  ;;  %v15085_v13 = vpop.f32.mrb[246].mxu0  ;;  %v14953_v39 = vadd.f32 %v14952_v44, %v14951_v56 }
 0x647   : > { %v15086_v2 = vpop.f32.mrb[247].mxu0 }
 0x648   : > { %v21158_v12 = vadd.f32 %v16401_v21, %v15084_v47  ;;  %v16423_v15 = vadd.f32 %v20982_v0, %v14953_v39  ;;  %v15087_v31 = vadd.f32 %v15086_v2, %v15085_v13 }
 0x64a   : > { %v21161_v43 = vadd.f32 %v16423_v15, %v15087_v31  ;;  %v14954_v16 = vpop.f32.mrb[184].mxu1 }
 0x64b   : > { %v14955_v29 = vpop.f32.mrb[185].mxu1 }
 0x64c   : > { %v15088_v17 = vpop.f32.mrb[248].mxu0  ;;  %v14956_v11 = vadd.f32 %v14955_v29, %v14954_v16  ;;  %v14957_v9 = vpop.f32.mrb[186].mxu1 }
 0x64d   : > { %v15089_v55 = vpop.f32.mrb[249].mxu0  ;;  %v14958_v18 = vpop.f32.mrb[187].mxu1 }
 0x64e   : > { %v16456_v63 = vadd.f32 %v20989_v24, %v14956_v11  ;;  %v15090_v58 = vadd.f32 %v15089_v55, %v15088_v17  ;;  %v15091_v50 = vpop.f32.mrb[250].mxu0  ;;  %v14959_v46 = vadd.f32 %v14958_v18, %v14957_v9  ;;  %v12376_v24 = vld [vmem:[%s21926_s7 + $0x68] sm:$0xff] }
 0x64f   : > { %v15092_v60 = vpop.f32.mrb[251].mxu0  ;;  %v16057_v19 = vpack.c.bf16 %v12376_v24, %v12375_v61 }
 0x650   : > { %v21164_v20 = vadd.f32 %v16456_v63, %v15090_v58  ;;  %v16478_v0 = vadd.f32 %v20992_v5, %v14959_v46  ;;  %v15093_v51 = vadd.f32 %v15092_v60, %v15091_v50 }
 0x651   : > { %16058 = vmatpush3.bf16.msra.mxu1 %v16057_v19  ;;  %16088 = vmatpush3.bf16.msra.mxu0 %v16057_v19 }
 0x652   : > { %v21167_v22 = vadd.f32 %v16478_v0, %v15093_v51  ;;  %v14960_v52 = vpop.f32.mrb[188].mxu1  ;;  %16059 = vmatprep.subr.bf16.mxu1 %v17284_v49  ;;  %16089 = vmatprep.subr.bf16.mxu0 %v17284_v49 }
 0x653   : > { %v14961_v62 = vpop.f32.mrb[189].mxu1 }
 0x654   : > { %v15094_v40 = vpop.f32.mrb[252].mxu0  ;;  %v14962_v56 = vadd.f32 %v14961_v62, %v14960_v52  ;;  %v14963_v45 = vpop.f32.mrb[190].mxu1 }
 0x655   : > { %v15095_v44 = vpop.f32.mrb[253].mxu0  ;;  %v14964_v21 = vpop.f32.mrb[191].mxu1 }
 0x656   : > { %v16445_v5 = vadd.f32 %v20999_v34, %v14962_v56  ;;  %v15096_v47 = vadd.f32 %v15095_v44, %v15094_v40  ;;  %v15097_v13 = vpop.f32.mrb[254].mxu0  ;;  %v14965_v39 = vadd.f32 %v14964_v21, %v14963_v45  ;;  %v12378_v56 = vld [vmem:[%s21926_s7 + $0x78] sm:$0xff] }
 0x657   : > { %v15098_v2 = vpop.f32.mrb[255].mxu0 }
 0x658   : > { %v21178_v15 = vadd.f32 %v16445_v5, %v15096_v47  ;;  %v16467_v31 = vadd.f32 %v21002_v26, %v14965_v39  ;;  %v15099_v16 = vadd.f32 %v15098_v2, %v15097_v13 }
 0x65a   : > { %v21181_v29 = vadd.f32 %v16467_v31, %v15099_v16  ;;  %v15138_v17 = vpop.f32.mrb[192].mxu1 }
 0x65b   : > { %v15139_v11 = vpop.f32.mrb[193].mxu1 }
 0x65c   : > { %v15140_v9 = vadd.f32 %v15139_v11, %v15138_v17  ;;  %v15141_v55 = vpop.f32.mrb[194].mxu1 }
 0x65d   : > { %v15142_v34 = vpop.f32.mrb[195].mxu1 }
 0x65e   : > { %v15143_v18 = vadd.f32 %v15142_v34, %v15141_v55  ;;  %v21184_v63 = vadd.f32 %v21009_v35, %v15140_v9 }
 0x660   : > { %v21187_v58 = vadd.f32 %v21015_v10, %v15143_v18  ;;  %v12377_v10 = vld [vmem:[%s21926_s7 + $0x70] sm:$0xff] }
 0x661   : > { %v16060_v44 = vpack.c.bf16 %v12378_v56, %v12377_v10 }
 0x662   : > { %v15144_v50 = vpop.f32.mrb[196].mxu1 }
 0x663   : > { %v15145_v46 = vpop.f32.mrb[197].mxu1  ;;  %16061 = vmatpush3.bf16.msra.mxu1 %v16060_v44  ;;  %16091 = vmatpush3.bf16.msra.mxu0 %v16060_v44 }
 0x664   : > { %v15146_v60 = vadd.f32 %v15145_v46, %v15144_v50  ;;  %v15147_v0 = vpop.f32.mrb[198].mxu1  ;;  %16062 = vmatprep.subr.bf16.mxu1 %v17284_v49 }
 0x665   : > { %v15148_v26 = vpop.f32.mrb[199].mxu1 }
 0x666   : > { %v15149_v51 = vadd.f32 %v15148_v26, %v15147_v0  ;;  %v21190_v52 = vadd.f32 %v21021_v53, %v15146_v60 }
 0x668   : > { %v21193_v61 = vadd.f32 %v21026_v4, %v15149_v51  ;;  %v17286_v4 = vmov 0.0  }
 0x669   : > { %15898 = vmatprep.mubr.msk.f32.mxu1 %vm17285_vm2, %v17286_v4  ;;  %15944 = vmatprep.mubr.msk.f32.mxu0 %vm17285_vm2, %v17286_v4 }
 0x66a   : > { %v15150_v24 = vpop.f32.mrb[200].mxu1 }
 0x66b   : > { %v15151_v62 = vpop.f32.mrb[201].mxu1 }
 0x66c   : > { %v15152_v19 = vadd.f32 %v15151_v62, %v15150_v24  ;;  %v15153_v35 = vpop.f32.mrb[202].mxu1 }
 0x66d   : > { %v15154_v40 = vpop.f32.mrb[203].mxu1 }
 0x66e   : > { %v15155_v45 = vadd.f32 %v15154_v40, %v15153_v35  ;;  %v21202_v53 = vadd.f32 %v21039_v38, %v15152_v19 }
 0x670   : > { %v21209_v21 = vadd.f32 %v21045_v23, %v15155_v45 }
 0x672   : > { %v15156_v5 = vpop.f32.mrb[204].mxu1 }
 0x673   : > { %v15157_v47 = vpop.f32.mrb[205].mxu1 }
 0x674   : > { %v15158_v38 = vadd.f32 %v15157_v47, %v15156_v5  ;;  %v15159_v13 = vpop.f32.mrb[206].mxu1 }
 0x675   : > { %v15160_v39 = vpop.f32.mrb[207].mxu1 }
 0x676   : > { %v15161_v2 = vadd.f32 %v15160_v39, %v15159_v13  ;;  %v16183_v31 = vadd.f32 %v21051_v57, %v15158_v38 }
 0x678   : > { %v21214_v16 = vadd.f32 %v21057_v59, %v15161_v2 }
 0x67a   : > { %v15162_v17 = vpop.f32.mrb[208].mxu1 }
 0x67b   : > { %v15163_v11 = vpop.f32.mrb[209].mxu1 }
 0x67c   : > { %v15164_v9 = vadd.f32 %v15163_v11, %v15162_v17  ;;  %v15165_v23 = vpop.f32.mrb[210].mxu1 }
 0x67d   : > { %v15166_v55 = vpop.f32.mrb[211].mxu1 }
 0x67e   : > { %v15167_v34 = vadd.f32 %v15166_v55, %v15165_v23  ;;  %v21217_v18 = vadd.f32 %v21069_v37, %v15164_v9 }
 0x680   : > { %v21220_v50 = vadd.f32 %v21075_v32, %v15167_v34 }
 0x682   : > { %v15168_v46 = vpop.f32.mrb[212].mxu1 }
 0x683   : > { %v15169_v60 = vpop.f32.mrb[213].mxu1 }
 0x684   : > { %v15170_v0 = vadd.f32 %v15169_v60, %v15168_v46  ;;  %v15171_v26 = vpop.f32.mrb[214].mxu1 }
 0x685   : > { %v15172_v57 = vpop.f32.mrb[215].mxu1 }
 0x686   : > { %v15173_v51 = vadd.f32 %v15172_v57, %v15171_v26  ;;  %v21223_v59 = vadd.f32 %v21078_v6, %v15170_v0 }
 0x688   : > { %v21226_v24 = vadd.f32 %v21081_v41, %v15173_v51 }
 0x68a   : > { %v15174_v62 = vpop.f32.mrb[216].mxu1 }
 0x68b   : > { %v15175_v19 = vpop.f32.mrb[217].mxu1 }
 0x68c   : > { %v15176_v35 = vadd.f32 %v15175_v19, %v15174_v62  ;;  %v15177_v37 = vpop.f32.mrb[218].mxu1 }
 0x68d   : > { %v15178_v40 = vpop.f32.mrb[219].mxu1 }
 0x68e   : > { %v15179_v10 = vadd.f32 %v15178_v40, %v15177_v37  ;;  %v21229_v32 = vadd.f32 %v21090_v28, %v15176_v35 }
 0x690   : > { %v21232_v56 = vadd.f32 %v21095_v27, %v15179_v10 }
 0x692   : > { %v15180_v45 = vpop.f32.mrb[220].mxu1 }
 0x693   : > { %v15181_v44 = vpop.f32.mrb[221].mxu1 }
 0x694   : > { %v15182_v5 = vadd.f32 %v15181_v44, %v15180_v45  ;;  %v15183_v6 = vpop.f32.mrb[222].mxu1 }
 0x695   : > { %v15184_v47 = vpop.f32.mrb[223].mxu1 }
 0x696   : > { %v15185_v38 = vadd.f32 %v15184_v47, %v15183_v6  ;;  %v21235_v41 = vadd.f32 %v21098_v48, %v15182_v5  ;;  %v21248_v48 = vld [vmem:[%s21923_s4] ss:$0 sm:$0xff] }
 0x698   : > { %v21238_v13 = vadd.f32 %v21101_v1, %v15185_v38 }
 0x69a   : > { %v15186_v39 = vpop.f32.mrb[224].mxu1 }
 0x69b   : > { %v15187_v2 = vpop.f32.mrb[225].mxu1 }
 0x69c   : > { %v15836_v17 = vpop.f32.mrb[32].mxu0  ;;  %v15188_v28 = vadd.f32 %v15187_v2, %v15186_v39  ;;  %v15189_v11 = vpop.f32.mrb[226].mxu1 }
 0x69d   : > { %v16140_v27 = vadd.f32 %v21190_v52, %v15836_v17  ;;  %v12128_v9 = vpop.f32.mrb[33].mxu0  ;;  %v15190_v23 = vpop.f32.mrb[227].mxu1 }
 0x69e   : > { %v16151_v55 = vadd.f32 %v21184_v63, %v12128_v9  ;;  %v15837_v34 = vpop.f32.mrb[34].mxu0  ;;  %v15191_v46 = vadd.f32 %v15190_v23, %v15189_v11  ;;  %v21243_v60 = vadd.f32 %v21104_v54, %v15188_v28 }
 0x69f   : > { %v16162_v1 = vadd.f32 %v21193_v61, %v15837_v34  ;;  %v12131_v0 = vpop.f32.mrb[35].mxu0  ;;  %v21262_v62 = vadd.f32 %v16140_v27, %v21248_v48 }
 0x6a0   : > { %v16173_v26 = vadd.f32 %v21187_v58, %v12131_v0  ;;  %v21253_v52 = vadd.f32 %v21113_v25, %v15191_v46  ;;  %v21256_v63 = vadd.f32 %v16151_v55, %v21248_v48 }
 0x6a1   : > { %v21267_v25 = vadd.f32 %v16162_v1, %v21248_v48 }
 0x6a2   : > { %v21259_v57 = vadd.f32 %v16173_v26, %v21248_v48  ;;  %v15192_v54 = vpop.f32.mrb[228].mxu1 }
 0x6a3   : > { %v15193_v51 = vpop.f32.mrb[229].mxu1 }
 0x6a4   : > { %v12326_v61 = vadd.f32 %v21259_v57, %v21256_v63  ;;  %v15840_v19 = vpop.f32.mrb[36].mxu0  ;;  %v15194_v35 = vadd.f32 %v15193_v51, %v15192_v54  ;;  %v15195_v58 = vpop.f32.mrb[230].mxu1 }
 0x6a5   : > { %v16184_v37 = vadd.f32 %v16183_v31, %v15840_v19  ;;  %v12144_v40 = vpop.f32.mrb[37].mxu0  ;;  %v15196_v10 = vpop.f32.mrb[231].mxu1 }
 0x6a6   : > { %v12327_v45 = vadd.f32 %v12326_v61, %v21262_v62  ;;  %v16195_v44 = vadd.f32 %v21202_v53, %v12144_v40  ;;  %v15841_v5 = vpop.f32.mrb[38].mxu0  ;;  %v15197_v6 = vadd.f32 %v15196_v10, %v15195_v58  ;;  %v21272_v47 = vadd.f32 %v21118_v36, %v15194_v35 }
 0x6a7   : > { %v16206_v38 = vadd.f32 %v21214_v16, %v15841_v5  ;;  %v12147_v39 = vpop.f32.mrb[39].mxu0  ;;  %v21288_v16 = vadd.f32 %v16184_v37, %v21248_v48 }
 0x6a8   : > { %v21276_v2 = vadd.f32 %v16195_v44, %v21248_v48  ;;  %v12328_v17 = vadd.f32 %v12327_v45, %v21267_v25  ;;  %v16217_v31 = vadd.f32 %v21209_v21, %v12147_v39  ;;  %v21281_v28 = vadd.f32 %v21121_v42, %v15197_v6 }
 0x6a9   : > { %v21292_v21 = vadd.f32 %v16206_v38, %v21248_v48 }
 0x6aa   : > { %v12329_v53 = vadd.f32 %v12328_v17, %v21276_v2  ;;  %v21285_v11 = vadd.f32 %v16217_v31, %v21248_v48  ;;  %v15198_v36 = vpop.f32.mrb[232].mxu1 }
 0x6ab   : > { %v15199_v27 = vpop.f32.mrb[233].mxu1 }
 0x6ac   : > { %v12330_v9 = vadd.f32 %v12329_v53, %v21285_v11  ;;  %v15844_v23 = vpop.f32.mrb[40].mxu0  ;;  %v15200_v55 = vadd.f32 %v15199_v27, %v15198_v36  ;;  %v15201_v34 = vpop.f32.mrb[234].mxu1 }
 0x6ad   : > { %v16228_v42 = vadd.f32 %v21223_v59, %v15844_v23  ;;  %v12160_v46 = vpop.f32.mrb[41].mxu0  ;;  %v15202_v1 = vpop.f32.mrb[235].mxu1 }
 0x6ae   : > { %v12331_v0 = vadd.f32 %v12330_v9, %v21288_v16  ;;  %v16239_v26 = vadd.f32 %v21217_v18, %v12160_v46  ;;  %v15845_v54 = vpop.f32.mrb[42].mxu0  ;;  %v15203_v51 = vadd.f32 %v15202_v1, %v15201_v34  ;;  %v21298_v61 = vadd.f32 %v21124_v33, %v15200_v55 }
 0x6af   : > { %v16250_v19 = vadd.f32 %v21226_v24, %v15845_v54  ;;  %v12163_v35 = vpop.f32.mrb[43].mxu0  ;;  %v21314_v24 = vadd.f32 %v16228_v42, %v21248_v48 }
 0x6b0   : > { %v21302_v58 = vadd.f32 %v16239_v26, %v21248_v48  ;;  %v12332_v37 = vadd.f32 %v12331_v0, %v21292_v21  ;;  %v16261_v59 = vadd.f32 %v21220_v50, %v12163_v35  ;;  %v21307_v40 = vadd.f32 %v21127_v8, %v15203_v51 }
 0x6b1   : > { %v21318_v50 = vadd.f32 %v16250_v19, %v21248_v48 }
 0x6b2   : > { %v12333_v18 = vadd.f32 %v12332_v37, %v21302_v58  ;;  %v21311_v10 = vadd.f32 %v16261_v59, %v21248_v48  ;;  %v15204_v33 = vpop.f32.mrb[236].mxu1 }
 0x6b3   : > { %v15205_v45 = vpop.f32.mrb[237].mxu1 }
 0x6b4   : > { %v12334_v44 = vadd.f32 %v12333_v18, %v21311_v10  ;;  %v15848_v5 = vpop.f32.mrb[44].mxu0  ;;  %v15206_v6 = vadd.f32 %v15205_v45, %v15204_v33  ;;  %v15207_v38 = vpop.f32.mrb[238].mxu1 }
 0x6b5   : > { %v16272_v8 = vadd.f32 %v21235_v41, %v15848_v5  ;;  %v12176_v39 = vpop.f32.mrb[45].mxu0  ;;  %v15208_v17 = vpop.f32.mrb[239].mxu1 }
 0x6b6   : > { %v12335_v31 = vadd.f32 %v12334_v44, %v21314_v24  ;;  %v16283_v53 = vadd.f32 %v21229_v32, %v12176_v39  ;;  %v15849_v36 = vpop.f32.mrb[46].mxu0  ;;  %v15209_v27 = vadd.f32 %v15208_v17, %v15207_v38  ;;  %v16359_v9 = vadd.f32 %v21138_v14, %v15206_v6 }
 0x6b7   : > { %v16294_v23 = vadd.f32 %v21238_v13, %v15849_v36  ;;  %v12179_v55 = vpop.f32.mrb[47].mxu0  ;;  %v21336_v14 = vadd.f32 %v16272_v8, %v21248_v48 }
 0x6b8   : > { %v21326_v34 = vadd.f32 %v16283_v53, %v21248_v48  ;;  %v12336_v42 = vadd.f32 %v12335_v31, %v21318_v50  ;;  %v16305_v41 = vadd.f32 %v21232_v56, %v12179_v55  ;;  %v16381_v46 = vadd.f32 %v21141_v7, %v15209_v27 }
 0x6b9   : > { %v21340_v35 = vadd.f32 %v16294_v23, %v21248_v48 }
 0x6ba   : > { %v12337_v1 = vadd.f32 %v12336_v42, %v21326_v34  ;;  %v21333_v32 = vadd.f32 %v16305_v41, %v21248_v48  ;;  %v15210_v0 = vpop.f32.mrb[240].mxu1 }
 0x6bb   : > { %v15211_v26 = vpop.f32.mrb[241].mxu1 }
 0x6bc   : > { %v12338_v13 = vadd.f32 %v12337_v1, %v21333_v32  ;;  %v15852_v54 = vpop.f32.mrb[48].mxu0  ;;  %v15212_v51 = vadd.f32 %v15211_v26, %v15210_v0  ;;  %v15213_v19 = vpop.f32.mrb[242].mxu1 }
 0x6bd   : > { %v16316_v7 = vadd.f32 %v21272_v47, %v15852_v54  ;;  %v12192_v56 = vpop.f32.mrb[49].mxu0  ;;  %v15214_v37 = vpop.f32.mrb[243].mxu1 }
 0x6be   : > { %v12339_v59 = vadd.f32 %v12338_v13, %v21336_v14  ;;  %v16327_v18 = vadd.f32 %v21243_v60, %v12192_v56  ;;  %v15853_v33 = vpop.f32.mrb[50].mxu0  ;;  %v15215_v45 = vadd.f32 %v15214_v37, %v15213_v19  ;;  %v16414_v44 = vadd.f32 %v21144_v30, %v15212_v51 }
 0x6bf   : > { %v16338_v5 = vadd.f32 %v21281_v28, %v15853_v33  ;;  %v12195_v6 = vpop.f32.mrb[51].mxu0  ;;  %v21358_v30 = vadd.f32 %v16316_v7, %v21248_v48 }
 0x6c0   : > { %v21348_v38 = vadd.f32 %v16327_v18, %v21248_v48  ;;  %v12340_v8 = vadd.f32 %v12339_v59, %v21340_v35  ;;  %v16349_v47 = vadd.f32 %v21253_v52, %v12195_v6  ;;  %v16436_v39 = vadd.f32 %v21147_v3, %v15215_v45 }
 0x6c1   : > { %v21362_v55 = vadd.f32 %v16338_v5, %v21248_v48 }
 0x6c2   : > { %v12341_v17 = vadd.f32 %v12340_v8, %v21348_v38  ;;  %v21355_v60 = vadd.f32 %v16349_v47, %v21248_v48  ;;  %v15216_v31 = vpop.f32.mrb[244].mxu1 }
 0x6c3   : > { %v15217_v53 = vpop.f32.mrb[245].mxu1 }
 0x6c4   : > { %v12342_v28 = vadd.f32 %v12341_v17, %v21355_v60  ;;  %v15856_v36 = vpop.f32.mrb[52].mxu0  ;;  %v15218_v27 = vadd.f32 %v15217_v53, %v15216_v31  ;;  %v15219_v23 = vpop.f32.mrb[246].mxu1 }
 0x6c5   : > { %v16360_v52 = vadd.f32 %v16359_v9, %v15856_v36  ;;  %v12208_v3 = vpop.f32.mrb[53].mxu0  ;;  %v15220_v42 = vpop.f32.mrb[247].mxu1 }
 0x6c6   : > { %v12343_v41 = vadd.f32 %v12342_v28, %v21358_v30  ;;  %v16371_v1 = vadd.f32 %v21298_v61, %v12208_v3  ;;  %v15857_v0 = vpop.f32.mrb[54].mxu0  ;;  %v15221_v26 = vadd.f32 %v15220_v42, %v15219_v23  ;;  %v16403_v13 = vadd.f32 %v21158_v12, %v15218_v27 }
 0x6c7   : > { %v16382_v54 = vadd.f32 %v16381_v46, %v15857_v0  ;;  %v12211_v51 = vpop.f32.mrb[55].mxu0  ;;  %v21378_v12 = vadd.f32 %v16360_v52, %v21248_v48 }
 0x6c8   : > { %v21368_v19 = vadd.f32 %v16371_v1, %v21248_v48  ;;  %v12344_v7 = vadd.f32 %v12343_v41, %v21362_v55  ;;  %v16393_v56 = vadd.f32 %v21307_v40, %v12211_v51  ;;  %v16425_v9 = vadd.f32 %v21161_v43, %v15221_v26 }
 0x6c9   : > { %v21382_v6 = vadd.f32 %v16382_v54, %v21248_v48 }
 0x6ca   : > { %v12345_v37 = vadd.f32 %v12344_v7, %v21368_v19  ;;  %v21375_v59 = vadd.f32 %v16393_v56, %v21248_v48  ;;  %v15222_v61 = vpop.f32.mrb[248].mxu1 }
 0x6cb   : > { %v15223_v18 = vpop.f32.mrb[249].mxu1 }
 0x6cc   : > { %v12346_v46 = vadd.f32 %v12345_v37, %v21375_v59  ;;  %v15860_v33 = vpop.f32.mrb[56].mxu0  ;;  %v15224_v45 = vadd.f32 %v15223_v18, %v15222_v61  ;;  %v15225_v5 = vpop.f32.mrb[250].mxu1 }
 0x6cd   : > { %v16404_v40 = vadd.f32 %v16403_v13, %v15860_v33  ;;  %v12224_v43 = vpop.f32.mrb[57].mxu0  ;;  %v15226_v8 = vpop.f32.mrb[251].mxu1 }
 0x6ce   : > { %v12347_v47 = vadd.f32 %v12346_v46, %v21378_v12  ;;  %v16415_v17 = vadd.f32 %v16414_v44, %v12224_v43  ;;  %v15861_v31 = vpop.f32.mrb[58].mxu0  ;;  %v15227_v53 = vadd.f32 %v15226_v8, %v15225_v5  ;;  %v16458_v28 = vadd.f32 %v21164_v20, %v15224_v45 }
 0x6cf   : > { %v16426_v36 = vadd.f32 %v16425_v9, %v15861_v31  ;;  %v12227_v27 = vpop.f32.mrb[59].mxu0  ;;  %v21396_v26 = vadd.f32 %v16404_v40, %v21248_v48 }
 0x6d0   : > { %v21387_v23 = vadd.f32 %v16415_v17, %v21248_v48  ;;  %v12348_v52 = vadd.f32 %v12347_v47, %v21382_v6  ;;  %v16437_v3 = vadd.f32 %v16436_v39, %v12227_v27  ;;  %v16480_v42 = vadd.f32 %v21167_v22, %v15227_v53 }
 0x6d1   : > { %v21400_v7 = vadd.f32 %v16426_v36, %v21248_v48 }
 0x6d2   : > { %v12349_v41 = vadd.f32 %v12348_v52, %v21387_v23  ;;  %v21393_v1 = vadd.f32 %v16437_v3, %v21248_v48  ;;  %v15228_v44 = vpop.f32.mrb[252].mxu1 }
 0x6d3   : > { %v15229_v0 = vpop.f32.mrb[253].mxu1 }
 0x6d4   : > { %v12350_v20 = vadd.f32 %v12349_v41, %v21393_v1  ;;  %v15864_v13 = vpop.f32.mrb[60].mxu0  ;;  %v15230_v54 = vadd.f32 %v15229_v0, %v15228_v44  ;;  %v15231_v51 = vpop.f32.mrb[254].mxu1  ;;  %v12450_v41 = vld [vmem:[%s21927_s8 + $0x8] sm:$0xff] }
 0x6d5   : > { %v12240_v39 = vpop.f32.mrb[61].mxu0  ;;  %v15232_v22 = vpop.f32.mrb[255].mxu1 }
 0x6d6   : > { %v12351_v56 = vadd.f32 %v12350_v20, %v21396_v26  ;;  %v16447_v9 = vadd.f32 %v21178_v15, %v15230_v54  ;;  %v16459_v37 = vadd.f32 %v16458_v28, %v12240_v39  ;;  %v15865_v61 = vpop.f32.mrb[62].mxu0  ;;  %v15233_v18 = vadd.f32 %v15232_v22, %v15231_v51  ;;  %v12451_v20 = vld [vmem:[%s21927_s8 + $0x10] sm:$0xff] }
 0x6d7   : > { %v12243_v46 = vpop.f32.mrb[63].mxu0  ;;  %v12526_v22 = vlaneseq }
 0x6d8   : > { %v16448_v33 = vadd.f32 %v16447_v9, %v15864_v13  ;;  %v21405_v45 = vadd.f32 %v16459_v37, %v21248_v48  ;;  %v12352_v5 = vadd.f32 %v12351_v56, %v21400_v7  ;;  %v16469_v40 = vadd.f32 %v21181_v29, %v15233_v18  ;;  %v12452_v13 = vld [vmem:[%s21927_s8 + $0x18] sm:$0xff] }
 0x6d9   : > { %v16481_v43 = vadd.f32 %v16480_v42, %v12243_v46  ;;  %v12449_v42 = vld [vmem:[%s21927_s8] sm:$0xff]  ;;  %v16066_v54 = vpack.c.bf16 %v12452_v13, %v12451_v20  ;;  %v21442_v56 = vshrl.u32 %v12526_v22, 7 }
 0x6da   : > { %v12353_v8 = vadd.f32 %v12352_v5, %v21405_v45  ;;  %v16470_v47 = vadd.f32 %v16469_v40, %v15865_v61  ;;  %v21414_v15 = vadd.f32 %v16448_v33, %v21248_v48  ;;  %v16063_v0 = vpack.c.bf16 %v12450_v41, %v12449_v42 }
 0x6db   : > { %v21411_v17 = vadd.f32 %v16481_v43, %v21248_v48  ;;  %v12528_v61 = vsub.s32 0, %v21442_v56 }
 0x6dc   : > { %v21418_v53 = vadd.f32 %v16470_v47, %v21248_v48 }
 0x6dd   : > { %v12354_v31 = vadd.f32 %v12353_v8, %v21411_v17 }
 0x6df   : > { %v12355_v28 = vadd.f32 %v12354_v31, %v21414_v15 }
 0x6e1   : > { %v12356_v36 = vadd.f32 %v12355_v28, %v21418_v53 }
 0x6e3   : > { %v12357_v29 = vrot.slane %v12356_v36, 4 }
 0x6e5   : > { %v12358_v27 = vadd.f32 %v12357_v29, %v12356_v36 }
 0x6e7   : > { %v12359_v52 = vrot.slane %v12358_v27, 2 }
 0x6e9   : > { %v12360_v3 = vadd.f32 %v12359_v52, %v12358_v27 }
 0x6eb   : > { %v12361_v44 = vrot.slane %v12360_v3, 1 }
 0x6ed   : > { %v12362_v48 = vadd.f32 %v12361_v44, %v12360_v3 }
 0x6ef   : > { %15899 = vmatmul.mubr.f32.vlgmr.msra.gmra.mrb[0].mxu1 %v12362_v48 }
 0x6f0   : > { %16064 = vmatpush3.bf16.msra.mxu1 %v16063_v0  ;;  %15909 = vmatprep.mubr.msk.f32.mxu1 %vm17285_vm2, %v17286_v4 }
 0x6f1   : > { %16065 = vmatprep.subr.bf16.mxu1 %v17284_v49 }
 0x6f4   : > { %16067 = vmatpush3.bf16.msra.mxu1 %v16066_v54 }
 0x6f5   : > { %16092 = vmatprep.subr.bf16.mxu1 %v17284_v49 }
 0x7c2   : > { %v12445_v51 = vpop.f32.mrb[0].mxu1 }
 0x7c3   : > { %v15900_v39 = vpop.f32.mrb[1].mxu1  ;;  %15910 = vmatmul.mubr.msk.f32.vlgmr.msra.gmra.mrb[2].mxu1 %vm647_vm0, %v12445_v51 }
 0x7c4   : > { %16094 = vmatpush3.bf16.msra.mxu1 %v16063_v0  ;;  %15955 = vmatprep.mubr.msk.f32.mxu1 %vm17285_vm2, %v17286_v4 }
 0x7c5   : > { %16095 = vmatprep.subr.bf16.mxu1 %v17284_v49 }
 0x7c8   : > { %16097 = vmatpush3.bf16.msra.mxu1 %v16066_v54 }
 0x896   : > { %v12522_v9 = vpop.f32.mrb[2].mxu1 }
 0x897   : > { %v15911_v37 = vpop.f32.mrb[3].mxu1  ;;  %v21447_v18 = vrot.slane %v12522_v9, %v12528_v61 }
 0x899   : > { %v21451_v46 = vsub.f32 %v21256_v63, %v21447_v18  ;;  %v21455_v4 = vsub.f32 %v21259_v57, %v21447_v18  ;;  %v21459_v49 = vsub.f32 %v21262_v62, %v21447_v18  ;;  %v21467_v40 = vsub.f32 %v21267_v25, %v21447_v18 }
 0x89a   : > { %v21471_v63 = vsub.f32 %v21276_v2, %v21447_v18  ;;  %v21477_v62 = vsub.f32 %v21285_v11, %v21447_v18  ;;  %v21483_v25 = vsub.f32 %v21288_v16, %v21447_v18  ;;  %v21489_v28 = vsub.f32 %v21292_v21, %v21447_v18 }
 0x89b   : > { %v12562_v33 = vmul.f32 %v21451_v46, %v21451_v46  ;;  %v12563_v5 = vmul.f32 %v21455_v4, %v21455_v4  ;;  %v12564_v57 = vmul.f32 %v21459_v49, %v21459_v49  ;;  %v12565_v8 = vmul.f32 %v21467_v40, %v21467_v40 }
 0x89c   : > { %v12566_v2 = vmul.f32 %v21471_v63, %v21471_v63  ;;  %v12567_v11 = vmul.f32 %v21477_v62, %v21477_v62  ;;  %v21495_v29 = vsub.f32 %v21302_v58, %v21447_v18  ;;  %v12568_v16 = vmul.f32 %v21483_v25, %v21483_v25 }
 0x89d   : > { %v12594_v43 = vadd.f32 %v12563_v5, %v12562_v33  ;;  %v21501_v52 = vsub.f32 %v21311_v10, %v21447_v18  ;;  %v12569_v21 = vmul.f32 %v21489_v28, %v21489_v28  ;;  %v21507_v42 = vsub.f32 %v21314_v24, %v21447_v18 }
 0x89e   : > { %v12570_v58 = vmul.f32 %v21495_v29, %v21495_v29  ;;  %v21513_v44 = vsub.f32 %v21318_v50, %v21447_v18  ;;  %v21519_v48 = vsub.f32 %v21326_v34, %v21447_v18  ;;  %v21525_v13 = vsub.f32 %v21333_v32, %v21447_v18 }
 0x89f   : > { %v12595_v47 = vadd.f32 %v12594_v43, %v12564_v57  ;;  %v12571_v10 = vmul.f32 %v21501_v52, %v21501_v52  ;;  %v12572_v24 = vmul.f32 %v21507_v42, %v21507_v42  ;;  %v21531_v51 = vsub.f32 %v21336_v14, %v21447_v18 }
 0x8a0   : > { %v12573_v50 = vmul.f32 %v21513_v44, %v21513_v44  ;;  %v12574_v34 = vmul.f32 %v21519_v48, %v21519_v48  ;;  %v21537_v22 = vsub.f32 %v21340_v35, %v21447_v18  ;;  %v12575_v32 = vmul.f32 %v21525_v13, %v21525_v13 }
 0x8a1   : > { %v12596_v31 = vadd.f32 %v12595_v47, %v12565_v8  ;;  %v21543_v37 = vsub.f32 %v21348_v38, %v21447_v18  ;;  %v12576_v14 = vmul.f32 %v21531_v51, %v21531_v51  ;;  %v21549_v5 = vsub.f32 %v21355_v60, %v21447_v18 }
 0x8a2   : > { %v12577_v35 = vmul.f32 %v21537_v22, %v21537_v22  ;;  %v21555_v43 = vsub.f32 %v21358_v30, %v21447_v18  ;;  %v21561_v47 = vsub.f32 %v21362_v55, %v21447_v18 }
 0x8a3   : > { %v12597_v36 = vadd.f32 %v12596_v31, %v12566_v2  ;;  %v12578_v38 = vmul.f32 %v21543_v37, %v21543_v37  ;;  %v12579_v60 = vmul.f32 %v21549_v5, %v21549_v5  ;;  %v21567_v31 = vsub.f32 %v21368_v19, %v21447_v18 }
 0x8a4   : > { %v12580_v30 = vmul.f32 %v21555_v43, %v21555_v43  ;;  %v12581_v55 = vmul.f32 %v21561_v47, %v21561_v47 }
 0x8a5   : > { %v12598_v27 = vadd.f32 %v12597_v36, %v12567_v11  ;;  %v21573_v36 = vsub.f32 %v21375_v59, %v21447_v18  ;;  %v12582_v19 = vmul.f32 %v21567_v31, %v21567_v31 }
 0x8a7   : > { %v12599_v3 = vadd.f32 %v12598_v27, %v12568_v16  ;;  %v21579_v27 = vsub.f32 %v21378_v12, %v21447_v18  ;;  %v12583_v59 = vmul.f32 %v21573_v36, %v21573_v36 }
 0x8a9   : > { %v12600_v41 = vadd.f32 %v12599_v3, %v12569_v21  ;;  %v21585_v3 = vsub.f32 %v21382_v6, %v21447_v18  ;;  %v12584_v12 = vmul.f32 %v21579_v27, %v21579_v27 }
 0x8ab   : > { %v12601_v0 = vadd.f32 %v12600_v41, %v12570_v58  ;;  %v21591_v41 = vsub.f32 %v21387_v23, %v21447_v18  ;;  %v12585_v6 = vmul.f32 %v21585_v3, %v21585_v3 }
 0x8ad   : > { %v12602_v20 = vadd.f32 %v12601_v0, %v12571_v10  ;;  %v21597_v0 = vsub.f32 %v21393_v1, %v21447_v18  ;;  %v12586_v23 = vmul.f32 %v21591_v41, %v21591_v41 }
 0x8af   : > { %v12603_v54 = vadd.f32 %v12602_v20, %v12572_v24  ;;  %v21603_v20 = vsub.f32 %v21396_v26, %v21447_v18  ;;  %v12587_v1 = vmul.f32 %v21597_v0, %v21597_v0 }
 0x8b1   : > { %v12604_v39 = vadd.f32 %v12603_v54, %v12573_v50  ;;  %v21609_v54 = vsub.f32 %v21400_v7, %v21447_v18  ;;  %v12588_v26 = vmul.f32 %v21603_v20, %v21603_v20 }
 0x8b3   : > { %v12605_v9 = vadd.f32 %v12604_v39, %v12574_v34  ;;  %v21615_v39 = vsub.f32 %v21405_v45, %v21447_v18  ;;  %v12589_v7 = vmul.f32 %v21609_v54, %v21609_v54 }
 0x8b5   : > { %v12606_v33 = vadd.f32 %v12605_v9, %v12575_v32  ;;  %v21621_v9 = vsub.f32 %v21411_v17, %v21447_v18  ;;  %v12590_v45 = vmul.f32 %v21615_v39, %v21615_v39 }
 0x8b7   : > { %v12607_v57 = vadd.f32 %v12606_v33, %v12576_v14  ;;  %v21627_v33 = vsub.f32 %v21414_v15, %v21447_v18  ;;  %v12591_v17 = vmul.f32 %v21621_v9, %v21621_v9 }
 0x8b9   : > { %v12608_v8 = vadd.f32 %v12607_v57, %v12577_v35  ;;  %v21633_v57 = vsub.f32 %v21418_v53, %v21447_v18  ;;  %v12948_v18 = vld [vmem:[%s21928_s9] sm:$0xff] }
 0x8bb   : > { %v12609_v2 = vadd.f32 %v12608_v8, %v12578_v38  ;;  %v12592_v8 = vmul.f32 %v21627_v33, %v21627_v33  ;;  %v12593_v15 = vmul.f32 %v21633_v57, %v21633_v57 }
 0x8bd   : > { %v12610_v11 = vadd.f32 %v12609_v2, %v12579_v60 }
 0x8bf   : > { %v12611_v16 = vadd.f32 %v12610_v11, %v12580_v30 }
 0x8c1   : > { %v12612_v21 = vadd.f32 %v12611_v16, %v12581_v55 }
 0x8c3   : > { %v12613_v58 = vadd.f32 %v12612_v21, %v12582_v19 }
 0x8c5   : > { %v12614_v10 = vadd.f32 %v12613_v58, %v12583_v59  ;;  %v12949_v59 = vld [vmem:[%s21928_s9 + $0x8] sm:$0xff] }
 0x8c6   : > { %v16098_v58 = vpack.c.bf16 %v12949_v59, %v12948_v18 }
 0x8c7   : > { %v12615_v24 = vadd.f32 %v12614_v10, %v12584_v12 }
 0x8c8   : > { %16099 = vmatprep.subr.bf16.mxu1 %v16098_v58 }
 0x8c9   : > { %v12616_v50 = vadd.f32 %v12615_v24, %v12585_v6  ;;  %v12950_v24 = vld [vmem:[%s21928_s9 + $0x10] sm:$0xff] }
 0x8cb   : > { %v12617_v34 = vadd.f32 %v12616_v50, %v12586_v23  ;;  %v12951_v23 = vld [vmem:[%s21928_s9 + $0x18] sm:$0xff] }
 0x8cc   : > { %v16102_v50 = vpack.c.bf16 %v12951_v23, %v12950_v24 }
 0x8cd   : > { %v12618_v32 = vadd.f32 %v12617_v34, %v12587_v1  ;;  %v12952_v34 = vld [vmem:[%s21928_s9 + $0x20] sm:$0xff] }
 0x8cf   : > { %v12619_v14 = vadd.f32 %v12618_v32, %v12588_v26  ;;  %v12953_v26 = vld [vmem:[%s21928_s9 + $0x28] sm:$0xff] }
 0x8d0   : > { %v16106_v32 = vpack.c.bf16 %v12953_v26, %v12952_v34 }
 0x8d1   : > { %v12620_v35 = vadd.f32 %v12619_v14, %v12589_v7  ;;  %v12954_v7 = vld [vmem:[%s21928_s9 + $0x30] sm:$0xff]  ;;  %v12955_v14 = vld [vmem:[%s21928_s9 + $0x38] sm:$0xff] }
 0x8d3   : > { %v12621_v38 = vadd.f32 %v12620_v35, %v12590_v45  ;;  %v16110_v45 = vpack.c.bf16 %v12955_v14, %v12954_v7  ;;  %v12956_v35 = vld [vmem:[%s21928_s9 + $0x40] sm:$0xff] }
 0x8d5   : > { %v12622_v60 = vadd.f32 %v12621_v38, %v12591_v17  ;;  %v12957_v17 = vld [vmem:[%s21928_s9 + $0x48] sm:$0xff] }
 0x8d6   : > { %v16114_v38 = vpack.c.bf16 %v12957_v17, %v12956_v35 }
 0x8d7   : > { %v12623_v2 = vadd.f32 %v12622_v60, %v12592_v8  ;;  %v12958_v8 = vld [vmem:[%s21928_s9 + $0x50] sm:$0xff]  ;;  %v12959_v60 = vld [vmem:[%s21928_s9 + $0x58] sm:$0xff] }
 0x8d9   : > { %v12624_v30 = vadd.f32 %v12623_v2, %v12593_v15  ;;  %v12960_v15 = vld [vmem:[%s21928_s9 + $0x60] sm:$0xff]  ;;  %v16118_v2 = vpack.c.bf16 %v12959_v60, %v12958_v8 }
 0x8db   : > { %v12625_v11 = vrot.slane %v12624_v30, 4 }
 0x8dd   : > { %v12626_v55 = vadd.f32 %v12625_v11, %v12624_v30  ;;  %v12961_v30 = vld [vmem:[%s21928_s9 + $0x68] sm:$0xff] }
 0x8de   : > { %v16122_v11 = vpack.c.bf16 %v12961_v30, %v12960_v15 }
 0x8df   : > { %v12627_v16 = vrot.slane %v12626_v55, 2 }
 0x8e1   : > { %v12628_v19 = vadd.f32 %v12627_v16, %v12626_v55  ;;  %v12962_v55 = vld [vmem:[%s21928_s9 + $0x70] sm:$0xff]  ;;  %v12963_v16 = vld [vmem:[%s21928_s9 + $0x78] sm:$0xff] }
 0x8e3   : > { %v12629_v21 = vrot.slane %v12628_v19, 1 }
 0x8e5   : > { %v12630_v53 = vadd.f32 %v12629_v21, %v12628_v19  ;;  %v16126_v19 = vpack.c.bf16 %v12963_v16, %v12962_v55  ;;  %v12775_v21 = vld [vmem:[%s21924_s5] sm:$0x1] }
 0x8e7   : > { %15945 = vmatmul.mubr.f32.vlgmr.msra.gmra.mrb[0].mxu0 %v12630_v53 }
 0x9ba   : > { %v12697_v12 = vpop.f32.mrb[0].mxu0 }
 0x9bb   : > { %v12698_v10 = vadd.f32 1e-05, %v12697_v12  ;;  %v15946_v6 = vpop.f32.mrb[1].mxu0 }
 0x9bd   : > { %17106 = vrsqrt.f32 %v12698_v10  ;;  %v21702_v10 = vld [vmem:[%s21925_s6] ss:$0 sm:$0xff] }
 0x9c7   : > { %v17107_v1 = vpop.eup %17106 }
 0x9c8   : > { %15956 = vmatmul.mubr.msk.f32.vlgmr.msra.gmra.mrb[4].mxu1 %vm647_vm0, %v17107_v1 }
 0x9c9   : > { %16101 = vmatpush3.bf16.msra.mxu1 %v16098_v58 }
 0x9ca   : > { %16103 = vmatprep.subr.bf16.mxu1 %v16102_v50 }
 0x9cd   : > { %16105 = vmatpush3.bf16.msra.mxu1 %v16102_v50 }
 0x9ce   : > { %16107 = vmatprep.subr.bf16.mxu1 %v16106_v32 }
 0x9d1   : > { %16109 = vmatpush3.bf16.msra.mxu1 %v16106_v32 }
 0x9d2   : > { %16111 = vmatprep.subr.bf16.mxu1 %v16110_v45 }
 0x9d5   : > { %16113 = vmatpush3.bf16.msra.mxu1 %v16110_v45 }
 0x9d6   : > { %16115 = vmatprep.subr.bf16.mxu1 %v16114_v38 }
 0x9d9   : > { %16117 = vmatpush3.bf16.msra.mxu1 %v16114_v38 }
 0x9da   : > { %16119 = vmatprep.subr.bf16.mxu1 %v16118_v2 }
 0x9dd   : > { %16121 = vmatpush3.bf16.msra.mxu1 %v16118_v2 }
 0x9de   : > { %16123 = vmatprep.subr.bf16.mxu1 %v16122_v11 }
 0x9e1   : > { %16125 = vmatpush3.bf16.msra.mxu1 %v16122_v11 }
 0x9e2   : > { %16127 = vmatprep.subr.bf16.mxu1 %v16126_v19 }
 0x9e5   : > { %16129 = vmatpush3.bf16.msra.mxu1 %v16126_v19 }
 0xa9b   : > { %v12771_v53 = vpop.f32.mrb[4].mxu1 }
 0xa9c   : > { %v12776_v18 = vmul.f32 %v12775_v21, %v12771_v53  ;;  %v15957_v59 = vpop.f32.mrb[5].mxu1 }
 0xa9e   : > { %v21695_v58 = vrot.slane %v12776_v18, %v12528_v61 }
 0xaa0   : > { %v12783_v12 = vmul.f32 %v21695_v58, %v21455_v4  ;;  %v12782_v6 = vmul.f32 %v21695_v58, %v21451_v46  ;;  %v12784_v23 = vmul.f32 %v21695_v58, %v21459_v49  ;;  %v12785_v56 = vmul.f32 %v21695_v58, %v21467_v40 }
 0xaa1   : > { %v12786_v61 = vmul.f32 %v21695_v58, %v21471_v63  ;;  %v12787_v50 = vmul.f32 %v21695_v58, %v21477_v62  ;;  %v12788_v49 = vmul.f32 %v21695_v58, %v21483_v25  ;;  %v12789_v14 = vmul.f32 %v21695_v58, %v21489_v28 }
 0xaa2   : > { %v12821_v24 = vadd.f32 %v21702_v10, %v12783_v12  ;;  %v12820_v4 = vadd.f32 %v21702_v10, %v12782_v6  ;;  %v12823_v1 = vadd.f32 %v21702_v10, %v12785_v56  ;;  %v12822_v34 = vadd.f32 %v21702_v10, %v12784_v23 }
 0xaa3   : > { %v12824_v40 = vadd.f32 %v21702_v10, %v12786_v61  ;;  %v12790_v62 = vmul.f32 %v21695_v58, %v21495_v29  ;;  %v12825_v45 = vadd.f32 %v21702_v10, %v12787_v50  ;;  %v12826_v38 = vadd.f32 %v21702_v10, %v12788_v49 }
 0xaa4   : > { %vm12853_vm3 = vcmp.ge.f32.partialorder %v12821_v24, 0.0  ;;  %v12885_v46 = vmul.f32 0.2, %v12821_v24  ;;  %vm12852_vm4 = vcmp.ge.f32.partialorder %v12820_v4, 0.0  ;;  %v12884_v26 = vmul.f32 0.2, %v12820_v4 }
 0xaa5   : > { %vm12854_vm5 = vcmp.ge.f32.partialorder %v12822_v34, 0.0  ;;  %v12886_v63 = vmul.f32 0.2, %v12822_v34  ;;  %v12887_v35 = vmul.f32 0.2, %v12823_v1  ;;  %vm12855_vm6 = vcmp.ge.f32.partialorder %v12823_v1, 0.0 }
 0xaa6   : > { %v12917_v32 = vsel %vm12853_vm3, %v12821_v24, %v12885_v46  ;;  %v12916_v7 = vsel %vm12852_vm4, %v12820_v4, %v12884_v26  ;;  %v12888_v17 = vmul.f32 0.2, %v12824_v40  ;;  %vm12856_vm7 = vcmp.ge.f32.partialorder %v12824_v40, 0.0 }
 0xaa7   : > { %15990 = vmatprep.mubr.f32.mxu1 %v12916_v7  ;;  %v12918_v25 = vsel %vm12854_vm5, %v12822_v34, %v12886_v63  ;;  %v12791_v8 = vmul.f32 %v21695_v58, %v21501_v52  ;;  %v12792_v28 = vmul.f32 %v21695_v58, %v21507_v42  ;;  %v12827_v29 = vadd.f32 %v21702_v10, %v12789_v14 }
 0xaa8   : > { %15991 = vmatmul.mubr.f32.vlgmr.msra.gmra.mrb[6].mxu1 %v12917_v32  ;;  %v12919_v60 = vsel %vm12855_vm6, %v12823_v1, %v12887_v35  ;;  %v12889_v15 = vmul.f32 0.2, %v12825_v45  ;;  %v12920_v2 = vsel %vm12856_vm7, %v12824_v40, %v12888_v17  ;;  %vm12857_vm8 = vcmp.ge.f32.partialorder %v12825_v45, 0.0 }
 0xaa9   : > { %15993 = vmatprep.mubr.f32.mxu1 %v12918_v25  ;;  %v12890_v30 = vmul.f32 0.2, %v12826_v38  ;;  %v12828_v11 = vadd.f32 %v21702_v10, %v12790_v62  ;;  %vm12858_vm9 = vcmp.ge.f32.partialorder %v12826_v38, 0.0  ;;  %v12793_v55 = vmul.f32 %v21695_v58, %v21513_v44 }
 0xaaa   : > { %v12794_v52 = vmul.f32 %v21695_v58, %v21519_v48  ;;  %v12829_v42 = vadd.f32 %v21702_v10, %v12791_v8  ;;  %v12921_v16 = vsel %vm12857_vm8, %v12825_v45, %v12889_v15  ;;  %v12891_v19 = vmul.f32 0.2, %v12827_v29 }
 0xaab   : > { %v12922_v21 = vsel %vm12858_vm9, %v12826_v38, %v12890_v30  ;;  %vm12859_vm10 = vcmp.ge.f32.partialorder %v12827_v29, 0.0  ;;  %v12892_v53 = vmul.f32 0.2, %v12828_v11  ;;  %v12830_v18 = vadd.f32 %v21702_v10, %v12792_v28 }
 0xaac   : > { %15994 = vmatmul.mubr.f32.gmra.mrb[8].mxu1 %v12919_v60  ;;  %vm12860_vm11 = vcmp.ge.f32.partialorder %v12828_v11, 0.0  ;;  %v12795_v59 = vmul.f32 %v21695_v58, %v21525_v13  ;;  %v12796_v44 = vmul.f32 %v21695_v58, %v21531_v51  ;;  %v12831_v48 = vadd.f32 %v21702_v10, %v12793_v55 }
 0xaad   : > { %15996 = vmatprep.mubr.f32.mxu1 %v12920_v2  ;;  %v12923_v12 = vsel %vm12859_vm10, %v12827_v29, %v12891_v19  ;;  %v12893_v6 = vmul.f32 0.2, %v12829_v42  ;;  %v12924_v24 = vsel %vm12860_vm11, %v12828_v11, %v12892_v53  ;;  %vm12861_vm12 = vcmp.ge.f32.partialorder %v12829_v42, 0.0 }
 0xaae   : > { %v12894_v23 = vmul.f32 0.2, %v12830_v18  ;;  %v12832_v56 = vadd.f32 %v21702_v10, %v12794_v52  ;;  %vm12862_vm13 = vcmp.ge.f32.partialorder %v12830_v18, 0.0  ;;  %v12797_v61 = vmul.f32 %v21695_v58, %v21537_v22 }
 0xaaf   : > { %v12798_v13 = vmul.f32 %v21695_v58, %v21543_v37  ;;  %v12833_v51 = vadd.f32 %v21702_v10, %v12795_v59  ;;  %v12925_v4 = vsel %vm12861_vm12, %v12829_v42, %v12893_v6  ;;  %v12895_v50 = vmul.f32 0.2, %v12831_v48 }
 0xab0   : > { %15997 = vmatmul.mubr.f32.gmra.mrb[10].mxu1 %v12921_v16  ;;  %v12926_v1 = vsel %vm12862_vm13, %v12830_v18, %v12894_v23  ;;  %vm12863_vm14 = vcmp.ge.f32.partialorder %v12831_v48, 0.0  ;;  %v12896_v46 = vmul.f32 0.2, %v12832_v56  ;;  %v12834_v34 = vadd.f32 %v21702_v10, %v12796_v44 }
 0xab1   : > { %15999 = vmatprep.mubr.f32.mxu1 %v12922_v21  ;;  %vm12864_vm15 = vcmp.ge.f32.partialorder %v12832_v56, 0.0  ;;  %v12799_v49 = vmul.f32 %v21695_v58, %v21549_v5  ;;  %v12800_v22 = vmul.f32 %v21695_v58, %v21555_v43  ;;  %v12835_v37 = vadd.f32 %v21702_v10, %v12797_v61 }
 0xab2   : > { %v12927_v26 = vsel %vm12863_vm14, %v12831_v48, %v12895_v50  ;;  %v12897_v40 = vmul.f32 0.2, %v12833_v51  ;;  %v12928_v32 = vsel %vm12864_vm15, %v12832_v56, %v12896_v46  ;;  %vm12865_vm1 = vcmp.ge.f32.partialorder %v12833_v51, 0.0 }
 0xab3   : > { %v12898_v63 = vmul.f32 0.2, %v12834_v34  ;;  %v12836_v7 = vadd.f32 %v21702_v10, %v12798_v13  ;;  %vm12866_vm2 = vcmp.ge.f32.partialorder %v12834_v34, 0.0  ;;  %v12801_v14 = vmul.f32 %v21695_v58, %v21561_v47 }
 0xab4   : > { %16000 = vmatmul.mubr.f32.gmra.mrb[12].mxu1 %v12923_v12  ;;  %v12802_v5 = vmul.f32 %v21695_v58, %v21567_v31  ;;  %v12837_v43 = vadd.f32 %v21702_v10, %v12799_v49  ;;  %v12929_v62 = vsel %vm12865_vm1, %v12833_v51, %v12897_v40  ;;  %v12899_v45 = vmul.f32 0.2, %v12835_v37 }
 0xab5   : > { %16002 = vmatprep.mubr.f32.mxu1 %v12924_v24  ;;  %v12930_v35 = vsel %vm12866_vm2, %v12834_v34, %v12898_v63  ;;  %vm12867_vm3 = vcmp.ge.f32.partialorder %v12835_v37, 0.0  ;;  %v12900_v25 = vmul.f32 0.2, %v12836_v7  ;;  %v12838_v17 = vadd.f32 %v21702_v10, %v12800_v22 }
 0xab6   : > { %vm12868_vm4 = vcmp.ge.f32.partialorder %v12836_v7, 0.0  ;;  %v12803_v38 = vmul.f32 %v21695_v58, %v21573_v36  ;;  %v12804_v47 = vmul.f32 %v21695_v58, %v21579_v27  ;;  %v12839_v31 = vadd.f32 %v21702_v10, %v12801_v14 }
 0xab7   : > { %v12931_v8 = vsel %vm12867_vm3, %v12835_v37, %v12899_v45  ;;  %v12901_v28 = vmul.f32 0.2, %v12837_v43  ;;  %v12932_v29 = vsel %vm12868_vm4, %v12836_v7, %v12900_v25  ;;  %vm12869_vm5 = vcmp.ge.f32.partialorder %v12837_v43, 0.0 }
 0xab8   : > { %16003 = vmatmul.mubr.f32.gmra.mrb[14].mxu1 %v12925_v4  ;;  %v12902_v60 = vmul.f32 0.2, %v12838_v17  ;;  %v12840_v15 = vadd.f32 %v21702_v10, %v12802_v5  ;;  %vm12870_vm6 = vcmp.ge.f32.partialorder %v12838_v17, 0.0  ;;  %v12805_v2 = vmul.f32 %v21695_v58, %v21585_v3 }
 0xab9   : > { %16005 = vmatprep.mubr.f32.mxu1 %v12926_v1  ;;  %v12806_v36 = vmul.f32 %v21695_v58, %v21591_v41  ;;  %v12841_v27 = vadd.f32 %v21702_v10, %v12803_v38  ;;  %v12933_v30 = vsel %vm12869_vm5, %v12837_v43, %v12901_v28  ;;  %v12903_v11 = vmul.f32 0.2, %v12839_v31 }
 0xaba   : > { %v12934_v55 = vsel %vm12870_vm6, %v12838_v17, %v12902_v60  ;;  %vm12871_vm7 = vcmp.ge.f32.partialorder %v12839_v31, 0.0  ;;  %v12904_v52 = vmul.f32 0.2, %v12840_v15  ;;  %v12842_v42 = vadd.f32 %v21702_v10, %v12804_v47 }
 0xabb   : > { %vm12872_vm8 = vcmp.ge.f32.partialorder %v12840_v15, 0.0  ;;  %v12807_v16 = vmul.f32 %v21695_v58, %v21597_v0  ;;  %v12808_v3 = vmul.f32 %v21695_v58, %v21603_v20  ;;  %v12843_v41 = vadd.f32 %v21702_v10, %v12805_v2 }
 0xabc   : > { %16006 = vmatmul.mubr.f32.gmra.mrb[16].mxu1 %v12927_v26  ;;  %v12935_v19 = vsel %vm12871_vm7, %v12839_v31, %v12903_v11  ;;  %v12905_v21 = vmul.f32 0.2, %v12841_v27  ;;  %v12936_v53 = vsel %vm12872_vm8, %v12840_v15, %v12904_v52  ;;  %vm12873_vm9 = vcmp.ge.f32.partialorder %v12841_v27, 0.0 }
 0xabd   : > { %16008 = vmatprep.mubr.f32.mxu1 %v12928_v32  ;;  %v12906_v18 = vmul.f32 0.2, %v12842_v42  ;;  %v12844_v59 = vadd.f32 %v21702_v10, %v12806_v36  ;;  %vm12874_vm10 = vcmp.ge.f32.partialorder %v12842_v42, 0.0  ;;  %v12809_v44 = vmul.f32 %v21695_v58, %v21609_v54 }
 0xabe   : > { %v12810_v0 = vmul.f32 %v21695_v58, %v21615_v39  ;;  %v12845_v20 = vadd.f32 %v21702_v10, %v12807_v16  ;;  %v12937_v48 = vsel %vm12873_vm9, %v12841_v27, %v12905_v21  ;;  %v12907_v12 = vmul.f32 0.2, %v12843_v41 }
 0xabf   : > { %v12938_v6 = vsel %vm12874_vm10, %v12842_v42, %v12906_v18  ;;  %vm12875_vm11 = vcmp.ge.f32.partialorder %v12843_v41, 0.0  ;;  %v12908_v24 = vmul.f32 0.2, %v12844_v59  ;;  %v12846_v23 = vadd.f32 %v21702_v10, %v12808_v3 }
 0xac0   : > { %16009 = vmatmul.mubr.f32.gmra.mrb[18].mxu1 %v12929_v62  ;;  %vm12876_vm12 = vcmp.ge.f32.partialorder %v12844_v59, 0.0  ;;  %v12811_v56 = vmul.f32 %v21695_v58, %v21621_v9  ;;  %v12847_v54 = vadd.f32 %v21702_v10, %v12809_v44  ;;  %v12939_v61 = vsel %vm12875_vm11, %v12843_v41, %v12907_v12 }
 0xac1   : > { %16011 = vmatprep.mubr.f32.mxu1 %v12930_v35  ;;  %vm12877_vm13 = vcmp.ge.f32.partialorder %v12845_v20, 0.0  ;;  %v12909_v39 = vmul.f32 0.2, %v12845_v20  ;;  %v12940_v13 = vsel %vm12876_vm12, %v12844_v59, %v12908_v24  ;;  %v12910_v51 = vmul.f32 0.2, %v12846_v23 }
 0xac2   : > { %v12848_v4 = vadd.f32 %v21702_v10, %v12810_v0  ;;  %v12812_v50 = vmul.f32 %v21695_v58, %v21627_v33  ;;  %vm12878_vm14 = vcmp.ge.f32.partialorder %v12846_v23, 0.0  ;;  %v12813_v1 = vmul.f32 %v21695_v58, %v21633_v57 }
 0xac3   : > { %v12849_v9 = vadd.f32 %v21702_v10, %v12811_v56  ;;  %v12941_v46 = vsel %vm12877_vm13, %v12845_v20, %v12909_v39  ;;  %v12911_v34 = vmul.f32 0.2, %v12847_v54  ;;  %v12942_v49 = vsel %vm12878_vm14, %v12846_v23, %v12910_v51 }
 0xac4   : > { %16012 = vmatmul.mubr.f32.gmra.mrb[20].mxu1 %v12931_v8  ;;  %vm12879_vm15 = vcmp.ge.f32.partialorder %v12847_v54, 0.0  ;;  %v12912_v22 = vmul.f32 0.2, %v12848_v4  ;;  %v12850_v37 = vadd.f32 %v21702_v10, %v12812_v50  ;;  %vm12880_vm1 = vcmp.ge.f32.partialorder %v12848_v4, 0.0 }
 0xac5   : > { %16014 = vmatprep.mubr.f32.mxu1 %v12932_v29  ;;  %v12943_v26 = vsel %vm12879_vm15, %v12847_v54, %v12911_v34  ;;  %v12913_v40 = vmul.f32 0.2, %v12849_v9  ;;  %v12851_v33 = vadd.f32 %v21702_v10, %v12813_v1  ;;  %vm12881_vm2 = vcmp.ge.f32.partialorder %v12849_v9, 0.0 }
 0xac6   : > { %v12944_v57 = vsel %vm12880_vm1, %v12848_v4, %v12912_v22  ;;  %v12914_v58 = vmul.f32 0.2, %v12850_v37  ;;  %vm12882_vm3 = vcmp.ge.f32.partialorder %v12850_v37, 0.0 }
 0xac7   : > { %v12945_v32 = vsel %vm12881_vm2, %v12849_v9, %v12913_v40  ;;  %v12915_v63 = vmul.f32 0.2, %v12851_v33  ;;  %vm12883_vm4 = vcmp.ge.f32.partialorder %v12851_v33, 0.0 }
 0xac8   : > { %16015 = vmatmul.mubr.f32.gmra.mrb[22].mxu1 %v12933_v30  ;;  %v12946_v7 = vsel %vm12882_vm3, %v12850_v37, %v12914_v58 }
 0xac9   : > { %16017 = vmatprep.mubr.f32.mxu1 %v12934_v55  ;;  %v12947_v14 = vsel %vm12883_vm4, %v12851_v33, %v12915_v63 }
 0xacc   : > { %16018 = vmatmul.mubr.f32.gmra.mrb[24].mxu1 %v12935_v19 }
 0xacd   : > { %16020 = vmatprep.mubr.f32.mxu1 %v12936_v53 }
 0xad0   : > { %16021 = vmatmul.mubr.f32.gmra.mrb[26].mxu1 %v12937_v48 }
 0xad1   : > { %16023 = vmatprep.mubr.f32.mxu1 %v12938_v6 }
 0xad4   : > { %16024 = vmatmul.mubr.f32.gmra.mrb[28].mxu1 %v12939_v61 }
 0xad5   : > { %16026 = vmatprep.mubr.f32.mxu1 %v12940_v13 }
 0xad8   : > { %16027 = vmatmul.mubr.f32.gmra.mrb[30].mxu1 %v12941_v46 }
 0xad9   : > { %16029 = vmatprep.mubr.f32.mxu1 %v12942_v49 }
 0xadc   : > { %16030 = vmatmul.mubr.f32.gmra.mrb[32].mxu1 %v12943_v26 }
 0xadd   : > { %16032 = vmatprep.mubr.f32.mxu1 %v12944_v57 }
 0xae0   : > { %16033 = vmatmul.mubr.f32.gmra.mrb[34].mxu1 %v12945_v32 }
 0xae1   : > { %16035 = vmatprep.mubr.f32.mxu1 %v12946_v7 }
 0xae4   : > { %16036 = vmatmul.mubr.f32.gmra.mrb[36].mxu1 %v12947_v14 }
 0xb7b   : > { %v15992_v5 = vpop.f32.mrb[6].mxu1 }
 0xb7c   : > { %13190 = vst.msk [vmem:[%s21801_s26 + $0x8] sm:$0xff] %vm647_vm0, %v15992_v5  ;;  %v13030_v10 = vpop.f32.mrb[7].mxu1 }
 0xb7d   : > { %13189 = vst.msk [vmem:[%s21801_s26] sm:$0xff] %vm647_vm0, %v13030_v10 }
 0xb7f   : > { %v15995_v43 = vpop.f32.mrb[8].mxu1 }
 0xb80   : > { %13192 = vst.msk [vmem:[%s21801_s26 + $0x18] sm:$0xff] %vm647_vm0, %v15995_v43  ;;  %v13040_v62 = vpop.f32.mrb[9].mxu1 }
 0xb81   : > { %13191 = vst.msk [vmem:[%s21801_s26 + $0x10] sm:$0xff] %vm647_vm0, %v13040_v62 }
 0xb83   : > { %v15998_v45 = vpop.f32.mrb[10].mxu1 }
 0xb84   : > { %13194 = vst.msk [vmem:[%s21801_s26 + $0x28] sm:$0xff] %vm647_vm0, %v15998_v45  ;;  %v13050_v35 = vpop.f32.mrb[11].mxu1 }
 0xb85   : > { %13193 = vst.msk [vmem:[%s21801_s26 + $0x20] sm:$0xff] %vm647_vm0, %v13050_v35 }
 0xb87   : > { %v16001_v25 = vpop.f32.mrb[12].mxu1 }
 0xb88   : > { %13196 = vst.msk [vmem:[%s21801_s26 + $0x38] sm:$0xff] %vm647_vm0, %v16001_v25  ;;  %v13060_v17 = vpop.f32.mrb[13].mxu1 }
 0xb89   : > { %13195 = vst.msk [vmem:[%s21801_s26 + $0x30] sm:$0xff] %vm647_vm0, %v13060_v17 }
 0xb8b   : > { %v16004_v38 = vpop.f32.mrb[14].mxu1 }
 0xb8c   : > { %13198 = vst.msk [vmem:[%s21801_s26 + $0x48] sm:$0xff] %vm647_vm0, %v16004_v38  ;;  %v13070_v47 = vpop.f32.mrb[15].mxu1 }
 0xb8d   : > { %13197 = vst.msk [vmem:[%s21801_s26 + $0x40] sm:$0xff] %vm647_vm0, %v13070_v47 }
 0xb8f   : > { %v16007_v31 = vpop.f32.mrb[16].mxu1 }
 0xb90   : > { %13200 = vst.msk [vmem:[%s21801_s26 + $0x58] sm:$0xff] %vm647_vm0, %v16007_v31  ;;  %v13080_v8 = vpop.f32.mrb[17].mxu1 }
 0xb91   : > { %13199 = vst.msk [vmem:[%s21801_s26 + $0x50] sm:$0xff] %vm647_vm0, %v13080_v8 }
 0xb93   : > { %v16010_v28 = vpop.f32.mrb[18].mxu1 }
 0xb94   : > { %13202 = vst.msk [vmem:[%s21801_s26 + $0x68] sm:$0xff] %vm647_vm0, %v16010_v28  ;;  %v13090_v29 = vpop.f32.mrb[19].mxu1 }
 0xb95   : > { %13201 = vst.msk [vmem:[%s21801_s26 + $0x60] sm:$0xff] %vm647_vm0, %v13090_v29 }
 0xb97   : > { %v16013_v60 = vpop.f32.mrb[20].mxu1 }
 0xb98   : > { %13204 = vst.msk [vmem:[%s21801_s26 + $0x78] sm:$0xff] %vm647_vm0, %v16013_v60  ;;  %v13100_v15 = vpop.f32.mrb[21].mxu1 }
 0xb99   : > { %13203 = vst.msk [vmem:[%s21801_s26 + $0x70] sm:$0xff] %vm647_vm0, %v13100_v15 }
 0xb9b   : > { %v16016_v2 = vpop.f32.mrb[22].mxu1 }
 0xb9c   : > { %13206 = vst.msk [vmem:[%s21801_s26 + $0x88] sm:$0xff] %vm647_vm0, %v16016_v2  ;;  %v13110_v36 = vpop.f32.mrb[23].mxu1 }
 0xb9d   : > { %13205 = vst.msk [vmem:[%s21801_s26 + $0x80] sm:$0xff] %vm647_vm0, %v13110_v36 }
 0xb9f   : > { %v16019_v27 = vpop.f32.mrb[24].mxu1 }
 0xba0   : > { %13208 = vst.msk [vmem:[%s21801_s26 + $0x98] sm:$0xff] %vm647_vm0, %v16019_v27  ;;  %v13120_v30 = vpop.f32.mrb[25].mxu1 }
 0xba1   : > { %13207 = vst.msk [vmem:[%s21801_s26 + $0x90] sm:$0xff] %vm647_vm0, %v13120_v30 }
 0xba3   : > { %v16022_v11 = vpop.f32.mrb[26].mxu1 }
 0xba4   : > { %13210 = vst.msk [vmem:[%s21801_s26 + $0xa8] sm:$0xff] %vm647_vm0, %v16022_v11  ;;  %v13130_v55 = vpop.f32.mrb[27].mxu1 }
 0xba5   : > { %13209 = vst.msk [vmem:[%s21801_s26 + $0xa0] sm:$0xff] %vm647_vm0, %v13130_v55 }
 0xba7   : > { %v16025_v52 = vpop.f32.mrb[28].mxu1 }
 0xba8   : > { %13212 = vst.msk [vmem:[%s21801_s26 + $0xb8] sm:$0xff] %vm647_vm0, %v16025_v52  ;;  %v13140_v42 = vpop.f32.mrb[29].mxu1 }
 0xba9   : > { %13211 = vst.msk [vmem:[%s21801_s26 + $0xb0] sm:$0xff] %vm647_vm0, %v13140_v42 }
 0xbab   : > { %v16028_v16 = vpop.f32.mrb[30].mxu1 }
 0xbac   : > { %13214 = vst.msk [vmem:[%s21801_s26 + $0xc8] sm:$0xff] %vm647_vm0, %v16028_v16  ;;  %v13150_v3 = vpop.f32.mrb[31].mxu1 }
 0xbad   : > { %13213 = vst.msk [vmem:[%s21801_s26 + $0xc0] sm:$0xff] %vm647_vm0, %v13150_v3 }
 0xbaf   : > { %v16031_v41 = vpop.f32.mrb[32].mxu1 }
 0xbb0   : > { %13216 = vst.msk [vmem:[%s21801_s26 + $0xd8] sm:$0xff] %vm647_vm0, %v16031_v41  ;;  %v13160_v19 = vpop.f32.mrb[33].mxu1 }
 0xbb1   : > { %13215 = vst.msk [vmem:[%s21801_s26 + $0xd0] sm:$0xff] %vm647_vm0, %v13160_v19 }
 0xbb3   : > { %v16034_v21 = vpop.f32.mrb[34].mxu1 }
 0xbb4   : > { %13218 = vst.msk [vmem:[%s21801_s26 + $0xe8] sm:$0xff] %vm647_vm0, %v16034_v21  ;;  %v13170_v53 = vpop.f32.mrb[35].mxu1 }
 0xbb5   : > { %13217 = vst.msk [vmem:[%s21801_s26 + $0xe0] sm:$0xff] %vm647_vm0, %v13170_v53 }
 0xbb7   : > { %v16037_v18 = vpop.f32.mrb[36].mxu1 }
 0xbb8   : > { %13220 = vst.msk [vmem:[%s21801_s26 + $0xf8] sm:$0xff] %vm647_vm0, %v16037_v18  ;;  %v13180_v59 = vpop.f32.mrb[37].mxu1 }
 0xbb9   : > { %13219 = vst.msk [vmem:[%s21801_s26 + $0xf0] sm:$0xff] %vm647_vm0, %v13180_v59 }
 0xbba   : > { %17222 = shalt.err (!%p17219_p7)
}
 0xbbb   : > { %s17223_s20 = scalar_lea.hbm %s21868_s25, 4096  ;;  %s17227_s12 = scalar_lea.hbm %s21929_s10, 8192 }
 0xbbc   : > { %p17224_p8 = scmp.ne.s32.totalorder %s21868_s25, %s17223_s20  ;;  %p17228_p1 = scmp.lt.u32.totalorder %s21868_s25, %s21929_s10 }
 0xbbd   : > { %p17229_p0 = scmp.lt.u32.totalorder %s17227_s12, %s17223_s20  ;;  %p17231_p6 = scmp.lt.u32.totalorder %s17223_s20, %s21868_s25 }
 0xbbe   : > { %p17225_p11 = pnand %p17224_p8, %p22159_p9 }
 0xbbf   : > { %p17230_p5 = por %p17229_p0, %p17228_p1 }
 0xbc0   : > { %p17226_p13 = pneg %p17225_p11 }
 0xbc1   : > { %p17232_p10 = por %p17231_p6, %p17230_p5 }
 0xbc3   : > { %p17233_p12 = pnand %p17232_p10, %p17226_p13 }
 0xbc5   : > { %17236 = shalt.err (!%p17233_p12)
}
 0xbc6   : > { %s17288_s27 = smov 128   ;;  %s17289_s11 = smov 8  }
 0xbc7   : > { %16806 = dma.vmem_to_hbm [thread:$0]  (%p22159_p9), %s21870_s30, 4096, %s21868_s25, %s21878_s17, %s17288_s27, %s17288_s27, %s17289_s11  }
 0xbc8 PF: > { %p16818_p2 = scmp.ge.s32.totalorder %s17275_s16, 2  ;;  %s13250_s21 = sand.u32 1, %s17263_s13  }
 0xbc9   : > { %p22160_p3 = scmp.ne.s32.totalorder %s21962_s24, 0  ;;  %s13251_s20 = scalar_lea.sflag [#allocation6], %s13250_s21 }
 0xbcb   : > { %p16813_p4 = pnand %p16818_p2, %p22160_p3 }
 0xbcd   : > { %17258 = dma.done.wait (!%p16813_p4), %s13251_s20, 4096  }
 0xbce   : > { %17260 = vsyncadd (!%p16813_p4), %s13251_s20, 4294963200  ;;  %p21_p7 = scmp.ge.s32.totalorder %s17370_s19, 4   ;;  %s22161_s13 = smov %s17267_s14 }
 0xbcf   : > { %s22162_s14 = smov %s17271_s15  ;;  %s22163_s15 = smov %s17381_s22 }
 0xbd0   : > { %s22164_s16 = smov %s17370_s19  ;;  %23 = sbr.rel (!%p21_p7) target bundleno = 4 (0x4), region = 112 }
 0xbd7   :  { %13256 = vsyncpa [#allocation5], 1 }
 0xbd8   :  { %13258 = vsyncpa [#allocation5 + $0x1], 1 }
 0xbd9   :  { %13259 = vsyncpa [#allocation6], 1 }
 0xbda   :  { %13261 = vsyncpa [#allocation6 + $0x1], 1 }

</bundles_post_ra>
